<compile_context>
chip_gen: v5e
topology: v5e:2x2
jax: 0.10.0
libtpu: 0.0.40
codegen_flags: <defaults>
</compile_context>

<pallas_src>
import functools

import numpy as np
import jax
import jax.numpy as jnp
from jax.experimental import pallas as pl
from jax.experimental.pallas import tpu as pltpu


def _round_up(x, m):
    return (x + m - 1) // m * m


def _largest_tile(dim, cap, step):
    """Largest multiple of `step` <= cap that divides `dim` (falls back to step)."""
    t = min(cap, _round_up(dim, step))
    t = max((t // step) * step, step)
    while t > step and dim % t != 0:
        t -= step
    return t


# ----------------------------------------------------------------------------
# Fused Pallas kernel: out = act(A @ B + bias [+ residual])
#   A (M,K) bf16, B (K,N) bf16 (BN scale pre-folded), bias (1,N) f32,
#   residual (M,N) bf16 (optional), accumulation f32, output bf16.
# ----------------------------------------------------------------------------
def _fused_mm_kernel(*refs, relu, has_res):
    if has_res:
        a_ref, b_ref, c_ref, r_ref, o_ref, acc_ref = refs
    else:
        a_ref, b_ref, c_ref, o_ref, acc_ref = refs
        r_ref = None

    k = pl.program_id(2)

    @pl.when(k == 0)
    def _():
        acc_ref[...] = jnp.zeros_like(acc_ref)

    acc_ref[...] += jnp.dot(a_ref[...], b_ref[...],
                            preferred_element_type=jnp.float32)

    @pl.when(k == pl.num_programs(2) - 1)
    def _():
        out = acc_ref[...] + c_ref[...]
        if has_res:
            out = out + r_ref[...].astype(jnp.float32)
        if relu:
            out = jnp.maximum(out, 0.0)
        o_ref[...] = out.astype(o_ref.dtype)


def fused_matmul(a, b, bias, residual=None, relu=True):
    M, K = a.shape
    K2, N = b.shape
    assert K == K2 and K % 128 == 0 and N % 128 == 0, (a.shape, b.shape)

    tn = min(256, N)
    tk = _largest_tile(K, 512, 128)
    tm = _largest_tile(M, 512, 8)
    Mp = _round_up(M, tm)
    if Mp != M:  # not hit in this network; kept for robustness
        a = jnp.pad(a, ((0, Mp - M), (0, 0)))
        if residual is not None:
            residual = jnp.pad(residual, ((0, Mp - M), (0, 0)))
    # keep >= 2 parallel grid steps when possible so both v7x TensorCores work
    if Mp // tm == 1 and N // tn == 1 and tm % 16 == 0:
        tm //= 2

    has_res = residual is not None
    in_specs = [
        pl.BlockSpec((tm, tk), lambda i, j, k: (i, k)),
        pl.BlockSpec((tk, tn), lambda i, j, k: (k, j)),
        pl.BlockSpec((1, tn), lambda i, j, k: (0, j)),
    ]
    inputs = [a, b, bias]
    if has_res:
        in_specs.append(pl.BlockSpec((tm, tn), lambda i, j, k: (i, j)))
        inputs.append(residual)

    out = pl.pallas_call(
        functools.partial(_fused_mm_kernel, relu=relu, has_res=has_res),
        out_shape=jax.ShapeDtypeStruct((Mp, N), jnp.bfloat16),
        grid_spec=pltpu.PrefetchScalarGridSpec(
            num_scalar_prefetch=0,
            grid=(Mp // tm, N // tn, K // tk),
            in_specs=in_specs,
            out_specs=pl.BlockSpec((tm, tn), lambda i, j, k: (i, j)),
            scratch_shapes=[pltpu.VMEM((tm, tn), jnp.float32)],
        ),
        compiler_params=pltpu.CompilerParams(
            dimension_semantics=("parallel", "parallel", "arbitrary")),
    )(*inputs)
    if Mp != M:
        out = out[:M]
    return out


# ----------------------------------------------------------------------------
# Conv wrappers (im2col glue in XLA, matmul hot path in Pallas)
# ----------------------------------------------------------------------------
def conv1x1(x, wmat, bias, residual=None, relu=True):
    N, H, W, C = x.shape
    a = x.reshape(N * H * W, C)
    res = None if residual is None else residual.reshape(N * H * W, -1)
    out = fused_matmul(a, wmat, bias, residual=res, relu=relu)
    return out.reshape(N, H, W, -1)


def conv_im2col(x, wmat, bias, kh, kw, stride, pad, residual=None, relu=True):
    N, H, W, C = x.shape
    xp = jnp.pad(x, ((0, 0), (pad, pad), (pad, pad), (0, 0)))
    Ho = (H + 2 * pad - kh) // stride + 1
    Wo = (W + 2 * pad - kw) // stride + 1
    cols = [xp[:, dh:dh + stride * Ho:stride, dw:dw + stride * Wo:stride, :]
            for dh in range(kh) for dw in range(kw)]
    patches = jnp.concatenate(cols, axis=-1).reshape(N * Ho * Wo, kh * kw * C)
    Kp = wmat.shape[0]
    if patches.shape[1] != Kp:  # stem only: K=147 -> 256, one tiny pad
        patches = jnp.pad(patches, ((0, 0), (0, Kp - patches.shape[1])))
    res = None if residual is None else residual.reshape(N * Ho * Wo, -1)
    out = fused_matmul(patches, wmat, bias, residual=res, relu=relu)
    return out.reshape(N, Ho, Wo, -1)


def maxpool_3x3_s2(x):
    """3x3 / stride-2 / pad-1 max pool, as a 9-tap maximum tree (no stacked copy)."""
    N, H, W, C = x.shape
    Ho = (H + 2 - 3) // 2 + 1
    Wo = (W + 2 - 3) // 2 + 1
    neg = jnp.finfo(x.dtype).min
    xp = jnp.pad(x, ((0, 0), (1, 1), (1, 1), (0, 0)), constant_values=neg)
    out = None
    for dh in range(3):
        for dw in range(3):
            v = xp[:, dh:dh + 2 * Ho:2, dw:dw + 2 * Wo:2, :]
            out = v if out is None else jnp.maximum(out, v)
    return out


def _pool_matrix(in_size, out_size):
    """AdaptiveAvgPool averaging matrix (out, in) using PyTorch's index rule."""
    rows = []
    for o in range(out_size):
        start = (o * in_size) // out_size
        end = -(-((o + 1) * in_size) // out_size)  # ceil
        row = np.zeros((in_size,), np.float32)
        row[start:end] = 1.0 / (end - start)
        rows.append(row)
    return np.stack(rows)


def adaptive_avg_pool(x, out_hw):
    """Separable adaptive average pool; tiny, VPU-class work (no MXU)."""
    N, H, W, C = x.shape
    Ph = jnp.asarray(_pool_matrix(H, out_hw))
    Pw = jnp.asarray(_pool_matrix(W, out_hw))
    xf = x.astype(jnp.float32)
    out = jnp.einsum("oh,nhwc->nowc", Ph, xf)
    out = jnp.einsum("pw,nowc->nopc", Pw, out)
    return out  # (N, out_hw, out_hw, C)


# ----------------------------------------------------------------------------
# Synthetic parameters: He init, BN folded into weights, pre-padded, bf16.
# ----------------------------------------------------------------------------
def _he(key, shape, fan_in):
    return jax.random.normal(key, shape, jnp.float32) * np.sqrt(2.0 / fan_in)


def _bn(key, c, mag=1.0):
    k1, k2 = jax.random.split(key)
    scale = mag * (1.0 + 0.1 * jax.random.normal(k1, (c,), jnp.float32))
    bias = 0.05 * jax.random.normal(k2, (c,), jnp.float32)
    return scale, bias


def _pack_1x1(w, scale, bias, cin_p, cout_p):
    wf = w * scale[None, :]
    wm = jnp.zeros((cin_p, cout_p), jnp.float32).at[:w.shape[0], :w.shape[1]].set(wf)
    bm = jnp.zeros((1, cout_p), jnp.float32).at[0, :w.shape[1]].set(bias)
    return wm.astype(jnp.bfloat16), bm


def _pack_3x3(w, scale, bias, cin_p, cout_p):
    kh, kw, cin, cout = w.shape
    wf = w * scale[None, None, None, :]
    wm = jnp.zeros((kh, kw, cin_p, cout_p), jnp.float32).at[:, :, :cin, :cout].set(wf)
    wm = wm.reshape(kh * kw * cin_p, cout_p)
    bm = jnp.zeros((1, cout_p), jnp.float32).at[0, :cout].set(bias)
    return wm.astype(jnp.bfloat16), bm


def _pack_stem(w, scale, bias, k_pad_to, cout_p):
    kh, kw, cin, cout = w.shape
    wf = (w * scale[None, None, None, :]).reshape(kh * kw * cin, cout)
    wm = jnp.zeros((k_pad_to, cout_p), jnp.float32).at[:kh * kw * cin, :cout].set(wf)
    bm = jnp.zeros((1, cout_p), jnp.float32).at[0, :cout].set(bias)
    return wm.astype(jnp.bfloat16), bm


def init_encoder_params(key, base_width=16, blocks=(3, 4, 23, 3)):
    params = {}
    key, k1, k2 = jax.random.split(key, 3)
    w = _he(k1, (7, 7, 3, base_width), 7 * 7 * 3)
    s, b = _bn(k2, base_width)
    params["stem_w"], params["stem_b"] = _pack_stem(
        w, s, b, _round_up(7 * 7 * 3, 128), _round_up(base_width, 128))

    in_ch = base_width
    layers = []
    for li, nblocks in enumerate(blocks):
        planes = base_width * (2 ** li)
        out_ch = planes * 4
        stride0 = 1 if li == 0 else 2
        blist = []
        for bi in range(nblocks):
            st = stride0 if bi == 0 else 1
            bp = {"stride": st}
            cin_p = _round_up(in_ch, 128)
            p_p = _round_up(planes, 128)
            out_p = _round_up(out_ch, 128)
            key, ka, kb = jax.random.split(key, 3)
            w1 = _he(ka, (in_ch, planes), in_ch); s1, b1 = _bn(kb, planes)
            bp["w1"], bp["b1"] = _pack_1x1(w1, s1, b1, cin_p, p_p)
            key, ka, kb = jax.random.split(key, 3)
            w2 = _he(ka, (3, 3, planes, planes), 9 * planes); s2, b2 = _bn(kb, planes)
            bp["w2"], bp["b2"] = _pack_3x3(w2, s2, b2, p_p, p_p)
            key, ka, kb = jax.random.split(key, 3)
            w3 = _he(ka, (planes, out_ch), planes)
            # small scale on the branch's last BN keeps the 33-block residual
            # stack numerically stable with random weights
            s3, b3 = _bn(kb, out_ch, mag=0.2)
            bp["w3"], bp["b3"] = _pack_1x1(w3, s3, b3, p_p, out_p)
            if st != 1 or in_ch != out_ch:
                key, ka, kb = jax.random.split(key, 3)
                wd = _he(ka, (in_ch, out_ch), in_ch); sd, bd = _bn(kb, out_ch)
                bp["wd"], bp["bd"] = _pack_1x1(wd, sd, bd, cin_p, out_p)
            blist.append(bp)
            in_ch = out_ch
        layers.append(blist)
    params["layers"] = layers
    params["c_final"] = in_ch
    return params


# ----------------------------------------------------------------------------
# Forward pass (matches Encoder.forward: resnet trunk -> adaptive pool -> permute)
# ----------------------------------------------------------------------------
def bottleneck(x, bp):
    st = bp["stride"]
    if "wd" in bp:
        xs = x[:, ::st, ::st, :] if st != 1 else x
        identity = conv1x1(xs, bp["wd"], bp["bd"], relu=False)
    else:
        identity = x
    out = conv1x1(x, bp["w1"], bp["b1"], relu=True)
    out = conv_im2col(out, bp["w2"], bp["b2"], 3, 3, stride=st, pad=1, relu=True)
    # residual add + ReLU fused into the w3 matmul epilogue
    out = conv1x1(out, bp["w3"], bp["b3"], residual=identity, relu=True)
    return out


def encoder_forward(params, imgs_nchw, enc_image_size=14):
    x = jnp.transpose(imgs_nchw, (0, 2, 3, 1)).astype(jnp.bfloat16)  # NCHW -> NHWC
    x = conv_im2col(x, params["stem_w"], params["stem_b"], 7, 7, stride=2, pad=3,
                    relu=True)
    x = maxpool_3x3_s2(x)
    for blocks in params["layers"]:
        for bp in blocks:
            x = bottleneck(x, bp)
    x = adaptive_avg_pool(x, enc_image_size)
    # drop channel padding (no-op when c_final is already a multiple of 128)
    return x[..., :params["c_final"]].astype(jnp.float32)


# ----------------------------------------------------------------------------
if __name__ == "__main__":
    key = jax.random.PRNGKey(0)
    kp, kx = jax.random.split(key)

    ENC_SIZE = 14
    BASE_WIDTH = 16          # ResNet-101 uses 64; scaled down for the synthetic run
    imgs = jax.random.normal(kx, (2, 3, 64, 64), jnp.float32)  # NCHW like PyTorch

    params = init_encoder_params(kp, base_width=BASE_WIDTH, blocks=(3, 4, 23, 3))

    fwd = jax.jit(lambda x: encoder_forward(params, x, enc_image_size=ENC_SIZE))
    out = fwd(imgs)
    out = jax.block_until_ready(out)

    expected_c = BASE_WIDTH * 8 * 4
    assert out.shape == (2, ENC_SIZE, ENC_SIZE, expected_c), out.shape
    assert bool(jnp.isfinite(out).all())
    print("KERNEL_OK")
</pallas_src>

<mosaic_0001>
module attributes {stable_mosaic.version = 11 : i64} {
  func.func @_fused_mm_kernel(%arg0: i32, %arg1: i32, %arg2: i32, %arg3: memref<512x256xbf16, #tpu.memory_space<vmem>>, %arg4: memref<256x128xbf16, #tpu.memory_space<vmem>>, %arg5: memref<1x128xf32, #tpu.memory_space<vmem>>, %arg6: memref<512x128xbf16, #tpu.memory_space<vmem>>, %arg7: memref<512x128xf32, #tpu.memory_space<vmem>>) attributes {dimension_semantics = [#tpu.dimension_semantics<parallel>, #tpu.dimension_semantics<parallel>, #tpu.dimension_semantics<arbitrary>], iteration_bounds = array<i64: 4, 1, 1>, scalar_prefetch = 0 : i64, scratch_operands = 1 : i64, tpu.core_type = #tpu.core_type<tc>, window_params = [{transform_indices = @transform_0, window_bounds = array<i64: 512, 256>}, {transform_indices = @transform_1, window_bounds = array<i64: 256, 128>}, {transform_indices = @transform_2, window_bounds = array<i64: 1, 128>}, {transform_indices = @transform_3, window_bounds = array<i64: 512, 128>}]} {
    %c0_i32 = arith.constant 0 : i32
    %0 = arith.cmpi eq, %arg2, %c0_i32 : i32
    %1 = arith.extui %0 : i1 to i32
    %c0_i32_0 = arith.constant 0 : i32
    %2 = arith.cmpi ne, %1, %c0_i32_0 : i32
    scf.if %2 {
      %cst_10 = arith.constant 0.000000e+00 : f32
      %12 = vector.broadcast %cst_10 : f32 to vector<512x128xf32>
      %c0_11 = arith.constant 0 : index
      %c0_12 = arith.constant 0 : index
      %13 = vector.load %arg7[%c0_11, %c0_12] : memref<512x128xf32, #tpu.memory_space<vmem>>, vector<512x128xf32>
      tpu.vector_store %arg7[%c0_11, %c0_12], %12 {strides = array<i32>} : memref<512x128xf32, #tpu.memory_space<vmem>>, vector<512x128xf32>,
    } else {
    }
    %c0 = arith.constant 0 : index
    %c0_1 = arith.constant 0 : index
    %3 = vector.load %arg7[%c0, %c0_1] : memref<512x128xf32, #tpu.memory_space<vmem>>, vector<512x128xf32>
    %c0_2 = arith.constant 0 : index
    %c0_3 = arith.constant 0 : index
    %4 = vector.load %arg3[%c0_2, %c0_3] : memref<512x256xbf16, #tpu.memory_space<vmem>>, vector<512x256xbf16>
    %c0_4 = arith.constant 0 : index
    %c0_5 = arith.constant 0 : index
    %5 = vector.load %arg4[%c0_4, %c0_5] : memref<256x128xbf16, #tpu.memory_space<vmem>>, vector<256x128xbf16>
    %cst = arith.constant dense<0.000000e+00> : vector<512x128xf32>
    %6 = tpu.matmul %4, %5, %cst {dimension_numbers = #tpu.dot_dimension_numbers<[1], [0], [0], [1], [0, 0, 1, 1], [], []>} : vector<512x256xbf16>, vector<256x128xbf16>, vector<512x128xf32> -> vector<512x128xf32>
    %7 = arith.addf %3, %6 : vector<512x128xf32>
    %c0_6 = arith.constant 0 : index
    %c0_7 = arith.constant 0 : index
    %8 = vector.load %arg7[%c0_6, %c0_7] : memref<512x128xf32, #tpu.memory_space<vmem>>, vector<512x128xf32>
    tpu.vector_store %arg7[%c0_6, %c0_7], %7 {strides = array<i32>} : memref<512x128xf32, #tpu.memory_space<vmem>>, vector<512x128xf32>,
    %c0_i32_8 = arith.constant 0 : i32
    %9 = arith.cmpi eq, %arg2, %c0_i32_8 : i32
    %10 = arith.extui %9 : i1 to i32
    %c0_i32_9 = arith.constant 0 : i32
    %11 = arith.cmpi ne, %10, %c0_i32_9 : i32
    scf.if %11 {
      %c0_10 = arith.constant 0 : index
      %c0_11 = arith.constant 0 : index
      %12 = vector.load %arg7[%c0_10, %c0_11] : memref<512x128xf32, #tpu.memory_space<vmem>>, vector<512x128xf32>
      %c0_12 = arith.constant 0 : index
      %c0_13 = arith.constant 0 : index
      %13 = vector.load %arg5[%c0_12, %c0_13] : memref<1x128xf32, #tpu.memory_space<vmem>>, vector<1x128xf32>
      %14 = vector.broadcast %13 : vector<1x128xf32> to vector<512x128xf32>
      %15 = arith.addf %12, %14 : vector<512x128xf32>
      %cst_14 = arith.constant 0.000000e+00 : f32
      %16 = vector.broadcast %cst_14 : f32 to vector<512x128xf32>
      %17 = arith.maximumf %15, %16 : vector<512x128xf32>
      %18 = arith.truncf %17 : vector<512x128xf32> to vector<512x128xbf16>
      %c0_15 = arith.constant 0 : index
      %c0_16 = arith.constant 0 : index
      %19 = vector.load %arg6[%c0_15, %c0_16] : memref<512x128xbf16, #tpu.memory_space<vmem>>, vector<512x128xbf16>
      tpu.vector_store %arg6[%c0_15, %c0_16], %18 {strides = array<i32>} : memref<512x128xbf16, #tpu.memory_space<vmem>>, vector<512x128xbf16>,
    } else {
    }
    return
  }
  func.func @transform_0(%arg0: i32, %arg1: i32, %arg2: i32) -> (i32, i32) {
    %c0_i32 = arith.constant 0 : i32
    return %arg0, %arg2 : i32, i32
  }
  func.func @transform_1(%arg0: i32, %arg1: i32, %arg2: i32) -> (i32, i32) {
    %c0_i32 = arith.constant 0 : i32
    return %arg2, %arg1 : i32, i32
  }
  func.func @transform_2(%arg0: i32, %arg1: i32, %arg2: i32) -> (i32, i32) {
    %c0_i32 = arith.constant 0 : i32
    %c0_i32_0 = arith.constant 0 : i32
    return %c0_i32, %arg1 : i32, i32
  }
  func.func @transform_3(%arg0: i32, %arg1: i32, %arg2: i32) -> (i32, i32) {
    %c0_i32 = arith.constant 0 : i32
    return %arg0, %arg1 : i32, i32
  }
}

module attributes {stable_mosaic.version = 11 : i64} {
  func.func @_fused_mm_kernel(%arg0: i32, %arg1: i32, %arg2: i32, %arg3: memref<256x128xbf16, #tpu.memory_space<vmem>>, %arg4: memref<128x128xbf16, #tpu.memory_space<vmem>>, %arg5: memref<1x128xf32, #tpu.memory_space<vmem>>, %arg6: memref<256x128xbf16, #tpu.memory_space<vmem>>, %arg7: memref<256x128xf32, #tpu.memory_space<vmem>>) attributes {dimension_semantics = [#tpu.dimension_semantics<parallel>, #tpu.dimension_semantics<parallel>, #tpu.dimension_semantics<arbitrary>], iteration_bounds = array<i64: 2, 1, 1>, scalar_prefetch = 0 : i64, scratch_operands = 1 : i64, tpu.core_type = #tpu.core_type<tc>, window_params = [{transform_indices = @transform_0, window_bounds = array<i64: 256, 128>}, {transform_indices = @transform_1, window_bounds = array<i64: 128, 128>}, {transform_indices = @transform_2, window_bounds = array<i64: 1, 128>}, {transform_indices = @transform_3, window_bounds = array<i64: 256, 128>}]} {
    %c0_i32 = arith.constant 0 : i32
    %0 = arith.cmpi eq, %arg2, %c0_i32 : i32
    %1 = arith.extui %0 : i1 to i32
    %c0_i32_0 = arith.constant 0 : i32
    %2 = arith.cmpi ne, %1, %c0_i32_0 : i32
    scf.if %2 {
      %cst_10 = arith.constant 0.000000e+00 : f32
      %12 = vector.broadcast %cst_10 : f32 to vector<256x128xf32>
      %c0_11 = arith.constant 0 : index
      %c0_12 = arith.constant 0 : index
      %13 = vector.load %arg7[%c0_11, %c0_12] : memref<256x128xf32, #tpu.memory_space<vmem>>, vector<256x128xf32>
      tpu.vector_store %arg7[%c0_11, %c0_12], %12 {strides = array<i32>} : memref<256x128xf32, #tpu.memory_space<vmem>>, vector<256x128xf32>,
    } else {
    }
    %c0 = arith.constant 0 : index
    %c0_1 = arith.constant 0 : index
    %3 = vector.load %arg7[%c0, %c0_1] : memref<256x128xf32, #tpu.memory_space<vmem>>, vector<256x128xf32>
    %c0_2 = arith.constant 0 : index
    %c0_3 = arith.constant 0 : index
    %4 = vector.load %arg3[%c0_2, %c0_3] : memref<256x128xbf16, #tpu.memory_space<vmem>>, vector<256x128xbf16>
    %c0_4 = arith.constant 0 : index
    %c0_5 = arith.constant 0 : index
    %5 = vector.load %arg4[%c0_4, %c0_5] : memref<128x128xbf16, #tpu.memory_space<vmem>>, vector<128x128xbf16>
    %cst = arith.constant dense<0.000000e+00> : vector<256x128xf32>
    %6 = tpu.matmul %4, %5, %cst {dimension_numbers = #tpu.dot_dimension_numbers<[1], [0], [0], [1], [0, 0, 1, 1], [], []>} : vector<256x128xbf16>, vector<128x128xbf16>, vector<256x128xf32> -> vector<256x128xf32>
    %7 = arith.addf %3, %6 : vector<256x128xf32>
    %c0_6 = arith.constant 0 : index
    %c0_7 = arith.constant 0 : index
    %8 = vector.load %arg7[%c0_6, %c0_7] : memref<256x128xf32, #tpu.memory_space<vmem>>, vector<256x128xf32>
    tpu.vector_store %arg7[%c0_6, %c0_7], %7 {strides = array<i32>} : memref<256x128xf32, #tpu.memory_space<vmem>>, vector<256x128xf32>,
    %c0_i32_8 = arith.constant 0 : i32
    %9 = arith.cmpi eq, %arg2, %c0_i32_8 : i32
    %10 = arith.extui %9 : i1 to i32
    %c0_i32_9 = arith.constant 0 : i32
    %11 = arith.cmpi ne, %10, %c0_i32_9 : i32
    scf.if %11 {
      %c0_10 = arith.constant 0 : index
      %c0_11 = arith.constant 0 : index
      %12 = vector.load %arg7[%c0_10, %c0_11] : memref<256x128xf32, #tpu.memory_space<vmem>>, vector<256x128xf32>
      %c0_12 = arith.constant 0 : index
      %c0_13 = arith.constant 0 : index
      %13 = vector.load %arg5[%c0_12, %c0_13] : memref<1x128xf32, #tpu.memory_space<vmem>>, vector<1x128xf32>
      %14 = vector.broadcast %13 : vector<1x128xf32> to vector<256x128xf32>
      %15 = arith.addf %12, %14 : vector<256x128xf32>
      %cst_14 = arith.constant 0.000000e+00 : f32
      %16 = vector.broadcast %cst_14 : f32 to vector<256x128xf32>
      %17 = arith.maximumf %15, %16 : vector<256x128xf32>
      %18 = arith.truncf %17 : vector<256x128xf32> to vector<256x128xbf16>
      %c0_15 = arith.constant 0 : index
      %c0_16 = arith.constant 0 : index
      %19 = vector.load %arg6[%c0_15, %c0_16] : memref<256x128xbf16, #tpu.memory_space<vmem>>, vector<256x128xbf16>
      tpu.vector_store %arg6[%c0_15, %c0_16], %18 {strides = array<i32>} : memref<256x128xbf16, #tpu.memory_space<vmem>>, vector<256x128xbf16>,
    } else {
    }
    return
  }
  func.func @transform_0(%arg0: i32, %arg1: i32, %arg2: i32) -> (i32, i32) {
    %c0_i32 = arith.constant 0 : i32
    return %arg0, %arg2 : i32, i32
  }
  func.func @transform_1(%arg0: i32, %arg1: i32, %arg2: i32) -> (i32, i32) {
    %c0_i32 = arith.constant 0 : i32
    return %arg2, %arg1 : i32, i32
  }
  func.func @transform_2(%arg0: i32, %arg1: i32, %arg2: i32) -> (i32, i32) {
    %c0_i32 = arith.constant 0 : i32
    %c0_i32_0 = arith.constant 0 : i32
    return %c0_i32, %arg1 : i32, i32
  }
  func.func @transform_3(%arg0: i32, %arg1: i32, %arg2: i32) -> (i32, i32) {
    %c0_i32 = arith.constant 0 : i32
    return %arg0, %arg1 : i32, i32
  }
}

module attributes {stable_mosaic.version = 11 : i64} {
  func.func @_fused_mm_kernel(%arg0: i32, %arg1: i32, %arg2: i32, %arg3: memref<256x128xbf16, #tpu.memory_space<vmem>>, %arg4: memref<128x128xbf16, #tpu.memory_space<vmem>>, %arg5: memref<1x128xf32, #tpu.memory_space<vmem>>, %arg6: memref<256x128xbf16, #tpu.memory_space<vmem>>, %arg7: memref<256x128xf32, #tpu.memory_space<vmem>>) attributes {dimension_semantics = [#tpu.dimension_semantics<parallel>, #tpu.dimension_semantics<parallel>, #tpu.dimension_semantics<arbitrary>], iteration_bounds = array<i64: 2, 1, 1>, scalar_prefetch = 0 : i64, scratch_operands = 1 : i64, tpu.core_type = #tpu.core_type<tc>, window_params = [{transform_indices = @transform_0, window_bounds = array<i64: 256, 128>}, {transform_indices = @transform_1, window_bounds = array<i64: 128, 128>}, {transform_indices = @transform_2, window_bounds = array<i64: 1, 128>}, {transform_indices = @transform_3, window_bounds = array<i64: 256, 128>}]} {
    %c0_i32 = arith.constant 0 : i32
    %0 = arith.cmpi eq, %arg2, %c0_i32 : i32
    %1 = arith.extui %0 : i1 to i32
    %c0_i32_0 = arith.constant 0 : i32
    %2 = arith.cmpi ne, %1, %c0_i32_0 : i32
    scf.if %2 {
      %cst_10 = arith.constant 0.000000e+00 : f32
      %12 = vector.broadcast %cst_10 : f32 to vector<256x128xf32>
      %c0_11 = arith.constant 0 : index
      %c0_12 = arith.constant 0 : index
      %13 = vector.load %arg7[%c0_11, %c0_12] : memref<256x128xf32, #tpu.memory_space<vmem>>, vector<256x128xf32>
      tpu.vector_store %arg7[%c0_11, %c0_12], %12 {strides = array<i32>} : memref<256x128xf32, #tpu.memory_space<vmem>>, vector<256x128xf32>,
    } else {
    }
    %c0 = arith.constant 0 : index
    %c0_1 = arith.constant 0 : index
    %3 = vector.load %arg7[%c0, %c0_1] : memref<256x128xf32, #tpu.memory_space<vmem>>, vector<256x128xf32>
    %c0_2 = arith.constant 0 : index
    %c0_3 = arith.constant 0 : index
    %4 = vector.load %arg3[%c0_2, %c0_3] : memref<256x128xbf16, #tpu.memory_space<vmem>>, vector<256x128xbf16>
    %c0_4 = arith.constant 0 : index
    %c0_5 = arith.constant 0 : index
    %5 = vector.load %arg4[%c0_4, %c0_5] : memref<128x128xbf16, #tpu.memory_space<vmem>>, vector<128x128xbf16>
    %cst = arith.constant dense<0.000000e+00> : vector<256x128xf32>
    %6 = tpu.matmul %4, %5, %cst {dimension_numbers = #tpu.dot_dimension_numbers<[1], [0], [0], [1], [0, 0, 1, 1], [], []>} : vector<256x128xbf16>, vector<128x128xbf16>, vector<256x128xf32> -> vector<256x128xf32>
    %7 = arith.addf %3, %6 : vector<256x128xf32>
    %c0_6 = arith.constant 0 : index
    %c0_7 = arith.constant 0 : index
    %8 = vector.load %arg7[%c0_6, %c0_7] : memref<256x128xf32, #tpu.memory_space<vmem>>, vector<256x128xf32>
    tpu.vector_store %arg7[%c0_6, %c0_7], %7 {strides = array<i32>} : memref<256x128xf32, #tpu.memory_space<vmem>>, vector<256x128xf32>,
    %c0_i32_8 = arith.constant 0 : i32
    %9 = arith.cmpi eq, %arg2, %c0_i32_8 : i32
    %10 = arith.extui %9 : i1 to i32
    %c0_i32_9 = arith.constant 0 : i32
    %11 = arith.cmpi ne, %10, %c0_i32_9 : i32
    scf.if %11 {
      %c0_10 = arith.constant 0 : index
      %c0_11 = arith.constant 0 : index
      %12 = vector.load %arg7[%c0_10, %c0_11] : memref<256x128xf32, #tpu.memory_space<vmem>>, vector<256x128xf32>
      %c0_12 = arith.constant 0 : index
      %c0_13 = arith.constant 0 : index
      %13 = vector.load %arg5[%c0_12, %c0_13] : memref<1x128xf32, #tpu.memory_space<vmem>>, vector<1x128xf32>
      %14 = vector.broadcast %13 : vector<1x128xf32> to vector<256x128xf32>
      %15 = arith.addf %12, %14 : vector<256x128xf32>
      %16 = arith.truncf %15 : vector<256x128xf32> to vector<256x128xbf16>
      %c0_14 = arith.constant 0 : index
      %c0_15 = arith.constant 0 : index
      %17 = vector.load %arg6[%c0_14, %c0_15] : memref<256x128xbf16, #tpu.memory_space<vmem>>, vector<256x128xbf16>
      tpu.vector_store %arg6[%c0_14, %c0_15], %16 {strides = array<i32>} : memref<256x128xbf16, #tpu.memory_space<vmem>>, vector<256x128xbf16>,
    } else {
    }
    return
  }
  func.func @transform_0(%arg0: i32, %arg1: i32, %arg2: i32) -> (i32, i32) {
    %c0_i32 = arith.constant 0 : i32
    return %arg0, %arg2 : i32, i32
  }
  func.func @transform_1(%arg0: i32, %arg1: i32, %arg2: i32) -> (i32, i32) {
    %c0_i32 = arith.constant 0 : i32
    return %arg2, %arg1 : i32, i32
  }
  func.func @transform_2(%arg0: i32, %arg1: i32, %arg2: i32) -> (i32, i32) {
    %c0_i32 = arith.constant 0 : i32
    %c0_i32_0 = arith.constant 0 : i32
    return %c0_i32, %arg1 : i32, i32
  }
  func.func @transform_3(%arg0: i32, %arg1: i32, %arg2: i32) -> (i32, i32) {
    %c0_i32 = arith.constant 0 : i32
    return %arg0, %arg1 : i32, i32
  }
}

module attributes {stable_mosaic.version = 11 : i64} {
  func.func @_fused_mm_kernel(%arg0: i32, %arg1: i32, %arg2: i32, %arg3: memref<256x384xbf16, #tpu.memory_space<vmem>>, %arg4: memref<384x128xbf16, #tpu.memory_space<vmem>>, %arg5: memref<1x128xf32, #tpu.memory_space<vmem>>, %arg6: memref<256x128xbf16, #tpu.memory_space<vmem>>, %arg7: memref<256x128xf32, #tpu.memory_space<vmem>>) attributes {dimension_semantics = [#tpu.dimension_semantics<parallel>, #tpu.dimension_semantics<parallel>, #tpu.dimension_semantics<arbitrary>], iteration_bounds = array<i64: 2, 1, 3>, scalar_prefetch = 0 : i64, scratch_operands = 1 : i64, tpu.core_type = #tpu.core_type<tc>, window_params = [{transform_indices = @transform_0, window_bounds = array<i64: 256, 384>}, {transform_indices = @transform_1, window_bounds = array<i64: 384, 128>}, {transform_indices = @transform_2, window_bounds = array<i64: 1, 128>}, {transform_indices = @transform_3, window_bounds = array<i64: 256, 128>}]} {
    %c0_i32 = arith.constant 0 : i32
    %0 = arith.cmpi eq, %arg2, %c0_i32 : i32
    %1 = arith.extui %0 : i1 to i32
    %c0_i32_0 = arith.constant 0 : i32
    %2 = arith.cmpi ne, %1, %c0_i32_0 : i32
    scf.if %2 {
      %cst_9 = arith.constant 0.000000e+00 : f32
      %12 = vector.broadcast %cst_9 : f32 to vector<256x128xf32>
      %c0_10 = arith.constant 0 : index
      %c0_11 = arith.constant 0 : index
      %13 = vector.load %arg7[%c0_10, %c0_11] : memref<256x128xf32, #tpu.memory_space<vmem>>, vector<256x128xf32>
      tpu.vector_store %arg7[%c0_10, %c0_11], %12 {strides = array<i32>} : memref<256x128xf32, #tpu.memory_space<vmem>>, vector<256x128xf32>,
    } else {
    }
    %c0 = arith.constant 0 : index
    %c0_1 = arith.constant 0 : index
    %3 = vector.load %arg7[%c0, %c0_1] : memref<256x128xf32, #tpu.memory_space<vmem>>, vector<256x128xf32>
    %c0_2 = arith.constant 0 : index
    %c0_3 = arith.constant 0 : index
    %4 = vector.load %arg3[%c0_2, %c0_3] : memref<256x384xbf16, #tpu.memory_space<vmem>>, vector<256x384xbf16>
    %c0_4 = arith.constant 0 : index
    %c0_5 = arith.constant 0 : index
    %5 = vector.load %arg4[%c0_4, %c0_5] : memref<384x128xbf16, #tpu.memory_space<vmem>>, vector<384x128xbf16>
    %cst = arith.constant dense<0.000000e+00> : vector<256x128xf32>
    %6 = tpu.matmul %4, %5, %cst {dimension_numbers = #tpu.dot_dimension_numbers<[1], [0], [0], [1], [0, 0, 1, 1], [], []>} : vector<256x384xbf16>, vector<384x128xbf16>, vector<256x128xf32> -> vector<256x128xf32>
    %7 = arith.addf %3, %6 : vector<256x128xf32>
    %c0_6 = arith.constant 0 : index
    %c0_7 = arith.constant 0 : index
    %8 = vector.load %arg7[%c0_6, %c0_7] : memref<256x128xf32, #tpu.memory_space<vmem>>, vector<256x128xf32>
    tpu.vector_store %arg7[%c0_6, %c0_7], %7 {strides = array<i32>} : memref<256x128xf32, #tpu.memory_space<vmem>>, vector<256x128xf32>,
    %c2_i32 = arith.constant 2 : i32
    %9 = arith.cmpi eq, %arg2, %c2_i32 : i32
    %10 = arith.extui %9 : i1 to i32
    %c0_i32_8 = arith.constant 0 : i32
    %11 = arith.cmpi ne, %10, %c0_i32_8 : i32
    scf.if %11 {
      %c0_9 = arith.constant 0 : index
      %c0_10 = arith.constant 0 : index
      %12 = vector.load %arg7[%c0_9, %c0_10] : memref<256x128xf32, #tpu.memory_space<vmem>>, vector<256x128xf32>
      %c0_11 = arith.constant 0 : index
      %c0_12 = arith.constant 0 : index
      %13 = vector.load %arg5[%c0_11, %c0_12] : memref<1x128xf32, #tpu.memory_space<vmem>>, vector<1x128xf32>
      %14 = vector.broadcast %13 : vector<1x128xf32> to vector<256x128xf32>
      %15 = arith.addf %12, %14 : vector<256x128xf32>
      %cst_13 = arith.constant 0.000000e+00 : f32
      %16 = vector.broadcast %cst_13 : f32 to vector<256x128xf32>
      %17 = arith.maximumf %15, %16 : vector<256x128xf32>
      %18 = arith.truncf %17 : vector<256x128xf32> to vector<256x128xbf16>
      %c0_14 = arith.constant 0 : index
      %c0_15 = arith.constant 0 : index
      %19 = vector.load %arg6[%c0_14, %c0_15] : memref<256x128xbf16, #tpu.memory_space<vmem>>, vector<256x128xbf16>
      tpu.vector_store %arg6[%c0_14, %c0_15], %18 {strides = array<i32>} : memref<256x128xbf16, #tpu.memory_space<vmem>>, vector<256x128xbf16>,
    } else {
    }
    return
  }
  func.func @transform_0(%arg0: i32, %arg1: i32, %arg2: i32) -> (i32, i32) {
    %c0_i32 = arith.constant 0 : i32
    return %arg0, %arg2 : i32, i32
  }
  func.func @transform_1(%arg0: i32, %arg1: i32, %arg2: i32) -> (i32, i32) {
    %c0_i32 = arith.constant 0 : i32
    return %arg2, %arg1 : i32, i32
  }
  func.func @transform_2(%arg0: i32, %arg1: i32, %arg2: i32) -> (i32, i32) {
    %c0_i32 = arith.constant 0 : i32
    %c0_i32_0 = arith.constant 0 : i32
    return %c0_i32, %arg1 : i32, i32
  }
  func.func @transform_3(%arg0: i32, %arg1: i32, %arg2: i32) -> (i32, i32) {
    %c0_i32 = arith.constant 0 : i32
    return %arg0, %arg1 : i32, i32
  }
}

module attributes {stable_mosaic.version = 11 : i64} {
  func.func @_fused_mm_kernel(%arg0: i32, %arg1: i32, %arg2: i32, %arg3: memref<256x128xbf16, #tpu.memory_space<vmem>>, %arg4: memref<128x128xbf16, #tpu.memory_space<vmem>>, %arg5: memref<1x128xf32, #tpu.memory_space<vmem>>, %arg6: memref<256x128xbf16, #tpu.memory_space<vmem>>, %arg7: memref<256x128xbf16, #tpu.memory_space<vmem>>, %arg8: memref<256x128xf32, #tpu.memory_space<vmem>>) attributes {dimension_semantics = [#tpu.dimension_semantics<parallel>, #tpu.dimension_semantics<parallel>, #tpu.dimension_semantics<arbitrary>], iteration_bounds = array<i64: 2, 1, 1>, scalar_prefetch = 0 : i64, scratch_operands = 1 : i64, tpu.core_type = #tpu.core_type<tc>, window_params = [{transform_indices = @transform_0, window_bounds = array<i64: 256, 128>}, {transform_indices = @transform_1, window_bounds = array<i64: 128, 128>}, {transform_indices = @transform_2, window_bounds = array<i64: 1, 128>}, {transform_indices = @transform_3, window_bounds = array<i64: 256, 128>}, {transform_indices = @transform_4, window_bounds = array<i64: 256, 128>}]} {
    %c0_i32 = arith.constant 0 : i32
    %0 = arith.cmpi eq, %arg2, %c0_i32 : i32
    %1 = arith.extui %0 : i1 to i32
    %c0_i32_0 = arith.constant 0 : i32
    %2 = arith.cmpi ne, %1, %c0_i32_0 : i32
    scf.if %2 {
      %cst_10 = arith.constant 0.000000e+00 : f32
      %12 = vector.broadcast %cst_10 : f32 to vector<256x128xf32>
      %c0_11 = arith.constant 0 : index
      %c0_12 = arith.constant 0 : index
      %13 = vector.load %arg8[%c0_11, %c0_12] : memref<256x128xf32, #tpu.memory_space<vmem>>, vector<256x128xf32>
      tpu.vector_store %arg8[%c0_11, %c0_12], %12 {strides = array<i32>} : memref<256x128xf32, #tpu.memory_space<vmem>>, vector<256x128xf32>,
    } else {
    }
    %c0 = arith.constant 0 : index
    %c0_1 = arith.constant 0 : index
    %3 = vector.load %arg8[%c0, %c0_1] : memref<256x128xf32, #tpu.memory_space<vmem>>, vector<256x128xf32>
    %c0_2 = arith.constant 0 : index
    %c0_3 = arith.constant 0 : index
    %4 = vector.load %arg3[%c0_2, %c0_3] : memref<256x128xbf16, #tpu.memory_space<vmem>>, vector<256x128xbf16>
    %c0_4 = arith.constant 0 : index
    %c0_5 = arith.constant 0 : index
    %5 = vector.load %arg4[%c0_4, %c0_5] : memref<128x128xbf16, #tpu.memory_space<vmem>>, vector<128x128xbf16>
    %cst = arith.constant dense<0.000000e+00> : vector<256x128xf32>
    %6 = tpu.matmul %4, %5, %cst {dimension_numbers = #tpu.dot_dimension_numbers<[1], [0], [0], [1], [0, 0, 1, 1], [], []>} : vector<256x128xbf16>, vector<128x128xbf16>, vector<256x128xf32> -> vector<256x128xf32>
    %7 = arith.addf %3, %6 : vector<256x128xf32>
    %c0_6 = arith.constant 0 : index
    %c0_7 = arith.constant 0 : index
    %8 = vector.load %arg8[%c0_6, %c0_7] : memref<256x128xf32, #tpu.memory_space<vmem>>, vector<256x128xf32>
    tpu.vector_store %arg8[%c0_6, %c0_7], %7 {strides = array<i32>} : memref<256x128xf32, #tpu.memory_space<vmem>>, vector<256x128xf32>,
    %c0_i32_8 = arith.constant 0 : i32
    %9 = arith.cmpi eq, %arg2, %c0_i32_8 : i32
    %10 = arith.extui %9 : i1 to i32
    %c0_i32_9 = arith.constant 0 : i32
    %11 = arith.cmpi ne, %10, %c0_i32_9 : i32
    scf.if %11 {
      %c0_10 = arith.constant 0 : index
      %c0_11 = arith.constant 0 : index
      %12 = vector.load %arg8[%c0_10, %c0_11] : memref<256x128xf32, #tpu.memory_space<vmem>>, vector<256x128xf32>
      %c0_12 = arith.constant 0 : index
      %c0_13 = arith.constant 0 : index
      %13 = vector.load %arg5[%c0_12, %c0_13] : memref<1x128xf32, #tpu.memory_space<vmem>>, vector<1x128xf32>
      %14 = vector.broadcast %13 : vector<1x128xf32> to vector<256x128xf32>
      %15 = arith.addf %12, %14 : vector<256x128xf32>
      %c0_14 = arith.constant 0 : index
      %c0_15 = arith.constant 0 : index
      %16 = vector.load %arg6[%c0_14, %c0_15] : memref<256x128xbf16, #tpu.memory_space<vmem>>, vector<256x128xbf16>
      %17 = arith.extf %16 : vector<256x128xbf16> to vector<256x128xf32>
      %18 = arith.addf %15, %17 : vector<256x128xf32>
      %cst_16 = arith.constant 0.000000e+00 : f32
      %19 = vector.broadcast %cst_16 : f32 to vector<256x128xf32>
      %20 = arith.maximumf %18, %19 : vector<256x128xf32>
      %21 = arith.truncf %20 : vector<256x128xf32> to vector<256x128xbf16>
      %c0_17 = arith.constant 0 : index
      %c0_18 = arith.constant 0 : index
      %22 = vector.load %arg7[%c0_17, %c0_18] : memref<256x128xbf16, #tpu.memory_space<vmem>>, vector<256x128xbf16>
      tpu.vector_store %arg7[%c0_17, %c0_18], %21 {strides = array<i32>} : memref<256x128xbf16, #tpu.memory_space<vmem>>, vector<256x128xbf16>,
    } else {
    }
    return
  }
  func.func @transform_0(%arg0: i32, %arg1: i32, %arg2: i32) -> (i32, i32) {
    %c0_i32 = arith.constant 0 : i32
    return %arg0, %arg2 : i32, i32
  }
  func.func @transform_1(%arg0: i32, %arg1: i32, %arg2: i32) -> (i32, i32) {
    %c0_i32 = arith.constant 0 : i32
    return %arg2, %arg1 : i32, i32
  }
  func.func @transform_2(%arg0: i32, %arg1: i32, %arg2: i32) -> (i32, i32) {
    %c0_i32 = arith.constant 0 : i32
    %c0_i32_0 = arith.constant 0 : i32
    return %c0_i32, %arg1 : i32, i32
  }
  func.func @transform_3(%arg0: i32, %arg1: i32, %arg2: i32) -> (i32, i32) {
    %c0_i32 = arith.constant 0 : i32
    return %arg0, %arg1 : i32, i32
  }
  func.func @transform_4(%arg0: i32, %arg1: i32, %arg2: i32) -> (i32, i32) {
    %c0_i32 = arith.constant 0 : i32
    return %arg0, %arg1 : i32, i32
  }
}

module attributes {stable_mosaic.version = 11 : i64} {
  func.func @_fused_mm_kernel(%arg0: i32, %arg1: i32, %arg2: i32, %arg3: memref<64x128xbf16, #tpu.memory_space<vmem>>, %arg4: memref<128x128xbf16, #tpu.memory_space<vmem>>, %arg5: memref<1x128xf32, #tpu.memory_space<vmem>>, %arg6: memref<64x128xbf16, #tpu.memory_space<vmem>>, %arg7: memref<64x128xf32, #tpu.memory_space<vmem>>) attributes {dimension_semantics = [#tpu.dimension_semantics<parallel>, #tpu.dimension_semantics<parallel>, #tpu.dimension_semantics<arbitrary>], iteration_bounds = array<i64: 2, 1, 1>, scalar_prefetch = 0 : i64, scratch_operands = 1 : i64, tpu.core_type = #tpu.core_type<tc>, window_params = [{transform_indices = @transform_0, window_bounds = array<i64: 64, 128>}, {transform_indices = @transform_1, window_bounds = array<i64: 128, 128>}, {transform_indices = @transform_2, window_bounds = array<i64: 1, 128>}, {transform_indices = @transform_3, window_bounds = array<i64: 64, 128>}]} {
    %c0_i32 = arith.constant 0 : i32
    %0 = arith.cmpi eq, %arg2, %c0_i32 : i32
    %1 = arith.extui %0 : i1 to i32
    %c0_i32_0 = arith.constant 0 : i32
    %2 = arith.cmpi ne, %1, %c0_i32_0 : i32
    scf.if %2 {
      %cst_10 = arith.constant 0.000000e+00 : f32
      %12 = vector.broadcast %cst_10 : f32 to vector<64x128xf32>
      %c0_11 = arith.constant 0 : index
      %c0_12 = arith.constant 0 : index
      %13 = vector.load %arg7[%c0_11, %c0_12] : memref<64x128xf32, #tpu.memory_space<vmem>>, vector<64x128xf32>
      tpu.vector_store %arg7[%c0_11, %c0_12], %12 {strides = array<i32>} : memref<64x128xf32, #tpu.memory_space<vmem>>, vector<64x128xf32>,
    } else {
    }
    %c0 = arith.constant 0 : index
    %c0_1 = arith.constant 0 : index
    %3 = vector.load %arg7[%c0, %c0_1] : memref<64x128xf32, #tpu.memory_space<vmem>>, vector<64x128xf32>
    %c0_2 = arith.constant 0 : index
    %c0_3 = arith.constant 0 : index
    %4 = vector.load %arg3[%c0_2, %c0_3] : memref<64x128xbf16, #tpu.memory_space<vmem>>, vector<64x128xbf16>
    %c0_4 = arith.constant 0 : index
    %c0_5 = arith.constant 0 : index
    %5 = vector.load %arg4[%c0_4, %c0_5] : memref<128x128xbf16, #tpu.memory_space<vmem>>, vector<128x128xbf16>
    %cst = arith.constant dense<0.000000e+00> : vector<64x128xf32>
    %6 = tpu.matmul %4, %5, %cst {dimension_numbers = #tpu.dot_dimension_numbers<[1], [0], [0], [1], [0, 0, 1, 1], [], []>} : vector<64x128xbf16>, vector<128x128xbf16>, vector<64x128xf32> -> vector<64x128xf32>
    %7 = arith.addf %3, %6 : vector<64x128xf32>
    %c0_6 = arith.constant 0 : index
    %c0_7 = arith.constant 0 : index
    %8 = vector.load %arg7[%c0_6, %c0_7] : memref<64x128xf32, #tpu.memory_space<vmem>>, vector<64x128xf32>
    tpu.vector_store %arg7[%c0_6, %c0_7], %7 {strides = array<i32>} : memref<64x128xf32, #tpu.memory_space<vmem>>, vector<64x128xf32>,
    %c0_i32_8 = arith.constant 0 : i32
    %9 = arith.cmpi eq, %arg2, %c0_i32_8 : i32
    %10 = arith.extui %9 : i1 to i32
    %c0_i32_9 = arith.constant 0 : i32
    %11 = arith.cmpi ne, %10, %c0_i32_9 : i32
    scf.if %11 {
      %c0_10 = arith.constant 0 : index
      %c0_11 = arith.constant 0 : index
      %12 = vector.load %arg7[%c0_10, %c0_11] : memref<64x128xf32, #tpu.memory_space<vmem>>, vector<64x128xf32>
      %c0_12 = arith.constant 0 : index
      %c0_13 = arith.constant 0 : index
      %13 = vector.load %arg5[%c0_12, %c0_13] : memref<1x128xf32, #tpu.memory_space<vmem>>, vector<1x128xf32>
      %14 = vector.broadcast %13 : vector<1x128xf32> to vector<64x128xf32>
      %15 = arith.addf %12, %14 : vector<64x128xf32>
      %16 = arith.truncf %15 : vector<64x128xf32> to vector<64x128xbf16>
      %c0_14 = arith.constant 0 : index
      %c0_15 = arith.constant 0 : index
      %17 = vector.load %arg6[%c0_14, %c0_15] : memref<64x128xbf16, #tpu.memory_space<vmem>>, vector<64x128xbf16>
      tpu.vector_store %arg6[%c0_14, %c0_15], %16 {strides = array<i32>} : memref<64x128xbf16, #tpu.memory_space<vmem>>, vector<64x128xbf16>,
    } else {
    }
    return
  }
  func.func @transform_0(%arg0: i32, %arg1: i32, %arg2: i32) -> (i32, i32) {
    %c0_i32 = arith.constant 0 : i32
    return %arg0, %arg2 : i32, i32
  }
  func.func @transform_1(%arg0: i32, %arg1: i32, %arg2: i32) -> (i32, i32) {
    %c0_i32 = arith.constant 0 : i32
    return %arg2, %arg1 : i32, i32
  }
  func.func @transform_2(%arg0: i32, %arg1: i32, %arg2: i32) -> (i32, i32) {
    %c0_i32 = arith.constant 0 : i32
    %c0_i32_0 = arith.constant 0 : i32
    return %c0_i32, %arg1 : i32, i32
  }
  func.func @transform_3(%arg0: i32, %arg1: i32, %arg2: i32) -> (i32, i32) {
    %c0_i32 = arith.constant 0 : i32
    return %arg0, %arg1 : i32, i32
  }
}

module attributes {stable_mosaic.version = 11 : i64} {
  func.func @_fused_mm_kernel(%arg0: i32, %arg1: i32, %arg2: i32, %arg3: memref<64x384xbf16, #tpu.memory_space<vmem>>, %arg4: memref<384x128xbf16, #tpu.memory_space<vmem>>, %arg5: memref<1x128xf32, #tpu.memory_space<vmem>>, %arg6: memref<64x128xbf16, #tpu.memory_space<vmem>>, %arg7: memref<64x128xf32, #tpu.memory_space<vmem>>) attributes {dimension_semantics = [#tpu.dimension_semantics<parallel>, #tpu.dimension_semantics<parallel>, #tpu.dimension_semantics<arbitrary>], iteration_bounds = array<i64: 2, 1, 3>, scalar_prefetch = 0 : i64, scratch_operands = 1 : i64, tpu.core_type = #tpu.core_type<tc>, window_params = [{transform_indices = @transform_0, window_bounds = array<i64: 64, 384>}, {transform_indices = @transform_1, window_bounds = array<i64: 384, 128>}, {transform_indices = @transform_2, window_bounds = array<i64: 1, 128>}, {transform_indices = @transform_3, window_bounds = array<i64: 64, 128>}]} {
    %c0_i32 = arith.constant 0 : i32
    %0 = arith.cmpi eq, %arg2, %c0_i32 : i32
    %1 = arith.extui %0 : i1 to i32
    %c0_i32_0 = arith.constant 0 : i32
    %2 = arith.cmpi ne, %1, %c0_i32_0 : i32
    scf.if %2 {
      %cst_9 = arith.constant 0.000000e+00 : f32
      %12 = vector.broadcast %cst_9 : f32 to vector<64x128xf32>
      %c0_10 = arith.constant 0 : index
      %c0_11 = arith.constant 0 : index
      %13 = vector.load %arg7[%c0_10, %c0_11] : memref<64x128xf32, #tpu.memory_space<vmem>>, vector<64x128xf32>
      tpu.vector_store %arg7[%c0_10, %c0_11], %12 {strides = array<i32>} : memref<64x128xf32, #tpu.memory_space<vmem>>, vector<64x128xf32>,
    } else {
    }
    %c0 = arith.constant 0 : index
    %c0_1 = arith.constant 0 : index
    %3 = vector.load %arg7[%c0, %c0_1] : memref<64x128xf32, #tpu.memory_space<vmem>>, vector<64x128xf32>
    %c0_2 = arith.constant 0 : index
    %c0_3 = arith.constant 0 : index
    %4 = vector.load %arg3[%c0_2, %c0_3] : memref<64x384xbf16, #tpu.memory_space<vmem>>, vector<64x384xbf16>
    %c0_4 = arith.constant 0 : index
    %c0_5 = arith.constant 0 : index
    %5 = vector.load %arg4[%c0_4, %c0_5] : memref<384x128xbf16, #tpu.memory_space<vmem>>, vector<384x128xbf16>
    %cst = arith.constant dense<0.000000e+00> : vector<64x128xf32>
    %6 = tpu.matmul %4, %5, %cst {dimension_numbers = #tpu.dot_dimension_numbers<[1], [0], [0], [1], [0, 0, 1, 1], [], []>} : vector<64x384xbf16>, vector<384x128xbf16>, vector<64x128xf32> -> vector<64x128xf32>
    %7 = arith.addf %3, %6 : vector<64x128xf32>
    %c0_6 = arith.constant 0 : index
    %c0_7 = arith.constant 0 : index
    %8 = vector.load %arg7[%c0_6, %c0_7] : memref<64x128xf32, #tpu.memory_space<vmem>>, vector<64x128xf32>
    tpu.vector_store %arg7[%c0_6, %c0_7], %7 {strides = array<i32>} : memref<64x128xf32, #tpu.memory_space<vmem>>, vector<64x128xf32>,
    %c2_i32 = arith.constant 2 : i32
    %9 = arith.cmpi eq, %arg2, %c2_i32 : i32
    %10 = arith.extui %9 : i1 to i32
    %c0_i32_8 = arith.constant 0 : i32
    %11 = arith.cmpi ne, %10, %c0_i32_8 : i32
    scf.if %11 {
      %c0_9 = arith.constant 0 : index
      %c0_10 = arith.constant 0 : index
      %12 = vector.load %arg7[%c0_9, %c0_10] : memref<64x128xf32, #tpu.memory_space<vmem>>, vector<64x128xf32>
      %c0_11 = arith.constant 0 : index
      %c0_12 = arith.constant 0 : index
      %13 = vector.load %arg5[%c0_11, %c0_12] : memref<1x128xf32, #tpu.memory_space<vmem>>, vector<1x128xf32>
      %14 = vector.broadcast %13 : vector<1x128xf32> to vector<64x128xf32>
      %15 = arith.addf %12, %14 : vector<64x128xf32>
      %cst_13 = arith.constant 0.000000e+00 : f32
      %16 = vector.broadcast %cst_13 : f32 to vector<64x128xf32>
      %17 = arith.maximumf %15, %16 : vector<64x128xf32>
      %18 = arith.truncf %17 : vector<64x128xf32> to vector<64x128xbf16>
      %c0_14 = arith.constant 0 : index
      %c0_15 = arith.constant 0 : index
      %19 = vector.load %arg6[%c0_14, %c0_15] : memref<64x128xbf16, #tpu.memory_space<vmem>>, vector<64x128xbf16>
      tpu.vector_store %arg6[%c0_14, %c0_15], %18 {strides = array<i32>} : memref<64x128xbf16, #tpu.memory_space<vmem>>, vector<64x128xbf16>,
    } else {
    }
    return
  }
  func.func @transform_0(%arg0: i32, %arg1: i32, %arg2: i32) -> (i32, i32) {
    %c0_i32 = arith.constant 0 : i32
    return %arg0, %arg2 : i32, i32
  }
  func.func @transform_1(%arg0: i32, %arg1: i32, %arg2: i32) -> (i32, i32) {
    %c0_i32 = arith.constant 0 : i32
    return %arg2, %arg1 : i32, i32
  }
  func.func @transform_2(%arg0: i32, %arg1: i32, %arg2: i32) -> (i32, i32) {
    %c0_i32 = arith.constant 0 : i32
    %c0_i32_0 = arith.constant 0 : i32
    return %c0_i32, %arg1 : i32, i32
  }
  func.func @transform_3(%arg0: i32, %arg1: i32, %arg2: i32) -> (i32, i32) {
    %c0_i32 = arith.constant 0 : i32
    return %arg0, %arg1 : i32, i32
  }
}

module attributes {stable_mosaic.version = 11 : i64} {
  func.func @_fused_mm_kernel(%arg0: i32, %arg1: i32, %arg2: i32, %arg3: memref<64x128xbf16, #tpu.memory_space<vmem>>, %arg4: memref<128x128xbf16, #tpu.memory_space<vmem>>, %arg5: memref<1x128xf32, #tpu.memory_space<vmem>>, %arg6: memref<64x128xbf16, #tpu.memory_space<vmem>>, %arg7: memref<64x128xbf16, #tpu.memory_space<vmem>>, %arg8: memref<64x128xf32, #tpu.memory_space<vmem>>) attributes {dimension_semantics = [#tpu.dimension_semantics<parallel>, #tpu.dimension_semantics<parallel>, #tpu.dimension_semantics<arbitrary>], iteration_bounds = array<i64: 2, 1, 1>, scalar_prefetch = 0 : i64, scratch_operands = 1 : i64, tpu.core_type = #tpu.core_type<tc>, window_params = [{transform_indices = @transform_0, window_bounds = array<i64: 64, 128>}, {transform_indices = @transform_1, window_bounds = array<i64: 128, 128>}, {transform_indices = @transform_2, window_bounds = array<i64: 1, 128>}, {transform_indices = @transform_3, window_bounds = array<i64: 64, 128>}, {transform_indices = @transform_4, window_bounds = array<i64: 64, 128>}]} {
    %c0_i32 = arith.constant 0 : i32
    %0 = arith.cmpi eq, %arg2, %c0_i32 : i32
    %1 = arith.extui %0 : i1 to i32
    %c0_i32_0 = arith.constant 0 : i32
    %2 = arith.cmpi ne, %1, %c0_i32_0 : i32
    scf.if %2 {
      %cst_10 = arith.constant 0.000000e+00 : f32
      %12 = vector.broadcast %cst_10 : f32 to vector<64x128xf32>
      %c0_11 = arith.constant 0 : index
      %c0_12 = arith.constant 0 : index
      %13 = vector.load %arg8[%c0_11, %c0_12] : memref<64x128xf32, #tpu.memory_space<vmem>>, vector<64x128xf32>
      tpu.vector_store %arg8[%c0_11, %c0_12], %12 {strides = array<i32>} : memref<64x128xf32, #tpu.memory_space<vmem>>, vector<64x128xf32>,
    } else {
    }
    %c0 = arith.constant 0 : index
    %c0_1 = arith.constant 0 : index
    %3 = vector.load %arg8[%c0, %c0_1] : memref<64x128xf32, #tpu.memory_space<vmem>>, vector<64x128xf32>
    %c0_2 = arith.constant 0 : index
    %c0_3 = arith.constant 0 : index
    %4 = vector.load %arg3[%c0_2, %c0_3] : memref<64x128xbf16, #tpu.memory_space<vmem>>, vector<64x128xbf16>
    %c0_4 = arith.constant 0 : index
    %c0_5 = arith.constant 0 : index
    %5 = vector.load %arg4[%c0_4, %c0_5] : memref<128x128xbf16, #tpu.memory_space<vmem>>, vector<128x128xbf16>
    %cst = arith.constant dense<0.000000e+00> : vector<64x128xf32>
    %6 = tpu.matmul %4, %5, %cst {dimension_numbers = #tpu.dot_dimension_numbers<[1], [0], [0], [1], [0, 0, 1, 1], [], []>} : vector<64x128xbf16>, vector<128x128xbf16>, vector<64x128xf32> -> vector<64x128xf32>
    %7 = arith.addf %3, %6 : vector<64x128xf32>
    %c0_6 = arith.constant 0 : index
    %c0_7 = arith.constant 0 : index
    %8 = vector.load %arg8[%c0_6, %c0_7] : memref<64x128xf32, #tpu.memory_space<vmem>>, vector<64x128xf32>
    tpu.vector_store %arg8[%c0_6, %c0_7], %7 {strides = array<i32>} : memref<64x128xf32, #tpu.memory_space<vmem>>, vector<64x128xf32>,
    %c0_i32_8 = arith.constant 0 : i32
    %9 = arith.cmpi eq, %arg2, %c0_i32_8 : i32
    %10 = arith.extui %9 : i1 to i32
    %c0_i32_9 = arith.constant 0 : i32
    %11 = arith.cmpi ne, %10, %c0_i32_9 : i32
    scf.if %11 {
      %c0_10 = arith.constant 0 : index
      %c0_11 = arith.constant 0 : index
      %12 = vector.load %arg8[%c0_10, %c0_11] : memref<64x128xf32, #tpu.memory_space<vmem>>, vector<64x128xf32>
      %c0_12 = arith.constant 0 : index
      %c0_13 = arith.constant 0 : index
      %13 = vector.load %arg5[%c0_12, %c0_13] : memref<1x128xf32, #tpu.memory_space<vmem>>, vector<1x128xf32>
      %14 = vector.broadcast %13 : vector<1x128xf32> to vector<64x128xf32>
      %15 = arith.addf %12, %14 : vector<64x128xf32>
      %c0_14 = arith.constant 0 : index
      %c0_15 = arith.constant 0 : index
      %16 = vector.load %arg6[%c0_14, %c0_15] : memref<64x128xbf16, #tpu.memory_space<vmem>>, vector<64x128xbf16>
      %17 = arith.extf %16 : vector<64x128xbf16> to vector<64x128xf32>
      %18 = arith.addf %15, %17 : vector<64x128xf32>
      %cst_16 = arith.constant 0.000000e+00 : f32
      %19 = vector.broadcast %cst_16 : f32 to vector<64x128xf32>
      %20 = arith.maximumf %18, %19 : vector<64x128xf32>
      %21 = arith.truncf %20 : vector<64x128xf32> to vector<64x128xbf16>
      %c0_17 = arith.constant 0 : index
      %c0_18 = arith.constant 0 : index
      %22 = vector.load %arg7[%c0_17, %c0_18] : memref<64x128xbf16, #tpu.memory_space<vmem>>, vector<64x128xbf16>
      tpu.vector_store %arg7[%c0_17, %c0_18], %21 {strides = array<i32>} : memref<64x128xbf16, #tpu.memory_space<vmem>>, vector<64x128xbf16>,
    } else {
    }
    return
  }
  func.func @transform_0(%arg0: i32, %arg1: i32, %arg2: i32) -> (i32, i32) {
    %c0_i32 = arith.constant 0 : i32
    return %arg0, %arg2 : i32, i32
  }
  func.func @transform_1(%arg0: i32, %arg1: i32, %arg2: i32) -> (i32, i32) {
    %c0_i32 = arith.constant 0 : i32
    return %arg2, %arg1 : i32, i32
  }
  func.func @transform_2(%arg0: i32, %arg1: i32, %arg2: i32) -> (i32, i32) {
    %c0_i32 = arith.constant 0 : i32
    %c0_i32_0 = arith.constant 0 : i32
    return %c0_i32, %arg1 : i32, i32
  }
  func.func @transform_3(%arg0: i32, %arg1: i32, %arg2: i32) -> (i32, i32) {
    %c0_i32 = arith.constant 0 : i32
    return %arg0, %arg1 : i32, i32
  }
  func.func @transform_4(%arg0: i32, %arg1: i32, %arg2: i32) -> (i32, i32) {
    %c0_i32 = arith.constant 0 : i32
    return %arg0, %arg1 : i32, i32
  }
}

module attributes {stable_mosaic.version = 11 : i64} {
  func.func @_fused_mm_kernel(%arg0: i32, %arg1: i32, %arg2: i32, %arg3: memref<64x128xbf16, #tpu.memory_space<vmem>>, %arg4: memref<128x128xbf16, #tpu.memory_space<vmem>>, %arg5: memref<1x128xf32, #tpu.memory_space<vmem>>, %arg6: memref<64x128xbf16, #tpu.memory_space<vmem>>, %arg7: memref<64x128xf32, #tpu.memory_space<vmem>>) attributes {dimension_semantics = [#tpu.dimension_semantics<parallel>, #tpu.dimension_semantics<parallel>, #tpu.dimension_semantics<arbitrary>], iteration_bounds = array<i64: 2, 1, 1>, scalar_prefetch = 0 : i64, scratch_operands = 1 : i64, tpu.core_type = #tpu.core_type<tc>, window_params = [{transform_indices = @transform_0, window_bounds = array<i64: 64, 128>}, {transform_indices = @transform_1, window_bounds = array<i64: 128, 128>}, {transform_indices = @transform_2, window_bounds = array<i64: 1, 128>}, {transform_indices = @transform_3, window_bounds = array<i64: 64, 128>}]} {
    %c0_i32 = arith.constant 0 : i32
    %0 = arith.cmpi eq, %arg2, %c0_i32 : i32
    %1 = arith.extui %0 : i1 to i32
    %c0_i32_0 = arith.constant 0 : i32
    %2 = arith.cmpi ne, %1, %c0_i32_0 : i32
    scf.if %2 {
      %cst_10 = arith.constant 0.000000e+00 : f32
      %12 = vector.broadcast %cst_10 : f32 to vector<64x128xf32>
      %c0_11 = arith.constant 0 : index
      %c0_12 = arith.constant 0 : index
      %13 = vector.load %arg7[%c0_11, %c0_12] : memref<64x128xf32, #tpu.memory_space<vmem>>, vector<64x128xf32>
      tpu.vector_store %arg7[%c0_11, %c0_12], %12 {strides = array<i32>} : memref<64x128xf32, #tpu.memory_space<vmem>>, vector<64x128xf32>,
    } else {
    }
    %c0 = arith.constant 0 : index
    %c0_1 = arith.constant 0 : index
    %3 = vector.load %arg7[%c0, %c0_1] : memref<64x128xf32, #tpu.memory_space<vmem>>, vector<64x128xf32>
    %c0_2 = arith.constant 0 : index
    %c0_3 = arith.constant 0 : index
    %4 = vector.load %arg3[%c0_2, %c0_3] : memref<64x128xbf16, #tpu.memory_space<vmem>>, vector<64x128xbf16>
    %c0_4 = arith.constant 0 : index
    %c0_5 = arith.constant 0 : index
    %5 = vector.load %arg4[%c0_4, %c0_5] : memref<128x128xbf16, #tpu.memory_space<vmem>>, vector<128x128xbf16>
    %cst = arith.constant dense<0.000000e+00> : vector<64x128xf32>
    %6 = tpu.matmul %4, %5, %cst {dimension_numbers = #tpu.dot_dimension_numbers<[1], [0], [0], [1], [0, 0, 1, 1], [], []>} : vector<64x128xbf16>, vector<128x128xbf16>, vector<64x128xf32> -> vector<64x128xf32>
    %7 = arith.addf %3, %6 : vector<64x128xf32>
    %c0_6 = arith.constant 0 : index
    %c0_7 = arith.constant 0 : index
    %8 = vector.load %arg7[%c0_6, %c0_7] : memref<64x128xf32, #tpu.memory_space<vmem>>, vector<64x128xf32>
    tpu.vector_store %arg7[%c0_6, %c0_7], %7 {strides = array<i32>} : memref<64x128xf32, #tpu.memory_space<vmem>>, vector<64x128xf32>,
    %c0_i32_8 = arith.constant 0 : i32
    %9 = arith.cmpi eq, %arg2, %c0_i32_8 : i32
    %10 = arith.extui %9 : i1 to i32
    %c0_i32_9 = arith.constant 0 : i32
    %11 = arith.cmpi ne, %10, %c0_i32_9 : i32
    scf.if %11 {
      %c0_10 = arith.constant 0 : index
      %c0_11 = arith.constant 0 : index
      %12 = vector.load %arg7[%c0_10, %c0_11] : memref<64x128xf32, #tpu.memory_space<vmem>>, vector<64x128xf32>
      %c0_12 = arith.constant 0 : index
      %c0_13 = arith.constant 0 : index
      %13 = vector.load %arg5[%c0_12, %c0_13] : memref<1x128xf32, #tpu.memory_space<vmem>>, vector<1x128xf32>
      %14 = vector.broadcast %13 : vector<1x128xf32> to vector<64x128xf32>
      %15 = arith.addf %12, %14 : vector<64x128xf32>
      %cst_14 = arith.constant 0.000000e+00 : f32
      %16 = vector.broadcast %cst_14 : f32 to vector<64x128xf32>
      %17 = arith.maximumf %15, %16 : vector<64x128xf32>
      %18 = arith.truncf %17 : vector<64x128xf32> to vector<64x128xbf16>
      %c0_15 = arith.constant 0 : index
      %c0_16 = arith.constant 0 : index
      %19 = vector.load %arg6[%c0_15, %c0_16] : memref<64x128xbf16, #tpu.memory_space<vmem>>, vector<64x128xbf16>
      tpu.vector_store %arg6[%c0_15, %c0_16], %18 {strides = array<i32>} : memref<64x128xbf16, #tpu.memory_space<vmem>>, vector<64x128xbf16>,
    } else {
    }
    return
  }
  func.func @transform_0(%arg0: i32, %arg1: i32, %arg2: i32) -> (i32, i32) {
    %c0_i32 = arith.constant 0 : i32
    return %arg0, %arg2 : i32, i32
  }
  func.func @transform_1(%arg0: i32, %arg1: i32, %arg2: i32) -> (i32, i32) {
    %c0_i32 = arith.constant 0 : i32
    return %arg2, %arg1 : i32, i32
  }
  func.func @transform_2(%arg0: i32, %arg1: i32, %arg2: i32) -> (i32, i32) {
    %c0_i32 = arith.constant 0 : i32
    %c0_i32_0 = arith.constant 0 : i32
    return %c0_i32, %arg1 : i32, i32
  }
  func.func @transform_3(%arg0: i32, %arg1: i32, %arg2: i32) -> (i32, i32) {
    %c0_i32 = arith.constant 0 : i32
    return %arg0, %arg1 : i32, i32
  }
}

module attributes {stable_mosaic.version = 11 : i64} {
  func.func @_fused_mm_kernel(%arg0: i32, %arg1: i32, %arg2: i32, %arg3: memref<16x128xbf16, #tpu.memory_space<vmem>>, %arg4: memref<128x256xbf16, #tpu.memory_space<vmem>>, %arg5: memref<1x256xf32, #tpu.memory_space<vmem>>, %arg6: memref<16x256xbf16, #tpu.memory_space<vmem>>, %arg7: memref<16x256xf32, #tpu.memory_space<vmem>>) attributes {dimension_semantics = [#tpu.dimension_semantics<parallel>, #tpu.dimension_semantics<parallel>, #tpu.dimension_semantics<arbitrary>], iteration_bounds = array<i64: 2, 1, 1>, scalar_prefetch = 0 : i64, scratch_operands = 1 : i64, tpu.core_type = #tpu.core_type<tc>, window_params = [{transform_indices = @transform_0, window_bounds = array<i64: 16, 128>}, {transform_indices = @transform_1, window_bounds = array<i64: 128, 256>}, {transform_indices = @transform_2, window_bounds = array<i64: 1, 256>}, {transform_indices = @transform_3, window_bounds = array<i64: 16, 256>}]} {
    %c0_i32 = arith.constant 0 : i32
    %0 = arith.cmpi eq, %arg2, %c0_i32 : i32
    %1 = arith.extui %0 : i1 to i32
    %c0_i32_0 = arith.constant 0 : i32
    %2 = arith.cmpi ne, %1, %c0_i32_0 : i32
    scf.if %2 {
      %cst_10 = arith.constant 0.000000e+00 : f32
      %12 = vector.broadcast %cst_10 : f32 to vector<16x256xf32>
      %c0_11 = arith.constant 0 : index
      %c0_12 = arith.constant 0 : index
      %13 = vector.load %arg7[%c0_11, %c0_12] : memref<16x256xf32, #tpu.memory_space<vmem>>, vector<16x256xf32>
      tpu.vector_store %arg7[%c0_11, %c0_12], %12 {strides = array<i32>} : memref<16x256xf32, #tpu.memory_space<vmem>>, vector<16x256xf32>,
    } else {
    }
    %c0 = arith.constant 0 : index
    %c0_1 = arith.constant 0 : index
    %3 = vector.load %arg7[%c0, %c0_1] : memref<16x256xf32, #tpu.memory_space<vmem>>, vector<16x256xf32>
    %c0_2 = arith.constant 0 : index
    %c0_3 = arith.constant 0 : index
    %4 = vector.load %arg3[%c0_2, %c0_3] : memref<16x128xbf16, #tpu.memory_space<vmem>>, vector<16x128xbf16>
    %c0_4 = arith.constant 0 : index
    %c0_5 = arith.constant 0 : index
    %5 = vector.load %arg4[%c0_4, %c0_5] : memref<128x256xbf16, #tpu.memory_space<vmem>>, vector<128x256xbf16>
    %cst = arith.constant dense<0.000000e+00> : vector<16x256xf32>
    %6 = tpu.matmul %4, %5, %cst {dimension_numbers = #tpu.dot_dimension_numbers<[1], [0], [0], [1], [0, 0, 1, 1], [], []>} : vector<16x128xbf16>, vector<128x256xbf16>, vector<16x256xf32> -> vector<16x256xf32>
    %7 = arith.addf %3, %6 : vector<16x256xf32>
    %c0_6 = arith.constant 0 : index
    %c0_7 = arith.constant 0 : index
    %8 = vector.load %arg7[%c0_6, %c0_7] : memref<16x256xf32, #tpu.memory_space<vmem>>, vector<16x256xf32>
    tpu.vector_store %arg7[%c0_6, %c0_7], %7 {strides = array<i32>} : memref<16x256xf32, #tpu.memory_space<vmem>>, vector<16x256xf32>,
    %c0_i32_8 = arith.constant 0 : i32
    %9 = arith.cmpi eq, %arg2, %c0_i32_8 : i32
    %10 = arith.extui %9 : i1 to i32
    %c0_i32_9 = arith.constant 0 : i32
    %11 = arith.cmpi ne, %10, %c0_i32_9 : i32
    scf.if %11 {
      %c0_10 = arith.constant 0 : index
      %c0_11 = arith.constant 0 : index
      %12 = vector.load %arg7[%c0_10, %c0_11] : memref<16x256xf32, #tpu.memory_space<vmem>>, vector<16x256xf32>
      %c0_12 = arith.constant 0 : index
      %c0_13 = arith.constant 0 : index
      %13 = vector.load %arg5[%c0_12, %c0_13] : memref<1x256xf32, #tpu.memory_space<vmem>>, vector<1x256xf32>
      %14 = vector.broadcast %13 : vector<1x256xf32> to vector<16x256xf32>
      %15 = arith.addf %12, %14 : vector<16x256xf32>
      %16 = arith.truncf %15 : vector<16x256xf32> to vector<16x256xbf16>
      %c0_14 = arith.constant 0 : index
      %c0_15 = arith.constant 0 : index
      %17 = vector.load %arg6[%c0_14, %c0_15] : memref<16x256xbf16, #tpu.memory_space<vmem>>, vector<16x256xbf16>
      tpu.vector_store %arg6[%c0_14, %c0_15], %16 {strides = array<i32>} : memref<16x256xbf16, #tpu.memory_space<vmem>>, vector<16x256xbf16>,
    } else {
    }
    return
  }
  func.func @transform_0(%arg0: i32, %arg1: i32, %arg2: i32) -> (i32, i32) {
    %c0_i32 = arith.constant 0 : i32
    return %arg0, %arg2 : i32, i32
  }
  func.func @transform_1(%arg0: i32, %arg1: i32, %arg2: i32) -> (i32, i32) {
    %c0_i32 = arith.constant 0 : i32
    return %arg2, %arg1 : i32, i32
  }
  func.func @transform_2(%arg0: i32, %arg1: i32, %arg2: i32) -> (i32, i32) {
    %c0_i32 = arith.constant 0 : i32
    %c0_i32_0 = arith.constant 0 : i32
    return %c0_i32, %arg1 : i32, i32
  }
  func.func @transform_3(%arg0: i32, %arg1: i32, %arg2: i32) -> (i32, i32) {
    %c0_i32 = arith.constant 0 : i32
    return %arg0, %arg1 : i32, i32
  }
}

module attributes {stable_mosaic.version = 11 : i64} {
  func.func @_fused_mm_kernel(%arg0: i32, %arg1: i32, %arg2: i32, %arg3: memref<16x384xbf16, #tpu.memory_space<vmem>>, %arg4: memref<384x128xbf16, #tpu.memory_space<vmem>>, %arg5: memref<1x128xf32, #tpu.memory_space<vmem>>, %arg6: memref<16x128xbf16, #tpu.memory_space<vmem>>, %arg7: memref<16x128xf32, #tpu.memory_space<vmem>>) attributes {dimension_semantics = [#tpu.dimension_semantics<parallel>, #tpu.dimension_semantics<parallel>, #tpu.dimension_semantics<arbitrary>], iteration_bounds = array<i64: 2, 1, 3>, scalar_prefetch = 0 : i64, scratch_operands = 1 : i64, tpu.core_type = #tpu.core_type<tc>, window_params = [{transform_indices = @transform_0, window_bounds = array<i64: 16, 384>}, {transform_indices = @transform_1, window_bounds = array<i64: 384, 128>}, {transform_indices = @transform_2, window_bounds = array<i64: 1, 128>}, {transform_indices = @transform_3, window_bounds = array<i64: 16, 128>}]} {
    %c0_i32 = arith.constant 0 : i32
    %0 = arith.cmpi eq, %arg2, %c0_i32 : i32
    %1 = arith.extui %0 : i1 to i32
    %c0_i32_0 = arith.constant 0 : i32
    %2 = arith.cmpi ne, %1, %c0_i32_0 : i32
    scf.if %2 {
      %cst_9 = arith.constant 0.000000e+00 : f32
      %12 = vector.broadcast %cst_9 : f32 to vector<16x128xf32>
      %c0_10 = arith.constant 0 : index
      %c0_11 = arith.constant 0 : index
      %13 = vector.load %arg7[%c0_10, %c0_11] : memref<16x128xf32, #tpu.memory_space<vmem>>, vector<16x128xf32>
      tpu.vector_store %arg7[%c0_10, %c0_11], %12 {strides = array<i32>} : memref<16x128xf32, #tpu.memory_space<vmem>>, vector<16x128xf32>,
    } else {
    }
    %c0 = arith.constant 0 : index
    %c0_1 = arith.constant 0 : index
    %3 = vector.load %arg7[%c0, %c0_1] : memref<16x128xf32, #tpu.memory_space<vmem>>, vector<16x128xf32>
    %c0_2 = arith.constant 0 : index
    %c0_3 = arith.constant 0 : index
    %4 = vector.load %arg3[%c0_2, %c0_3] : memref<16x384xbf16, #tpu.memory_space<vmem>>, vector<16x384xbf16>
    %c0_4 = arith.constant 0 : index
    %c0_5 = arith.constant 0 : index
    %5 = vector.load %arg4[%c0_4, %c0_5] : memref<384x128xbf16, #tpu.memory_space<vmem>>, vector<384x128xbf16>
    %cst = arith.constant dense<0.000000e+00> : vector<16x128xf32>
    %6 = tpu.matmul %4, %5, %cst {dimension_numbers = #tpu.dot_dimension_numbers<[1], [0], [0], [1], [0, 0, 1, 1], [], []>} : vector<16x384xbf16>, vector<384x128xbf16>, vector<16x128xf32> -> vector<16x128xf32>
    %7 = arith.addf %3, %6 : vector<16x128xf32>
    %c0_6 = arith.constant 0 : index
    %c0_7 = arith.constant 0 : index
    %8 = vector.load %arg7[%c0_6, %c0_7] : memref<16x128xf32, #tpu.memory_space<vmem>>, vector<16x128xf32>
    tpu.vector_store %arg7[%c0_6, %c0_7], %7 {strides = array<i32>} : memref<16x128xf32, #tpu.memory_space<vmem>>, vector<16x128xf32>,
    %c2_i32 = arith.constant 2 : i32
    %9 = arith.cmpi eq, %arg2, %c2_i32 : i32
    %10 = arith.extui %9 : i1 to i32
    %c0_i32_8 = arith.constant 0 : i32
    %11 = arith.cmpi ne, %10, %c0_i32_8 : i32
    scf.if %11 {
      %c0_9 = arith.constant 0 : index
      %c0_10 = arith.constant 0 : index
      %12 = vector.load %arg7[%c0_9, %c0_10] : memref<16x128xf32, #tpu.memory_space<vmem>>, vector<16x128xf32>
      %c0_11 = arith.constant 0 : index
      %c0_12 = arith.constant 0 : index
      %13 = vector.load %arg5[%c0_11, %c0_12] : memref<1x128xf32, #tpu.memory_space<vmem>>, vector<1x128xf32>
      %14 = vector.broadcast %13 : vector<1x128xf32> to vector<16x128xf32>
      %15 = arith.addf %12, %14 : vector<16x128xf32>
      %cst_13 = arith.constant 0.000000e+00 : f32
      %16 = vector.broadcast %cst_13 : f32 to vector<16x128xf32>
      %17 = arith.maximumf %15, %16 : vector<16x128xf32>
      %18 = arith.truncf %17 : vector<16x128xf32> to vector<16x128xbf16>
      %c0_14 = arith.constant 0 : index
      %c0_15 = arith.constant 0 : index
      %19 = vector.load %arg6[%c0_14, %c0_15] : memref<16x128xbf16, #tpu.memory_space<vmem>>, vector<16x128xbf16>
      tpu.vector_store %arg6[%c0_14, %c0_15], %18 {strides = array<i32>} : memref<16x128xbf16, #tpu.memory_space<vmem>>, vector<16x128xbf16>,
    } else {
    }
    return
  }
  func.func @transform_0(%arg0: i32, %arg1: i32, %arg2: i32) -> (i32, i32) {
    %c0_i32 = arith.constant 0 : i32
    return %arg0, %arg2 : i32, i32
  }
  func.func @transform_1(%arg0: i32, %arg1: i32, %arg2: i32) -> (i32, i32) {
    %c0_i32 = arith.constant 0 : i32
    return %arg2, %arg1 : i32, i32
  }
  func.func @transform_2(%arg0: i32, %arg1: i32, %arg2: i32) -> (i32, i32) {
    %c0_i32 = arith.constant 0 : i32
    %c0_i32_0 = arith.constant 0 : i32
    return %c0_i32, %arg1 : i32, i32
  }
  func.func @transform_3(%arg0: i32, %arg1: i32, %arg2: i32) -> (i32, i32) {
    %c0_i32 = arith.constant 0 : i32
    return %arg0, %arg1 : i32, i32
  }
}

module attributes {stable_mosaic.version = 11 : i64} {
  func.func @_fused_mm_kernel(%arg0: i32, %arg1: i32, %arg2: i32, %arg3: memref<16x128xbf16, #tpu.memory_space<vmem>>, %arg4: memref<128x256xbf16, #tpu.memory_space<vmem>>, %arg5: memref<1x256xf32, #tpu.memory_space<vmem>>, %arg6: memref<16x256xbf16, #tpu.memory_space<vmem>>, %arg7: memref<16x256xbf16, #tpu.memory_space<vmem>>, %arg8: memref<16x256xf32, #tpu.memory_space<vmem>>) attributes {dimension_semantics = [#tpu.dimension_semantics<parallel>, #tpu.dimension_semantics<parallel>, #tpu.dimension_semantics<arbitrary>], iteration_bounds = array<i64: 2, 1, 1>, scalar_prefetch = 0 : i64, scratch_operands = 1 : i64, tpu.core_type = #tpu.core_type<tc>, window_params = [{transform_indices = @transform_0, window_bounds = array<i64: 16, 128>}, {transform_indices = @transform_1, window_bounds = array<i64: 128, 256>}, {transform_indices = @transform_2, window_bounds = array<i64: 1, 256>}, {transform_indices = @transform_3, window_bounds = array<i64: 16, 256>}, {transform_indices = @transform_4, window_bounds = array<i64: 16, 256>}]} {
    %c0_i32 = arith.constant 0 : i32
    %0 = arith.cmpi eq, %arg2, %c0_i32 : i32
    %1 = arith.extui %0 : i1 to i32
    %c0_i32_0 = arith.constant 0 : i32
    %2 = arith.cmpi ne, %1, %c0_i32_0 : i32
    scf.if %2 {
      %cst_10 = arith.constant 0.000000e+00 : f32
      %12 = vector.broadcast %cst_10 : f32 to vector<16x256xf32>
      %c0_11 = arith.constant 0 : index
      %c0_12 = arith.constant 0 : index
      %13 = vector.load %arg8[%c0_11, %c0_12] : memref<16x256xf32, #tpu.memory_space<vmem>>, vector<16x256xf32>
      tpu.vector_store %arg8[%c0_11, %c0_12], %12 {strides = array<i32>} : memref<16x256xf32, #tpu.memory_space<vmem>>, vector<16x256xf32>,
    } else {
    }
    %c0 = arith.constant 0 : index
    %c0_1 = arith.constant 0 : index
    %3 = vector.load %arg8[%c0, %c0_1] : memref<16x256xf32, #tpu.memory_space<vmem>>, vector<16x256xf32>
    %c0_2 = arith.constant 0 : index
    %c0_3 = arith.constant 0 : index
    %4 = vector.load %arg3[%c0_2, %c0_3] : memref<16x128xbf16, #tpu.memory_space<vmem>>, vector<16x128xbf16>
    %c0_4 = arith.constant 0 : index
    %c0_5 = arith.constant 0 : index
    %5 = vector.load %arg4[%c0_4, %c0_5] : memref<128x256xbf16, #tpu.memory_space<vmem>>, vector<128x256xbf16>
    %cst = arith.constant dense<0.000000e+00> : vector<16x256xf32>
    %6 = tpu.matmul %4, %5, %cst {dimension_numbers = #tpu.dot_dimension_numbers<[1], [0], [0], [1], [0, 0, 1, 1], [], []>} : vector<16x128xbf16>, vector<128x256xbf16>, vector<16x256xf32> -> vector<16x256xf32>
    %7 = arith.addf %3, %6 : vector<16x256xf32>
    %c0_6 = arith.constant 0 : index
    %c0_7 = arith.constant 0 : index
    %8 = vector.load %arg8[%c0_6, %c0_7] : memref<16x256xf32, #tpu.memory_space<vmem>>, vector<16x256xf32>
    tpu.vector_store %arg8[%c0_6, %c0_7], %7 {strides = array<i32>} : memref<16x256xf32, #tpu.memory_space<vmem>>, vector<16x256xf32>,
    %c0_i32_8 = arith.constant 0 : i32
    %9 = arith.cmpi eq, %arg2, %c0_i32_8 : i32
    %10 = arith.extui %9 : i1 to i32
    %c0_i32_9 = arith.constant 0 : i32
    %11 = arith.cmpi ne, %10, %c0_i32_9 : i32
    scf.if %11 {
      %c0_10 = arith.constant 0 : index
      %c0_11 = arith.constant 0 : index
      %12 = vector.load %arg8[%c0_10, %c0_11] : memref<16x256xf32, #tpu.memory_space<vmem>>, vector<16x256xf32>
      %c0_12 = arith.constant 0 : index
      %c0_13 = arith.constant 0 : index
      %13 = vector.load %arg5[%c0_12, %c0_13] : memref<1x256xf32, #tpu.memory_space<vmem>>, vector<1x256xf32>
      %14 = vector.broadcast %13 : vector<1x256xf32> to vector<16x256xf32>
      %15 = arith.addf %12, %14 : vector<16x256xf32>
      %c0_14 = arith.constant 0 : index
      %c0_15 = arith.constant 0 : index
      %16 = vector.load %arg6[%c0_14, %c0_15] : memref<16x256xbf16, #tpu.memory_space<vmem>>, vector<16x256xbf16>
      %17 = arith.extf %16 : vector<16x256xbf16> to vector<16x256xf32>
      %18 = arith.addf %15, %17 : vector<16x256xf32>
      %cst_16 = arith.constant 0.000000e+00 : f32
      %19 = vector.broadcast %cst_16 : f32 to vector<16x256xf32>
      %20 = arith.maximumf %18, %19 : vector<16x256xf32>
      %21 = arith.truncf %20 : vector<16x256xf32> to vector<16x256xbf16>
      %c0_17 = arith.constant 0 : index
      %c0_18 = arith.constant 0 : index
      %22 = vector.load %arg7[%c0_17, %c0_18] : memref<16x256xbf16, #tpu.memory_space<vmem>>, vector<16x256xbf16>
      tpu.vector_store %arg7[%c0_17, %c0_18], %21 {strides = array<i32>} : memref<16x256xbf16, #tpu.memory_space<vmem>>, vector<16x256xbf16>,
    } else {
    }
    return
  }
  func.func @transform_0(%arg0: i32, %arg1: i32, %arg2: i32) -> (i32, i32) {
    %c0_i32 = arith.constant 0 : i32
    return %arg0, %arg2 : i32, i32
  }
  func.func @transform_1(%arg0: i32, %arg1: i32, %arg2: i32) -> (i32, i32) {
    %c0_i32 = arith.constant 0 : i32
    return %arg2, %arg1 : i32, i32
  }
  func.func @transform_2(%arg0: i32, %arg1: i32, %arg2: i32) -> (i32, i32) {
    %c0_i32 = arith.constant 0 : i32
    %c0_i32_0 = arith.constant 0 : i32
    return %c0_i32, %arg1 : i32, i32
  }
  func.func @transform_3(%arg0: i32, %arg1: i32, %arg2: i32) -> (i32, i32) {
    %c0_i32 = arith.constant 0 : i32
    return %arg0, %arg1 : i32, i32
  }
  func.func @transform_4(%arg0: i32, %arg1: i32, %arg2: i32) -> (i32, i32) {
    %c0_i32 = arith.constant 0 : i32
    return %arg0, %arg1 : i32, i32
  }
}

module attributes {stable_mosaic.version = 11 : i64} {
  func.func @_fused_mm_kernel(%arg0: i32, %arg1: i32, %arg2: i32, %arg3: memref<16x256xbf16, #tpu.memory_space<vmem>>, %arg4: memref<256x128xbf16, #tpu.memory_space<vmem>>, %arg5: memref<1x128xf32, #tpu.memory_space<vmem>>, %arg6: memref<16x128xbf16, #tpu.memory_space<vmem>>, %arg7: memref<16x128xf32, #tpu.memory_space<vmem>>) attributes {dimension_semantics = [#tpu.dimension_semantics<parallel>, #tpu.dimension_semantics<parallel>, #tpu.dimension_semantics<arbitrary>], iteration_bounds = array<i64: 2, 1, 1>, scalar_prefetch = 0 : i64, scratch_operands = 1 : i64, tpu.core_type = #tpu.core_type<tc>, window_params = [{transform_indices = @transform_0, window_bounds = array<i64: 16, 256>}, {transform_indices = @transform_1, window_bounds = array<i64: 256, 128>}, {transform_indices = @transform_2, window_bounds = array<i64: 1, 128>}, {transform_indices = @transform_3, window_bounds = array<i64: 16, 128>}]} {
    %c0_i32 = arith.constant 0 : i32
    %0 = arith.cmpi eq, %arg2, %c0_i32 : i32
    %1 = arith.extui %0 : i1 to i32
    %c0_i32_0 = arith.constant 0 : i32
    %2 = arith.cmpi ne, %1, %c0_i32_0 : i32
    scf.if %2 {
      %cst_10 = arith.constant 0.000000e+00 : f32
      %12 = vector.broadcast %cst_10 : f32 to vector<16x128xf32>
      %c0_11 = arith.constant 0 : index
      %c0_12 = arith.constant 0 : index
      %13 = vector.load %arg7[%c0_11, %c0_12] : memref<16x128xf32, #tpu.memory_space<vmem>>, vector<16x128xf32>
      tpu.vector_store %arg7[%c0_11, %c0_12], %12 {strides = array<i32>} : memref<16x128xf32, #tpu.memory_space<vmem>>, vector<16x128xf32>,
    } else {
    }
    %c0 = arith.constant 0 : index
    %c0_1 = arith.constant 0 : index
    %3 = vector.load %arg7[%c0, %c0_1] : memref<16x128xf32, #tpu.memory_space<vmem>>, vector<16x128xf32>
    %c0_2 = arith.constant 0 : index
    %c0_3 = arith.constant 0 : index
    %4 = vector.load %arg3[%c0_2, %c0_3] : memref<16x256xbf16, #tpu.memory_space<vmem>>, vector<16x256xbf16>
    %c0_4 = arith.constant 0 : index
    %c0_5 = arith.constant 0 : index
    %5 = vector.load %arg4[%c0_4, %c0_5] : memref<256x128xbf16, #tpu.memory_space<vmem>>, vector<256x128xbf16>
    %cst = arith.constant dense<0.000000e+00> : vector<16x128xf32>
    %6 = tpu.matmul %4, %5, %cst {dimension_numbers = #tpu.dot_dimension_numbers<[1], [0], [0], [1], [0, 0, 1, 1], [], []>} : vector<16x256xbf16>, vector<256x128xbf16>, vector<16x128xf32> -> vector<16x128xf32>
    %7 = arith.addf %3, %6 : vector<16x128xf32>
    %c0_6 = arith.constant 0 : index
    %c0_7 = arith.constant 0 : index
    %8 = vector.load %arg7[%c0_6, %c0_7] : memref<16x128xf32, #tpu.memory_space<vmem>>, vector<16x128xf32>
    tpu.vector_store %arg7[%c0_6, %c0_7], %7 {strides = array<i32>} : memref<16x128xf32, #tpu.memory_space<vmem>>, vector<16x128xf32>,
    %c0_i32_8 = arith.constant 0 : i32
    %9 = arith.cmpi eq, %arg2, %c0_i32_8 : i32
    %10 = arith.extui %9 : i1 to i32
    %c0_i32_9 = arith.constant 0 : i32
    %11 = arith.cmpi ne, %10, %c0_i32_9 : i32
    scf.if %11 {
      %c0_10 = arith.constant 0 : index
      %c0_11 = arith.constant 0 : index
      %12 = vector.load %arg7[%c0_10, %c0_11] : memref<16x128xf32, #tpu.memory_space<vmem>>, vector<16x128xf32>
      %c0_12 = arith.constant 0 : index
      %c0_13 = arith.constant 0 : index
      %13 = vector.load %arg5[%c0_12, %c0_13] : memref<1x128xf32, #tpu.memory_space<vmem>>, vector<1x128xf32>
      %14 = vector.broadcast %13 : vector<1x128xf32> to vector<16x128xf32>
      %15 = arith.addf %12, %14 : vector<16x128xf32>
      %cst_14 = arith.constant 0.000000e+00 : f32
      %16 = vector.broadcast %cst_14 : f32 to vector<16x128xf32>
      %17 = arith.maximumf %15, %16 : vector<16x128xf32>
      %18 = arith.truncf %17 : vector<16x128xf32> to vector<16x128xbf16>
      %c0_15 = arith.constant 0 : index
      %c0_16 = arith.constant 0 : index
      %19 = vector.load %arg6[%c0_15, %c0_16] : memref<16x128xbf16, #tpu.memory_space<vmem>>, vector<16x128xbf16>
      tpu.vector_store %arg6[%c0_15, %c0_16], %18 {strides = array<i32>} : memref<16x128xbf16, #tpu.memory_space<vmem>>, vector<16x128xbf16>,
    } else {
    }
    return
  }
  func.func @transform_0(%arg0: i32, %arg1: i32, %arg2: i32) -> (i32, i32) {
    %c0_i32 = arith.constant 0 : i32
    return %arg0, %arg2 : i32, i32
  }
  func.func @transform_1(%arg0: i32, %arg1: i32, %arg2: i32) -> (i32, i32) {
    %c0_i32 = arith.constant 0 : i32
    return %arg2, %arg1 : i32, i32
  }
  func.func @transform_2(%arg0: i32, %arg1: i32, %arg2: i32) -> (i32, i32) {
    %c0_i32 = arith.constant 0 : i32
    %c0_i32_0 = arith.constant 0 : i32
    return %c0_i32, %arg1 : i32, i32
  }
  func.func @transform_3(%arg0: i32, %arg1: i32, %arg2: i32) -> (i32, i32) {
    %c0_i32 = arith.constant 0 : i32
    return %arg0, %arg1 : i32, i32
  }
}

module attributes {stable_mosaic.version = 11 : i64} {
  func.func @_fused_mm_kernel(%arg0: i32, %arg1: i32, %arg2: i32, %arg3: memref<16x128xbf16, #tpu.memory_space<vmem>>, %arg4: memref<128x256xbf16, #tpu.memory_space<vmem>>, %arg5: memref<1x256xf32, #tpu.memory_space<vmem>>, %arg6: memref<16x256xbf16, #tpu.memory_space<vmem>>, %arg7: memref<16x256xbf16, #tpu.memory_space<vmem>>, %arg8: memref<16x256xf32, #tpu.memory_space<vmem>>) attributes {dimension_semantics = [#tpu.dimension_semantics<parallel>, #tpu.dimension_semantics<parallel>, #tpu.dimension_semantics<arbitrary>], iteration_bounds = array<i64: 2, 1, 1>, scalar_prefetch = 0 : i64, scratch_operands = 1 : i64, tpu.core_type = #tpu.core_type<tc>, window_params = [{transform_indices = @transform_0, window_bounds = array<i64: 16, 128>}, {transform_indices = @transform_1, window_bounds = array<i64: 128, 256>}, {transform_indices = @transform_2, window_bounds = array<i64: 1, 256>}, {transform_indices = @transform_3, window_bounds = array<i64: 16, 256>}, {transform_indices = @transform_4, window_bounds = array<i64: 16, 256>}]} {
    %c0_i32 = arith.constant 0 : i32
    %0 = arith.cmpi eq, %arg2, %c0_i32 : i32
    %1 = arith.extui %0 : i1 to i32
    %c0_i32_0 = arith.constant 0 : i32
    %2 = arith.cmpi ne, %1, %c0_i32_0 : i32
    scf.if %2 {
      %cst_10 = arith.constant 0.000000e+00 : f32
      %12 = vector.broadcast %cst_10 : f32 to vector<16x256xf32>
      %c0_11 = arith.constant 0 : index
      %c0_12 = arith.constant 0 : index
      %13 = vector.load %arg8[%c0_11, %c0_12] : memref<16x256xf32, #tpu.memory_space<vmem>>, vector<16x256xf32>
      tpu.vector_store %arg8[%c0_11, %c0_12], %12 {strides = array<i32>} : memref<16x256xf32, #tpu.memory_space<vmem>>, vector<16x256xf32>,
    } else {
    }
    %c0 = arith.constant 0 : index
    %c0_1 = arith.constant 0 : index
    %3 = vector.load %arg8[%c0, %c0_1] : memref<16x256xf32, #tpu.memory_space<vmem>>, vector<16x256xf32>
    %c0_2 = arith.constant 0 : index
    %c0_3 = arith.constant 0 : index
    %4 = vector.load %arg3[%c0_2, %c0_3] : memref<16x128xbf16, #tpu.memory_space<vmem>>, vector<16x128xbf16>
    %c0_4 = arith.constant 0 : index
    %c0_5 = arith.constant 0 : index
    %5 = vector.load %arg4[%c0_4, %c0_5] : memref<128x256xbf16, #tpu.memory_space<vmem>>, vector<128x256xbf16>
    %cst = arith.constant dense<0.000000e+00> : vector<16x256xf32>
    %6 = tpu.matmul %4, %5, %cst {dimension_numbers = #tpu.dot_dimension_numbers<[1], [0], [0], [1], [0, 0, 1, 1], [], []>} : vector<16x128xbf16>, vector<128x256xbf16>, vector<16x256xf32> -> vector<16x256xf32>
    %7 = arith.addf %3, %6 : vector<16x256xf32>
    %c0_6 = arith.constant 0 : index
    %c0_7 = arith.constant 0 : index
    %8 = vector.load %arg8[%c0_6, %c0_7] : memref<16x256xf32, #tpu.memory_space<vmem>>, vector<16x256xf32>
    tpu.vector_store %arg8[%c0_6, %c0_7], %7 {strides = array<i32>} : memref<16x256xf32, #tpu.memory_space<vmem>>, vector<16x256xf32>,
    %c0_i32_8 = arith.constant 0 : i32
    %9 = arith.cmpi eq, %arg2, %c0_i32_8 : i32
    %10 = arith.extui %9 : i1 to i32
    %c0_i32_9 = arith.constant 0 : i32
    %11 = arith.cmpi ne, %10, %c0_i32_9 : i32
    scf.if %11 {
      %c0_10 = arith.constant 0 : index
      %c0_11 = arith.constant 0 : index
      %12 = vector.load %arg8[%c0_10, %c0_11] : memref<16x256xf32, #tpu.memory_space<vmem>>, vector<16x256xf32>
      %c0_12 = arith.constant 0 : index
      %c0_13 = arith.constant 0 : index
      %13 = vector.load %arg5[%c0_12, %c0_13] : memref<1x256xf32, #tpu.memory_space<vmem>>, vector<1x256xf32>
      %14 = vector.broadcast %13 : vector<1x256xf32> to vector<16x256xf32>
      %15 = arith.addf %12, %14 : vector<16x256xf32>
      %c0_14 = arith.constant 0 : index
      %c0_15 = arith.constant 0 : index
      %16 = vector.load %arg6[%c0_14, %c0_15] : memref<16x256xbf16, #tpu.memory_space<vmem>>, vector<16x256xbf16>
      %17 = arith.extf %16 : vector<16x256xbf16> to vector<16x256xf32>
      %18 = arith.addf %15, %17 : vector<16x256xf32>
      %cst_16 = arith.constant 0.000000e+00 : f32
      %19 = vector.broadcast %cst_16 : f32 to vector<16x256xf32>
      %20 = arith.maximumf %18, %19 : vector<16x256xf32>
      %21 = arith.truncf %20 : vector<16x256xf32> to vector<16x256xbf16>
      %c0_17 = arith.constant 0 : index
      %c0_18 = arith.constant 0 : index
      %22 = vector.load %arg7[%c0_17, %c0_18] : memref<16x256xbf16, #tpu.memory_space<vmem>>, vector<16x256xbf16>
      tpu.vector_store %arg7[%c0_17, %c0_18], %21 {strides = array<i32>} : memref<16x256xbf16, #tpu.memory_space<vmem>>, vector<16x256xbf16>,
    } else {
    }
    return
  }
  func.func @transform_0(%arg0: i32, %arg1: i32, %arg2: i32) -> (i32, i32) {
    %c0_i32 = arith.constant 0 : i32
    return %arg0, %arg2 : i32, i32
  }
  func.func @transform_1(%arg0: i32, %arg1: i32, %arg2: i32) -> (i32, i32) {
    %c0_i32 = arith.constant 0 : i32
    return %arg2, %arg1 : i32, i32
  }
  func.func @transform_2(%arg0: i32, %arg1: i32, %arg2: i32) -> (i32, i32) {
    %c0_i32 = arith.constant 0 : i32
    %c0_i32_0 = arith.constant 0 : i32
    return %c0_i32, %arg1 : i32, i32
  }
  func.func @transform_3(%arg0: i32, %arg1: i32, %arg2: i32) -> (i32, i32) {
    %c0_i32 = arith.constant 0 : i32
    return %arg0, %arg1 : i32, i32
  }
  func.func @transform_4(%arg0: i32, %arg1: i32, %arg2: i32) -> (i32, i32) {
    %c0_i32 = arith.constant 0 : i32
    return %arg0, %arg1 : i32, i32
  }
}

module attributes {stable_mosaic.version = 11 : i64} {
  func.func @_fused_mm_kernel(%arg0: i32, %arg1: i32, %arg2: i32, %arg3: memref<16x128xbf16, #tpu.memory_space<vmem>>, %arg4: memref<128x256xbf16, #tpu.memory_space<vmem>>, %arg5: memref<1x256xf32, #tpu.memory_space<vmem>>, %arg6: memref<16x256xbf16, #tpu.memory_space<vmem>>, %arg7: memref<16x256xbf16, #tpu.memory_space<vmem>>, %arg8: memref<16x256xf32, #tpu.memory_space<vmem>>) attributes {dimension_semantics = [#tpu.dimension_semantics<parallel>, #tpu.dimension_semantics<parallel>, #tpu.dimension_semantics<arbitrary>], iteration_bounds = array<i64: 2, 1, 1>, scalar_prefetch = 0 : i64, scratch_operands = 1 : i64, tpu.core_type = #tpu.core_type<tc>, window_params = [{transform_indices = @transform_0, window_bounds = array<i64: 16, 128>}, {transform_indices = @transform_1, window_bounds = array<i64: 128, 256>}, {transform_indices = @transform_2, window_bounds = array<i64: 1, 256>}, {transform_indices = @transform_3, window_bounds = array<i64: 16, 256>}, {transform_indices = @transform_4, window_bounds = array<i64: 16, 256>}]} {
    %c0_i32 = arith.constant 0 : i32
    %0 = arith.cmpi eq, %arg2, %c0_i32 : i32
    %1 = arith.extui %0 : i1 to i32
    %c0_i32_0 = arith.constant 0 : i32
    %2 = arith.cmpi ne, %1, %c0_i32_0 : i32
    scf.if %2 {
      %cst_10 = arith.constant 0.000000e+00 : f32
      %12 = vector.broadcast %cst_10 : f32 to vector<16x256xf32>
      %c0_11 = arith.constant 0 : index
      %c0_12 = arith.constant 0 : index
      %13 = vector.load %arg8[%c0_11, %c0_12] : memref<16x256xf32, #tpu.memory_space<vmem>>, vector<16x256xf32>
      tpu.vector_store %arg8[%c0_11, %c0_12], %12 {strides = array<i32>} : memref<16x256xf32, #tpu.memory_space<vmem>>, vector<16x256xf32>,
    } else {
    }
    %c0 = arith.constant 0 : index
    %c0_1 = arith.constant 0 : index
    %3 = vector.load %arg8[%c0, %c0_1] : memref<16x256xf32, #tpu.memory_space<vmem>>, vector<16x256xf32>
    %c0_2 = arith.constant 0 : index
    %c0_3 = arith.constant 0 : index
    %4 = vector.load %arg3[%c0_2, %c0_3] : memref<16x128xbf16, #tpu.memory_space<vmem>>, vector<16x128xbf16>
    %c0_4 = arith.constant 0 : index
    %c0_5 = arith.constant 0 : index
    %5 = vector.load %arg4[%c0_4, %c0_5] : memref<128x256xbf16, #tpu.memory_space<vmem>>, vector<128x256xbf16>
    %cst = arith.constant dense<0.000000e+00> : vector<16x256xf32>
    %6 = tpu.matmul %4, %5, %cst {dimension_numbers = #tpu.dot_dimension_numbers<[1], [0], [0], [1], [0, 0, 1, 1], [], []>} : vector<16x128xbf16>, vector<128x256xbf16>, vector<16x256xf32> -> vector<16x256xf32>
    %7 = arith.addf %3, %6 : vector<16x256xf32>
    %c0_6 = arith.constant 0 : index
    %c0_7 = arith.constant 0 : index
    %8 = vector.load %arg8[%c0_6, %c0_7] : memref<16x256xf32, #tpu.memory_space<vmem>>, vector<16x256xf32>
    tpu.vector_store %arg8[%c0_6, %c0_7], %7 {strides = array<i32>} : memref<16x256xf32, #tpu.memory_space<vmem>>, vector<16x256xf32>,
    %c0_i32_8 = arith.constant 0 : i32
    %9 = arith.cmpi eq, %arg2, %c0_i32_8 : i32
    %10 = arith.extui %9 : i1 to i32
    %c0_i32_9 = arith.constant 0 : i32
    %11 = arith.cmpi ne, %10, %c0_i32_9 : i32
    scf.if %11 {
      %c0_10 = arith.constant 0 : index
      %c0_11 = arith.constant 0 : index
      %12 = vector.load %arg8[%c0_10, %c0_11] : memref<16x256xf32, #tpu.memory_space<vmem>>, vector<16x256xf32>
      %c0_12 = arith.constant 0 : index
      %c0_13 = arith.constant 0 : index
      %13 = vector.load %arg5[%c0_12, %c0_13] : memref<1x256xf32, #tpu.memory_space<vmem>>, vector<1x256xf32>
      %14 = vector.broadcast %13 : vector<1x256xf32> to vector<16x256xf32>
      %15 = arith.addf %12, %14 : vector<16x256xf32>
      %c0_14 = arith.constant 0 : index
      %c0_15 = arith.constant 0 : index
      %16 = vector.load %arg6[%c0_14, %c0_15] : memref<16x256xbf16, #tpu.memory_space<vmem>>, vector<16x256xbf16>
      %17 = arith.extf %16 : vector<16x256xbf16> to vector<16x256xf32>
      %18 = arith.addf %15, %17 : vector<16x256xf32>
      %cst_16 = arith.constant 0.000000e+00 : f32
      %19 = vector.broadcast %cst_16 : f32 to vector<16x256xf32>
      %20 = arith.maximumf %18, %19 : vector<16x256xf32>
      %21 = arith.truncf %20 : vector<16x256xf32> to vector<16x256xbf16>
      %c0_17 = arith.constant 0 : index
      %c0_18 = arith.constant 0 : index
      %22 = vector.load %arg7[%c0_17, %c0_18] : memref<16x256xbf16, #tpu.memory_space<vmem>>, vector<16x256xbf16>
      tpu.vector_store %arg7[%c0_17, %c0_18], %21 {strides = array<i32>} : memref<16x256xbf16, #tpu.memory_space<vmem>>, vector<16x256xbf16>,
    } else {
    }
    return
  }
  func.func @transform_0(%arg0: i32, %arg1: i32, %arg2: i32) -> (i32, i32) {
    %c0_i32 = arith.constant 0 : i32
    return %arg0, %arg2 : i32, i32
  }
  func.func @transform_1(%arg0: i32, %arg1: i32, %arg2: i32) -> (i32, i32) {
    %c0_i32 = arith.constant 0 : i32
    return %arg2, %arg1 : i32, i32
  }
  func.func @transform_2(%arg0: i32, %arg1: i32, %arg2: i32) -> (i32, i32) {
    %c0_i32 = arith.constant 0 : i32
    %c0_i32_0 = arith.constant 0 : i32
    return %c0_i32, %arg1 : i32, i32
  }
  func.func @transform_3(%arg0: i32, %arg1: i32, %arg2: i32) -> (i32, i32) {
    %c0_i32 = arith.constant 0 : i32
    return %arg0, %arg1 : i32, i32
  }
  func.func @transform_4(%arg0: i32, %arg1: i32, %arg2: i32) -> (i32, i32) {
    %c0_i32 = arith.constant 0 : i32
    return %arg0, %arg1 : i32, i32
  }
}

module attributes {stable_mosaic.version = 11 : i64} {
  func.func @_fused_mm_kernel(%arg0: i32, %arg1: i32, %arg2: i32, %arg3: memref<16x384xbf16, #tpu.memory_space<vmem>>, %arg4: memref<384x128xbf16, #tpu.memory_space<vmem>>, %arg5: memref<1x128xf32, #tpu.memory_space<vmem>>, %arg6: memref<16x128xbf16, #tpu.memory_space<vmem>>, %arg7: memref<16x128xf32, #tpu.memory_space<vmem>>) attributes {dimension_semantics = [#tpu.dimension_semantics<parallel>, #tpu.dimension_semantics<parallel>, #tpu.dimension_semantics<arbitrary>], iteration_bounds = array<i64: 2, 1, 3>, scalar_prefetch = 0 : i64, scratch_operands = 1 : i64, tpu.core_type = #tpu.core_type<tc>, window_params = [{transform_indices = @transform_0, window_bounds = array<i64: 16, 384>}, {transform_indices = @transform_1, window_bounds = array<i64: 384, 128>}, {transform_indices = @transform_2, window_bounds = array<i64: 1, 128>}, {transform_indices = @transform_3, window_bounds = array<i64: 16, 128>}]} {
    %c0_i32 = arith.constant 0 : i32
    %0 = arith.cmpi eq, %arg2, %c0_i32 : i32
    %1 = arith.extui %0 : i1 to i32
    %c0_i32_0 = arith.constant 0 : i32
    %2 = arith.cmpi ne, %1, %c0_i32_0 : i32
    scf.if %2 {
      %cst_9 = arith.constant 0.000000e+00 : f32
      %12 = vector.broadcast %cst_9 : f32 to vector<16x128xf32>
      %c0_10 = arith.constant 0 : index
      %c0_11 = arith.constant 0 : index
      %13 = vector.load %arg7[%c0_10, %c0_11] : memref<16x128xf32, #tpu.memory_space<vmem>>, vector<16x128xf32>
      tpu.vector_store %arg7[%c0_10, %c0_11], %12 {strides = array<i32>} : memref<16x128xf32, #tpu.memory_space<vmem>>, vector<16x128xf32>,
    } else {
    }
    %c0 = arith.constant 0 : index
    %c0_1 = arith.constant 0 : index
    %3 = vector.load %arg7[%c0, %c0_1] : memref<16x128xf32, #tpu.memory_space<vmem>>, vector<16x128xf32>
    %c0_2 = arith.constant 0 : index
    %c0_3 = arith.constant 0 : index
    %4 = vector.load %arg3[%c0_2, %c0_3] : memref<16x384xbf16, #tpu.memory_space<vmem>>, vector<16x384xbf16>
    %c0_4 = arith.constant 0 : index
    %c0_5 = arith.constant 0 : index
    %5 = vector.load %arg4[%c0_4, %c0_5] : memref<384x128xbf16, #tpu.memory_space<vmem>>, vector<384x128xbf16>
    %cst = arith.constant dense<0.000000e+00> : vector<16x128xf32>
    %6 = tpu.matmul %4, %5, %cst {dimension_numbers = #tpu.dot_dimension_numbers<[1], [0], [0], [1], [0, 0, 1, 1], [], []>} : vector<16x384xbf16>, vector<384x128xbf16>, vector<16x128xf32> -> vector<16x128xf32>
    %7 = arith.addf %3, %6 : vector<16x128xf32>
    %c0_6 = arith.constant 0 : index
    %c0_7 = arith.constant 0 : index
    %8 = vector.load %arg7[%c0_6, %c0_7] : memref<16x128xf32, #tpu.memory_space<vmem>>, vector<16x128xf32>
    tpu.vector_store %arg7[%c0_6, %c0_7], %7 {strides = array<i32>} : memref<16x128xf32, #tpu.memory_space<vmem>>, vector<16x128xf32>,
    %c2_i32 = arith.constant 2 : i32
    %9 = arith.cmpi eq, %arg2, %c2_i32 : i32
    %10 = arith.extui %9 : i1 to i32
    %c0_i32_8 = arith.constant 0 : i32
    %11 = arith.cmpi ne, %10, %c0_i32_8 : i32
    scf.if %11 {
      %c0_9 = arith.constant 0 : index
      %c0_10 = arith.constant 0 : index
      %12 = vector.load %arg7[%c0_9, %c0_10] : memref<16x128xf32, #tpu.memory_space<vmem>>, vector<16x128xf32>
      %c0_11 = arith.constant 0 : index
      %c0_12 = arith.constant 0 : index
      %13 = vector.load %arg5[%c0_11, %c0_12] : memref<1x128xf32, #tpu.memory_space<vmem>>, vector<1x128xf32>
      %14 = vector.broadcast %13 : vector<1x128xf32> to vector<16x128xf32>
      %15 = arith.addf %12, %14 : vector<16x128xf32>
      %cst_13 = arith.constant 0.000000e+00 : f32
      %16 = vector.broadcast %cst_13 : f32 to vector<16x128xf32>
      %17 = arith.maximumf %15, %16 : vector<16x128xf32>
      %18 = arith.truncf %17 : vector<16x128xf32> to vector<16x128xbf16>
      %c0_14 = arith.constant 0 : index
      %c0_15 = arith.constant 0 : index
      %19 = vector.load %arg6[%c0_14, %c0_15] : memref<16x128xbf16, #tpu.memory_space<vmem>>, vector<16x128xbf16>
      tpu.vector_store %arg6[%c0_14, %c0_15], %18 {strides = array<i32>} : memref<16x128xbf16, #tpu.memory_space<vmem>>, vector<16x128xbf16>,
    } else {
    }
    return
  }
  func.func @transform_0(%arg0: i32, %arg1: i32, %arg2: i32) -> (i32, i32) {
    %c0_i32 = arith.constant 0 : i32
    return %arg0, %arg2 : i32, i32
  }
  func.func @transform_1(%arg0: i32, %arg1: i32, %arg2: i32) -> (i32, i32) {
    %c0_i32 = arith.constant 0 : i32
    return %arg2, %arg1 : i32, i32
  }
  func.func @transform_2(%arg0: i32, %arg1: i32, %arg2: i32) -> (i32, i32) {
    %c0_i32 = arith.constant 0 : i32
    %c0_i32_0 = arith.constant 0 : i32
    return %c0_i32, %arg1 : i32, i32
  }
  func.func @transform_3(%arg0: i32, %arg1: i32, %arg2: i32) -> (i32, i32) {
    %c0_i32 = arith.constant 0 : i32
    return %arg0, %arg1 : i32, i32
  }
}

module attributes {stable_mosaic.version = 11 : i64} {
  func.func @_fused_mm_kernel(%arg0: i32, %arg1: i32, %arg2: i32, %arg3: memref<16x256xbf16, #tpu.memory_space<vmem>>, %arg4: memref<256x128xbf16, #tpu.memory_space<vmem>>, %arg5: memref<1x128xf32, #tpu.memory_space<vmem>>, %arg6: memref<16x128xbf16, #tpu.memory_space<vmem>>, %arg7: memref<16x128xf32, #tpu.memory_space<vmem>>) attributes {dimension_semantics = [#tpu.dimension_semantics<parallel>, #tpu.dimension_semantics<parallel>, #tpu.dimension_semantics<arbitrary>], iteration_bounds = array<i64: 2, 1, 1>, scalar_prefetch = 0 : i64, scratch_operands = 1 : i64, tpu.core_type = #tpu.core_type<tc>, window_params = [{transform_indices = @transform_0, window_bounds = array<i64: 16, 256>}, {transform_indices = @transform_1, window_bounds = array<i64: 256, 128>}, {transform_indices = @transform_2, window_bounds = array<i64: 1, 128>}, {transform_indices = @transform_3, window_bounds = array<i64: 16, 128>}]} {
    %c0_i32 = arith.constant 0 : i32
    %0 = arith.cmpi eq, %arg2, %c0_i32 : i32
    %1 = arith.extui %0 : i1 to i32
    %c0_i32_0 = arith.constant 0 : i32
    %2 = arith.cmpi ne, %1, %c0_i32_0 : i32
    scf.if %2 {
      %cst_10 = arith.constant 0.000000e+00 : f32
      %12 = vector.broadcast %cst_10 : f32 to vector<16x128xf32>
      %c0_11 = arith.constant 0 : index
      %c0_12 = arith.constant 0 : index
      %13 = vector.load %arg7[%c0_11, %c0_12] : memref<16x128xf32, #tpu.memory_space<vmem>>, vector<16x128xf32>
      tpu.vector_store %arg7[%c0_11, %c0_12], %12 {strides = array<i32>} : memref<16x128xf32, #tpu.memory_space<vmem>>, vector<16x128xf32>,
    } else {
    }
    %c0 = arith.constant 0 : index
    %c0_1 = arith.constant 0 : index
    %3 = vector.load %arg7[%c0, %c0_1] : memref<16x128xf32, #tpu.memory_space<vmem>>, vector<16x128xf32>
    %c0_2 = arith.constant 0 : index
    %c0_3 = arith.constant 0 : index
    %4 = vector.load %arg3[%c0_2, %c0_3] : memref<16x256xbf16, #tpu.memory_space<vmem>>, vector<16x256xbf16>
    %c0_4 = arith.constant 0 : index
    %c0_5 = arith.constant 0 : index
    %5 = vector.load %arg4[%c0_4, %c0_5] : memref<256x128xbf16, #tpu.memory_space<vmem>>, vector<256x128xbf16>
    %cst = arith.constant dense<0.000000e+00> : vector<16x128xf32>
    %6 = tpu.matmul %4, %5, %cst {dimension_numbers = #tpu.dot_dimension_numbers<[1], [0], [0], [1], [0, 0, 1, 1], [], []>} : vector<16x256xbf16>, vector<256x128xbf16>, vector<16x128xf32> -> vector<16x128xf32>
    %7 = arith.addf %3, %6 : vector<16x128xf32>
    %c0_6 = arith.constant 0 : index
    %c0_7 = arith.constant 0 : index
    %8 = vector.load %arg7[%c0_6, %c0_7] : memref<16x128xf32, #tpu.memory_space<vmem>>, vector<16x128xf32>
    tpu.vector_store %arg7[%c0_6, %c0_7], %7 {strides = array<i32>} : memref<16x128xf32, #tpu.memory_space<vmem>>, vector<16x128xf32>,
    %c0_i32_8 = arith.constant 0 : i32
    %9 = arith.cmpi eq, %arg2, %c0_i32_8 : i32
    %10 = arith.extui %9 : i1 to i32
    %c0_i32_9 = arith.constant 0 : i32
    %11 = arith.cmpi ne, %10, %c0_i32_9 : i32
    scf.if %11 {
      %c0_10 = arith.constant 0 : index
      %c0_11 = arith.constant 0 : index
      %12 = vector.load %arg7[%c0_10, %c0_11] : memref<16x128xf32, #tpu.memory_space<vmem>>, vector<16x128xf32>
      %c0_12 = arith.constant 0 : index
      %c0_13 = arith.constant 0 : index
      %13 = vector.load %arg5[%c0_12, %c0_13] : memref<1x128xf32, #tpu.memory_space<vmem>>, vector<1x128xf32>
      %14 = vector.broadcast %13 : vector<1x128xf32> to vector<16x128xf32>
      %15 = arith.addf %12, %14 : vector<16x128xf32>
      %cst_14 = arith.constant 0.000000e+00 : f32
      %16 = vector.broadcast %cst_14 : f32 to vector<16x128xf32>
      %17 = arith.maximumf %15, %16 : vector<16x128xf32>
      %18 = arith.truncf %17 : vector<16x128xf32> to vector<16x128xbf16>
      %c0_15 = arith.constant 0 : index
      %c0_16 = arith.constant 0 : index
      %19 = vector.load %arg6[%c0_15, %c0_16] : memref<16x128xbf16, #tpu.memory_space<vmem>>, vector<16x128xbf16>
      tpu.vector_store %arg6[%c0_15, %c0_16], %18 {strides = array<i32>} : memref<16x128xbf16, #tpu.memory_space<vmem>>, vector<16x128xbf16>,
    } else {
    }
    return
  }
  func.func @transform_0(%arg0: i32, %arg1: i32, %arg2: i32) -> (i32, i32) {
    %c0_i32 = arith.constant 0 : i32
    return %arg0, %arg2 : i32, i32
  }
  func.func @transform_1(%arg0: i32, %arg1: i32, %arg2: i32) -> (i32, i32) {
    %c0_i32 = arith.constant 0 : i32
    return %arg2, %arg1 : i32, i32
  }
  func.func @transform_2(%arg0: i32, %arg1: i32, %arg2: i32) -> (i32, i32) {
    %c0_i32 = arith.constant 0 : i32
    %c0_i32_0 = arith.constant 0 : i32
    return %c0_i32, %arg1 : i32, i32
  }
  func.func @transform_3(%arg0: i32, %arg1: i32, %arg2: i32) -> (i32, i32) {
    %c0_i32 = arith.constant 0 : i32
    return %arg0, %arg1 : i32, i32
  }
}

module attributes {stable_mosaic.version = 11 : i64} {
  func.func @_fused_mm_kernel(%arg0: i32, %arg1: i32, %arg2: i32, %arg3: memref<16x256xbf16, #tpu.memory_space<vmem>>, %arg4: memref<256x128xbf16, #tpu.memory_space<vmem>>, %arg5: memref<1x128xf32, #tpu.memory_space<vmem>>, %arg6: memref<16x128xbf16, #tpu.memory_space<vmem>>, %arg7: memref<16x128xf32, #tpu.memory_space<vmem>>) attributes {dimension_semantics = [#tpu.dimension_semantics<parallel>, #tpu.dimension_semantics<parallel>, #tpu.dimension_semantics<arbitrary>], iteration_bounds = array<i64: 2, 1, 1>, scalar_prefetch = 0 : i64, scratch_operands = 1 : i64, tpu.core_type = #tpu.core_type<tc>, window_params = [{transform_indices = @transform_0, window_bounds = array<i64: 16, 256>}, {transform_indices = @transform_1, window_bounds = array<i64: 256, 128>}, {transform_indices = @transform_2, window_bounds = array<i64: 1, 128>}, {transform_indices = @transform_3, window_bounds = array<i64: 16, 128>}]} {
    %c0_i32 = arith.constant 0 : i32
    %0 = arith.cmpi eq, %arg2, %c0_i32 : i32
    %1 = arith.extui %0 : i1 to i32
    %c0_i32_0 = arith.constant 0 : i32
    %2 = arith.cmpi ne, %1, %c0_i32_0 : i32
    scf.if %2 {
      %cst_10 = arith.constant 0.000000e+00 : f32
      %12 = vector.broadcast %cst_10 : f32 to vector<16x128xf32>
      %c0_11 = arith.constant 0 : index
      %c0_12 = arith.constant 0 : index
      %13 = vector.load %arg7[%c0_11, %c0_12] : memref<16x128xf32, #tpu.memory_space<vmem>>, vector<16x128xf32>
      tpu.vector_store %arg7[%c0_11, %c0_12], %12 {strides = array<i32>} : memref<16x128xf32, #tpu.memory_space<vmem>>, vector<16x128xf32>,
    } else {
    }
    %c0 = arith.constant 0 : index
    %c0_1 = arith.constant 0 : index
    %3 = vector.load %arg7[%c0, %c0_1] : memref<16x128xf32, #tpu.memory_space<vmem>>, vector<16x128xf32>
    %c0_2 = arith.constant 0 : index
    %c0_3 = arith.constant 0 : index
    %4 = vector.load %arg3[%c0_2, %c0_3] : memref<16x256xbf16, #tpu.memory_space<vmem>>, vector<16x256xbf16>
    %c0_4 = arith.constant 0 : index
    %c0_5 = arith.constant 0 : index
    %5 = vector.load %arg4[%c0_4, %c0_5] : memref<256x128xbf16, #tpu.memory_space<vmem>>, vector<256x128xbf16>
    %cst = arith.constant dense<0.000000e+00> : vector<16x128xf32>
    %6 = tpu.matmul %4, %5, %cst {dimension_numbers = #tpu.dot_dimension_numbers<[1], [0], [0], [1], [0, 0, 1, 1], [], []>} : vector<16x256xbf16>, vector<256x128xbf16>, vector<16x128xf32> -> vector<16x128xf32>
    %7 = arith.addf %3, %6 : vector<16x128xf32>
    %c0_6 = arith.constant 0 : index
    %c0_7 = arith.constant 0 : index
    %8 = vector.load %arg7[%c0_6, %c0_7] : memref<16x128xf32, #tpu.memory_space<vmem>>, vector<16x128xf32>
    tpu.vector_store %arg7[%c0_6, %c0_7], %7 {strides = array<i32>} : memref<16x128xf32, #tpu.memory_space<vmem>>, vector<16x128xf32>,
    %c0_i32_8 = arith.constant 0 : i32
    %9 = arith.cmpi eq, %arg2, %c0_i32_8 : i32
    %10 = arith.extui %9 : i1 to i32
    %c0_i32_9 = arith.constant 0 : i32
    %11 = arith.cmpi ne, %10, %c0_i32_9 : i32
    scf.if %11 {
      %c0_10 = arith.constant 0 : index
      %c0_11 = arith.constant 0 : index
      %12 = vector.load %arg7[%c0_10, %c0_11] : memref<16x128xf32, #tpu.memory_space<vmem>>, vector<16x128xf32>
      %c0_12 = arith.constant 0 : index
      %c0_13 = arith.constant 0 : index
      %13 = vector.load %arg5[%c0_12, %c0_13] : memref<1x128xf32, #tpu.memory_space<vmem>>, vector<1x128xf32>
      %14 = vector.broadcast %13 : vector<1x128xf32> to vector<16x128xf32>
      %15 = arith.addf %12, %14 : vector<16x128xf32>
      %cst_14 = arith.constant 0.000000e+00 : f32
      %16 = vector.broadcast %cst_14 : f32 to vector<16x128xf32>
      %17 = arith.maximumf %15, %16 : vector<16x128xf32>
      %18 = arith.truncf %17 : vector<16x128xf32> to vector<16x128xbf16>
      %c0_15 = arith.constant 0 : index
      %c0_16 = arith.constant 0 : index
      %19 = vector.load %arg6[%c0_15, %c0_16] : memref<16x128xbf16, #tpu.memory_space<vmem>>, vector<16x128xbf16>
      tpu.vector_store %arg6[%c0_15, %c0_16], %18 {strides = array<i32>} : memref<16x128xbf16, #tpu.memory_space<vmem>>, vector<16x128xbf16>,
    } else {
    }
    return
  }
  func.func @transform_0(%arg0: i32, %arg1: i32, %arg2: i32) -> (i32, i32) {
    %c0_i32 = arith.constant 0 : i32
    return %arg0, %arg2 : i32, i32
  }
  func.func @transform_1(%arg0: i32, %arg1: i32, %arg2: i32) -> (i32, i32) {
    %c0_i32 = arith.constant 0 : i32
    return %arg2, %arg1 : i32, i32
  }
  func.func @transform_2(%arg0: i32, %arg1: i32, %arg2: i32) -> (i32, i32) {
    %c0_i32 = arith.constant 0 : i32
    %c0_i32_0 = arith.constant 0 : i32
    return %c0_i32, %arg1 : i32, i32
  }
  func.func @transform_3(%arg0: i32, %arg1: i32, %arg2: i32) -> (i32, i32) {
    %c0_i32 = arith.constant 0 : i32
    return %arg0, %arg1 : i32, i32
  }
}

module attributes {stable_mosaic.version = 11 : i64} {
  func.func @_fused_mm_kernel(%arg0: i32, %arg1: i32, %arg2: i32, %arg3: memref<8x256xbf16, #tpu.memory_space<vmem>>, %arg4: memref<256x256xbf16, #tpu.memory_space<vmem>>, %arg5: memref<1x256xf32, #tpu.memory_space<vmem>>, %arg6: memref<8x256xbf16, #tpu.memory_space<vmem>>, %arg7: memref<8x256xf32, #tpu.memory_space<vmem>>) attributes {dimension_semantics = [#tpu.dimension_semantics<parallel>, #tpu.dimension_semantics<parallel>, #tpu.dimension_semantics<arbitrary>], iteration_bounds = array<i64: 1, 2, 1>, scalar_prefetch = 0 : i64, scratch_operands = 1 : i64, tpu.core_type = #tpu.core_type<tc>, window_params = [{transform_indices = @transform_0, window_bounds = array<i64: 8, 256>}, {transform_indices = @transform_1, window_bounds = array<i64: 256, 256>}, {transform_indices = @transform_2, window_bounds = array<i64: 1, 256>}, {transform_indices = @transform_3, window_bounds = array<i64: 8, 256>}]} {
    %c0_i32 = arith.constant 0 : i32
    %0 = arith.cmpi eq, %arg2, %c0_i32 : i32
    %1 = arith.extui %0 : i1 to i32
    %c0_i32_0 = arith.constant 0 : i32
    %2 = arith.cmpi ne, %1, %c0_i32_0 : i32
    scf.if %2 {
      %cst_10 = arith.constant 0.000000e+00 : f32
      %12 = vector.broadcast %cst_10 : f32 to vector<8x256xf32>
      %c0_11 = arith.constant 0 : index
      %c0_12 = arith.constant 0 : index
      %13 = vector.load %arg7[%c0_11, %c0_12] : memref<8x256xf32, #tpu.memory_space<vmem>>, vector<8x256xf32>
      tpu.vector_store %arg7[%c0_11, %c0_12], %12 {strides = array<i32>} : memref<8x256xf32, #tpu.memory_space<vmem>>, vector<8x256xf32>,
    } else {
    }
    %c0 = arith.constant 0 : index
    %c0_1 = arith.constant 0 : index
    %3 = vector.load %arg7[%c0, %c0_1] : memref<8x256xf32, #tpu.memory_space<vmem>>, vector<8x256xf32>
    %c0_2 = arith.constant 0 : index
    %c0_3 = arith.constant 0 : index
    %4 = vector.load %arg3[%c0_2, %c0_3] : memref<8x256xbf16, #tpu.memory_space<vmem>>, vector<8x256xbf16>
    %c0_4 = arith.constant 0 : index
    %c0_5 = arith.constant 0 : index
    %5 = vector.load %arg4[%c0_4, %c0_5] : memref<256x256xbf16, #tpu.memory_space<vmem>>, vector<256x256xbf16>
    %cst = arith.constant dense<0.000000e+00> : vector<8x256xf32>
    %6 = tpu.matmul %4, %5, %cst {dimension_numbers = #tpu.dot_dimension_numbers<[1], [0], [0], [1], [0, 0, 1, 1], [], []>} : vector<8x256xbf16>, vector<256x256xbf16>, vector<8x256xf32> -> vector<8x256xf32>
    %7 = arith.addf %3, %6 : vector<8x256xf32>
    %c0_6 = arith.constant 0 : index
    %c0_7 = arith.constant 0 : index
    %8 = vector.load %arg7[%c0_6, %c0_7] : memref<8x256xf32, #tpu.memory_space<vmem>>, vector<8x256xf32>
    tpu.vector_store %arg7[%c0_6, %c0_7], %7 {strides = array<i32>} : memref<8x256xf32, #tpu.memory_space<vmem>>, vector<8x256xf32>,
    %c0_i32_8 = arith.constant 0 : i32
    %9 = arith.cmpi eq, %arg2, %c0_i32_8 : i32
    %10 = arith.extui %9 : i1 to i32
    %c0_i32_9 = arith.constant 0 : i32
    %11 = arith.cmpi ne, %10, %c0_i32_9 : i32
    scf.if %11 {
      %c0_10 = arith.constant 0 : index
      %c0_11 = arith.constant 0 : index
      %12 = vector.load %arg7[%c0_10, %c0_11] : memref<8x256xf32, #tpu.memory_space<vmem>>, vector<8x256xf32>
      %c0_12 = arith.constant 0 : index
      %c0_13 = arith.constant 0 : index
      %13 = vector.load %arg5[%c0_12, %c0_13] : memref<1x256xf32, #tpu.memory_space<vmem>>, vector<1x256xf32>
      %14 = vector.broadcast %13 : vector<1x256xf32> to vector<8x256xf32>
      %15 = arith.addf %12, %14 : vector<8x256xf32>
      %16 = arith.truncf %15 : vector<8x256xf32> to vector<8x256xbf16>
      %c0_14 = arith.constant 0 : index
      %c0_15 = arith.constant 0 : index
      %17 = vector.load %arg6[%c0_14, %c0_15] : memref<8x256xbf16, #tpu.memory_space<vmem>>, vector<8x256xbf16>
      tpu.vector_store %arg6[%c0_14, %c0_15], %16 {strides = array<i32>} : memref<8x256xbf16, #tpu.memory_space<vmem>>, vector<8x256xbf16>,
    } else {
    }
    return
  }
  func.func @transform_0(%arg0: i32, %arg1: i32, %arg2: i32) -> (i32, i32) {
    %c0_i32 = arith.constant 0 : i32
    return %arg0, %arg2 : i32, i32
  }
  func.func @transform_1(%arg0: i32, %arg1: i32, %arg2: i32) -> (i32, i32) {
    %c0_i32 = arith.constant 0 : i32
    return %arg2, %arg1 : i32, i32
  }
  func.func @transform_2(%arg0: i32, %arg1: i32, %arg2: i32) -> (i32, i32) {
    %c0_i32 = arith.constant 0 : i32
    %c0_i32_0 = arith.constant 0 : i32
    return %c0_i32, %arg1 : i32, i32
  }
  func.func @transform_3(%arg0: i32, %arg1: i32, %arg2: i32) -> (i32, i32) {
    %c0_i32 = arith.constant 0 : i32
    return %arg0, %arg1 : i32, i32
  }
}

module attributes {stable_mosaic.version = 11 : i64} {
  func.func @_fused_mm_kernel(%arg0: i32, %arg1: i32, %arg2: i32, %arg3: memref<8x512xbf16, #tpu.memory_space<vmem>>, %arg4: memref<512x128xbf16, #tpu.memory_space<vmem>>, %arg5: memref<1x128xf32, #tpu.memory_space<vmem>>, %arg6: memref<8x128xbf16, #tpu.memory_space<vmem>>, %arg7: memref<8x128xf32, #tpu.memory_space<vmem>>) attributes {dimension_semantics = [#tpu.dimension_semantics<parallel>, #tpu.dimension_semantics<parallel>, #tpu.dimension_semantics<arbitrary>], iteration_bounds = array<i64: 1, 1, 1>, scalar_prefetch = 0 : i64, scratch_operands = 1 : i64, tpu.core_type = #tpu.core_type<tc>, window_params = [{transform_indices = @transform_0, window_bounds = array<i64: 8, 512>}, {transform_indices = @transform_1, window_bounds = array<i64: 512, 128>}, {transform_indices = @transform_2, window_bounds = array<i64: 1, 128>}, {transform_indices = @transform_3, window_bounds = array<i64: 8, 128>}]} {
    %c0_i32 = arith.constant 0 : i32
    %0 = arith.cmpi eq, %arg2, %c0_i32 : i32
    %1 = arith.extui %0 : i1 to i32
    %c0_i32_0 = arith.constant 0 : i32
    %2 = arith.cmpi ne, %1, %c0_i32_0 : i32
    scf.if %2 {
      %cst_10 = arith.constant 0.000000e+00 : f32
      %12 = vector.broadcast %cst_10 : f32 to vector<8x128xf32>
      %c0_11 = arith.constant 0 : index
      %c0_12 = arith.constant 0 : index
      %13 = vector.load %arg7[%c0_11, %c0_12] : memref<8x128xf32, #tpu.memory_space<vmem>>, vector<8x128xf32>
      tpu.vector_store %arg7[%c0_11, %c0_12], %12 {strides = array<i32>} : memref<8x128xf32, #tpu.memory_space<vmem>>, vector<8x128xf32>,
    } else {
    }
    %c0 = arith.constant 0 : index
    %c0_1 = arith.constant 0 : index
    %3 = vector.load %arg7[%c0, %c0_1] : memref<8x128xf32, #tpu.memory_space<vmem>>, vector<8x128xf32>
    %c0_2 = arith.constant 0 : index
    %c0_3 = arith.constant 0 : index
    %4 = vector.load %arg3[%c0_2, %c0_3] : memref<8x512xbf16, #tpu.memory_space<vmem>>, vector<8x512xbf16>
    %c0_4 = arith.constant 0 : index
    %c0_5 = arith.constant 0 : index
    %5 = vector.load %arg4[%c0_4, %c0_5] : memref<512x128xbf16, #tpu.memory_space<vmem>>, vector<512x128xbf16>
    %cst = arith.constant dense<0.000000e+00> : vector<8x128xf32>
    %6 = tpu.matmul %4, %5, %cst {dimension_numbers = #tpu.dot_dimension_numbers<[1], [0], [0], [1], [0, 0, 1, 1], [], []>} : vector<8x512xbf16>, vector<512x128xbf16>, vector<8x128xf32> -> vector<8x128xf32>
    %7 = arith.addf %3, %6 : vector<8x128xf32>
    %c0_6 = arith.constant 0 : index
    %c0_7 = arith.constant 0 : index
    %8 = vector.load %arg7[%c0_6, %c0_7] : memref<8x128xf32, #tpu.memory_space<vmem>>, vector<8x128xf32>
    tpu.vector_store %arg7[%c0_6, %c0_7], %7 {strides = array<i32>} : memref<8x128xf32, #tpu.memory_space<vmem>>, vector<8x128xf32>,
    %c0_i32_8 = arith.constant 0 : i32
    %9 = arith.cmpi eq, %arg2, %c0_i32_8 : i32
    %10 = arith.extui %9 : i1 to i32
    %c0_i32_9 = arith.constant 0 : i32
    %11 = arith.cmpi ne, %10, %c0_i32_9 : i32
    scf.if %11 {
      %c0_10 = arith.constant 0 : index
      %c0_11 = arith.constant 0 : index
      %12 = vector.load %arg7[%c0_10, %c0_11] : memref<8x128xf32, #tpu.memory_space<vmem>>, vector<8x128xf32>
      %c0_12 = arith.constant 0 : index
      %c0_13 = arith.constant 0 : index
      %13 = vector.load %arg5[%c0_12, %c0_13] : memref<1x128xf32, #tpu.memory_space<vmem>>, vector<1x128xf32>
      %14 = vector.broadcast %13 : vector<1x128xf32> to vector<8x128xf32>
      %15 = arith.addf %12, %14 : vector<8x128xf32>
      %cst_14 = arith.constant 0.000000e+00 : f32
      %16 = vector.broadcast %cst_14 : f32 to vector<8x128xf32>
      %17 = arith.maximumf %15, %16 : vector<8x128xf32>
      %18 = arith.truncf %17 : vector<8x128xf32> to vector<8x128xbf16>
      %c0_15 = arith.constant 0 : index
      %c0_16 = arith.constant 0 : index
      %19 = vector.load %arg6[%c0_15, %c0_16] : memref<8x128xbf16, #tpu.memory_space<vmem>>, vector<8x128xbf16>
      tpu.vector_store %arg6[%c0_15, %c0_16], %18 {strides = array<i32>} : memref<8x128xbf16, #tpu.memory_space<vmem>>, vector<8x128xbf16>,
    } else {
    }
    return
  }
  func.func @transform_0(%arg0: i32, %arg1: i32, %arg2: i32) -> (i32, i32) {
    %c0_i32 = arith.constant 0 : i32
    return %arg0, %arg2 : i32, i32
  }
  func.func @transform_1(%arg0: i32, %arg1: i32, %arg2: i32) -> (i32, i32) {
    %c0_i32 = arith.constant 0 : i32
    return %arg2, %arg1 : i32, i32
  }
  func.func @transform_2(%arg0: i32, %arg1: i32, %arg2: i32) -> (i32, i32) {
    %c0_i32 = arith.constant 0 : i32
    %c0_i32_0 = arith.constant 0 : i32
    return %c0_i32, %arg1 : i32, i32
  }
  func.func @transform_3(%arg0: i32, %arg1: i32, %arg2: i32) -> (i32, i32) {
    %c0_i32 = arith.constant 0 : i32
    return %arg0, %arg1 : i32, i32
  }
}

module attributes {stable_mosaic.version = 11 : i64} {
  func.func @_fused_mm_kernel(%arg0: i32, %arg1: i32, %arg2: i32, %arg3: memref<8x384xbf16, #tpu.memory_space<vmem>>, %arg4: memref<384x128xbf16, #tpu.memory_space<vmem>>, %arg5: memref<1x128xf32, #tpu.memory_space<vmem>>, %arg6: memref<8x128xbf16, #tpu.memory_space<vmem>>, %arg7: memref<8x128xf32, #tpu.memory_space<vmem>>) attributes {dimension_semantics = [#tpu.dimension_semantics<parallel>, #tpu.dimension_semantics<parallel>, #tpu.dimension_semantics<arbitrary>], iteration_bounds = array<i64: 1, 1, 3>, scalar_prefetch = 0 : i64, scratch_operands = 1 : i64, tpu.core_type = #tpu.core_type<tc>, window_params = [{transform_indices = @transform_0, window_bounds = array<i64: 8, 384>}, {transform_indices = @transform_1, window_bounds = array<i64: 384, 128>}, {transform_indices = @transform_2, window_bounds = array<i64: 1, 128>}, {transform_indices = @transform_3, window_bounds = array<i64: 8, 128>}]} {
    %c0_i32 = arith.constant 0 : i32
    %0 = arith.cmpi eq, %arg2, %c0_i32 : i32
    %1 = arith.extui %0 : i1 to i32
    %c0_i32_0 = arith.constant 0 : i32
    %2 = arith.cmpi ne, %1, %c0_i32_0 : i32
    scf.if %2 {
      %cst_9 = arith.constant 0.000000e+00 : f32
      %12 = vector.broadcast %cst_9 : f32 to vector<8x128xf32>
      %c0_10 = arith.constant 0 : index
      %c0_11 = arith.constant 0 : index
      %13 = vector.load %arg7[%c0_10, %c0_11] : memref<8x128xf32, #tpu.memory_space<vmem>>, vector<8x128xf32>
      tpu.vector_store %arg7[%c0_10, %c0_11], %12 {strides = array<i32>} : memref<8x128xf32, #tpu.memory_space<vmem>>, vector<8x128xf32>,
    } else {
    }
    %c0 = arith.constant 0 : index
    %c0_1 = arith.constant 0 : index
    %3 = vector.load %arg7[%c0, %c0_1] : memref<8x128xf32, #tpu.memory_space<vmem>>, vector<8x128xf32>
    %c0_2 = arith.constant 0 : index
    %c0_3 = arith.constant 0 : index
    %4 = vector.load %arg3[%c0_2, %c0_3] : memref<8x384xbf16, #tpu.memory_space<vmem>>, vector<8x384xbf16>
    %c0_4 = arith.constant 0 : index
    %c0_5 = arith.constant 0 : index
    %5 = vector.load %arg4[%c0_4, %c0_5] : memref<384x128xbf16, #tpu.memory_space<vmem>>, vector<384x128xbf16>
    %cst = arith.constant dense<0.000000e+00> : vector<8x128xf32>
    %6 = tpu.matmul %4, %5, %cst {dimension_numbers = #tpu.dot_dimension_numbers<[1], [0], [0], [1], [0, 0, 1, 1], [], []>} : vector<8x384xbf16>, vector<384x128xbf16>, vector<8x128xf32> -> vector<8x128xf32>
    %7 = arith.addf %3, %6 : vector<8x128xf32>
    %c0_6 = arith.constant 0 : index
    %c0_7 = arith.constant 0 : index
    %8 = vector.load %arg7[%c0_6, %c0_7] : memref<8x128xf32, #tpu.memory_space<vmem>>, vector<8x128xf32>
    tpu.vector_store %arg7[%c0_6, %c0_7], %7 {strides = array<i32>} : memref<8x128xf32, #tpu.memory_space<vmem>>, vector<8x128xf32>,
    %c2_i32 = arith.constant 2 : i32
    %9 = arith.cmpi eq, %arg2, %c2_i32 : i32
    %10 = arith.extui %9 : i1 to i32
    %c0_i32_8 = arith.constant 0 : i32
    %11 = arith.cmpi ne, %10, %c0_i32_8 : i32
    scf.if %11 {
      %c0_9 = arith.constant 0 : index
      %c0_10 = arith.constant 0 : index
      %12 = vector.load %arg7[%c0_9, %c0_10] : memref<8x128xf32, #tpu.memory_space<vmem>>, vector<8x128xf32>
      %c0_11 = arith.constant 0 : index
      %c0_12 = arith.constant 0 : index
      %13 = vector.load %arg5[%c0_11, %c0_12] : memref<1x128xf32, #tpu.memory_space<vmem>>, vector<1x128xf32>
      %14 = vector.broadcast %13 : vector<1x128xf32> to vector<8x128xf32>
      %15 = arith.addf %12, %14 : vector<8x128xf32>
      %cst_13 = arith.constant 0.000000e+00 : f32
      %16 = vector.broadcast %cst_13 : f32 to vector<8x128xf32>
      %17 = arith.maximumf %15, %16 : vector<8x128xf32>
      %18 = arith.truncf %17 : vector<8x128xf32> to vector<8x128xbf16>
      %c0_14 = arith.constant 0 : index
      %c0_15 = arith.constant 0 : index
      %19 = vector.load %arg6[%c0_14, %c0_15] : memref<8x128xbf16, #tpu.memory_space<vmem>>, vector<8x128xbf16>
      tpu.vector_store %arg6[%c0_14, %c0_15], %18 {strides = array<i32>} : memref<8x128xbf16, #tpu.memory_space<vmem>>, vector<8x128xbf16>,
    } else {
    }
    return
  }
  func.func @transform_0(%arg0: i32, %arg1: i32, %arg2: i32) -> (i32, i32) {
    %c0_i32 = arith.constant 0 : i32
    return %arg0, %arg2 : i32, i32
  }
  func.func @transform_1(%arg0: i32, %arg1: i32, %arg2: i32) -> (i32, i32) {
    %c0_i32 = arith.constant 0 : i32
    return %arg2, %arg1 : i32, i32
  }
  func.func @transform_2(%arg0: i32, %arg1: i32, %arg2: i32) -> (i32, i32) {
    %c0_i32 = arith.constant 0 : i32
    %c0_i32_0 = arith.constant 0 : i32
    return %c0_i32, %arg1 : i32, i32
  }
  func.func @transform_3(%arg0: i32, %arg1: i32, %arg2: i32) -> (i32, i32) {
    %c0_i32 = arith.constant 0 : i32
    return %arg0, %arg1 : i32, i32
  }
}

module attributes {stable_mosaic.version = 11 : i64} {
  func.func @_fused_mm_kernel(%arg0: i32, %arg1: i32, %arg2: i32, %arg3: memref<8x128xbf16, #tpu.memory_space<vmem>>, %arg4: memref<128x256xbf16, #tpu.memory_space<vmem>>, %arg5: memref<1x256xf32, #tpu.memory_space<vmem>>, %arg6: memref<8x256xbf16, #tpu.memory_space<vmem>>, %arg7: memref<8x256xbf16, #tpu.memory_space<vmem>>, %arg8: memref<8x256xf32, #tpu.memory_space<vmem>>) attributes {dimension_semantics = [#tpu.dimension_semantics<parallel>, #tpu.dimension_semantics<parallel>, #tpu.dimension_semantics<arbitrary>], iteration_bounds = array<i64: 1, 2, 1>, scalar_prefetch = 0 : i64, scratch_operands = 1 : i64, tpu.core_type = #tpu.core_type<tc>, window_params = [{transform_indices = @transform_0, window_bounds = array<i64: 8, 128>}, {transform_indices = @transform_1, window_bounds = array<i64: 128, 256>}, {transform_indices = @transform_2, window_bounds = array<i64: 1, 256>}, {transform_indices = @transform_3, window_bounds = array<i64: 8, 256>}, {transform_indices = @transform_4, window_bounds = array<i64: 8, 256>}]} {
    %c0_i32 = arith.constant 0 : i32
    %0 = arith.cmpi eq, %arg2, %c0_i32 : i32
    %1 = arith.extui %0 : i1 to i32
    %c0_i32_0 = arith.constant 0 : i32
    %2 = arith.cmpi ne, %1, %c0_i32_0 : i32
    scf.if %2 {
      %cst_10 = arith.constant 0.000000e+00 : f32
      %12 = vector.broadcast %cst_10 : f32 to vector<8x256xf32>
      %c0_11 = arith.constant 0 : index
      %c0_12 = arith.constant 0 : index
      %13 = vector.load %arg8[%c0_11, %c0_12] : memref<8x256xf32, #tpu.memory_space<vmem>>, vector<8x256xf32>
      tpu.vector_store %arg8[%c0_11, %c0_12], %12 {strides = array<i32>} : memref<8x256xf32, #tpu.memory_space<vmem>>, vector<8x256xf32>,
    } else {
    }
    %c0 = arith.constant 0 : index
    %c0_1 = arith.constant 0 : index
    %3 = vector.load %arg8[%c0, %c0_1] : memref<8x256xf32, #tpu.memory_space<vmem>>, vector<8x256xf32>
    %c0_2 = arith.constant 0 : index
    %c0_3 = arith.constant 0 : index
    %4 = vector.load %arg3[%c0_2, %c0_3] : memref<8x128xbf16, #tpu.memory_space<vmem>>, vector<8x128xbf16>
    %c0_4 = arith.constant 0 : index
    %c0_5 = arith.constant 0 : index
    %5 = vector.load %arg4[%c0_4, %c0_5] : memref<128x256xbf16, #tpu.memory_space<vmem>>, vector<128x256xbf16>
    %cst = arith.constant dense<0.000000e+00> : vector<8x256xf32>
    %6 = tpu.matmul %4, %5, %cst {dimension_numbers = #tpu.dot_dimension_numbers<[1], [0], [0], [1], [0, 0, 1, 1], [], []>} : vector<8x128xbf16>, vector<128x256xbf16>, vector<8x256xf32> -> vector<8x256xf32>
    %7 = arith.addf %3, %6 : vector<8x256xf32>
    %c0_6 = arith.constant 0 : index
    %c0_7 = arith.constant 0 : index
    %8 = vector.load %arg8[%c0_6, %c0_7] : memref<8x256xf32, #tpu.memory_space<vmem>>, vector<8x256xf32>
    tpu.vector_store %arg8[%c0_6, %c0_7], %7 {strides = array<i32>} : memref<8x256xf32, #tpu.memory_space<vmem>>, vector<8x256xf32>,
    %c0_i32_8 = arith.constant 0 : i32
    %9 = arith.cmpi eq, %arg2, %c0_i32_8 : i32
    %10 = arith.extui %9 : i1 to i32
    %c0_i32_9 = arith.constant 0 : i32
    %11 = arith.cmpi ne, %10, %c0_i32_9 : i32
    scf.if %11 {
      %c0_10 = arith.constant 0 : index
      %c0_11 = arith.constant 0 : index
      %12 = vector.load %arg8[%c0_10, %c0_11] : memref<8x256xf32, #tpu.memory_space<vmem>>, vector<8x256xf32>
      %c0_12 = arith.constant 0 : index
      %c0_13 = arith.constant 0 : index
      %13 = vector.load %arg5[%c0_12, %c0_13] : memref<1x256xf32, #tpu.memory_space<vmem>>, vector<1x256xf32>
      %14 = vector.broadcast %13 : vector<1x256xf32> to vector<8x256xf32>
      %15 = arith.addf %12, %14 : vector<8x256xf32>
      %c0_14 = arith.constant 0 : index
      %c0_15 = arith.constant 0 : index
      %16 = vector.load %arg6[%c0_14, %c0_15] : memref<8x256xbf16, #tpu.memory_space<vmem>>, vector<8x256xbf16>
      %17 = arith.extf %16 : vector<8x256xbf16> to vector<8x256xf32>
      %18 = arith.addf %15, %17 : vector<8x256xf32>
      %cst_16 = arith.constant 0.000000e+00 : f32
      %19 = vector.broadcast %cst_16 : f32 to vector<8x256xf32>
      %20 = arith.maximumf %18, %19 : vector<8x256xf32>
      %21 = arith.truncf %20 : vector<8x256xf32> to vector<8x256xbf16>
      %c0_17 = arith.constant 0 : index
      %c0_18 = arith.constant 0 : index
      %22 = vector.load %arg7[%c0_17, %c0_18] : memref<8x256xbf16, #tpu.memory_space<vmem>>, vector<8x256xbf16>
      tpu.vector_store %arg7[%c0_17, %c0_18], %21 {strides = array<i32>} : memref<8x256xbf16, #tpu.memory_space<vmem>>, vector<8x256xbf16>,
    } else {
    }
    return
  }
  func.func @transform_0(%arg0: i32, %arg1: i32, %arg2: i32) -> (i32, i32) {
    %c0_i32 = arith.constant 0 : i32
    return %arg0, %arg2 : i32, i32
  }
  func.func @transform_1(%arg0: i32, %arg1: i32, %arg2: i32) -> (i32, i32) {
    %c0_i32 = arith.constant 0 : i32
    return %arg2, %arg1 : i32, i32
  }
  func.func @transform_2(%arg0: i32, %arg1: i32, %arg2: i32) -> (i32, i32) {
    %c0_i32 = arith.constant 0 : i32
    %c0_i32_0 = arith.constant 0 : i32
    return %c0_i32, %arg1 : i32, i32
  }
  func.func @transform_3(%arg0: i32, %arg1: i32, %arg2: i32) -> (i32, i32) {
    %c0_i32 = arith.constant 0 : i32
    return %arg0, %arg1 : i32, i32
  }
  func.func @transform_4(%arg0: i32, %arg1: i32, %arg2: i32) -> (i32, i32) {
    %c0_i32 = arith.constant 0 : i32
    return %arg0, %arg1 : i32, i32
  }
}

</mosaic_0001>

<bundles_post_ra>
// kernel: _lambda_.104
= control target key start
LH: loop header
LB: loop body
LE: loop exit
PB: predicated region body
PF: predicated region fallthrough
CT: control target
= control target key end

     0   :  { %s2509_s12 = smov 0   ;;  %s2511_s13 = smov 0   ;;  %s2830_s0 = inlined_call_operand.vmem [shape: bf16[2048,256], index: 0, kind: input, shape index: {}]   ;;  %s2831_s1 = inlined_call_operand.vmem [shape: bf16[256,128], index: 1, kind: input, shape index: {}]   ;;  %s2832_s2 = inlined_call_operand.vmem [shape: f32[1,128], index: 2, kind: input, shape index: {}]   ;;  %s2833_s3 = inlined_call_operand.vmem [shape: bf16[2048,128], index: 3, kind: output, shape index: {}]  }
   0x1   :  { %s2513_s14 = smov 0  }
   0x2 LB: > { %s32_s15 = sadd.s32 1, %s2483_s13  ;;  %p1824_p0 = scmp.ge.s32.totalorder %s2487_s14, 1  ;;  %s2487_s14 = sphi %s2513_s14, %s13_s14   ;;  %s2483_s13 = sphi %s2511_s13, %s2835_s13   ;;  %s2479_s12 = sphi %s2509_s12, %s2834_s12  }
   0x3   : > { %p34_p1 = scmp.ge.s32.totalorder %s32_s15, 4  ;;  %p191_p2 = scmp.lt.s32.totalorder %s2487_s14, 5 }
   0x5   : > { %s2837_s15 = smov (%p34_p1, %s32_s15), 0  ;;  %p192_p3 = pnand %p1824_p0, %p191_p2 }
   0x6   : > { %s1825_s28 = sshll.u32 (!%p192_p3), %s2479_s12, 6 }
   0x7   : > { %195 = sbr.rel (%p192_p3) target bundleno = 434 (0x1b2), region = 32  ;;  %p236_p4 = scmp.lt.s32.totalorder (!%p192_p3), %s1825_s28, 255 }
   0xc   : > { %v2224_v0 = vld [vmem:[%s2831_s1 + $0x38] sm:$0xff]  ;;  %v2223_v2 = vld [vmem:[%s2831_s1 + $0x30] sm:$0xff]  ;;  %v2222_v4 = vld [vmem:[%s2831_s1 + $0x28] sm:$0xff]  ;;  %s2839_s28 = smov (!%p236_p4, %s1825_s28), 255 }
   0xd   : > { %v2232_v1 = vld [vmem:[%s2831_s1 + $0x78] sm:$0xff]  ;;  %911 = vmatpush.bf16.msra.mxu0 %v2224_v0  ;;  %2424 = vmatpush.bf16.msra.mxu2 %v2224_v0  ;;  %v2231_v3 = vld [vmem:[%s2831_s1 + $0x70] sm:$0xff]  ;;  %v2230_v5 = vld [vmem:[%s2831_s1 + $0x68] sm:$0xff]  ;;  %s2152_s17 = sshll.u32 %s2839_s28, 3  ;;  %s1829_s5 = sshll.u32 %s2839_s28, 2 }
   0xe   : > { %1080 = vmatpush.bf16.msra.mxu1 %v2232_v1  ;;  %2432 = vmatpush.bf16.msra.mxu3 %v2232_v1  ;;  %v2221_v6 = vld [vmem:[%s2831_s1 + $0x20] sm:$0xff]  ;;  %v2220_v8 = vld [vmem:[%s2831_s1 + $0x18] sm:$0xff]  ;;  %v2219_v10 = vld [vmem:[%s2831_s1 + $0x10] sm:$0xff]  ;;  %s2575_s22 = scalar_lea.vmem %s2830_s0, %s2152_s17  ;;  %s2677_s8 = scalar_lea.vmem %s2833_s3, %s1829_s5 }
   0xf   : > { %v2229_v7 = vld [vmem:[%s2831_s1 + $0x60] sm:$0xff]  ;;  %v2228_v9 = vld [vmem:[%s2831_s1 + $0x58] sm:$0xff]  ;;  %v2227_v11 = vld [vmem:[%s2831_s1 + $0x50] sm:$0xff] }
  0x10   : > { %v2218_v12 = vld [vmem:[%s2831_s1 + $0x8] sm:$0xff]  ;;  %v2217_v14 = vld [vmem:[%s2831_s1] sm:$0xff]  ;;  %v1840_v28 = vld [vmem:[%s2575_s22 + $0x10] sm:$0xf] }
  0x11   : > { %912 = vmatpush.bf16.msra.mxu0 %v2223_v2  ;;  %2425 = vmatpush.bf16.msra.mxu2 %v2223_v2  ;;  %v2226_v13 = vld [vmem:[%s2831_s1 + $0x48] sm:$0xff]  ;;  %v2225_v15 = vld [vmem:[%s2831_s1 + $0x40] sm:$0xff]  ;;  %v2156_v29 = vld [vmem:[%s2575_s22 + $0x14] sm:$0xf0] }
  0x12   : > { %1081 = vmatpush.bf16.msra.mxu1 %v2231_v3  ;;  %2433 = vmatpush.bf16.msra.mxu3 %v2231_v3  ;;  %v1832_v16 = vld [vmem:[%s2575_s22] sm:$0xf]  ;;  %v2154_v17 = vld [vmem:[%s2575_s22 + $0x4] sm:$0xf0]  ;;  %v2153_v20 = vld [vmem:[%s2575_s22 + $0x4] sm:$0xf]  ;;  %v1841_v36 = vor.u32 %v2156_v29, %v1840_v28 }
  0x13   : > { %v1960_v18 = vld [vmem:[%s2575_s22 + $0x100] sm:$0xf]  ;;  %v2186_v19 = vld [vmem:[%s2575_s22 + $0x104] sm:$0xf0]  ;;  %v1834_v21 = vld [vmem:[%s2575_s22 + $0x8] sm:$0xf0]  ;;  %v1833_v24 = vor.u32 %v2154_v17, %v1832_v16 }
  0x14   : > { %v2185_v22 = vld [vmem:[%s2575_s22 + $0x104] sm:$0xf]  ;;  %v1962_v23 = vld [vmem:[%s2575_s22 + $0x108] sm:$0xf0]  ;;  %v1961_v25 = vor.u32 %v2186_v19, %v1960_v18  ;;  %v1837_v26 = vor.u32 %v2153_v20, %v1834_v21  ;;  %v1968_v30 = vld [vmem:[%s2575_s22 + $0x110] sm:$0xf] }
  0x15   : > { %913 = vmatpush.bf16.msra.mxu0 %v2222_v4  ;;  %2426 = vmatpush.bf16.msra.mxu2 %v2222_v4  ;;  %v1965_v27 = vor.u32 %v2185_v22, %v1962_v23  ;;  %v2188_v31 = vld [vmem:[%s2575_s22 + $0x114] sm:$0xf0]  ;;  %v2155_v32 = vld [vmem:[%s2575_s22 + $0x14] sm:$0xf]  ;;  %v1842_v33 = vld [vmem:[%s2575_s22 + $0x18] sm:$0xf0] }
  0x16   : > { %1082 = vmatpush.bf16.msra.mxu1 %v2230_v5  ;;  %2434 = vmatpush.bf16.msra.mxu3 %v2230_v5  ;;  %v2187_v34 = vld [vmem:[%s2575_s22 + $0x114] sm:$0xf]  ;;  %v1970_v35 = vld [vmem:[%s2575_s22 + $0x118] sm:$0xf0]  ;;  %v1969_v37 = vor.u32 %v2188_v31, %v1968_v30  ;;  %v1845_v38 = vor.u32 %v2155_v32, %v1842_v33  ;;  %v1848_v40 = vld [vmem:[%s2575_s22 + $0x20] sm:$0xf] }
  0x17   : > { %v1973_v39 = vor.u32 %v2187_v34, %v1970_v35  ;;  %v2158_v41 = vld [vmem:[%s2575_s22 + $0x24] sm:$0xf0]  ;;  %v1976_v42 = vld [vmem:[%s2575_s22 + $0x120] sm:$0xf]  ;;  %v2157_v44 = vld [vmem:[%s2575_s22 + $0x24] sm:$0xf] }
  0x18   : > { %v2190_v43 = vld [vmem:[%s2575_s22 + $0x124] sm:$0xf0]  ;;  %v1850_v45 = vld [vmem:[%s2575_s22 + $0x28] sm:$0xf0]  ;;  %v2189_v46 = vld [vmem:[%s2575_s22 + $0x124] sm:$0xf]  ;;  %v1849_v48 = vor.u32 %v2158_v41, %v1848_v40 }
  0x19   : > { %914 = vmatpush.bf16.msra.mxu0 %v2221_v6  ;;  %2427 = vmatpush.bf16.msra.mxu2 %v2221_v6  ;;  %v1978_v47 = vld [vmem:[%s2575_s22 + $0x128] sm:$0xf0]  ;;  %v1977_v49 = vor.u32 %v2190_v43, %v1976_v42  ;;  %v1853_v50 = vor.u32 %v2157_v44, %v1850_v45  ;;  %v1856_v52 = vld [vmem:[%s2575_s22 + $0x30] sm:$0xf]  ;;  %v2160_v53 = vld [vmem:[%s2575_s22 + $0x34] sm:$0xf0] }
  0x1a   : > { %1083 = vmatpush.bf16.msra.mxu1 %v2229_v7  ;;  %2435 = vmatpush.bf16.msra.mxu3 %v2229_v7  ;;  %v1981_v51 = vor.u32 %v2189_v46, %v1978_v47  ;;  %v1984_v54 = vld [vmem:[%s2575_s22 + $0x130] sm:$0xf]  ;;  %v2192_v55 = vld [vmem:[%s2575_s22 + $0x134] sm:$0xf0]  ;;  %v2159_v56 = vld [vmem:[%s2575_s22 + $0x34] sm:$0xf]  ;;  %v1857_v60 = vor.u32 %v2160_v53, %v1856_v52 }
  0x1b   : > { %v1858_v57 = vld [vmem:[%s2575_s22 + $0x38] sm:$0xf0]  ;;  %v2191_v58 = vld [vmem:[%s2575_s22 + $0x134] sm:$0xf]  ;;  %v1985_v61 = vor.u32 %v2192_v55, %v1984_v54  ;;  %v1864_v0 = vld [vmem:[%s2575_s22 + $0x40] sm:$0xf] }
  0x1c   : > { %v1986_v59 = vld [vmem:[%s2575_s22 + $0x138] sm:$0xf0]  ;;  %v1861_v62 = vor.u32 %v2159_v56, %v1858_v57  ;;  %v2162_v1 = vld [vmem:[%s2575_s22 + $0x44] sm:$0xf0]  ;;  %v1992_v2 = vld [vmem:[%s2575_s22 + $0x140] sm:$0xf] }
  0x1d   : > { %915 = vmatpush.bf16.msra.mxu0 %v2220_v8  ;;  %2428 = vmatpush.bf16.msra.mxu2 %v2220_v8  ;;  %v1989_v63 = vor.u32 %v2191_v58, %v1986_v59  ;;  %v2194_v3 = vld [vmem:[%s2575_s22 + $0x144] sm:$0xf0]  ;;  %v2161_v4 = vld [vmem:[%s2575_s22 + $0x44] sm:$0xf]  ;;  %v1866_v5 = vld [vmem:[%s2575_s22 + $0x48] sm:$0xf0]  ;;  %v1865_v8 = vor.u32 %v2162_v1, %v1864_v0 }
  0x1e   : > { %1084 = vmatpush.bf16.msra.mxu1 %v2228_v9  ;;  %2436 = vmatpush.bf16.msra.mxu3 %v2228_v9  ;;  %v2193_v6 = vld [vmem:[%s2575_s22 + $0x144] sm:$0xf]  ;;  %v1994_v7 = vld [vmem:[%s2575_s22 + $0x148] sm:$0xf0]  ;;  %v1993_v9 = vor.u32 %v2194_v3, %v1992_v2  ;;  %v2163_v16 = vld [vmem:[%s2575_s22 + $0x54] sm:$0xf] }
  0x1f   : > { %v1874_v17 = vld [vmem:[%s2575_s22 + $0x58] sm:$0xf0]  ;;  %v2195_v18 = vld [vmem:[%s2575_s22 + $0x154] sm:$0xf]  ;;  %v2165_v28 = vld [vmem:[%s2575_s22 + $0x64] sm:$0xf] }
  0x20   : > { %v2002_v19 = vld [vmem:[%s2575_s22 + $0x158] sm:$0xf0]  ;;  %v1877_v22 = vor.u32 %v2163_v16, %v1874_v17  ;;  %v1882_v29 = vld [vmem:[%s2575_s22 + $0x68] sm:$0xf0]  ;;  %v2197_v30 = vld [vmem:[%s2575_s22 + $0x164] sm:$0xf] }
  0x21   : > { %916 = vmatpush.bf16.msra.mxu0 %v2219_v10  ;;  %2429 = vmatpush.bf16.msra.mxu2 %v2219_v10  ;;  %v1869_v10 = vor.u32 %v2161_v4, %v1866_v5  ;;  %v2005_v23 = vor.u32 %v2195_v18, %v2002_v19  ;;  %v2010_v31 = vld [vmem:[%s2575_s22 + $0x168] sm:$0xf0]  ;;  %v1885_v34 = vor.u32 %v2165_v28, %v1882_v29  ;;  %v2167_v40 = vld [vmem:[%s2575_s22 + $0x74] sm:$0xf]  ;;  %v1890_v41 = vld [vmem:[%s2575_s22 + $0x78] sm:$0xf0] }
  0x22   : > { %1085 = vmatpush.bf16.msra.mxu1 %v2227_v11  ;;  %2437 = vmatpush.bf16.msra.mxu3 %v2227_v11  ;;  %v1997_v11 = vor.u32 %v2193_v6, %v1994_v7  ;;  %v2013_v35 = vor.u32 %v2197_v30, %v2010_v31  ;;  %v2199_v42 = vld [vmem:[%s2575_s22 + $0x174] sm:$0xf]  ;;  %v2018_v43 = vld [vmem:[%s2575_s22 + $0x178] sm:$0xf0]  ;;  %v1893_v46 = vor.u32 %v2167_v40, %v1890_v41  ;;  %v2169_v52 = vld [vmem:[%s2575_s22 + $0x84] sm:$0xf] }
  0x23   : > { %v2021_v47 = vor.u32 %v2199_v42, %v2018_v43  ;;  %v1898_v53 = vld [vmem:[%s2575_s22 + $0x88] sm:$0xf0]  ;;  %v2201_v54 = vld [vmem:[%s2575_s22 + $0x184] sm:$0xf]  ;;  %v1904_v6 = vld [vmem:[%s2575_s22 + $0x90] sm:$0xf] }
  0x24   : > { %v2026_v55 = vld [vmem:[%s2575_s22 + $0x188] sm:$0xf0]  ;;  %v1901_v59 = vor.u32 %v2169_v52, %v1898_v53  ;;  %v2172_v7 = vld [vmem:[%s2575_s22 + $0x94] sm:$0xf0]  ;;  %v1912_v40 = vld [vmem:[%s2575_s22 + $0xa0] sm:$0xf] }
  0x25   : > { %917 = vmatpush.bf16.msra.mxu0 %v2218_v12  ;;  %2430 = vmatpush.bf16.msra.mxu2 %v2218_v12  ;;  %v1872_v12 = vld [vmem:[%s2575_s22 + $0x50] sm:$0xf]  ;;  %v2174_v41 = vld [vmem:[%s2575_s22 + $0xa4] sm:$0xf0]  ;;  %v2040_v42 = vld [vmem:[%s2575_s22 + $0x1a0] sm:$0xf] }
  0x26   : > { %1086 = vmatpush.bf16.msra.mxu1 %v2226_v13  ;;  %2438 = vmatpush.bf16.msra.mxu3 %v2226_v13  ;;  %v2164_v13 = vld [vmem:[%s2575_s22 + $0x54] sm:$0xf0] }
  0x27   : > { %v1873_v20 = vor.u32 %v2164_v13, %v1872_v12  ;;  %v2171_v12 = vld [vmem:[%s2575_s22 + $0x94] sm:$0xf]  ;;  %v1906_v13 = vld [vmem:[%s2575_s22 + $0x98] sm:$0xf0] }
  0x29   : > { %918 = vmatpush.bf16.msra.mxu0 %v2217_v14  ;;  %2431 = vmatpush.bf16.msra.mxu2 %v2217_v14  ;;  %v2000_v14 = vld [vmem:[%s2575_s22 + $0x150] sm:$0xf] }
  0x2a   : > { %1087 = vmatpush.bf16.msra.mxu1 %v2225_v15  ;;  %2439 = vmatpush.bf16.msra.mxu3 %v2225_v15  ;;  %v2196_v15 = vld [vmem:[%s2575_s22 + $0x154] sm:$0xf0] }
  0x2b   : > { %v2001_v21 = vor.u32 %v2196_v15, %v2000_v14  ;;  %v2203_v14 = vld [vmem:[%s2575_s22 + $0x194] sm:$0xf]  ;;  %v2034_v15 = vld [vmem:[%s2575_s22 + $0x198] sm:$0xf0] }
  0x2c   : > { %919 = vmatmul.bf16.vlgmr.msra.gmra.mxu0 %v1833_v24  ;;  %999 = vmatmul.bf16.vlgmr.msra.gmra.mxu2 %v1961_v25  ;;  %v1880_v24 = vld [vmem:[%s2575_s22 + $0x60] sm:$0xf]  ;;  %v2166_v25 = vld [vmem:[%s2575_s22 + $0x64] sm:$0xf0] }
  0x2d   : > { %1088 = vmatmul.bf16.vlgmr.msra.gmra.mxu1 %v1837_v26  ;;  %1168 = vmatmul.bf16.vlgmr.msra.gmra.mxu3 %v1965_v27  ;;  %v2008_v26 = vld [vmem:[%s2575_s22 + $0x160] sm:$0xf]  ;;  %v2198_v27 = vld [vmem:[%s2575_s22 + $0x164] sm:$0xf0]  ;;  %v1881_v32 = vor.u32 %v2166_v25, %v1880_v24 }
  0x2e   : > { %v2009_v33 = vor.u32 %v2198_v27, %v2008_v26  ;;  %v2037_v27 = vor.u32 %v2203_v14, %v2034_v15 }
  0x3c   : > { %924 = vmatmul.bf16.gmra.mxu0 %v1841_v36  ;;  %1004 = vmatmul.bf16.gmra.mxu2 %v1969_v37  ;;  %v1888_v36 = vld [vmem:[%s2575_s22 + $0x70] sm:$0xf]  ;;  %v2168_v37 = vld [vmem:[%s2575_s22 + $0x74] sm:$0xf0] }
  0x3d   : > { %1093 = vmatmul.bf16.gmra.mxu1 %v1845_v38  ;;  %1173 = vmatmul.bf16.gmra.mxu3 %v1973_v39  ;;  %v2016_v38 = vld [vmem:[%s2575_s22 + $0x170] sm:$0xf]  ;;  %v2200_v39 = vld [vmem:[%s2575_s22 + $0x174] sm:$0xf0]  ;;  %v1889_v44 = vor.u32 %v2168_v37, %v1888_v36 }
  0x3e   : > { %v2017_v45 = vor.u32 %v2200_v39, %v2016_v38 }
  0x4c   : > { %929 = vmatmul.bf16.gmra.mxu0 %v1849_v48  ;;  %1009 = vmatmul.bf16.gmra.mxu2 %v1977_v49  ;;  %v1896_v48 = vld [vmem:[%s2575_s22 + $0x80] sm:$0xf]  ;;  %v2170_v49 = vld [vmem:[%s2575_s22 + $0x84] sm:$0xf0] }
  0x4d   : > { %1098 = vmatmul.bf16.gmra.mxu1 %v1853_v50  ;;  %1178 = vmatmul.bf16.gmra.mxu3 %v1981_v51  ;;  %v2024_v50 = vld [vmem:[%s2575_s22 + $0x180] sm:$0xf]  ;;  %v2202_v51 = vld [vmem:[%s2575_s22 + $0x184] sm:$0xf0]  ;;  %v1897_v56 = vor.u32 %v2170_v49, %v1896_v48  ;;  %v2205_v48 = vld [vmem:[%s2575_s22 + $0x1a4] sm:$0xf] }
  0x4e   : > { %v2025_v57 = vor.u32 %v2202_v51, %v2024_v50  ;;  %v2042_v49 = vld [vmem:[%s2575_s22 + $0x1a8] sm:$0xf0] }
  0x5c   : > { %934 = vmatmul.bf16.gmra.mxu0 %v1857_v60  ;;  %1014 = vmatmul.bf16.gmra.mxu2 %v1985_v61  ;;  %v2029_v60 = vor.u32 %v2201_v54, %v2026_v55  ;;  %v1913_v54 = vor.u32 %v2174_v41, %v1912_v40 }
  0x5d   : > { %1103 = vmatmul.bf16.gmra.mxu1 %v1861_v62  ;;  %1183 = vmatmul.bf16.gmra.mxu3 %v1989_v63  ;;  %v2661_v63 = vld [vmem:[%s2832_s2] ss:$0 sm:$0xff] }
  0x6c   : > { %939 = vmatmul.bf16.gmra.mxu0 %v1865_v8  ;;  %1019 = vmatmul.bf16.gmra.mxu2 %v1993_v9  ;;  %v2032_v8 = vld [vmem:[%s2575_s22 + $0x190] sm:$0xf] }
  0x6d   : > { %1108 = vmatmul.bf16.gmra.mxu1 %v1869_v10  ;;  %1188 = vmatmul.bf16.gmra.mxu3 %v1997_v11  ;;  %v2204_v11 = vld [vmem:[%s2575_s22 + $0x194] sm:$0xf0] }
  0x7c   : > { %944 = vmatmul.bf16.gmra.mxu0 %v1873_v20  ;;  %1024 = vmatmul.bf16.gmra.mxu2 %v2001_v21  ;;  %v1905_v20 = vor.u32 %v2172_v7, %v1904_v6  ;;  %v2033_v21 = vor.u32 %v2204_v11, %v2032_v8  ;;  %v1920_v11 = vld [vmem:[%s2575_s22 + $0xb0] sm:$0xf] }
  0x7d   : > { %1113 = vmatmul.bf16.gmra.mxu1 %v1877_v22  ;;  %1193 = vmatmul.bf16.gmra.mxu3 %v2005_v23  ;;  %v1909_v22 = vor.u32 %v2171_v12, %v1906_v13  ;;  %v2176_v12 = vld [vmem:[%s2575_s22 + $0xb4] sm:$0xf0]  ;;  %v2048_v13 = vld [vmem:[%s2575_s22 + $0x1b0] sm:$0xf] }
  0x8c   : > { %949 = vmatmul.bf16.gmra.mxu0 %v1881_v32  ;;  %1029 = vmatmul.bf16.gmra.mxu2 %v2009_v33 }
  0x8d   : > { %1118 = vmatmul.bf16.gmra.mxu1 %v1885_v34  ;;  %1198 = vmatmul.bf16.gmra.mxu3 %v2013_v35 }
  0x9c   : > { %954 = vmatmul.bf16.gmra.mxu0 %v1889_v44  ;;  %1034 = vmatmul.bf16.gmra.mxu2 %v2017_v45  ;;  %v2206_v45 = vld [vmem:[%s2575_s22 + $0x1a4] sm:$0xf0] }
  0x9d   : > { %1123 = vmatmul.bf16.gmra.mxu1 %v1893_v46  ;;  %1203 = vmatmul.bf16.gmra.mxu3 %v2021_v47  ;;  %v2173_v46 = vld [vmem:[%s2575_s22 + $0xa4] sm:$0xf]  ;;  %v1914_v47 = vld [vmem:[%s2575_s22 + $0xa8] sm:$0xf0]  ;;  %v2041_v55 = vor.u32 %v2206_v45, %v2040_v42  ;;  %v1928_v45 = vld [vmem:[%s2575_s22 + $0xc0] sm:$0xf] }
  0xa9   : > { %v920_v58 = vpop.f32.mrf.mxu0 }
  0xaa   : > { %v1089_v61 = vpop.f32.mrf.mxu1 }
  0xab   : > { %v1090_v62 = vadd.f32 %v1089_v61, %v920_v58  ;;  %v2045_v61 = vor.u32 %v2205_v48, %v2042_v49 }
  0xac   : > { %959 = vmatmul.bf16.gmra.mxu0 %v1897_v56  ;;  %1039 = vmatmul.bf16.gmra.mxu2 %v2025_v57  ;;  %v1917_v56 = vor.u32 %v2173_v46, %v1914_v47  ;;  %v2178_v46 = vld [vmem:[%s2575_s22 + $0xc4] sm:$0xf0]  ;;  %v2056_v47 = vld [vmem:[%s2575_s22 + $0x1c0] sm:$0xf] }
  0xad   : > { %1128 = vmatmul.bf16.gmra.mxu1 %v1901_v59  ;;  %1208 = vmatmul.bf16.gmra.mxu3 %v2029_v60  ;;  %v1448_v4 = vadd.f32 %v2661_v63, %v1090_v62 }
  0xaf   : > { %v1000_v0 = vpop.f32.mrf.mxu2  ;;  %v1512_v16 = vmax.f32 %v1448_v4, 0.0 }
  0xb0   : > { %v1169_v1 = vpop.f32.mrf.mxu3 }
  0xb1   : > { %v922_v2 = vpop.f32.mrf.mxu0  ;;  %v1170_v9 = vadd.f32 %v1169_v1, %v1000_v0 }
  0xb2   : > { %v1091_v3 = vpop.f32.mrf.mxu1 }
  0xb3   : > { %v1092_v5 = vadd.f32 %v1091_v3, %v922_v2  ;;  %v1480_v23 = vadd.f32 %v2661_v63, %v1170_v9 }
  0xb5   : > { %v1449_v10 = vadd.f32 %v2661_v63, %v1092_v5  ;;  %v1544_v30 = vmax.f32 %v1480_v23, 0.0 }
  0xb7   : > { %v1513_v17 = vmax.f32 %v1449_v10, 0.0  ;;  %v1002_v18 = vpop.f32.mrf.mxu2 }
  0xb8   : > { %v1171_v19 = vpop.f32.mrf.mxu3 }
  0xb9   : > { %v2236_v24 = vpack.c.bf16 %v1513_v17, %v1512_v16  ;;  %v1172_v25 = vadd.f32 %v1171_v19, %v1002_v18  ;;  %v925_v26 = vpop.f32.mrf.mxu0  ;;  %v2208_v16 = vld [vmem:[%s2575_s22 + $0x1b4] sm:$0xf0]  ;;  %v2175_v17 = vld [vmem:[%s2575_s22 + $0xb4] sm:$0xf]  ;;  %v1922_v18 = vld [vmem:[%s2575_s22 + $0xb8] sm:$0xf0] }
  0xba   : > { %v1094_v28 = vpop.f32.mrf.mxu1  ;;  %v2207_v19 = vld [vmem:[%s2575_s22 + $0x1b4] sm:$0xf] }
  0xbb   : > { %2237 = vst [vmem:[%s2677_s8] sm:$0xff] %v2236_v24   ;;  %v1481_v29 = vadd.f32 %v2661_v63, %v1172_v25  ;;  %v1095_v33 = vadd.f32 %v1094_v28, %v925_v26  ;;  %v1921_v25 = vor.u32 %v2176_v12, %v1920_v11  ;;  %v2049_v26 = vor.u32 %v2208_v16, %v2048_v13  ;;  %v1936_v16 = vld [vmem:[%s2575_s22 + $0xd0] sm:$0xf] }
  0xbc   : > { %964 = vmatmul.bf16.gmra.mxu0 %v1905_v20  ;;  %1044 = vmatmul.bf16.gmra.mxu2 %v2033_v21  ;;  %v2050_v20 = vld [vmem:[%s2575_s22 + $0x1b8] sm:$0xf0] }
  0xbd   : > { %v1545_v31 = vmax.f32 %v1481_v29, 0.0  ;;  %1133 = vmatmul.bf16.gmra.mxu1 %v1909_v22  ;;  %1213 = vmatmul.bf16.gmra.mxu3 %v2037_v27  ;;  %v1450_v38 = vadd.f32 %v2661_v63, %v1095_v33  ;;  %v1925_v27 = vor.u32 %v2175_v17, %v1922_v18  ;;  %v2180_v17 = vld [vmem:[%s2575_s22 + $0xd4] sm:$0xf0]  ;;  %v2064_v18 = vld [vmem:[%s2575_s22 + $0x1d0] sm:$0xf] }
  0xbf   : > { %v2316_v32 = vpack.c.bf16 %v1545_v31, %v1544_v30  ;;  %v1005_v34 = vpop.f32.mrf.mxu2  ;;  %v1514_v50 = vmax.f32 %v1450_v38, 0.0 }
  0xc0   : > { %v1174_v35 = vpop.f32.mrf.mxu3 }
  0xc1   : > { %2408 = vst [vmem:[%s2677_s8 + $0x80] sm:$0xff] %v2316_v32   ;;  %v927_v36 = vpop.f32.mrf.mxu0  ;;  %v1175_v43 = vadd.f32 %v1174_v35, %v1005_v34  ;;  %v2053_v32 = vor.u32 %v2207_v19, %v2050_v20 }
  0xc2   : > { %v1096_v37 = vpop.f32.mrf.mxu1 }
  0xc3   : > { %v1097_v39 = vadd.f32 %v1096_v37, %v927_v36  ;;  %v1482_v57 = vadd.f32 %v2661_v63, %v1175_v43 }
  0xc5   : > { %v1451_v44 = vadd.f32 %v2661_v63, %v1097_v39  ;;  %v1546_v1 = vmax.f32 %v1482_v57, 0.0 }
  0xc7   : > { %v1515_v51 = vmax.f32 %v1451_v44, 0.0  ;;  %v1007_v52 = vpop.f32.mrf.mxu2 }
  0xc8   : > { %v1176_v53 = vpop.f32.mrf.mxu3 }
  0xc9   : > { %v2241_v58 = vpack.c.bf16 %v1515_v51, %v1514_v50  ;;  %v1177_v59 = vadd.f32 %v1176_v53, %v1007_v52  ;;  %v930_v60 = vpop.f32.mrf.mxu0  ;;  %v2210_v50 = vld [vmem:[%s2575_s22 + $0x1c4] sm:$0xf0]  ;;  %v2177_v51 = vld [vmem:[%s2575_s22 + $0xc4] sm:$0xf]  ;;  %v1930_v52 = vld [vmem:[%s2575_s22 + $0xc8] sm:$0xf0] }
  0xca   : > { %v1099_v62 = vpop.f32.mrf.mxu1  ;;  %v2209_v53 = vld [vmem:[%s2575_s22 + $0x1c4] sm:$0xf] }
  0xcb   : > { %2393 = vst [vmem:[%s2677_s8 + $0x8] sm:$0xff] %v2241_v58   ;;  %v1483_v0 = vadd.f32 %v2661_v63, %v1177_v59  ;;  %v1100_v4 = vadd.f32 %v1099_v62, %v930_v60  ;;  %v1929_v59 = vor.u32 %v2178_v46, %v1928_v45  ;;  %v2057_v60 = vor.u32 %v2210_v50, %v2056_v47  ;;  %v1944_v50 = vld [vmem:[%s2575_s22 + $0xe0] sm:$0xf] }
  0xcc   : > { %969 = vmatmul.bf16.gmra.mxu0 %v1913_v54  ;;  %1049 = vmatmul.bf16.gmra.mxu2 %v2041_v55  ;;  %v2058_v54 = vld [vmem:[%s2575_s22 + $0x1c8] sm:$0xf0] }
  0xcd   : > { %v1547_v2 = vmax.f32 %v1483_v0, 0.0  ;;  %1138 = vmatmul.bf16.gmra.mxu1 %v1917_v56  ;;  %1218 = vmatmul.bf16.gmra.mxu3 %v2045_v61  ;;  %v1452_v9 = vadd.f32 %v2661_v63, %v1100_v4  ;;  %v1933_v61 = vor.u32 %v2177_v51, %v1930_v52  ;;  %v2182_v51 = vld [vmem:[%s2575_s22 + $0xe4] sm:$0xf0]  ;;  %v2072_v52 = vld [vmem:[%s2575_s22 + $0x1e0] sm:$0xf] }
  0xcf   : > { %v2321_v3 = vpack.c.bf16 %v1547_v2, %v1546_v1  ;;  %v1010_v5 = vpop.f32.mrf.mxu2  ;;  %v1516_v21 = vmax.f32 %v1452_v9, 0.0 }
  0xd0   : > { %v1179_v6 = vpop.f32.mrf.mxu3 }
  0xd1   : > { %2409 = vst [vmem:[%s2677_s8 + $0x88] sm:$0xff] %v2321_v3   ;;  %v932_v7 = vpop.f32.mrf.mxu0  ;;  %v1180_v14 = vadd.f32 %v1179_v6, %v1010_v5  ;;  %v2061_v3 = vor.u32 %v2209_v53, %v2058_v54 }
  0xd2   : > { %v1101_v8 = vpop.f32.mrf.mxu1 }
  0xd3   : > { %v1102_v10 = vadd.f32 %v1101_v8, %v932_v7  ;;  %v1484_v28 = vadd.f32 %v2661_v63, %v1180_v14 }
  0xd5   : > { %v1453_v15 = vadd.f32 %v2661_v63, %v1102_v10  ;;  %v1548_v35 = vmax.f32 %v1484_v28, 0.0 }
  0xd7   : > { %v1517_v22 = vmax.f32 %v1453_v15, 0.0  ;;  %v1012_v23 = vpop.f32.mrf.mxu2 }
  0xd8   : > { %v1181_v24 = vpop.f32.mrf.mxu3 }
  0xd9   : > { %v2246_v29 = vpack.c.bf16 %v1517_v22, %v1516_v21  ;;  %v1182_v30 = vadd.f32 %v1181_v24, %v1012_v23  ;;  %v935_v31 = vpop.f32.mrf.mxu0  ;;  %v2212_v21 = vld [vmem:[%s2575_s22 + $0x1d4] sm:$0xf0]  ;;  %v2179_v22 = vld [vmem:[%s2575_s22 + $0xd4] sm:$0xf]  ;;  %v1938_v23 = vld [vmem:[%s2575_s22 + $0xd8] sm:$0xf0] }
  0xda   : > { %v1104_v33 = vpop.f32.mrf.mxu1  ;;  %v2211_v24 = vld [vmem:[%s2575_s22 + $0x1d4] sm:$0xf] }
  0xdb   : > { %2394 = vst [vmem:[%s2677_s8 + $0x10] sm:$0xff] %v2246_v29   ;;  %v1485_v34 = vadd.f32 %v2661_v63, %v1182_v30  ;;  %v1105_v38 = vadd.f32 %v1104_v33, %v935_v31  ;;  %v1937_v30 = vor.u32 %v2180_v17, %v1936_v16  ;;  %v2065_v31 = vor.u32 %v2212_v21, %v2064_v18  ;;  %v1952_v21 = vld [vmem:[%s2575_s22 + $0xf0] sm:$0xf] }
  0xdc   : > { %974 = vmatmul.bf16.gmra.mxu0 %v1921_v25  ;;  %1054 = vmatmul.bf16.gmra.mxu2 %v2049_v26  ;;  %v2066_v25 = vld [vmem:[%s2575_s22 + $0x1d8] sm:$0xf0] }
  0xdd   : > { %v1549_v36 = vmax.f32 %v1485_v34, 0.0  ;;  %1143 = vmatmul.bf16.gmra.mxu1 %v1925_v27  ;;  %1223 = vmatmul.bf16.gmra.mxu3 %v2053_v32  ;;  %v1454_v43 = vadd.f32 %v2661_v63, %v1105_v38  ;;  %v1941_v32 = vor.u32 %v2179_v22, %v1938_v23  ;;  %v2184_v22 = vld [vmem:[%s2575_s22 + $0xf4] sm:$0xf0]  ;;  %v2080_v23 = vld [vmem:[%s2575_s22 + $0x1f0] sm:$0xf] }
  0xdf   : > { %v2326_v37 = vpack.c.bf16 %v1549_v36, %v1548_v35  ;;  %v1015_v39 = vpop.f32.mrf.mxu2  ;;  %v1518_v55 = vmax.f32 %v1454_v43, 0.0 }
  0xe0   : > { %v1184_v40 = vpop.f32.mrf.mxu3 }
  0xe1   : > { %2410 = vst [vmem:[%s2677_s8 + $0x90] sm:$0xff] %v2326_v37   ;;  %v937_v41 = vpop.f32.mrf.mxu0  ;;  %v1185_v48 = vadd.f32 %v1184_v40, %v1015_v39  ;;  %v2069_v37 = vor.u32 %v2211_v24, %v2066_v25 }
  0xe2   : > { %v1106_v42 = vpop.f32.mrf.mxu1 }
  0xe3   : > { %v1107_v44 = vadd.f32 %v1106_v42, %v937_v41  ;;  %v1486_v62 = vadd.f32 %v2661_v63, %v1185_v48 }
  0xe5   : > { %v1455_v49 = vadd.f32 %v2661_v63, %v1107_v44  ;;  %v1550_v6 = vmax.f32 %v1486_v62, 0.0 }
  0xe7   : > { %v1519_v56 = vmax.f32 %v1455_v49, 0.0  ;;  %v1017_v57 = vpop.f32.mrf.mxu2 }
  0xe8   : > { %v1186_v58 = vpop.f32.mrf.mxu3 }
  0xe9   : > { %v2251_v0 = vpack.c.bf16 %v1519_v56, %v1518_v55  ;;  %v1187_v1 = vadd.f32 %v1186_v58, %v1017_v57  ;;  %v940_v2 = vpop.f32.mrf.mxu0  ;;  %v2214_v55 = vld [vmem:[%s2575_s22 + $0x1e4] sm:$0xf0]  ;;  %v2181_v56 = vld [vmem:[%s2575_s22 + $0xe4] sm:$0xf]  ;;  %v1946_v57 = vld [vmem:[%s2575_s22 + $0xe8] sm:$0xf0] }
  0xea   : > { %v1109_v4 = vpop.f32.mrf.mxu1  ;;  %v2213_v58 = vld [vmem:[%s2575_s22 + $0x1e4] sm:$0xf] }
  0xeb   : > { %2395 = vst [vmem:[%s2677_s8 + $0x18] sm:$0xff] %v2251_v0   ;;  %v1487_v5 = vadd.f32 %v2661_v63, %v1187_v1  ;;  %v1110_v9 = vadd.f32 %v1109_v4, %v940_v2  ;;  %v1945_v1 = vor.u32 %v2182_v51, %v1944_v50  ;;  %v2073_v2 = vor.u32 %v2214_v55, %v2072_v52 }
  0xec   : > { %979 = vmatmul.bf16.gmra.mxu0 %v1929_v59  ;;  %1059 = vmatmul.bf16.gmra.mxu2 %v2057_v60  ;;  %v2074_v59 = vld [vmem:[%s2575_s22 + $0x1e8] sm:$0xf0] }
  0xed   : > { %v1551_v7 = vmax.f32 %v1487_v5, 0.0  ;;  %1148 = vmatmul.bf16.gmra.mxu1 %v1933_v61  ;;  %1228 = vmatmul.bf16.gmra.mxu3 %v2061_v3  ;;  %v1456_v14 = vadd.f32 %v2661_v63, %v1110_v9  ;;  %v1949_v3 = vor.u32 %v2181_v56, %v1946_v57 }
  0xef   : > { %v2331_v8 = vpack.c.bf16 %v1551_v7, %v1550_v6  ;;  %v1020_v10 = vpop.f32.mrf.mxu2  ;;  %v1520_v26 = vmax.f32 %v1456_v14, 0.0 }
  0xf0   : > { %v1189_v11 = vpop.f32.mrf.mxu3 }
  0xf1   : > { %2411 = vst [vmem:[%s2677_s8 + $0x98] sm:$0xff] %v2331_v8   ;;  %v942_v12 = vpop.f32.mrf.mxu0  ;;  %v1190_v19 = vadd.f32 %v1189_v11, %v1020_v10  ;;  %v2077_v8 = vor.u32 %v2213_v58, %v2074_v59 }
  0xf2   : > { %v1111_v13 = vpop.f32.mrf.mxu1 }
  0xf3   : > { %v1112_v15 = vadd.f32 %v1111_v13, %v942_v12  ;;  %v1488_v33 = vadd.f32 %v2661_v63, %v1190_v19 }
  0xf5   : > { %v1457_v20 = vadd.f32 %v2661_v63, %v1112_v15  ;;  %v1552_v40 = vmax.f32 %v1488_v33, 0.0 }
  0xf7   : > { %v1521_v27 = vmax.f32 %v1457_v20, 0.0  ;;  %v1022_v28 = vpop.f32.mrf.mxu2 }
  0xf8   : > { %v1191_v29 = vpop.f32.mrf.mxu3 }
  0xf9   : > { %v2256_v34 = vpack.c.bf16 %v1521_v27, %v1520_v26  ;;  %v1192_v35 = vadd.f32 %v1191_v29, %v1022_v28  ;;  %v945_v36 = vpop.f32.mrf.mxu0  ;;  %v2216_v26 = vld [vmem:[%s2575_s22 + $0x1f4] sm:$0xf0]  ;;  %v2183_v27 = vld [vmem:[%s2575_s22 + $0xf4] sm:$0xf]  ;;  %v1954_v28 = vld [vmem:[%s2575_s22 + $0xf8] sm:$0xf0] }
  0xfa   : > { %v1114_v38 = vpop.f32.mrf.mxu1  ;;  %v2215_v29 = vld [vmem:[%s2575_s22 + $0x1f4] sm:$0xf] }
  0xfb   : > { %2396 = vst [vmem:[%s2677_s8 + $0x20] sm:$0xff] %v2256_v34   ;;  %v1489_v39 = vadd.f32 %v2661_v63, %v1192_v35  ;;  %v1115_v43 = vadd.f32 %v1114_v38, %v945_v36  ;;  %v1953_v35 = vor.u32 %v2184_v22, %v1952_v21  ;;  %v2081_v36 = vor.u32 %v2216_v26, %v2080_v23 }
  0xfc   : > { %984 = vmatmul.bf16.gmra.mxu0 %v1937_v30  ;;  %1064 = vmatmul.bf16.gmra.mxu2 %v2065_v31  ;;  %v2082_v30 = vld [vmem:[%s2575_s22 + $0x1f8] sm:$0xf0] }
  0xfd   : > { %v1553_v41 = vmax.f32 %v1489_v39, 0.0  ;;  %1153 = vmatmul.bf16.gmra.mxu1 %v1941_v32  ;;  %1233 = vmatmul.bf16.gmra.mxu3 %v2069_v37  ;;  %v1458_v48 = vadd.f32 %v2661_v63, %v1115_v43  ;;  %v1957_v37 = vor.u32 %v2183_v27, %v1954_v28 }
  0xff   : > { %v2336_v42 = vpack.c.bf16 %v1553_v41, %v1552_v40  ;;  %v1025_v44 = vpop.f32.mrf.mxu2  ;;  %v1522_v60 = vmax.f32 %v1458_v48, 0.0 }
 0x100   : > { %v1194_v45 = vpop.f32.mrf.mxu3 }
 0x101   : > { %2412 = vst [vmem:[%s2677_s8 + $0xa0] sm:$0xff] %v2336_v42   ;;  %v947_v46 = vpop.f32.mrf.mxu0  ;;  %v1195_v53 = vadd.f32 %v1194_v45, %v1025_v44  ;;  %v2085_v42 = vor.u32 %v2215_v29, %v2082_v30 }
 0x102   : > { %v1116_v47 = vpop.f32.mrf.mxu1 }
 0x103   : > { %v1117_v49 = vadd.f32 %v1116_v47, %v947_v46  ;;  %v1490_v4 = vadd.f32 %v2661_v63, %v1195_v53 }
 0x105   : > { %v1459_v54 = vadd.f32 %v2661_v63, %v1117_v49  ;;  %v1554_v11 = vmax.f32 %v1490_v4, 0.0 }
 0x107   : > { %v1523_v61 = vmax.f32 %v1459_v54, 0.0  ;;  %v1027_v62 = vpop.f32.mrf.mxu2 }
 0x108   : > { %v1196_v0 = vpop.f32.mrf.mxu3 }
 0x109   : > { %v2261_v5 = vpack.c.bf16 %v1523_v61, %v1522_v60  ;;  %v1197_v6 = vadd.f32 %v1196_v0, %v1027_v62  ;;  %v950_v7 = vpop.f32.mrf.mxu0 }
 0x10a   : > { %v1119_v9 = vpop.f32.mrf.mxu1 }
 0x10b   : > { %2397 = vst [vmem:[%s2677_s8 + $0x28] sm:$0xff] %v2261_v5   ;;  %v1491_v10 = vadd.f32 %v2661_v63, %v1197_v6  ;;  %v1120_v14 = vadd.f32 %v1119_v9, %v950_v7 }
 0x10c   : > { %989 = vmatmul.bf16.gmra.mxu0 %v1945_v1  ;;  %1069 = vmatmul.bf16.gmra.mxu2 %v2073_v2 }
 0x10d   : > { %v1555_v12 = vmax.f32 %v1491_v10, 0.0  ;;  %1158 = vmatmul.bf16.gmra.mxu1 %v1949_v3  ;;  %1238 = vmatmul.bf16.gmra.mxu3 %v2077_v8  ;;  %v1460_v19 = vadd.f32 %v2661_v63, %v1120_v14 }
 0x10f   : > { %v2341_v13 = vpack.c.bf16 %v1555_v12, %v1554_v11  ;;  %v1030_v15 = vpop.f32.mrf.mxu2  ;;  %v1524_v31 = vmax.f32 %v1460_v19, 0.0 }
 0x110   : > { %v1199_v16 = vpop.f32.mrf.mxu3 }
 0x111   : > { %2413 = vst [vmem:[%s2677_s8 + $0xa8] sm:$0xff] %v2341_v13   ;;  %v952_v17 = vpop.f32.mrf.mxu0  ;;  %v1200_v24 = vadd.f32 %v1199_v16, %v1030_v15 }
 0x112   : > { %v1121_v18 = vpop.f32.mrf.mxu1 }
 0x113   : > { %v1122_v20 = vadd.f32 %v1121_v18, %v952_v17  ;;  %v1492_v38 = vadd.f32 %v2661_v63, %v1200_v24 }
 0x115   : > { %v1461_v25 = vadd.f32 %v2661_v63, %v1122_v20  ;;  %v1556_v45 = vmax.f32 %v1492_v38, 0.0 }
 0x117   : > { %v1525_v32 = vmax.f32 %v1461_v25, 0.0  ;;  %v1032_v33 = vpop.f32.mrf.mxu2 }
 0x118   : > { %v1201_v34 = vpop.f32.mrf.mxu3 }
 0x119   : > { %v2266_v39 = vpack.c.bf16 %v1525_v32, %v1524_v31  ;;  %v1202_v40 = vadd.f32 %v1201_v34, %v1032_v33  ;;  %v955_v41 = vpop.f32.mrf.mxu0 }
 0x11a   : > { %v1124_v43 = vpop.f32.mrf.mxu1 }
 0x11b   : > { %2398 = vst [vmem:[%s2677_s8 + $0x30] sm:$0xff] %v2266_v39   ;;  %v1493_v44 = vadd.f32 %v2661_v63, %v1202_v40  ;;  %v1125_v48 = vadd.f32 %v1124_v43, %v955_v41 }
 0x11c   : > { %994 = vmatmul.bf16.gmra.mxu0 %v1953_v35  ;;  %1074 = vmatmul.bf16.gmra.mxu2 %v2081_v36 }
 0x11d   : > { %v1557_v46 = vmax.f32 %v1493_v44, 0.0  ;;  %1163 = vmatmul.bf16.gmra.mxu1 %v1957_v37  ;;  %1243 = vmatmul.bf16.gmra.mxu3 %v2085_v42  ;;  %v1462_v53 = vadd.f32 %v2661_v63, %v1125_v48 }
 0x11f   : > { %v2346_v47 = vpack.c.bf16 %v1557_v46, %v1556_v45  ;;  %v1035_v49 = vpop.f32.mrf.mxu2  ;;  %v1526_v57 = vmax.f32 %v1462_v53, 0.0 }
 0x120   : > { %v1204_v50 = vpop.f32.mrf.mxu3 }
 0x121   : > { %2414 = vst [vmem:[%s2677_s8 + $0xb0] sm:$0xff] %v2346_v47   ;;  %v957_v51 = vpop.f32.mrf.mxu0  ;;  %v1205_v55 = vadd.f32 %v1204_v50, %v1035_v49 }
 0x122   : > { %v1126_v52 = vpop.f32.mrf.mxu1 }
 0x123   : > { %v1127_v54 = vadd.f32 %v1126_v52, %v957_v51  ;;  %v1494_v61 = vadd.f32 %v2661_v63, %v1205_v55 }
 0x125   : > { %v1463_v56 = vadd.f32 %v2661_v63, %v1127_v54  ;;  %v1558_v4 = vmax.f32 %v1494_v61, 0.0 }
 0x127   : > { %v1527_v58 = vmax.f32 %v1463_v56, 0.0  ;;  %v1037_v59 = vpop.f32.mrf.mxu2 }
 0x128   : > { %v1206_v60 = vpop.f32.mrf.mxu3 }
 0x129   : > { %v2271_v62 = vpack.c.bf16 %v1527_v58, %v1526_v57  ;;  %v1207_v0 = vadd.f32 %v1206_v60, %v1037_v59  ;;  %v960_v1 = vpop.f32.mrf.mxu0 }
 0x12a   : > { %v1129_v2 = vpop.f32.mrf.mxu1 }
 0x12b   : > { %2399 = vst [vmem:[%s2677_s8 + $0x38] sm:$0xff] %v2271_v62   ;;  %v1495_v3 = vadd.f32 %v2661_v63, %v1207_v0  ;;  %v1130_v7 = vadd.f32 %v1129_v2, %v960_v1 }
 0x12d   : > { %v1559_v5 = vmax.f32 %v1495_v3, 0.0  ;;  %v1464_v12 = vadd.f32 %v2661_v63, %v1130_v7 }
 0x12f   : > { %v2351_v6 = vpack.c.bf16 %v1559_v5, %v1558_v4  ;;  %v1040_v8 = vpop.f32.mrf.mxu2  ;;  %v1528_v16 = vmax.f32 %v1464_v12, 0.0 }
 0x130   : > { %v1209_v9 = vpop.f32.mrf.mxu3 }
 0x131   : > { %2415 = vst [vmem:[%s2677_s8 + $0xb8] sm:$0xff] %v2351_v6   ;;  %v962_v10 = vpop.f32.mrf.mxu0  ;;  %v1210_v14 = vadd.f32 %v1209_v9, %v1040_v8 }
 0x132   : > { %v1131_v11 = vpop.f32.mrf.mxu1 }
 0x133   : > { %v1132_v13 = vadd.f32 %v1131_v11, %v962_v10  ;;  %v1496_v20 = vadd.f32 %v2661_v63, %v1210_v14 }
 0x135   : > { %v1465_v15 = vadd.f32 %v2661_v63, %v1132_v13  ;;  %v1560_v26 = vmax.f32 %v1496_v20, 0.0 }
 0x137   : > { %v1529_v17 = vmax.f32 %v1465_v15, 0.0  ;;  %v1042_v18 = vpop.f32.mrf.mxu2 }
 0x138   : > { %v1211_v19 = vpop.f32.mrf.mxu3 }
 0x139   : > { %v2276_v21 = vpack.c.bf16 %v1529_v17, %v1528_v16  ;;  %v1212_v22 = vadd.f32 %v1211_v19, %v1042_v18  ;;  %v965_v23 = vpop.f32.mrf.mxu0 }
 0x13a   : > { %v1134_v24 = vpop.f32.mrf.mxu1 }
 0x13b   : > { %2400 = vst [vmem:[%s2677_s8 + $0x40] sm:$0xff] %v2276_v21   ;;  %v1497_v25 = vadd.f32 %v2661_v63, %v1212_v22  ;;  %v1135_v29 = vadd.f32 %v1134_v24, %v965_v23 }
 0x13d   : > { %v1561_v27 = vmax.f32 %v1497_v25, 0.0  ;;  %v1466_v34 = vadd.f32 %v2661_v63, %v1135_v29 }
 0x13f   : > { %v2356_v28 = vpack.c.bf16 %v1561_v27, %v1560_v26  ;;  %v1045_v30 = vpop.f32.mrf.mxu2  ;;  %v1530_v38 = vmax.f32 %v1466_v34, 0.0 }
 0x140   : > { %v1214_v31 = vpop.f32.mrf.mxu3 }
 0x141   : > { %2416 = vst [vmem:[%s2677_s8 + $0xc0] sm:$0xff] %v2356_v28   ;;  %v967_v32 = vpop.f32.mrf.mxu0  ;;  %v1215_v36 = vadd.f32 %v1214_v31, %v1045_v30 }
 0x142   : > { %v1136_v33 = vpop.f32.mrf.mxu1 }
 0x143   : > { %v1137_v35 = vadd.f32 %v1136_v33, %v967_v32  ;;  %v1498_v42 = vadd.f32 %v2661_v63, %v1215_v36 }
 0x145   : > { %v1467_v37 = vadd.f32 %v2661_v63, %v1137_v35  ;;  %v1562_v48 = vmax.f32 %v1498_v42, 0.0 }
 0x147   : > { %v1531_v39 = vmax.f32 %v1467_v37, 0.0  ;;  %v1047_v40 = vpop.f32.mrf.mxu2 }
 0x148   : > { %v1216_v41 = vpop.f32.mrf.mxu3 }
 0x149   : > { %v2281_v43 = vpack.c.bf16 %v1531_v39, %v1530_v38  ;;  %v1217_v44 = vadd.f32 %v1216_v41, %v1047_v40  ;;  %v970_v45 = vpop.f32.mrf.mxu0 }
 0x14a   : > { %v1139_v46 = vpop.f32.mrf.mxu1 }
 0x14b   : > { %2401 = vst [vmem:[%s2677_s8 + $0x48] sm:$0xff] %v2281_v43   ;;  %v1499_v47 = vadd.f32 %v2661_v63, %v1217_v44  ;;  %v1140_v51 = vadd.f32 %v1139_v46, %v970_v45 }
 0x14d   : > { %v1563_v49 = vmax.f32 %v1499_v47, 0.0  ;;  %v1468_v56 = vadd.f32 %v2661_v63, %v1140_v51 }
 0x14f   : > { %v2361_v50 = vpack.c.bf16 %v1563_v49, %v1562_v48  ;;  %v1050_v52 = vpop.f32.mrf.mxu2  ;;  %v1532_v60 = vmax.f32 %v1468_v56, 0.0 }
 0x150   : > { %v1219_v53 = vpop.f32.mrf.mxu3 }
 0x151   : > { %2417 = vst [vmem:[%s2677_s8 + $0xc8] sm:$0xff] %v2361_v50   ;;  %v972_v54 = vpop.f32.mrf.mxu0  ;;  %v1220_v58 = vadd.f32 %v1219_v53, %v1050_v52 }
 0x152   : > { %v1141_v55 = vpop.f32.mrf.mxu1 }
 0x153   : > { %v1142_v57 = vadd.f32 %v1141_v55, %v972_v54  ;;  %v1500_v1 = vadd.f32 %v2661_v63, %v1220_v58 }
 0x155   : > { %v1469_v59 = vadd.f32 %v2661_v63, %v1142_v57  ;;  %v1564_v7 = vmax.f32 %v1500_v1, 0.0 }
 0x157   : > { %v1533_v61 = vmax.f32 %v1469_v59, 0.0  ;;  %v1052_v62 = vpop.f32.mrf.mxu2 }
 0x158   : > { %v1221_v0 = vpop.f32.mrf.mxu3 }
 0x159   : > { %v2286_v2 = vpack.c.bf16 %v1533_v61, %v1532_v60  ;;  %v1222_v3 = vadd.f32 %v1221_v0, %v1052_v62  ;;  %v975_v4 = vpop.f32.mrf.mxu0 }
 0x15a   : > { %v1144_v5 = vpop.f32.mrf.mxu1 }
 0x15b   : > { %2402 = vst [vmem:[%s2677_s8 + $0x50] sm:$0xff] %v2286_v2   ;;  %v1501_v6 = vadd.f32 %v2661_v63, %v1222_v3  ;;  %v1145_v10 = vadd.f32 %v1144_v5, %v975_v4 }
 0x15d   : > { %v1565_v8 = vmax.f32 %v1501_v6, 0.0  ;;  %v1470_v15 = vadd.f32 %v2661_v63, %v1145_v10 }
 0x15f   : > { %v2366_v9 = vpack.c.bf16 %v1565_v8, %v1564_v7  ;;  %v1055_v11 = vpop.f32.mrf.mxu2  ;;  %v1534_v19 = vmax.f32 %v1470_v15, 0.0 }
 0x160   : > { %v1224_v12 = vpop.f32.mrf.mxu3 }
 0x161   : > { %2418 = vst [vmem:[%s2677_s8 + $0xd0] sm:$0xff] %v2366_v9   ;;  %v977_v13 = vpop.f32.mrf.mxu0  ;;  %v1225_v17 = vadd.f32 %v1224_v12, %v1055_v11 }
 0x162   : > { %v1146_v14 = vpop.f32.mrf.mxu1 }
 0x163   : > { %v1147_v16 = vadd.f32 %v1146_v14, %v977_v13  ;;  %v1502_v23 = vadd.f32 %v2661_v63, %v1225_v17 }
 0x165   : > { %v1471_v18 = vadd.f32 %v2661_v63, %v1147_v16  ;;  %v1566_v29 = vmax.f32 %v1502_v23, 0.0 }
 0x167   : > { %v1535_v20 = vmax.f32 %v1471_v18, 0.0  ;;  %v1057_v21 = vpop.f32.mrf.mxu2 }
 0x168   : > { %v1226_v22 = vpop.f32.mrf.mxu3 }
 0x169   : > { %v2291_v24 = vpack.c.bf16 %v1535_v20, %v1534_v19  ;;  %v1227_v25 = vadd.f32 %v1226_v22, %v1057_v21  ;;  %v980_v26 = vpop.f32.mrf.mxu0 }
 0x16a   : > { %v1149_v27 = vpop.f32.mrf.mxu1 }
 0x16b   : > { %2403 = vst [vmem:[%s2677_s8 + $0x58] sm:$0xff] %v2291_v24   ;;  %v1503_v28 = vadd.f32 %v2661_v63, %v1227_v25  ;;  %v1150_v32 = vadd.f32 %v1149_v27, %v980_v26 }
 0x16d   : > { %v1567_v30 = vmax.f32 %v1503_v28, 0.0  ;;  %v1472_v37 = vadd.f32 %v2661_v63, %v1150_v32 }
 0x16f   : > { %v2371_v31 = vpack.c.bf16 %v1567_v30, %v1566_v29  ;;  %v1060_v33 = vpop.f32.mrf.mxu2  ;;  %v1536_v41 = vmax.f32 %v1472_v37, 0.0 }
 0x170   : > { %v1229_v34 = vpop.f32.mrf.mxu3 }
 0x171   : > { %2419 = vst [vmem:[%s2677_s8 + $0xd8] sm:$0xff] %v2371_v31   ;;  %v982_v35 = vpop.f32.mrf.mxu0  ;;  %v1230_v39 = vadd.f32 %v1229_v34, %v1060_v33 }
 0x172   : > { %v1151_v36 = vpop.f32.mrf.mxu1 }
 0x173   : > { %v1152_v38 = vadd.f32 %v1151_v36, %v982_v35  ;;  %v1504_v45 = vadd.f32 %v2661_v63, %v1230_v39 }
 0x175   : > { %v1473_v40 = vadd.f32 %v2661_v63, %v1152_v38  ;;  %v1568_v51 = vmax.f32 %v1504_v45, 0.0 }
 0x177   : > { %v1537_v42 = vmax.f32 %v1473_v40, 0.0  ;;  %v1062_v43 = vpop.f32.mrf.mxu2 }
 0x178   : > { %v1231_v44 = vpop.f32.mrf.mxu3 }
 0x179   : > { %v2296_v46 = vpack.c.bf16 %v1537_v42, %v1536_v41  ;;  %v1232_v47 = vadd.f32 %v1231_v44, %v1062_v43  ;;  %v985_v48 = vpop.f32.mrf.mxu0 }
 0x17a   : > { %v1154_v49 = vpop.f32.mrf.mxu1 }
 0x17b   : > { %2404 = vst [vmem:[%s2677_s8 + $0x60] sm:$0xff] %v2296_v46   ;;  %v1505_v50 = vadd.f32 %v2661_v63, %v1232_v47  ;;  %v1155_v54 = vadd.f32 %v1154_v49, %v985_v48 }
 0x17d   : > { %v1569_v52 = vmax.f32 %v1505_v50, 0.0  ;;  %v1474_v59 = vadd.f32 %v2661_v63, %v1155_v54 }
 0x17f   : > { %v2376_v53 = vpack.c.bf16 %v1569_v52, %v1568_v51  ;;  %v1065_v55 = vpop.f32.mrf.mxu2  ;;  %v1538_v0 = vmax.f32 %v1474_v59, 0.0 }
 0x180   : > { %v1234_v56 = vpop.f32.mrf.mxu3 }
 0x181   : > { %2420 = vst [vmem:[%s2677_s8 + $0xe0] sm:$0xff] %v2376_v53   ;;  %v987_v57 = vpop.f32.mrf.mxu0  ;;  %v1235_v61 = vadd.f32 %v1234_v56, %v1065_v55 }
 0x182   : > { %v1156_v58 = vpop.f32.mrf.mxu1 }
 0x183   : > { %v1157_v60 = vadd.f32 %v1156_v58, %v987_v57  ;;  %v1506_v4 = vadd.f32 %v2661_v63, %v1235_v61 }
 0x185   : > { %v1475_v62 = vadd.f32 %v2661_v63, %v1157_v60  ;;  %v1570_v10 = vmax.f32 %v1506_v4, 0.0 }
 0x187   : > { %v1539_v1 = vmax.f32 %v1475_v62, 0.0  ;;  %v1067_v2 = vpop.f32.mrf.mxu2 }
 0x188   : > { %v1236_v3 = vpop.f32.mrf.mxu3 }
 0x189   : > { %v2301_v5 = vpack.c.bf16 %v1539_v1, %v1538_v0  ;;  %v1237_v6 = vadd.f32 %v1236_v3, %v1067_v2  ;;  %v990_v7 = vpop.f32.mrf.mxu0 }
 0x18a   : > { %v1159_v8 = vpop.f32.mrf.mxu1 }
 0x18b   : > { %2405 = vst [vmem:[%s2677_s8 + $0x68] sm:$0xff] %v2301_v5   ;;  %v1507_v9 = vadd.f32 %v2661_v63, %v1237_v6  ;;  %v1160_v13 = vadd.f32 %v1159_v8, %v990_v7 }
 0x18d   : > { %v1571_v11 = vmax.f32 %v1507_v9, 0.0  ;;  %v1476_v18 = vadd.f32 %v2661_v63, %v1160_v13 }
 0x18f   : > { %v2381_v12 = vpack.c.bf16 %v1571_v11, %v1570_v10  ;;  %v1070_v14 = vpop.f32.mrf.mxu2  ;;  %v1540_v22 = vmax.f32 %v1476_v18, 0.0 }
 0x190   : > { %v1239_v15 = vpop.f32.mrf.mxu3 }
 0x191   : > { %2421 = vst [vmem:[%s2677_s8 + $0xe8] sm:$0xff] %v2381_v12   ;;  %v992_v16 = vpop.f32.mrf.mxu0  ;;  %v1240_v20 = vadd.f32 %v1239_v15, %v1070_v14 }
 0x192   : > { %v1161_v17 = vpop.f32.mrf.mxu1 }
 0x193   : > { %v1162_v19 = vadd.f32 %v1161_v17, %v992_v16  ;;  %v1508_v26 = vadd.f32 %v2661_v63, %v1240_v20 }
 0x195   : > { %v1477_v21 = vadd.f32 %v2661_v63, %v1162_v19  ;;  %v1572_v32 = vmax.f32 %v1508_v26, 0.0 }
 0x197   : > { %v1541_v23 = vmax.f32 %v1477_v21, 0.0  ;;  %v1072_v24 = vpop.f32.mrf.mxu2 }
 0x198   : > { %v1241_v25 = vpop.f32.mrf.mxu3 }
 0x199   : > { %v2306_v27 = vpack.c.bf16 %v1541_v23, %v1540_v22  ;;  %v1242_v28 = vadd.f32 %v1241_v25, %v1072_v24  ;;  %v995_v29 = vpop.f32.mrf.mxu0 }
 0x19a   : > { %v1164_v30 = vpop.f32.mrf.mxu1 }
 0x19b   : > { %2406 = vst [vmem:[%s2677_s8 + $0x70] sm:$0xff] %v2306_v27   ;;  %v1509_v31 = vadd.f32 %v2661_v63, %v1242_v28  ;;  %v1165_v35 = vadd.f32 %v1164_v30, %v995_v29 }
 0x19d   : > { %v1573_v33 = vmax.f32 %v1509_v31, 0.0  ;;  %v1478_v40 = vadd.f32 %v2661_v63, %v1165_v35 }
 0x19f   : > { %v2386_v34 = vpack.c.bf16 %v1573_v33, %v1572_v32  ;;  %v1075_v36 = vpop.f32.mrf.mxu2  ;;  %v1542_v44 = vmax.f32 %v1478_v40, 0.0 }
 0x1a0   : > { %v1244_v37 = vpop.f32.mrf.mxu3 }
 0x1a1   : > { %2422 = vst [vmem:[%s2677_s8 + $0xf0] sm:$0xff] %v2386_v34   ;;  %v997_v38 = vpop.f32.mrf.mxu0  ;;  %v1245_v42 = vadd.f32 %v1244_v37, %v1075_v36 }
 0x1a2   : > { %v1166_v39 = vpop.f32.mrf.mxu1 }
 0x1a3   : > { %v1167_v41 = vadd.f32 %v1166_v39, %v997_v38  ;;  %v1510_v48 = vadd.f32 %v2661_v63, %v1245_v42 }
 0x1a5   : > { %v1479_v43 = vadd.f32 %v2661_v63, %v1167_v41  ;;  %v1574_v52 = vmax.f32 %v1510_v48, 0.0 }
 0x1a7   : > { %v1543_v45 = vmax.f32 %v1479_v43, 0.0  ;;  %v1077_v46 = vpop.f32.mrf.mxu2 }
 0x1a8   : > { %v1246_v47 = vpop.f32.mrf.mxu3 }
 0x1a9   : > { %v2311_v49 = vpack.c.bf16 %v1543_v45, %v1542_v44  ;;  %v1247_v50 = vadd.f32 %v1246_v47, %v1077_v46 }
 0x1ab   : > { %2407 = vst [vmem:[%s2677_s8 + $0x78] sm:$0xff] %v2311_v49   ;;  %v1511_v51 = vadd.f32 %v2661_v63, %v1247_v50 }
 0x1ad   : > { %v1575_v53 = vmax.f32 %v1511_v51, 0.0 }
 0x1af   : > { %v2391_v54 = vpack.c.bf16 %v1575_v53, %v1574_v52 }
 0x1b1   : > { %2423 = vst [vmem:[%s2677_s8 + $0xf8] sm:$0xff] %v2391_v54  }
 0x1b2 PF: > { %s13_s14 = sadd.s32 1, %s2487_s14   ;;  %s2834_s12 = smov %s2483_s13 }
 0x1b3   : > { %p10_p5 = scmp.ge.s32.totalorder %s13_s14, 6   ;;  %s2835_s13 = smov %s2837_s15 }
 0x1b5   :  { %12 = sbr.rel (!%p10_p5) target bundleno = 2 (0x2), region = 76 }

// kernel: _lambda_.105
= control target key start
LH: loop header
LB: loop body
LE: loop exit
PB: predicated region body
PF: predicated region fallthrough
CT: control target
= control target key end

     0   :  { %s1239_s12 = smov 0   ;;  %s1241_s13 = smov 0   ;;  %s1379_s0 = inlined_call_operand.vmem [shape: bf16[512,128], index: 0, kind: input, shape index: {}]   ;;  %s1380_s1 = inlined_call_operand.vmem [shape: bf16[128,128], index: 1, kind: input, shape index: {}]   ;;  %s1381_s2 = inlined_call_operand.vmem [shape: f32[1,128], index: 2, kind: input, shape index: {}]   ;;  %s1382_s3 = inlined_call_operand.vmem [shape: bf16[512,128], index: 3, kind: output, shape index: {}]  }
   0x1   :  { %s1243_s14 = smov 0  }
   0x2 LB: > { %s32_s15 = sadd.s32 1, %s1213_s13  ;;  %p924_p0 = scmp.ge.s32.totalorder %s1217_s14, 1  ;;  %s1217_s14 = sphi %s1243_s14, %s13_s14   ;;  %s1213_s13 = sphi %s1241_s13, %s1384_s13   ;;  %s1209_s12 = sphi %s1239_s12, %s1383_s12  }
   0x3   : > { %p34_p1 = scmp.ge.s32.totalorder %s32_s15, 2  ;;  %p188_p2 = scmp.lt.s32.totalorder %s1217_s14, 3 }
   0x5   : > { %s1386_s15 = smov (%p34_p1, %s32_s15), 0  ;;  %p189_p3 = pnand %p924_p0, %p188_p2 }
   0x6   : > { %s925_s24 = sshll.u32 (!%p189_p3), %s1209_s12, 5 }
   0x7   : > { %192 = sbr.rel (%p189_p3) target bundleno = 239 (0xef), region = 32  ;;  %p230_p4 = scmp.lt.s32.totalorder (!%p189_p3), %s925_s24, 63 }
   0xc   : > { %v1050_v0 = vld [vmem:[%s1380_s1 + $0x38] sm:$0xff]  ;;  %v1049_v1 = vld [vmem:[%s1380_s1 + $0x30] sm:$0xff]  ;;  %v1048_v2 = vld [vmem:[%s1380_s1 + $0x28] sm:$0xff]  ;;  %s1388_s24 = smov (!%p230_p4, %s925_s24), 63 }
   0xd   : > { %519 = vmatpush.bf16.msra.mxu0 %v1050_v0  ;;  %1146 = vmatpush.bf16.msra.mxu1 %v1050_v0  ;;  %v1047_v3 = vld [vmem:[%s1380_s1 + $0x20] sm:$0xff]  ;;  %v1046_v4 = vld [vmem:[%s1380_s1 + $0x18] sm:$0xff]  ;;  %v1045_v5 = vld [vmem:[%s1380_s1 + $0x10] sm:$0xff]  ;;  %s926_s4 = sshll.u32 %s1388_s24, 2 }
   0xe   : > { %1147 = vmatpush.bf16.msra.mxu2 %v1050_v0  ;;  %1148 = vmatpush.bf16.msra.mxu3 %v1050_v0  ;;  %v1044_v6 = vld [vmem:[%s1380_s1 + $0x8] sm:$0xff]  ;;  %v1043_v7 = vld [vmem:[%s1380_s1] sm:$0xff]  ;;  %s1292_s9 = scalar_lea.vmem %s1379_s0, %s926_s4  ;;  %s1324_s17 = scalar_lea.vmem %s1382_s3, %s926_s4 }
   0xf   : > { %v1027_v8 = vld [vmem:[%s1292_s9] sm:$0xff]  ;;  %v1028_v12 = vld [vmem:[%s1292_s9 + $0x8] sm:$0xff]  ;;  %v1029_v16 = vld [vmem:[%s1292_s9 + $0x10] sm:$0xff] }
  0x10   : > { %v1031_v9 = vld [vmem:[%s1292_s9 + $0x20] sm:$0xff]  ;;  %v1032_v13 = vld [vmem:[%s1292_s9 + $0x28] sm:$0xff]  ;;  %v1033_v17 = vld [vmem:[%s1292_s9 + $0x30] sm:$0xff] }
  0x11   : > { %520 = vmatpush.bf16.msra.mxu0 %v1049_v1  ;;  %1149 = vmatpush.bf16.msra.mxu1 %v1049_v1  ;;  %v1035_v10 = vld [vmem:[%s1292_s9 + $0x40] sm:$0xff]  ;;  %v1036_v14 = vld [vmem:[%s1292_s9 + $0x48] sm:$0xff]  ;;  %v1037_v18 = vld [vmem:[%s1292_s9 + $0x50] sm:$0xff] }
  0x12   : > { %1150 = vmatpush.bf16.msra.mxu2 %v1049_v1  ;;  %1151 = vmatpush.bf16.msra.mxu3 %v1049_v1  ;;  %v1039_v11 = vld [vmem:[%s1292_s9 + $0x60] sm:$0xff]  ;;  %v1040_v15 = vld [vmem:[%s1292_s9 + $0x68] sm:$0xff]  ;;  %v1041_v19 = vld [vmem:[%s1292_s9 + $0x70] sm:$0xff] }
  0x13   : > { %v1030_v20 = vld [vmem:[%s1292_s9 + $0x18] sm:$0xff]  ;;  %v1313_v26 = vld [vmem:[%s1381_s2] ss:$0 sm:$0xff] }
  0x14   : > { %v1034_v21 = vld [vmem:[%s1292_s9 + $0x38] sm:$0xff] }
  0x15   : > { %521 = vmatpush.bf16.msra.mxu0 %v1048_v2  ;;  %1152 = vmatpush.bf16.msra.mxu1 %v1048_v2  ;;  %v1038_v22 = vld [vmem:[%s1292_s9 + $0x58] sm:$0xff] }
  0x16   : > { %1153 = vmatpush.bf16.msra.mxu2 %v1048_v2  ;;  %1154 = vmatpush.bf16.msra.mxu3 %v1048_v2  ;;  %v1042_v23 = vld [vmem:[%s1292_s9 + $0x78] sm:$0xff] }
  0x19   : > { %522 = vmatpush.bf16.msra.mxu0 %v1047_v3  ;;  %1155 = vmatpush.bf16.msra.mxu1 %v1047_v3 }
  0x1a   : > { %1156 = vmatpush.bf16.msra.mxu2 %v1047_v3  ;;  %1157 = vmatpush.bf16.msra.mxu3 %v1047_v3 }
  0x1d   : > { %523 = vmatpush.bf16.msra.mxu0 %v1046_v4  ;;  %1158 = vmatpush.bf16.msra.mxu1 %v1046_v4 }
  0x1e   : > { %1159 = vmatpush.bf16.msra.mxu2 %v1046_v4  ;;  %1160 = vmatpush.bf16.msra.mxu3 %v1046_v4 }
  0x21   : > { %524 = vmatpush.bf16.msra.mxu0 %v1045_v5  ;;  %1161 = vmatpush.bf16.msra.mxu1 %v1045_v5 }
  0x22   : > { %1162 = vmatpush.bf16.msra.mxu2 %v1045_v5  ;;  %1163 = vmatpush.bf16.msra.mxu3 %v1045_v5 }
  0x25   : > { %525 = vmatpush.bf16.msra.mxu0 %v1044_v6  ;;  %1164 = vmatpush.bf16.msra.mxu1 %v1044_v6 }
  0x26   : > { %1165 = vmatpush.bf16.msra.mxu2 %v1044_v6  ;;  %1166 = vmatpush.bf16.msra.mxu3 %v1044_v6 }
  0x29   : > { %526 = vmatpush.bf16.msra.mxu0 %v1043_v7  ;;  %1167 = vmatpush.bf16.msra.mxu1 %v1043_v7 }
  0x2a   : > { %1168 = vmatpush.bf16.msra.mxu2 %v1043_v7  ;;  %1169 = vmatpush.bf16.msra.mxu3 %v1043_v7 }
  0x2c   : > { %527 = vmatmul.bf16.vlgmr.msra.gmra.mxu0 %v1027_v8  ;;  %547 = vmatmul.bf16.vlgmr.msra.gmra.mxu1 %v1031_v9 }
  0x2d   : > { %567 = vmatmul.bf16.vlgmr.msra.gmra.mxu2 %v1035_v10  ;;  %587 = vmatmul.bf16.vlgmr.msra.gmra.mxu3 %v1039_v11 }
  0x3c   : > { %532 = vmatmul.bf16.gmra.mxu0 %v1028_v12  ;;  %552 = vmatmul.bf16.gmra.mxu1 %v1032_v13 }
  0x3d   : > { %572 = vmatmul.bf16.gmra.mxu2 %v1036_v14  ;;  %592 = vmatmul.bf16.gmra.mxu3 %v1040_v15 }
  0x4c   : > { %537 = vmatmul.bf16.gmra.mxu0 %v1029_v16  ;;  %557 = vmatmul.bf16.gmra.mxu1 %v1033_v17 }
  0x4d   : > { %577 = vmatmul.bf16.gmra.mxu2 %v1037_v18  ;;  %597 = vmatmul.bf16.gmra.mxu3 %v1041_v19 }
  0x5c   : > { %542 = vmatmul.bf16.gmra.mxu0 %v1030_v20  ;;  %562 = vmatmul.bf16.gmra.mxu1 %v1034_v21 }
  0x5d   : > { %582 = vmatmul.bf16.gmra.mxu2 %v1038_v22  ;;  %602 = vmatmul.bf16.gmra.mxu3 %v1042_v23 }
  0xa9   : > { %v528_v24 = vpop.f32.mrf.mxu0  ;;  %v548_v25 = vpop.f32.mrf.mxu1 }
  0xaa   : > { %v711_v31 = vadd.f32 %v1313_v26, %v528_v24  ;;  %v719_v32 = vadd.f32 %v1313_v26, %v548_v25 }
  0xb0   : > { %v568_v27 = vpop.f32.mrf.mxu2  ;;  %v588_v28 = vpop.f32.mrf.mxu3 }
  0xb1   : > { %v530_v29 = vpop.f32.mrf.mxu0  ;;  %v550_v30 = vpop.f32.mrf.mxu1  ;;  %v727_v39 = vadd.f32 %v1313_v26, %v568_v27  ;;  %v735_v40 = vadd.f32 %v1313_v26, %v588_v28 }
  0xb2   : > { %v712_v33 = vadd.f32 %v1313_v26, %v530_v29  ;;  %v720_v34 = vadd.f32 %v1313_v26, %v550_v30 }
  0xb4   : > { %v1054_v35 = vpack.c.bf16 %v712_v33, %v711_v31  ;;  %v1074_v36 = vpack.c.bf16 %v720_v34, %v719_v32 }
  0xb6   : > { %1055 = vst [vmem:[%s1324_s17] sm:$0xff] %v1054_v35  }
  0xb7   : > { %1134 = vst [vmem:[%s1324_s17 + $0x20] sm:$0xff] %v1074_v36  }
  0xb8   : > { %v570_v37 = vpop.f32.mrf.mxu2  ;;  %v590_v38 = vpop.f32.mrf.mxu3 }
  0xb9   : > { %v728_v41 = vadd.f32 %v1313_v26, %v570_v37  ;;  %v736_v42 = vadd.f32 %v1313_v26, %v590_v38  ;;  %v533_v43 = vpop.f32.mrf.mxu0  ;;  %v553_v44 = vpop.f32.mrf.mxu1 }
  0xba   : > { %v713_v51 = vadd.f32 %v1313_v26, %v533_v43  ;;  %v721_v52 = vadd.f32 %v1313_v26, %v553_v44 }
  0xbb   : > { %v1094_v45 = vpack.c.bf16 %v728_v41, %v727_v39  ;;  %v1114_v46 = vpack.c.bf16 %v736_v42, %v735_v40 }
  0xbd   : > { %1138 = vst [vmem:[%s1324_s17 + $0x40] sm:$0xff] %v1094_v45  }
  0xbe   : > { %1142 = vst [vmem:[%s1324_s17 + $0x60] sm:$0xff] %v1114_v46  }
  0xc0   : > { %v573_v47 = vpop.f32.mrf.mxu2  ;;  %v593_v48 = vpop.f32.mrf.mxu3 }
  0xc1   : > { %v535_v49 = vpop.f32.mrf.mxu0  ;;  %v555_v50 = vpop.f32.mrf.mxu1  ;;  %v729_v59 = vadd.f32 %v1313_v26, %v573_v47  ;;  %v737_v60 = vadd.f32 %v1313_v26, %v593_v48 }
  0xc2   : > { %v714_v53 = vadd.f32 %v1313_v26, %v535_v49  ;;  %v722_v54 = vadd.f32 %v1313_v26, %v555_v50 }
  0xc4   : > { %v1059_v55 = vpack.c.bf16 %v714_v53, %v713_v51  ;;  %v1079_v56 = vpack.c.bf16 %v722_v54, %v721_v52 }
  0xc6   : > { %1131 = vst [vmem:[%s1324_s17 + $0x8] sm:$0xff] %v1059_v55  }
  0xc7   : > { %1135 = vst [vmem:[%s1324_s17 + $0x28] sm:$0xff] %v1079_v56  }
  0xc8   : > { %v575_v57 = vpop.f32.mrf.mxu2  ;;  %v595_v58 = vpop.f32.mrf.mxu3 }
  0xc9   : > { %v730_v61 = vadd.f32 %v1313_v26, %v575_v57  ;;  %v738_v62 = vadd.f32 %v1313_v26, %v595_v58  ;;  %v538_v63 = vpop.f32.mrf.mxu0  ;;  %v558_v0 = vpop.f32.mrf.mxu1 }
  0xca   : > { %v715_v7 = vadd.f32 %v1313_v26, %v538_v63  ;;  %v723_v8 = vadd.f32 %v1313_v26, %v558_v0 }
  0xcb   : > { %v1099_v1 = vpack.c.bf16 %v730_v61, %v729_v59  ;;  %v1119_v2 = vpack.c.bf16 %v738_v62, %v737_v60 }
  0xcd   : > { %1139 = vst [vmem:[%s1324_s17 + $0x48] sm:$0xff] %v1099_v1  }
  0xce   : > { %1143 = vst [vmem:[%s1324_s17 + $0x68] sm:$0xff] %v1119_v2  }
  0xd0   : > { %v578_v3 = vpop.f32.mrf.mxu2  ;;  %v598_v4 = vpop.f32.mrf.mxu3 }
  0xd1   : > { %v540_v5 = vpop.f32.mrf.mxu0  ;;  %v560_v6 = vpop.f32.mrf.mxu1  ;;  %v731_v15 = vadd.f32 %v1313_v26, %v578_v3  ;;  %v739_v16 = vadd.f32 %v1313_v26, %v598_v4 }
  0xd2   : > { %v716_v9 = vadd.f32 %v1313_v26, %v540_v5  ;;  %v724_v10 = vadd.f32 %v1313_v26, %v560_v6 }
  0xd4   : > { %v1064_v11 = vpack.c.bf16 %v716_v9, %v715_v7  ;;  %v1084_v12 = vpack.c.bf16 %v724_v10, %v723_v8 }
  0xd6   : > { %1132 = vst [vmem:[%s1324_s17 + $0x10] sm:$0xff] %v1064_v11  }
  0xd7   : > { %1136 = vst [vmem:[%s1324_s17 + $0x30] sm:$0xff] %v1084_v12  }
  0xd8   : > { %v580_v13 = vpop.f32.mrf.mxu2  ;;  %v600_v14 = vpop.f32.mrf.mxu3 }
  0xd9   : > { %v732_v17 = vadd.f32 %v1313_v26, %v580_v13  ;;  %v740_v18 = vadd.f32 %v1313_v26, %v600_v14  ;;  %v543_v19 = vpop.f32.mrf.mxu0  ;;  %v563_v20 = vpop.f32.mrf.mxu1 }
  0xda   : > { %v717_v28 = vadd.f32 %v1313_v26, %v543_v19  ;;  %v725_v29 = vadd.f32 %v1313_v26, %v563_v20 }
  0xdb   : > { %v1104_v21 = vpack.c.bf16 %v732_v17, %v731_v15  ;;  %v1124_v22 = vpack.c.bf16 %v740_v18, %v739_v16 }
  0xdd   : > { %1140 = vst [vmem:[%s1324_s17 + $0x50] sm:$0xff] %v1104_v21  }
  0xde   : > { %1144 = vst [vmem:[%s1324_s17 + $0x70] sm:$0xff] %v1124_v22  }
  0xe0   : > { %v583_v23 = vpop.f32.mrf.mxu2  ;;  %v603_v24 = vpop.f32.mrf.mxu3 }
  0xe1   : > { %v545_v25 = vpop.f32.mrf.mxu0  ;;  %v565_v27 = vpop.f32.mrf.mxu1  ;;  %v733_v36 = vadd.f32 %v1313_v26, %v583_v23  ;;  %v741_v37 = vadd.f32 %v1313_v26, %v603_v24 }
  0xe2   : > { %v718_v30 = vadd.f32 %v1313_v26, %v545_v25  ;;  %v726_v31 = vadd.f32 %v1313_v26, %v565_v27 }
  0xe4   : > { %v1069_v32 = vpack.c.bf16 %v718_v30, %v717_v28  ;;  %v1089_v33 = vpack.c.bf16 %v726_v31, %v725_v29 }
  0xe6   : > { %1133 = vst [vmem:[%s1324_s17 + $0x18] sm:$0xff] %v1069_v32  }
  0xe7   : > { %1137 = vst [vmem:[%s1324_s17 + $0x38] sm:$0xff] %v1089_v33  }
  0xe8   : > { %v585_v34 = vpop.f32.mrf.mxu2  ;;  %v605_v35 = vpop.f32.mrf.mxu3 }
  0xe9   : > { %v734_v38 = vadd.f32 %v1313_v26, %v585_v34  ;;  %v742_v39 = vadd.f32 %v1313_v26, %v605_v35 }
  0xeb   : > { %v1109_v40 = vpack.c.bf16 %v734_v38, %v733_v36  ;;  %v1129_v41 = vpack.c.bf16 %v742_v39, %v741_v37 }
  0xed   : > { %1141 = vst [vmem:[%s1324_s17 + $0x58] sm:$0xff] %v1109_v40  }
  0xee   : > { %1145 = vst [vmem:[%s1324_s17 + $0x78] sm:$0xff] %v1129_v41  }
  0xef PF: > { %s13_s14 = sadd.s32 1, %s1217_s14   ;;  %s1383_s12 = smov %s1213_s13 }
  0xf0   : > { %p10_p5 = scmp.ge.s32.totalorder %s13_s14, 4   ;;  %s1384_s13 = smov %s1386_s15 }
  0xf2   :  { %12 = sbr.rel (!%p10_p5) target bundleno = 2 (0x2), region = 76 }

// kernel: _lambda_.106
= control target key start
LH: loop header
LB: loop body
LE: loop exit
PB: predicated region body
PF: predicated region fallthrough
CT: control target
= control target key end

     0   :  { %s1271_s12 = smov 0   ;;  %s1273_s13 = smov 0   ;;  %s1411_s0 = inlined_call_operand.vmem [shape: bf16[512,128], index: 0, kind: input, shape index: {}]   ;;  %s1412_s1 = inlined_call_operand.vmem [shape: bf16[128,128], index: 1, kind: input, shape index: {}]   ;;  %s1413_s2 = inlined_call_operand.vmem [shape: f32[1,128], index: 2, kind: input, shape index: {}]   ;;  %s1414_s3 = inlined_call_operand.vmem [shape: bf16[512,128], index: 3, kind: output, shape index: {}]  }
   0x1   :  { %s1275_s14 = smov 0  }
   0x2 LB: > { %s32_s15 = sadd.s32 1, %s1245_s13  ;;  %p956_p0 = scmp.ge.s32.totalorder %s1249_s14, 1  ;;  %s1249_s14 = sphi %s1275_s14, %s13_s14   ;;  %s1245_s13 = sphi %s1273_s13, %s1416_s13   ;;  %s1241_s12 = sphi %s1271_s12, %s1415_s12  }
   0x3   : > { %p34_p1 = scmp.ge.s32.totalorder %s32_s15, 2  ;;  %p188_p2 = scmp.lt.s32.totalorder %s1249_s14, 3 }
   0x5   : > { %s1418_s15 = smov (%p34_p1, %s32_s15), 0  ;;  %p189_p3 = pnand %p956_p0, %p188_p2 }
   0x6   : > { %s957_s24 = sshll.u32 (!%p189_p3), %s1241_s12, 5 }
   0x7   : > { %192 = sbr.rel (%p189_p3) target bundleno = 241 (0xf1), region = 32  ;;  %p230_p4 = scmp.lt.s32.totalorder (!%p189_p3), %s957_s24, 63 }
   0xc   : > { %v1082_v0 = vld [vmem:[%s1412_s1 + $0x38] sm:$0xff]  ;;  %v1081_v1 = vld [vmem:[%s1412_s1 + $0x30] sm:$0xff]  ;;  %v1080_v2 = vld [vmem:[%s1412_s1 + $0x28] sm:$0xff]  ;;  %s1420_s24 = smov (!%p230_p4, %s957_s24), 63 }
   0xd   : > { %519 = vmatpush.bf16.msra.mxu0 %v1082_v0  ;;  %1178 = vmatpush.bf16.msra.mxu1 %v1082_v0  ;;  %v1079_v3 = vld [vmem:[%s1412_s1 + $0x20] sm:$0xff]  ;;  %v1078_v4 = vld [vmem:[%s1412_s1 + $0x18] sm:$0xff]  ;;  %v1077_v5 = vld [vmem:[%s1412_s1 + $0x10] sm:$0xff]  ;;  %s958_s4 = sshll.u32 %s1420_s24, 2 }
   0xe   : > { %1179 = vmatpush.bf16.msra.mxu2 %v1082_v0  ;;  %1180 = vmatpush.bf16.msra.mxu3 %v1082_v0  ;;  %v1076_v6 = vld [vmem:[%s1412_s1 + $0x8] sm:$0xff]  ;;  %v1075_v7 = vld [vmem:[%s1412_s1] sm:$0xff]  ;;  %s1324_s9 = scalar_lea.vmem %s1411_s0, %s958_s4  ;;  %s1356_s17 = scalar_lea.vmem %s1414_s3, %s958_s4 }
   0xf   : > { %v1059_v8 = vld [vmem:[%s1324_s9] sm:$0xff]  ;;  %v1060_v12 = vld [vmem:[%s1324_s9 + $0x8] sm:$0xff]  ;;  %v1061_v16 = vld [vmem:[%s1324_s9 + $0x10] sm:$0xff] }
  0x10   : > { %v1063_v9 = vld [vmem:[%s1324_s9 + $0x20] sm:$0xff]  ;;  %v1064_v13 = vld [vmem:[%s1324_s9 + $0x28] sm:$0xff]  ;;  %v1065_v17 = vld [vmem:[%s1324_s9 + $0x30] sm:$0xff] }
  0x11   : > { %520 = vmatpush.bf16.msra.mxu0 %v1081_v1  ;;  %1181 = vmatpush.bf16.msra.mxu1 %v1081_v1  ;;  %v1067_v10 = vld [vmem:[%s1324_s9 + $0x40] sm:$0xff]  ;;  %v1068_v14 = vld [vmem:[%s1324_s9 + $0x48] sm:$0xff]  ;;  %v1069_v18 = vld [vmem:[%s1324_s9 + $0x50] sm:$0xff] }
  0x12   : > { %1182 = vmatpush.bf16.msra.mxu2 %v1081_v1  ;;  %1183 = vmatpush.bf16.msra.mxu3 %v1081_v1  ;;  %v1071_v11 = vld [vmem:[%s1324_s9 + $0x60] sm:$0xff]  ;;  %v1072_v15 = vld [vmem:[%s1324_s9 + $0x68] sm:$0xff]  ;;  %v1073_v19 = vld [vmem:[%s1324_s9 + $0x70] sm:$0xff] }
  0x13   : > { %v1062_v20 = vld [vmem:[%s1324_s9 + $0x18] sm:$0xff]  ;;  %v1345_v26 = vld [vmem:[%s1413_s2] ss:$0 sm:$0xff] }
  0x14   : > { %v1066_v21 = vld [vmem:[%s1324_s9 + $0x38] sm:$0xff] }
  0x15   : > { %521 = vmatpush.bf16.msra.mxu0 %v1080_v2  ;;  %1184 = vmatpush.bf16.msra.mxu1 %v1080_v2  ;;  %v1070_v22 = vld [vmem:[%s1324_s9 + $0x58] sm:$0xff] }
  0x16   : > { %1185 = vmatpush.bf16.msra.mxu2 %v1080_v2  ;;  %1186 = vmatpush.bf16.msra.mxu3 %v1080_v2  ;;  %v1074_v23 = vld [vmem:[%s1324_s9 + $0x78] sm:$0xff] }
  0x19   : > { %522 = vmatpush.bf16.msra.mxu0 %v1079_v3  ;;  %1187 = vmatpush.bf16.msra.mxu1 %v1079_v3 }
  0x1a   : > { %1188 = vmatpush.bf16.msra.mxu2 %v1079_v3  ;;  %1189 = vmatpush.bf16.msra.mxu3 %v1079_v3 }
  0x1d   : > { %523 = vmatpush.bf16.msra.mxu0 %v1078_v4  ;;  %1190 = vmatpush.bf16.msra.mxu1 %v1078_v4 }
  0x1e   : > { %1191 = vmatpush.bf16.msra.mxu2 %v1078_v4  ;;  %1192 = vmatpush.bf16.msra.mxu3 %v1078_v4 }
  0x21   : > { %524 = vmatpush.bf16.msra.mxu0 %v1077_v5  ;;  %1193 = vmatpush.bf16.msra.mxu1 %v1077_v5 }
  0x22   : > { %1194 = vmatpush.bf16.msra.mxu2 %v1077_v5  ;;  %1195 = vmatpush.bf16.msra.mxu3 %v1077_v5 }
  0x25   : > { %525 = vmatpush.bf16.msra.mxu0 %v1076_v6  ;;  %1196 = vmatpush.bf16.msra.mxu1 %v1076_v6 }
  0x26   : > { %1197 = vmatpush.bf16.msra.mxu2 %v1076_v6  ;;  %1198 = vmatpush.bf16.msra.mxu3 %v1076_v6 }
  0x29   : > { %526 = vmatpush.bf16.msra.mxu0 %v1075_v7  ;;  %1199 = vmatpush.bf16.msra.mxu1 %v1075_v7 }
  0x2a   : > { %1200 = vmatpush.bf16.msra.mxu2 %v1075_v7  ;;  %1201 = vmatpush.bf16.msra.mxu3 %v1075_v7 }
  0x2c   : > { %527 = vmatmul.bf16.vlgmr.msra.gmra.mxu0 %v1059_v8  ;;  %547 = vmatmul.bf16.vlgmr.msra.gmra.mxu1 %v1063_v9 }
  0x2d   : > { %567 = vmatmul.bf16.vlgmr.msra.gmra.mxu2 %v1067_v10  ;;  %587 = vmatmul.bf16.vlgmr.msra.gmra.mxu3 %v1071_v11 }
  0x3c   : > { %532 = vmatmul.bf16.gmra.mxu0 %v1060_v12  ;;  %552 = vmatmul.bf16.gmra.mxu1 %v1064_v13 }
  0x3d   : > { %572 = vmatmul.bf16.gmra.mxu2 %v1068_v14  ;;  %592 = vmatmul.bf16.gmra.mxu3 %v1072_v15 }
  0x4c   : > { %537 = vmatmul.bf16.gmra.mxu0 %v1061_v16  ;;  %557 = vmatmul.bf16.gmra.mxu1 %v1065_v17 }
  0x4d   : > { %577 = vmatmul.bf16.gmra.mxu2 %v1069_v18  ;;  %597 = vmatmul.bf16.gmra.mxu3 %v1073_v19 }
  0x5c   : > { %542 = vmatmul.bf16.gmra.mxu0 %v1062_v20  ;;  %562 = vmatmul.bf16.gmra.mxu1 %v1066_v21 }
  0x5d   : > { %582 = vmatmul.bf16.gmra.mxu2 %v1070_v22  ;;  %602 = vmatmul.bf16.gmra.mxu3 %v1074_v23 }
  0xa9   : > { %v528_v24 = vpop.f32.mrf.mxu0  ;;  %v548_v25 = vpop.f32.mrf.mxu1 }
  0xaa   : > { %v711_v27 = vadd.f32 %v1345_v26, %v528_v24  ;;  %v719_v28 = vadd.f32 %v1345_v26, %v548_v25 }
  0xac   : > { %v743_v35 = vmax.f32 %v711_v27, 0.0  ;;  %v751_v36 = vmax.f32 %v719_v28, 0.0 }
  0xb0   : > { %v568_v29 = vpop.f32.mrf.mxu2  ;;  %v588_v30 = vpop.f32.mrf.mxu3 }
  0xb1   : > { %v530_v31 = vpop.f32.mrf.mxu0  ;;  %v550_v32 = vpop.f32.mrf.mxu1  ;;  %v727_v41 = vadd.f32 %v1345_v26, %v568_v29  ;;  %v735_v42 = vadd.f32 %v1345_v26, %v588_v30 }
  0xb2   : > { %v712_v33 = vadd.f32 %v1345_v26, %v530_v31  ;;  %v720_v34 = vadd.f32 %v1345_v26, %v550_v32 }
  0xb3   : > { %v759_v49 = vmax.f32 %v727_v41, 0.0  ;;  %v767_v50 = vmax.f32 %v735_v42, 0.0 }
  0xb4   : > { %v744_v37 = vmax.f32 %v712_v33, 0.0  ;;  %v752_v38 = vmax.f32 %v720_v34, 0.0 }
  0xb6   : > { %v1086_v39 = vpack.c.bf16 %v744_v37, %v743_v35  ;;  %v1106_v40 = vpack.c.bf16 %v752_v38, %v751_v36 }
  0xb8   : > { %1087 = vst [vmem:[%s1356_s17] sm:$0xff] %v1086_v39   ;;  %v570_v43 = vpop.f32.mrf.mxu2  ;;  %v590_v44 = vpop.f32.mrf.mxu3 }
  0xb9   : > { %1166 = vst [vmem:[%s1356_s17 + $0x20] sm:$0xff] %v1106_v40   ;;  %v728_v45 = vadd.f32 %v1345_v26, %v570_v43  ;;  %v736_v46 = vadd.f32 %v1345_v26, %v590_v44  ;;  %v533_v47 = vpop.f32.mrf.mxu0  ;;  %v553_v48 = vpop.f32.mrf.mxu1 }
  0xba   : > { %v713_v55 = vadd.f32 %v1345_v26, %v533_v47  ;;  %v721_v56 = vadd.f32 %v1345_v26, %v553_v48 }
  0xbb   : > { %v760_v51 = vmax.f32 %v728_v45, 0.0  ;;  %v768_v52 = vmax.f32 %v736_v46, 0.0 }
  0xbc   : > { %v745_v63 = vmax.f32 %v713_v55, 0.0  ;;  %v753_v0 = vmax.f32 %v721_v56, 0.0 }
  0xbd   : > { %v1126_v53 = vpack.c.bf16 %v760_v51, %v759_v49  ;;  %v1146_v54 = vpack.c.bf16 %v768_v52, %v767_v50 }
  0xbf   : > { %1170 = vst [vmem:[%s1356_s17 + $0x40] sm:$0xff] %v1126_v53  }
  0xc0   : > { %1174 = vst [vmem:[%s1356_s17 + $0x60] sm:$0xff] %v1146_v54   ;;  %v573_v57 = vpop.f32.mrf.mxu2  ;;  %v593_v58 = vpop.f32.mrf.mxu3 }
  0xc1   : > { %v535_v59 = vpop.f32.mrf.mxu0  ;;  %v555_v60 = vpop.f32.mrf.mxu1  ;;  %v729_v5 = vadd.f32 %v1345_v26, %v573_v57  ;;  %v737_v6 = vadd.f32 %v1345_v26, %v593_v58 }
  0xc2   : > { %v714_v61 = vadd.f32 %v1345_v26, %v535_v59  ;;  %v722_v62 = vadd.f32 %v1345_v26, %v555_v60 }
  0xc3   : > { %v761_v13 = vmax.f32 %v729_v5, 0.0  ;;  %v769_v14 = vmax.f32 %v737_v6, 0.0 }
  0xc4   : > { %v746_v1 = vmax.f32 %v714_v61, 0.0  ;;  %v754_v2 = vmax.f32 %v722_v62, 0.0 }
  0xc6   : > { %v1091_v3 = vpack.c.bf16 %v746_v1, %v745_v63  ;;  %v1111_v4 = vpack.c.bf16 %v754_v2, %v753_v0 }
  0xc8   : > { %1163 = vst [vmem:[%s1356_s17 + $0x8] sm:$0xff] %v1091_v3   ;;  %v575_v7 = vpop.f32.mrf.mxu2  ;;  %v595_v8 = vpop.f32.mrf.mxu3 }
  0xc9   : > { %1167 = vst [vmem:[%s1356_s17 + $0x28] sm:$0xff] %v1111_v4   ;;  %v730_v9 = vadd.f32 %v1345_v26, %v575_v7  ;;  %v738_v10 = vadd.f32 %v1345_v26, %v595_v8  ;;  %v538_v11 = vpop.f32.mrf.mxu0  ;;  %v558_v12 = vpop.f32.mrf.mxu1 }
  0xca   : > { %v715_v19 = vadd.f32 %v1345_v26, %v538_v11  ;;  %v723_v20 = vadd.f32 %v1345_v26, %v558_v12 }
  0xcb   : > { %v762_v15 = vmax.f32 %v730_v9, 0.0  ;;  %v770_v16 = vmax.f32 %v738_v10, 0.0 }
  0xcc   : > { %v747_v28 = vmax.f32 %v715_v19, 0.0  ;;  %v755_v29 = vmax.f32 %v723_v20, 0.0 }
  0xcd   : > { %v1131_v17 = vpack.c.bf16 %v762_v15, %v761_v13  ;;  %v1151_v18 = vpack.c.bf16 %v770_v16, %v769_v14 }
  0xcf   : > { %1171 = vst [vmem:[%s1356_s17 + $0x48] sm:$0xff] %v1131_v17  }
  0xd0   : > { %1175 = vst [vmem:[%s1356_s17 + $0x68] sm:$0xff] %v1151_v18   ;;  %v578_v21 = vpop.f32.mrf.mxu2  ;;  %v598_v22 = vpop.f32.mrf.mxu3 }
  0xd1   : > { %v540_v23 = vpop.f32.mrf.mxu0  ;;  %v560_v24 = vpop.f32.mrf.mxu1  ;;  %v731_v34 = vadd.f32 %v1345_v26, %v578_v21  ;;  %v739_v35 = vadd.f32 %v1345_v26, %v598_v22 }
  0xd2   : > { %v716_v25 = vadd.f32 %v1345_v26, %v540_v23  ;;  %v724_v27 = vadd.f32 %v1345_v26, %v560_v24 }
  0xd3   : > { %v763_v42 = vmax.f32 %v731_v34, 0.0  ;;  %v771_v43 = vmax.f32 %v739_v35, 0.0 }
  0xd4   : > { %v748_v30 = vmax.f32 %v716_v25, 0.0  ;;  %v756_v31 = vmax.f32 %v724_v27, 0.0 }
  0xd6   : > { %v1096_v32 = vpack.c.bf16 %v748_v30, %v747_v28  ;;  %v1116_v33 = vpack.c.bf16 %v756_v31, %v755_v29 }
  0xd8   : > { %1164 = vst [vmem:[%s1356_s17 + $0x10] sm:$0xff] %v1096_v32   ;;  %v580_v36 = vpop.f32.mrf.mxu2  ;;  %v600_v37 = vpop.f32.mrf.mxu3 }
  0xd9   : > { %1168 = vst [vmem:[%s1356_s17 + $0x30] sm:$0xff] %v1116_v33   ;;  %v732_v38 = vadd.f32 %v1345_v26, %v580_v36  ;;  %v740_v39 = vadd.f32 %v1345_v26, %v600_v37  ;;  %v543_v40 = vpop.f32.mrf.mxu0  ;;  %v563_v41 = vpop.f32.mrf.mxu1 }
  0xda   : > { %v717_v48 = vadd.f32 %v1345_v26, %v543_v40  ;;  %v725_v49 = vadd.f32 %v1345_v26, %v563_v41 }
  0xdb   : > { %v764_v44 = vmax.f32 %v732_v38, 0.0  ;;  %v772_v45 = vmax.f32 %v740_v39, 0.0 }
  0xdc   : > { %v749_v56 = vmax.f32 %v717_v48, 0.0  ;;  %v757_v57 = vmax.f32 %v725_v49, 0.0 }
  0xdd   : > { %v1136_v46 = vpack.c.bf16 %v764_v44, %v763_v42  ;;  %v1156_v47 = vpack.c.bf16 %v772_v45, %v771_v43 }
  0xdf   : > { %1172 = vst [vmem:[%s1356_s17 + $0x50] sm:$0xff] %v1136_v46  }
  0xe0   : > { %1176 = vst [vmem:[%s1356_s17 + $0x70] sm:$0xff] %v1156_v47   ;;  %v583_v50 = vpop.f32.mrf.mxu2  ;;  %v603_v51 = vpop.f32.mrf.mxu3 }
  0xe1   : > { %v545_v52 = vpop.f32.mrf.mxu0  ;;  %v565_v53 = vpop.f32.mrf.mxu1  ;;  %v733_v62 = vadd.f32 %v1345_v26, %v583_v50  ;;  %v741_v63 = vadd.f32 %v1345_v26, %v603_v51 }
  0xe2   : > { %v718_v54 = vadd.f32 %v1345_v26, %v545_v52  ;;  %v726_v55 = vadd.f32 %v1345_v26, %v565_v53 }
  0xe3   : > { %v765_v4 = vmax.f32 %v733_v62, 0.0  ;;  %v773_v5 = vmax.f32 %v741_v63, 0.0 }
  0xe4   : > { %v750_v58 = vmax.f32 %v718_v54, 0.0  ;;  %v758_v59 = vmax.f32 %v726_v55, 0.0 }
  0xe6   : > { %v1101_v60 = vpack.c.bf16 %v750_v58, %v749_v56  ;;  %v1121_v61 = vpack.c.bf16 %v758_v59, %v757_v57 }
  0xe8   : > { %1165 = vst [vmem:[%s1356_s17 + $0x18] sm:$0xff] %v1101_v60   ;;  %v585_v0 = vpop.f32.mrf.mxu2  ;;  %v605_v1 = vpop.f32.mrf.mxu3 }
  0xe9   : > { %1169 = vst [vmem:[%s1356_s17 + $0x38] sm:$0xff] %v1121_v61   ;;  %v734_v2 = vadd.f32 %v1345_v26, %v585_v0  ;;  %v742_v3 = vadd.f32 %v1345_v26, %v605_v1 }
  0xeb   : > { %v766_v6 = vmax.f32 %v734_v2, 0.0  ;;  %v774_v7 = vmax.f32 %v742_v3, 0.0 }
  0xed   : > { %v1141_v8 = vpack.c.bf16 %v766_v6, %v765_v4  ;;  %v1161_v9 = vpack.c.bf16 %v774_v7, %v773_v5 }
  0xef   : > { %1173 = vst [vmem:[%s1356_s17 + $0x58] sm:$0xff] %v1141_v8  }
  0xf0   : > { %1177 = vst [vmem:[%s1356_s17 + $0x78] sm:$0xff] %v1161_v9  }
  0xf1 PF: > { %s13_s14 = sadd.s32 1, %s1249_s14   ;;  %s1415_s12 = smov %s1245_s13 }
  0xf2   : > { %p10_p5 = scmp.ge.s32.totalorder %s13_s14, 4   ;;  %s1416_s13 = smov %s1418_s15 }
  0xf4   :  { %12 = sbr.rel (!%p10_p5) target bundleno = 2 (0x2), region = 76 }

// kernel: _lambda_.108
= control target key start
LH: loop header
LB: loop body
LE: loop exit
PB: predicated region body
PF: predicated region fallthrough
CT: control target
= control target key end

     0   :  { %s1528_s15 = smov 0   ;;  %s1530_s16 = smov 0   ;;  %s1687_s0 = inlined_call_operand.vmem [shape: bf16[512,128], index: 0, kind: input, shape index: {}]   ;;  %s1688_s1 = inlined_call_operand.vmem [shape: bf16[128,128], index: 1, kind: input, shape index: {}]   ;;  %s1689_s2 = inlined_call_operand.vmem [shape: f32[1,128], index: 2, kind: input, shape index: {}]   ;;  %s1690_s3 = inlined_call_operand.vmem [shape: bf16[512,128], index: 3, kind: input, shape index: {}]   ;;  %s1691_s4 = inlined_call_operand.vmem [shape: bf16[512,128], index: 4, kind: output, shape index: {}]  }
   0x1   :  { %s1532_s17 = smov 0  }
   0x2 LB: > { %s33_s18 = sadd.s32 1, %s1497_s16  ;;  %p1127_p0 = scmp.ge.s32.totalorder %s1501_s17, 1  ;;  %s1501_s17 = sphi %s1532_s17, %s14_s17   ;;  %s1497_s16 = sphi %s1530_s16, %s1693_s16   ;;  %s1493_s15 = sphi %s1528_s15, %s1692_s15  }
   0x3   : > { %p35_p1 = scmp.ge.s32.totalorder %s33_s18, 2  ;;  %p229_p2 = scmp.lt.s32.totalorder %s1501_s17, 3 }
   0x5   : > { %s1695_s18 = smov (%p35_p1, %s33_s18), 0  ;;  %p230_p3 = pnand %p1127_p0, %p229_p2 }
   0x6   : > { %s1128_s27 = sshll.u32 (!%p230_p3), %s1493_s15, 5 }
   0x7   : > { %233 = sbr.rel (%p230_p3) target bundleno = 243 (0xf3), region = 36  ;;  %p281_p4 = scmp.lt.s32.totalorder (!%p230_p3), %s1128_s27, 63 }
   0xc   : > { %v1255_v0 = vld [vmem:[%s1688_s1 + $0x38] sm:$0xff]  ;;  %v1254_v1 = vld [vmem:[%s1688_s1 + $0x30] sm:$0xff]  ;;  %v1253_v2 = vld [vmem:[%s1688_s1 + $0x28] sm:$0xff]  ;;  %s1697_s27 = smov (!%p281_p4, %s1128_s27), 63 }
   0xd   : > { %579 = vmatpush.bf16.msra.mxu0 %v1255_v0  ;;  %1430 = vmatpush.bf16.msra.mxu1 %v1255_v0  ;;  %v1252_v3 = vld [vmem:[%s1688_s1 + $0x20] sm:$0xff]  ;;  %v1251_v4 = vld [vmem:[%s1688_s1 + $0x18] sm:$0xff]  ;;  %v1250_v5 = vld [vmem:[%s1688_s1 + $0x10] sm:$0xff]  ;;  %s1570_s8 = sshll.u32 %s1697_s27, 2 }
   0xe   : > { %1431 = vmatpush.bf16.msra.mxu2 %v1255_v0  ;;  %1432 = vmatpush.bf16.msra.mxu3 %v1255_v0  ;;  %v1249_v6 = vld [vmem:[%s1688_s1 + $0x8] sm:$0xff]  ;;  %v1248_v7 = vld [vmem:[%s1688_s1] sm:$0xff]  ;;  %s1579_s13 = scalar_lea.vmem %s1687_s0, %s1570_s8  ;;  %s1601_s19 = scalar_lea.vmem %s1690_s3, %s1570_s8 }
   0xf   : > { %v1232_v8 = vld [vmem:[%s1579_s13] sm:$0xff]  ;;  %v1233_v12 = vld [vmem:[%s1579_s13 + $0x8] sm:$0xff]  ;;  %v1234_v16 = vld [vmem:[%s1579_s13 + $0x10] sm:$0xff]  ;;  %s1622_s24 = scalar_lea.vmem %s1691_s4, %s1570_s8 }
  0x10   : > { %v1236_v9 = vld [vmem:[%s1579_s13 + $0x20] sm:$0xff]  ;;  %v1237_v13 = vld [vmem:[%s1579_s13 + $0x28] sm:$0xff]  ;;  %v1238_v17 = vld [vmem:[%s1579_s13 + $0x30] sm:$0xff] }
  0x11   : > { %580 = vmatpush.bf16.msra.mxu0 %v1254_v1  ;;  %1433 = vmatpush.bf16.msra.mxu1 %v1254_v1  ;;  %v1240_v10 = vld [vmem:[%s1579_s13 + $0x40] sm:$0xff]  ;;  %v1241_v14 = vld [vmem:[%s1579_s13 + $0x48] sm:$0xff]  ;;  %v1242_v18 = vld [vmem:[%s1579_s13 + $0x50] sm:$0xff] }
  0x12   : > { %1434 = vmatpush.bf16.msra.mxu2 %v1254_v1  ;;  %1435 = vmatpush.bf16.msra.mxu3 %v1254_v1  ;;  %v1244_v11 = vld [vmem:[%s1579_s13 + $0x60] sm:$0xff]  ;;  %v1245_v15 = vld [vmem:[%s1579_s13 + $0x68] sm:$0xff]  ;;  %v1246_v19 = vld [vmem:[%s1579_s13 + $0x70] sm:$0xff] }
  0x13   : > { %v1235_v20 = vld [vmem:[%s1579_s13 + $0x18] sm:$0xff]  ;;  %v1606_v26 = vld [vmem:[%s1689_s2] ss:$0 sm:$0xff] }
  0x14   : > { %v1239_v21 = vld [vmem:[%s1579_s13 + $0x38] sm:$0xff]  ;;  %v1257_v27 = vld [vmem:[%s1601_s19] sm:$0xff]  }
  0x15   : > { %581 = vmatpush.bf16.msra.mxu0 %v1253_v2  ;;  %1436 = vmatpush.bf16.msra.mxu1 %v1253_v2  ;;  %v1243_v22 = vld [vmem:[%s1579_s13 + $0x58] sm:$0xff]  ;;  %v1403_v28 = vld [vmem:[%s1601_s19 + $0x20] sm:$0xff]   ;;  %v1258_v30 = vunpack.c.l.bf16 %v1257_v27  ;;  %v1259_v35 = vunpack.c.h.bf16 %v1257_v27  ;;  %v1412_v27 = vld [vmem:[%s1601_s19 + $0x68] sm:$0xff]  }
  0x16   : > { %1437 = vmatpush.bf16.msra.mxu2 %v1253_v2  ;;  %1438 = vmatpush.bf16.msra.mxu3 %v1253_v2  ;;  %v1247_v23 = vld [vmem:[%s1579_s13 + $0x78] sm:$0xff]  ;;  %v1274_v32 = vunpack.c.l.bf16 %v1403_v28  ;;  %v1275_v36 = vunpack.c.h.bf16 %v1403_v28  ;;  %v1407_v41 = vld [vmem:[%s1601_s19 + $0x40] sm:$0xff]  }
  0x17   : > { %v1411_v42 = vld [vmem:[%s1601_s19 + $0x60] sm:$0xff]   ;;  %v1290_v48 = vunpack.c.l.bf16 %v1407_v41  ;;  %v1291_v55 = vunpack.c.h.bf16 %v1407_v41  ;;  %v1311_v41 = vunpack.c.h.bf16 %v1412_v27 }
  0x18   : > { %v1306_v50 = vunpack.c.l.bf16 %v1411_v42  ;;  %v1307_v56 = vunpack.c.h.bf16 %v1411_v42 }
  0x19   : > { %582 = vmatpush.bf16.msra.mxu0 %v1252_v3  ;;  %1439 = vmatpush.bf16.msra.mxu1 %v1252_v3 }
  0x1a   : > { %1440 = vmatpush.bf16.msra.mxu2 %v1252_v3  ;;  %1441 = vmatpush.bf16.msra.mxu3 %v1252_v3 }
  0x1d   : > { %583 = vmatpush.bf16.msra.mxu0 %v1251_v4  ;;  %1442 = vmatpush.bf16.msra.mxu1 %v1251_v4 }
  0x1e   : > { %1443 = vmatpush.bf16.msra.mxu2 %v1251_v4  ;;  %1444 = vmatpush.bf16.msra.mxu3 %v1251_v4 }
  0x21   : > { %584 = vmatpush.bf16.msra.mxu0 %v1250_v5  ;;  %1445 = vmatpush.bf16.msra.mxu1 %v1250_v5 }
  0x22   : > { %1446 = vmatpush.bf16.msra.mxu2 %v1250_v5  ;;  %1447 = vmatpush.bf16.msra.mxu3 %v1250_v5  ;;  %v1400_v5 = vld [vmem:[%s1601_s19 + $0x8] sm:$0xff]  }
  0x25   : > { %585 = vmatpush.bf16.msra.mxu0 %v1249_v6  ;;  %1448 = vmatpush.bf16.msra.mxu1 %v1249_v6 }
  0x26   : > { %1449 = vmatpush.bf16.msra.mxu2 %v1249_v6  ;;  %1450 = vmatpush.bf16.msra.mxu3 %v1249_v6  ;;  %v1404_v6 = vld [vmem:[%s1601_s19 + $0x28] sm:$0xff]  }
  0x29   : > { %586 = vmatpush.bf16.msra.mxu0 %v1248_v7  ;;  %1451 = vmatpush.bf16.msra.mxu1 %v1248_v7 }
  0x2a   : > { %1452 = vmatpush.bf16.msra.mxu2 %v1248_v7  ;;  %1453 = vmatpush.bf16.msra.mxu3 %v1248_v7 }
  0x2c   : > { %587 = vmatmul.bf16.vlgmr.msra.gmra.mxu0 %v1232_v8  ;;  %607 = vmatmul.bf16.vlgmr.msra.gmra.mxu1 %v1236_v9 }
  0x2d   : > { %627 = vmatmul.bf16.vlgmr.msra.gmra.mxu2 %v1240_v10  ;;  %647 = vmatmul.bf16.vlgmr.msra.gmra.mxu3 %v1244_v11 }
  0x3c   : > { %592 = vmatmul.bf16.gmra.mxu0 %v1233_v12  ;;  %612 = vmatmul.bf16.gmra.mxu1 %v1237_v13  ;;  %v1262_v12 = vunpack.c.l.bf16 %v1400_v5 }
  0x3d   : > { %632 = vmatmul.bf16.gmra.mxu2 %v1241_v14  ;;  %652 = vmatmul.bf16.gmra.mxu3 %v1245_v15  ;;  %v1278_v14 = vunpack.c.l.bf16 %v1404_v6 }
  0x4c   : > { %597 = vmatmul.bf16.gmra.mxu0 %v1234_v16  ;;  %617 = vmatmul.bf16.gmra.mxu1 %v1238_v17 }
  0x4d   : > { %637 = vmatmul.bf16.gmra.mxu2 %v1242_v18  ;;  %657 = vmatmul.bf16.gmra.mxu3 %v1246_v19  ;;  %v1263_v19 = vunpack.c.h.bf16 %v1400_v5 }
  0x5c   : > { %602 = vmatmul.bf16.gmra.mxu0 %v1235_v20  ;;  %622 = vmatmul.bf16.gmra.mxu1 %v1239_v21  ;;  %v1279_v20 = vunpack.c.h.bf16 %v1404_v6 }
  0x5d   : > { %642 = vmatmul.bf16.gmra.mxu2 %v1243_v22  ;;  %662 = vmatmul.bf16.gmra.mxu3 %v1247_v23 }
  0xa9   : > { %v588_v24 = vpop.f32.mrf.mxu0  ;;  %v608_v25 = vpop.f32.mrf.mxu1 }
  0xaa   : > { %v771_v29 = vadd.f32 %v1606_v26, %v588_v24  ;;  %v779_v31 = vadd.f32 %v1606_v26, %v608_v25  ;;  %v1408_v25 = vld [vmem:[%s1601_s19 + $0x48] sm:$0xff]  }
  0xac   : > { %v867_v39 = vadd.f32 %v1258_v30, %v771_v29  ;;  %v875_v40 = vadd.f32 %v1274_v32, %v779_v31 }
  0xae   : > { %v899_v51 = vmax.f32 %v867_v39, 0.0  ;;  %v907_v52 = vmax.f32 %v875_v40, 0.0  ;;  %v1295_v40 = vunpack.c.h.bf16 %v1408_v25 }
  0xb0   : > { %v628_v33 = vpop.f32.mrf.mxu2  ;;  %v648_v34 = vpop.f32.mrf.mxu3 }
  0xb1   : > { %v590_v37 = vpop.f32.mrf.mxu0  ;;  %v610_v38 = vpop.f32.mrf.mxu1  ;;  %v787_v47 = vadd.f32 %v1606_v26, %v628_v33  ;;  %v795_v49 = vadd.f32 %v1606_v26, %v648_v34  ;;  %v1294_v33 = vunpack.c.l.bf16 %v1408_v25 }
  0xb2   : > { %v772_v43 = vadd.f32 %v1606_v26, %v590_v37  ;;  %v780_v44 = vadd.f32 %v1606_v26, %v610_v38 }
  0xb3   : > { %v883_v61 = vadd.f32 %v1290_v48, %v787_v47  ;;  %v891_v62 = vadd.f32 %v1306_v50, %v795_v49 }
  0xb4   : > { %v868_v45 = vadd.f32 %v1259_v35, %v772_v43  ;;  %v876_v46 = vadd.f32 %v1275_v36, %v780_v44  ;;  %v1310_v35 = vunpack.c.l.bf16 %v1412_v27 }
  0xb5   : > { %v915_v7 = vmax.f32 %v883_v61, 0.0  ;;  %v923_v8 = vmax.f32 %v891_v62, 0.0 }
  0xb6   : > { %v900_v53 = vmax.f32 %v868_v45, 0.0  ;;  %v908_v54 = vmax.f32 %v876_v46, 0.0 }
  0xb8   : > { %v1323_v57 = vpack.c.bf16 %v900_v53, %v899_v51  ;;  %v1343_v58 = vpack.c.bf16 %v908_v54, %v907_v52  ;;  %v630_v59 = vpop.f32.mrf.mxu2  ;;  %v650_v60 = vpop.f32.mrf.mxu3  ;;  %v1401_v54 = vld [vmem:[%s1601_s19 + $0x10] sm:$0xff]  }
  0xb9   : > { %v788_v63 = vadd.f32 %v1606_v26, %v630_v59  ;;  %v796_v0 = vadd.f32 %v1606_v26, %v650_v60  ;;  %v593_v1 = vpop.f32.mrf.mxu0  ;;  %v613_v2 = vpop.f32.mrf.mxu1  ;;  %v1266_v61 = vunpack.c.l.bf16 %v1401_v54 }
  0xba   : > { %1324 = vst [vmem:[%s1622_s24] sm:$0xff] %v1323_v57   ;;  %v773_v11 = vadd.f32 %v1606_v26, %v593_v1  ;;  %v781_v13 = vadd.f32 %v1606_v26, %v613_v2 }
  0xbb   : > { %1418 = vst [vmem:[%s1622_s24 + $0x20] sm:$0xff] %v1343_v58   ;;  %v884_v3 = vadd.f32 %v1291_v55, %v788_v63  ;;  %v892_v4 = vadd.f32 %v1307_v56, %v796_v0  ;;  %v1405_v55 = vld [vmem:[%s1601_s19 + $0x30] sm:$0xff]  }
  0xbc   : > { %v869_v23 = vadd.f32 %v1262_v12, %v773_v11  ;;  %v877_v24 = vadd.f32 %v1278_v14, %v781_v13  ;;  %v1282_v63 = vunpack.c.l.bf16 %v1405_v55  ;;  %v1283_v5 = vunpack.c.h.bf16 %v1405_v55  ;;  %v1413_v11 = vld [vmem:[%s1601_s19 + $0x70] sm:$0xff]  }
  0xbd   : > { %v916_v9 = vmax.f32 %v884_v3, 0.0  ;;  %v924_v10 = vmax.f32 %v892_v4, 0.0  ;;  %v1267_v4 = vunpack.c.h.bf16 %v1401_v54  ;;  %v1315_v25 = vunpack.c.h.bf16 %v1413_v11 }
  0xbe   : > { %v901_v36 = vmax.f32 %v869_v23, 0.0  ;;  %v909_v37 = vmax.f32 %v877_v24, 0.0 }
  0xbf   : > { %v1363_v15 = vpack.c.bf16 %v916_v9, %v915_v7  ;;  %v1383_v16 = vpack.c.bf16 %v924_v10, %v923_v8  ;;  %v1409_v10 = vld [vmem:[%s1601_s19 + $0x50] sm:$0xff]  }
  0xc0   : > { %v633_v17 = vpop.f32.mrf.mxu2  ;;  %v653_v18 = vpop.f32.mrf.mxu3  ;;  %v1299_v24 = vunpack.c.h.bf16 %v1409_v10 }
  0xc1   : > { %1422 = vst [vmem:[%s1622_s24 + $0x40] sm:$0xff] %v1363_v15   ;;  %v595_v21 = vpop.f32.mrf.mxu0  ;;  %v615_v22 = vpop.f32.mrf.mxu1  ;;  %v789_v32 = vadd.f32 %v1606_v26, %v633_v17  ;;  %v797_v34 = vadd.f32 %v1606_v26, %v653_v18  ;;  %v1298_v17 = vunpack.c.l.bf16 %v1409_v10 }
  0xc2   : > { %1426 = vst [vmem:[%s1622_s24 + $0x60] sm:$0xff] %v1383_v16   ;;  %v774_v28 = vadd.f32 %v1606_v26, %v595_v21  ;;  %v782_v29 = vadd.f32 %v1606_v26, %v615_v22 }
  0xc3   : > { %v885_v46 = vadd.f32 %v1294_v33, %v789_v32  ;;  %v893_v47 = vadd.f32 %v1310_v35, %v797_v34 }
  0xc4   : > { %v870_v30 = vadd.f32 %v1263_v19, %v774_v28  ;;  %v878_v31 = vadd.f32 %v1279_v20, %v782_v29  ;;  %v1314_v19 = vunpack.c.l.bf16 %v1413_v11 }
  0xc5   : > { %v917_v56 = vmax.f32 %v885_v46, 0.0  ;;  %v925_v57 = vmax.f32 %v893_v47, 0.0 }
  0xc6   : > { %v902_v38 = vmax.f32 %v870_v30, 0.0  ;;  %v910_v39 = vmax.f32 %v878_v31, 0.0 }
  0xc8   : > { %v1328_v42 = vpack.c.bf16 %v902_v38, %v901_v36  ;;  %v1348_v43 = vpack.c.bf16 %v910_v39, %v909_v37  ;;  %v635_v44 = vpop.f32.mrf.mxu2  ;;  %v655_v45 = vpop.f32.mrf.mxu3  ;;  %v1402_v39 = vld [vmem:[%s1601_s19 + $0x18] sm:$0xff]  }
  0xc9   : > { %v790_v48 = vadd.f32 %v1606_v26, %v635_v44  ;;  %v798_v49 = vadd.f32 %v1606_v26, %v655_v45  ;;  %v598_v50 = vpop.f32.mrf.mxu0  ;;  %v618_v51 = vpop.f32.mrf.mxu1  ;;  %v1270_v46 = vunpack.c.l.bf16 %v1402_v39 }
  0xca   : > { %1415 = vst [vmem:[%s1622_s24 + $0x8] sm:$0xff] %v1328_v42   ;;  %v775_v60 = vadd.f32 %v1606_v26, %v598_v50  ;;  %v783_v62 = vadd.f32 %v1606_v26, %v618_v51 }
  0xcb   : > { %1419 = vst [vmem:[%s1622_s24 + $0x28] sm:$0xff] %v1348_v43   ;;  %v886_v52 = vadd.f32 %v1295_v40, %v790_v48  ;;  %v894_v53 = vadd.f32 %v1311_v41, %v798_v49  ;;  %v1406_v40 = vld [vmem:[%s1601_s19 + $0x38] sm:$0xff]  }
  0xcc   : > { %v871_v8 = vadd.f32 %v1266_v61, %v775_v60  ;;  %v879_v9 = vadd.f32 %v1282_v63, %v783_v62  ;;  %v1286_v48 = vunpack.c.l.bf16 %v1406_v40  ;;  %v1287_v54 = vunpack.c.h.bf16 %v1406_v40  ;;  %v1414_v60 = vld [vmem:[%s1601_s19 + $0x78] sm:$0xff]  }
  0xcd   : > { %v918_v58 = vmax.f32 %v886_v52, 0.0  ;;  %v926_v59 = vmax.f32 %v894_v53, 0.0  ;;  %v1271_v53 = vunpack.c.h.bf16 %v1402_v39  ;;  %v1319_v10 = vunpack.c.h.bf16 %v1414_v60 }
  0xce   : > { %v903_v20 = vmax.f32 %v871_v8, 0.0  ;;  %v911_v21 = vmax.f32 %v879_v9, 0.0 }
  0xcf   : > { %v1368_v0 = vpack.c.bf16 %v918_v58, %v917_v56  ;;  %v1388_v1 = vpack.c.bf16 %v926_v59, %v925_v57  ;;  %v1410_v59 = vld [vmem:[%s1601_s19 + $0x58] sm:$0xff]  }
  0xd0   : > { %v638_v2 = vpop.f32.mrf.mxu2  ;;  %v658_v3 = vpop.f32.mrf.mxu3  ;;  %v1303_v9 = vunpack.c.h.bf16 %v1410_v59 }
  0xd1   : > { %1423 = vst [vmem:[%s1622_s24 + $0x48] sm:$0xff] %v1368_v0   ;;  %v600_v6 = vpop.f32.mrf.mxu0  ;;  %v620_v7 = vpop.f32.mrf.mxu1  ;;  %v791_v16 = vadd.f32 %v1606_v26, %v638_v2  ;;  %v799_v18 = vadd.f32 %v1606_v26, %v658_v3  ;;  %v1302_v2 = vunpack.c.l.bf16 %v1410_v59 }
  0xd2   : > { %1427 = vst [vmem:[%s1622_s24 + $0x68] sm:$0xff] %v1388_v1   ;;  %v776_v12 = vadd.f32 %v1606_v26, %v600_v6  ;;  %v784_v13 = vadd.f32 %v1606_v26, %v620_v7 }
  0xd3   : > { %v887_v31 = vadd.f32 %v1298_v17, %v791_v16  ;;  %v895_v32 = vadd.f32 %v1314_v19, %v799_v18 }
  0xd4   : > { %v872_v14 = vadd.f32 %v1267_v4, %v776_v12  ;;  %v880_v15 = vadd.f32 %v1283_v5, %v784_v13  ;;  %v1318_v4 = vunpack.c.l.bf16 %v1414_v60 }
  0xd5   : > { %v919_v41 = vmax.f32 %v887_v31, 0.0  ;;  %v927_v42 = vmax.f32 %v895_v32, 0.0 }
  0xd6   : > { %v904_v22 = vmax.f32 %v872_v14, 0.0  ;;  %v912_v23 = vmax.f32 %v880_v15, 0.0 }
  0xd8   : > { %v1333_v27 = vpack.c.bf16 %v904_v22, %v903_v20  ;;  %v1353_v28 = vpack.c.bf16 %v912_v23, %v911_v21  ;;  %v640_v29 = vpop.f32.mrf.mxu2  ;;  %v660_v30 = vpop.f32.mrf.mxu3 }
  0xd9   : > { %v792_v33 = vadd.f32 %v1606_v26, %v640_v29  ;;  %v800_v34 = vadd.f32 %v1606_v26, %v660_v30  ;;  %v603_v35 = vpop.f32.mrf.mxu0  ;;  %v623_v36 = vpop.f32.mrf.mxu1 }
  0xda   : > { %1416 = vst [vmem:[%s1622_s24 + $0x10] sm:$0xff] %v1333_v27   ;;  %v777_v45 = vadd.f32 %v1606_v26, %v603_v35  ;;  %v785_v47 = vadd.f32 %v1606_v26, %v623_v36 }
  0xdb   : > { %1420 = vst [vmem:[%s1622_s24 + $0x30] sm:$0xff] %v1353_v28   ;;  %v888_v37 = vadd.f32 %v1299_v24, %v792_v33  ;;  %v896_v38 = vadd.f32 %v1315_v25, %v800_v34 }
  0xdc   : > { %v873_v57 = vadd.f32 %v1270_v46, %v777_v45  ;;  %v881_v58 = vadd.f32 %v1286_v48, %v785_v47 }
  0xdd   : > { %v920_v43 = vmax.f32 %v888_v37, 0.0  ;;  %v928_v44 = vmax.f32 %v896_v38, 0.0 }
  0xde   : > { %v905_v5 = vmax.f32 %v873_v57, 0.0  ;;  %v913_v6 = vmax.f32 %v881_v58, 0.0 }
  0xdf   : > { %v1373_v49 = vpack.c.bf16 %v920_v43, %v919_v41  ;;  %v1393_v50 = vpack.c.bf16 %v928_v44, %v927_v42 }
  0xe0   : > { %v643_v51 = vpop.f32.mrf.mxu2  ;;  %v663_v52 = vpop.f32.mrf.mxu3 }
  0xe1   : > { %1424 = vst [vmem:[%s1622_s24 + $0x50] sm:$0xff] %v1373_v49   ;;  %v605_v55 = vpop.f32.mrf.mxu0  ;;  %v625_v56 = vpop.f32.mrf.mxu1  ;;  %v793_v1 = vadd.f32 %v1606_v26, %v643_v51  ;;  %v801_v3 = vadd.f32 %v1606_v26, %v663_v52 }
  0xe2   : > { %1428 = vst [vmem:[%s1622_s24 + $0x70] sm:$0xff] %v1393_v50   ;;  %v778_v61 = vadd.f32 %v1606_v26, %v605_v55  ;;  %v786_v62 = vadd.f32 %v1606_v26, %v625_v56 }
  0xe3   : > { %v889_v15 = vadd.f32 %v1302_v2, %v793_v1  ;;  %v897_v16 = vadd.f32 %v1318_v4, %v801_v3 }
  0xe4   : > { %v874_v63 = vadd.f32 %v1271_v53, %v778_v61  ;;  %v882_v0 = vadd.f32 %v1287_v54, %v786_v62 }
  0xe5   : > { %v921_v21 = vmax.f32 %v889_v15, 0.0  ;;  %v929_v22 = vmax.f32 %v897_v16, 0.0 }
  0xe6   : > { %v906_v7 = vmax.f32 %v874_v63, 0.0  ;;  %v914_v8 = vmax.f32 %v882_v0, 0.0 }
  0xe8   : > { %v1338_v11 = vpack.c.bf16 %v906_v7, %v905_v5  ;;  %v1358_v12 = vpack.c.bf16 %v914_v8, %v913_v6  ;;  %v645_v13 = vpop.f32.mrf.mxu2  ;;  %v665_v14 = vpop.f32.mrf.mxu3 }
  0xe9   : > { %v794_v17 = vadd.f32 %v1606_v26, %v645_v13  ;;  %v802_v18 = vadd.f32 %v1606_v26, %v665_v14 }
  0xea   : > { %1417 = vst [vmem:[%s1622_s24 + $0x18] sm:$0xff] %v1338_v11  }
  0xeb   : > { %1421 = vst [vmem:[%s1622_s24 + $0x38] sm:$0xff] %v1358_v12   ;;  %v890_v19 = vadd.f32 %v1303_v9, %v794_v17  ;;  %v898_v20 = vadd.f32 %v1319_v10, %v802_v18 }
  0xed   : > { %v922_v23 = vmax.f32 %v890_v19, 0.0  ;;  %v930_v24 = vmax.f32 %v898_v20, 0.0 }
  0xef   : > { %v1378_v25 = vpack.c.bf16 %v922_v23, %v921_v21  ;;  %v1398_v27 = vpack.c.bf16 %v930_v24, %v929_v22 }
  0xf1   : > { %1425 = vst [vmem:[%s1622_s24 + $0x58] sm:$0xff] %v1378_v25  }
  0xf2   : > { %1429 = vst [vmem:[%s1622_s24 + $0x78] sm:$0xff] %v1398_v27  }
  0xf3 PF: > { %s14_s17 = sadd.s32 1, %s1501_s17   ;;  %s1692_s15 = smov %s1497_s16 }
  0xf4   : > { %p11_p5 = scmp.ge.s32.totalorder %s14_s17, 4   ;;  %s1693_s16 = smov %s1695_s18 }
  0xf6   :  { %13 = sbr.rel (!%p11_p5) target bundleno = 2 (0x2), region = 83 }

// kernel: _lambda_.107
= control target key start
LH: loop header
LB: loop body
LE: loop exit
PB: predicated region body
PF: predicated region fallthrough
CT: control target
= control target key end

     0   :  { %s2306_s12 = smov 0   ;;  %s2308_s13 = smov 0   ;;  %s2799_s0 = inlined_call_operand.vmem [shape: bf16[512,1152], index: 0, kind: input, shape index: {}]   ;;  %s2800_s1 = inlined_call_operand.vmem [shape: bf16[1152,128], index: 1, kind: input, shape index: {}]   ;;  %s2801_s2 = inlined_call_operand.vmem [shape: f32[1,128], index: 2, kind: input, shape index: {}]   ;;  %s2802_s3 = inlined_call_operand.vmem [shape: bf16[512,128], index: 3, kind: output, shape index: {}]  }
   0x1   :  { %s2310_s14 = smov 0   ;;  %s2312_s15 = smov 0  }
   0x2   :  { %s2314_s16 = smov 0   ;;  %s2316_s17 = smov 0  }
   0x3   :  { %s2318_s18 = smov 0  }
   0x4 LB: > { %s25_s19 = sadd.s32 1, %s2275_s16  ;;  %s32_s20 = sadd.s32 1, %s2279_s17  ;;  %s2283_s18 = sphi %s2318_s18, %s13_s18   ;;  %s2279_s17 = sphi %s2316_s17, %s2808_s17   ;;  %s2275_s16 = sphi %s2314_s16, %s2807_s16   ;;  %s2271_s15 = sphi %s2312_s15, %s2806_s15   ;;  %s2267_s14 = sphi %s2310_s14, %s2805_s14   ;;  %s2263_s13 = sphi %s2308_s13, %s2804_s13   ;;  %s2259_s12 = sphi %s2306_s12, %s2803_s12  }
   0x5   : > { %p26_p0 = scmp.ge.s32.totalorder %s25_s19, 3  ;;  %p48_p1 = scmp.ne.s32.totalorder %s2263_s13, %s2259_s12 }
   0x6   : > { %p49_p2 = scmp.eq.s32.totalorder %s2283_s18, 0  ;;  %s41_s24 = sadd.s32 1, %s2263_s13 }
   0x7   : > { %s2810_s19 = smov (%p26_p0, %s25_s19), 0  ;;  %s2812_s20 = smov (!%p26_p0, %s32_s20), %s2279_s17 }
   0x8   : > { %p50_p3 = por %p49_p2, %p48_p1  ;;  %p34_p4 = scmp.ge.s32.totalorder %s2812_s20, 2 }
   0x9   : > { %s37_s21 = ssub.s32 %s2275_s16, %s2810_s19  ;;  %p1613_p6 = scmp.ge.s32.totalorder %s2283_s18, 6 }
   0xa   : > { %s2814_s20 = smov (%p34_p4, %s2812_s20), 0 }
   0xb   : > { %s36_s22 = ssub.s32 %s2279_s17, %s2814_s20  ;;  %162 = sbr.rel (%p1613_p6) target bundleno = 89 (0x59), region = 20 }
   0xc   : > { %s38_s23 = sor.u32 %s37_s21, %s36_s22 }
   0xd   : > { %p39_p5 = scmp.eq.s32.totalorder %s38_s23, 0 }
   0xf   : > { %s2357_s25 = scalar_select %p39_p5, %s2263_s13, %s41_s24  }
  0x10   : > { %165 = sbr.rel (!%p50_p3) target bundleno = 89 (0x59), region = 24  ;;  %s167_s26 = sand.u32 (%p50_p3), 1, %s2263_s13  }
  0x11   : > { %s171_s27 = smul.u32 (%p50_p3), 3, %s2275_s16 }
  0x12   : > { %s2168_s28 = smul.u32 (%p50_p3), 384, %s167_s26 }
  0x13   : > { %s2169_s29 = smul.u32 (%p50_p3), 288, %s2279_s17 }
  0x14   : > { %s2371_s8 = scalar_lea.vmem (%p50_p3), [#allocation3], %s2168_s28 }
  0x15   : > { %s173_s30 = sadd.s32 %s2169_s29, %s171_s27 }
  0x16   : > { %s1616_s4 = sshll.u32 %s173_s30, 2 }
  0x17   : > { %s2366_s7 = scalar_lea.vmem %s2799_s0, %s1616_s4 }
  0x18   : > { %v190_v0 = vld [vmem:[%s2366_s7] sm:$0xff]  ;;  %v194_v2 = vld [vmem:[%s2366_s7 + $0x48] sm:$0xff]  ;;  %v198_v4 = vld [vmem:[%s2366_s7 + $0x90] sm:$0xff] }
  0x19   : > { %v192_v1 = vld [vmem:[%s2366_s7 + $0x24] sm:$0xff]  ;;  %191 = vst [vmem:[%s2371_s8] sm:$0xff] %v190_v0  ;;  %v196_v3 = vld [vmem:[%s2366_s7 + $0x6c] sm:$0xff]  ;;  %v200_v5 = vld [vmem:[%s2366_s7 + $0xb4] sm:$0xff] }
  0x1a   : > { %193 = vst [vmem:[%s2371_s8 + $0xc] sm:$0xff] %v192_v1  ;;  %v202_v6 = vld [vmem:[%s2366_s7 + $0xd8] sm:$0xff]  ;;  %v206_v8 = vld [vmem:[%s2366_s7 + $0x120] sm:$0xff]  ;;  %v210_v10 = vld [vmem:[%s2366_s7 + $0x168] sm:$0xff] }
  0x1b   : > { %195 = vst [vmem:[%s2371_s8 + $0x18] sm:$0xff] %v194_v2  ;;  %v204_v7 = vld [vmem:[%s2366_s7 + $0xfc] sm:$0xff]  ;;  %v208_v9 = vld [vmem:[%s2366_s7 + $0x144] sm:$0xff]  ;;  %v212_v11 = vld [vmem:[%s2366_s7 + $0x18c] sm:$0xff] }
  0x1c   : > { %197 = vst [vmem:[%s2371_s8 + $0x24] sm:$0xff] %v196_v3  ;;  %v214_v12 = vld [vmem:[%s2366_s7 + $0x1b0] sm:$0xff]  ;;  %v218_v14 = vld [vmem:[%s2366_s7 + $0x1f8] sm:$0xff]  ;;  %v222_v16 = vld [vmem:[%s2366_s7 + $0x240] sm:$0xff] }
  0x1d   : > { %199 = vst [vmem:[%s2371_s8 + $0x30] sm:$0xff] %v198_v4  ;;  %v216_v13 = vld [vmem:[%s2366_s7 + $0x1d4] sm:$0xff]  ;;  %v220_v15 = vld [vmem:[%s2366_s7 + $0x21c] sm:$0xff]  ;;  %v224_v17 = vld [vmem:[%s2366_s7 + $0x264] sm:$0xff] }
  0x1e   : > { %201 = vst [vmem:[%s2371_s8 + $0x3c] sm:$0xff] %v200_v5  ;;  %v226_v18 = vld [vmem:[%s2366_s7 + $0x288] sm:$0xff]  ;;  %v230_v20 = vld [vmem:[%s2366_s7 + $0x2d0] sm:$0xff]  ;;  %v234_v22 = vld [vmem:[%s2366_s7 + $0x318] sm:$0xff] }
  0x1f   : > { %203 = vst [vmem:[%s2371_s8 + $0x48] sm:$0xff] %v202_v6  ;;  %v228_v19 = vld [vmem:[%s2366_s7 + $0x2ac] sm:$0xff]  ;;  %v232_v21 = vld [vmem:[%s2366_s7 + $0x2f4] sm:$0xff]  ;;  %v236_v23 = vld [vmem:[%s2366_s7 + $0x33c] sm:$0xff] }
  0x20   : > { %205 = vst [vmem:[%s2371_s8 + $0x54] sm:$0xff] %v204_v7  ;;  %v238_v24 = vld [vmem:[%s2366_s7 + $0x360] sm:$0xff]  ;;  %v242_v26 = vld [vmem:[%s2366_s7 + $0x3a8] sm:$0xff]  ;;  %v246_v28 = vld [vmem:[%s2366_s7 + $0x3f0] sm:$0xff] }
  0x21   : > { %207 = vst [vmem:[%s2371_s8 + $0x60] sm:$0xff] %v206_v8  ;;  %v240_v25 = vld [vmem:[%s2366_s7 + $0x384] sm:$0xff]  ;;  %v244_v27 = vld [vmem:[%s2366_s7 + $0x3cc] sm:$0xff]  ;;  %v248_v29 = vld [vmem:[%s2366_s7 + $0x414] sm:$0xff] }
  0x22   : > { %209 = vst [vmem:[%s2371_s8 + $0x6c] sm:$0xff] %v208_v9  ;;  %v250_v30 = vld [vmem:[%s2366_s7 + $0x438] sm:$0xff]  ;;  %v1617_v32 = vld [vmem:[%s2366_s7 + $0x8] sm:$0xf]  ;;  %v1619_v33 = vld [vmem:[%s2366_s7 + $0x2c] sm:$0xf] }
  0x23   : > { %211 = vst [vmem:[%s2371_s8 + $0x78] sm:$0xff] %v210_v10  ;;  %v252_v31 = vld [vmem:[%s2366_s7 + $0x45c] sm:$0xff]  ;;  %v1621_v34 = vld [vmem:[%s2366_s7 + $0x50] sm:$0xf]  ;;  %v1623_v35 = vld [vmem:[%s2366_s7 + $0x74] sm:$0xf] }
  0x24   : > { %213 = vst [vmem:[%s2371_s8 + $0x84] sm:$0xff] %v212_v11  ;;  %v1625_v36 = vld [vmem:[%s2366_s7 + $0x98] sm:$0xf]  ;;  %v1627_v37 = vld [vmem:[%s2366_s7 + $0xbc] sm:$0xf] }
  0x25   : > { %215 = vst [vmem:[%s2371_s8 + $0x90] sm:$0xff] %v214_v12  ;;  %v1629_v38 = vld [vmem:[%s2366_s7 + $0xe0] sm:$0xf]  ;;  %v1631_v39 = vld [vmem:[%s2366_s7 + $0x104] sm:$0xf] }
  0x26   : > { %217 = vst [vmem:[%s2371_s8 + $0x9c] sm:$0xff] %v216_v13  ;;  %v1633_v40 = vld [vmem:[%s2366_s7 + $0x128] sm:$0xf]  ;;  %v1635_v41 = vld [vmem:[%s2366_s7 + $0x14c] sm:$0xf] }
  0x27   : > { %219 = vst [vmem:[%s2371_s8 + $0xa8] sm:$0xff] %v218_v14  ;;  %v1637_v42 = vld [vmem:[%s2366_s7 + $0x170] sm:$0xf]  ;;  %v1639_v43 = vld [vmem:[%s2366_s7 + $0x194] sm:$0xf] }
  0x28   : > { %221 = vst [vmem:[%s2371_s8 + $0xb4] sm:$0xff] %v220_v15  ;;  %v1641_v44 = vld [vmem:[%s2366_s7 + $0x1b8] sm:$0xf]  ;;  %v1643_v45 = vld [vmem:[%s2366_s7 + $0x1dc] sm:$0xf] }
  0x29   : > { %223 = vst [vmem:[%s2371_s8 + $0xc0] sm:$0xff] %v222_v16  ;;  %v1645_v46 = vld [vmem:[%s2366_s7 + $0x200] sm:$0xf]  ;;  %v1647_v47 = vld [vmem:[%s2366_s7 + $0x224] sm:$0xf] }
  0x2a   : > { %225 = vst [vmem:[%s2371_s8 + $0xcc] sm:$0xff] %v224_v17  ;;  %v1649_v48 = vld [vmem:[%s2366_s7 + $0x248] sm:$0xf]  ;;  %v1651_v49 = vld [vmem:[%s2366_s7 + $0x26c] sm:$0xf] }
  0x2b   : > { %227 = vst [vmem:[%s2371_s8 + $0xd8] sm:$0xff] %v226_v18  ;;  %v1653_v50 = vld [vmem:[%s2366_s7 + $0x290] sm:$0xf]  ;;  %v1655_v51 = vld [vmem:[%s2366_s7 + $0x2b4] sm:$0xf] }
  0x2c   : > { %229 = vst [vmem:[%s2371_s8 + $0xe4] sm:$0xff] %v228_v19  ;;  %v1657_v52 = vld [vmem:[%s2366_s7 + $0x2d8] sm:$0xf]  ;;  %v1659_v53 = vld [vmem:[%s2366_s7 + $0x2fc] sm:$0xf] }
  0x2d   : > { %231 = vst [vmem:[%s2371_s8 + $0xf0] sm:$0xff] %v230_v20  ;;  %v1661_v54 = vld [vmem:[%s2366_s7 + $0x320] sm:$0xf]  ;;  %v1663_v55 = vld [vmem:[%s2366_s7 + $0x344] sm:$0xf] }
  0x2e   : > { %233 = vst [vmem:[%s2371_s8 + $0xfc] sm:$0xff] %v232_v21  ;;  %v1665_v56 = vld [vmem:[%s2366_s7 + $0x368] sm:$0xf]  ;;  %v1667_v57 = vld [vmem:[%s2366_s7 + $0x38c] sm:$0xf] }
  0x2f   : > { %235 = vst [vmem:[%s2371_s8 + $0x108] sm:$0xff] %v234_v22  ;;  %v1669_v58 = vld [vmem:[%s2366_s7 + $0x3b0] sm:$0xf]  ;;  %v1671_v59 = vld [vmem:[%s2366_s7 + $0x3d4] sm:$0xf] }
  0x30   : > { %237 = vst [vmem:[%s2371_s8 + $0x114] sm:$0xff] %v236_v23  ;;  %v1673_v60 = vld [vmem:[%s2366_s7 + $0x3f8] sm:$0xf]  ;;  %v1675_v61 = vld [vmem:[%s2366_s7 + $0x41c] sm:$0xf] }
  0x31   : > { %239 = vst [vmem:[%s2371_s8 + $0x120] sm:$0xff] %v238_v24  ;;  %v1677_v62 = vld [vmem:[%s2366_s7 + $0x440] sm:$0xf]  ;;  %v1679_v63 = vld [vmem:[%s2366_s7 + $0x464] sm:$0xf] }
  0x32   : > { %241 = vst [vmem:[%s2371_s8 + $0x12c] sm:$0xff] %v240_v25 }
  0x33   : > { %243 = vst [vmem:[%s2371_s8 + $0x138] sm:$0xff] %v242_v26 }
  0x34   : > { %245 = vst [vmem:[%s2371_s8 + $0x144] sm:$0xff] %v244_v27 }
  0x35   : > { %247 = vst [vmem:[%s2371_s8 + $0x150] sm:$0xff] %v246_v28 }
  0x36   : > { %249 = vst [vmem:[%s2371_s8 + $0x15c] sm:$0xff] %v248_v29 }
  0x37   : > { %251 = vst [vmem:[%s2371_s8 + $0x168] sm:$0xff] %v250_v30 }
  0x38   : > { %253 = vst [vmem:[%s2371_s8 + $0x174] sm:$0xff] %v252_v31 }
  0x39   : > { %1618 = vst [vmem:[%s2371_s8 + $0x8] sm:$0xf] %v1617_v32 }
  0x3a   : > { %1620 = vst [vmem:[%s2371_s8 + $0x14] sm:$0xf] %v1619_v33 }
  0x3b   : > { %1622 = vst [vmem:[%s2371_s8 + $0x20] sm:$0xf] %v1621_v34 }
  0x3c   : > { %1624 = vst [vmem:[%s2371_s8 + $0x2c] sm:$0xf] %v1623_v35 }
  0x3d   : > { %1626 = vst [vmem:[%s2371_s8 + $0x38] sm:$0xf] %v1625_v36 }
  0x3e   : > { %1628 = vst [vmem:[%s2371_s8 + $0x44] sm:$0xf] %v1627_v37 }
  0x3f   : > { %1630 = vst [vmem:[%s2371_s8 + $0x50] sm:$0xf] %v1629_v38 }
  0x40   : > { %1632 = vst [vmem:[%s2371_s8 + $0x5c] sm:$0xf] %v1631_v39 }
  0x41   : > { %1634 = vst [vmem:[%s2371_s8 + $0x68] sm:$0xf] %v1633_v40 }
  0x42   : > { %1636 = vst [vmem:[%s2371_s8 + $0x74] sm:$0xf] %v1635_v41 }
  0x43   : > { %1638 = vst [vmem:[%s2371_s8 + $0x80] sm:$0xf] %v1637_v42 }
  0x44   : > { %1640 = vst [vmem:[%s2371_s8 + $0x8c] sm:$0xf] %v1639_v43 }
  0x45   : > { %1642 = vst [vmem:[%s2371_s8 + $0x98] sm:$0xf] %v1641_v44 }
  0x46   : > { %1644 = vst [vmem:[%s2371_s8 + $0xa4] sm:$0xf] %v1643_v45 }
  0x47   : > { %1646 = vst [vmem:[%s2371_s8 + $0xb0] sm:$0xf] %v1645_v46 }
  0x48   : > { %1648 = vst [vmem:[%s2371_s8 + $0xbc] sm:$0xf] %v1647_v47 }
  0x49   : > { %1650 = vst [vmem:[%s2371_s8 + $0xc8] sm:$0xf] %v1649_v48 }
  0x4a   : > { %1652 = vst [vmem:[%s2371_s8 + $0xd4] sm:$0xf] %v1651_v49 }
  0x4b   : > { %1654 = vst [vmem:[%s2371_s8 + $0xe0] sm:$0xf] %v1653_v50 }
  0x4c   : > { %1656 = vst [vmem:[%s2371_s8 + $0xec] sm:$0xf] %v1655_v51 }
  0x4d   : > { %1658 = vst [vmem:[%s2371_s8 + $0xf8] sm:$0xf] %v1657_v52 }
  0x4e   : > { %1660 = vst [vmem:[%s2371_s8 + $0x104] sm:$0xf] %v1659_v53 }
  0x4f   : > { %1662 = vst [vmem:[%s2371_s8 + $0x110] sm:$0xf] %v1661_v54 }
  0x50   : > { %1664 = vst [vmem:[%s2371_s8 + $0x11c] sm:$0xf] %v1663_v55 }
  0x51   : > { %1666 = vst [vmem:[%s2371_s8 + $0x128] sm:$0xf] %v1665_v56 }
  0x52   : > { %1668 = vst [vmem:[%s2371_s8 + $0x134] sm:$0xf] %v1667_v57 }
  0x53   : > { %1670 = vst [vmem:[%s2371_s8 + $0x140] sm:$0xf] %v1669_v58 }
  0x54   : > { %1672 = vst [vmem:[%s2371_s8 + $0x14c] sm:$0xf] %v1671_v59 }
  0x55   : > { %1674 = vst [vmem:[%s2371_s8 + $0x158] sm:$0xf] %v1673_v60 }
  0x56   : > { %1676 = vst [vmem:[%s2371_s8 + $0x164] sm:$0xf] %v1675_v61 }
  0x57   : > { %1678 = vst [vmem:[%s2371_s8 + $0x170] sm:$0xf] %v1677_v62 }
  0x58   : > { %1680 = vst [vmem:[%s2371_s8 + $0x17c] sm:$0xf] %v1679_v63 }
  0x59 PF: > { %p1681_p7 = scmp.ge.s32.totalorder %s2283_s18, 1  ;;  %p342_p8 = scmp.lt.s32.totalorder %s2283_s18, 7 }
  0x5b   : > { %p343_p9 = pnand %p1681_p7, %p342_p8 }
  0x5c   : > { %s349_s9 = sand.u32 (!%p343_p9), 1, %s2259_s12   ;;  %s388_s10 = smul.u32 (!%p343_p9), 48, %s2267_s14 }
  0x5d   : > { %346 = sbr.rel (%p343_p9) target bundleno = 520 (0x208), region = 54  ;;  %s1683_s21 = sshll.u32 (!%p343_p9), %s2271_s15, 5 }
  0x5e   : > { %s2170_s11 = smul.u32 (!%p343_p9), 384, %s349_s9  ;;  %p389_p10 = scmp.lt.s32.totalorder (!%p343_p9), %s388_s10, 143 }
  0x5f   : > { %p401_p11 = scmp.lt.s32.totalorder (!%p343_p9), %s1683_s21, 63  ;;  %p1685_p12 = scmp.ne.s32.totalorder (!%p343_p9), %s2267_s14, 0 }
  0x60   : > { %s2513_s12 = scalar_lea.vmem (!%p343_p9), [#allocation3], %s2170_s11 }
  0x62   : > { %s2816_s10 = smov (!%p389_p10, %s388_s10), 143  ;;  %s2818_s21 = smov (!%p401_p11, %s1683_s21), 63 }
  0x63   : > { %s1682_s22 = sshll.u32 %s2816_s10, 2  ;;  %s1684_s27 = sshll.u32 %s2818_s21, 2 }
  0x64   : > { %s2506_s26 = scalar_lea.vmem %s2800_s1, %s1682_s22  ;;  %s2511_s30 = scalar_lea.vmem %s2802_s3, %s1684_s27 }
  0x65   : > { %412 = sbr.rel (%p1685_p12) target bundleno = 139 (0x8b), region = 62 }
  0x6a   : > { %v2285_v0 = vmov 0.0  }
  0x6b   : > { %413 = vst [vmem:[#allocation2 + $0xb0] sm:$0xff] %v2285_v0 }
  0x6c   : > { %414 = vst [vmem:[#allocation2] sm:$0xff] %v2285_v0 }
  0x6d   : > { %415 = vst [vmem:[#allocation2 + $0xd8] sm:$0xff] %v2285_v0 }
  0x6e   : > { %416 = vst [vmem:[#allocation2 + $0x18] sm:$0xff] %v2285_v0 }
  0x6f   : > { %417 = vst [vmem:[#allocation2 + $0x50] sm:$0xff] %v2285_v0 }
  0x70   : > { %418 = vst [vmem:[#allocation2 + $0x68] sm:$0xff] %v2285_v0 }
  0x71   : > { %419 = vst [vmem:[#allocation2 + $0x30] sm:$0xff] %v2285_v0 }
  0x72   : > { %420 = vst [vmem:[#allocation2 + $0x48] sm:$0xff] %v2285_v0 }
  0x73   : > { %421 = vst [vmem:[#allocation2 + $0x80] sm:$0xff] %v2285_v0 }
  0x74   : > { %422 = vst [vmem:[#allocation2 + $0x88] sm:$0xff] %v2285_v0 }
  0x75   : > { %423 = vst [vmem:[#allocation2 + $0xe8] sm:$0xff] %v2285_v0 }
  0x76   : > { %424 = vst [vmem:[#allocation2 + $0xb8] sm:$0xff] %v2285_v0 }
  0x77   : > { %425 = vst [vmem:[#allocation2 + $0x60] sm:$0xff] %v2285_v0 }
  0x78   : > { %426 = vst [vmem:[#allocation2 + $0xf0] sm:$0xff] %v2285_v0 }
  0x79   : > { %427 = vst [vmem:[#allocation2 + $0x8] sm:$0xff] %v2285_v0 }
  0x7a   : > { %428 = vst [vmem:[#allocation2 + $0x78] sm:$0xff] %v2285_v0 }
  0x7b   : > { %429 = vst [vmem:[#allocation2 + $0x38] sm:$0xff] %v2285_v0 }
  0x7c   : > { %430 = vst [vmem:[#allocation2 + $0x58] sm:$0xff] %v2285_v0 }
  0x7d   : > { %431 = vst [vmem:[#allocation2 + $0x40] sm:$0xff] %v2285_v0 }
  0x7e   : > { %432 = vst [vmem:[#allocation2 + $0xc8] sm:$0xff] %v2285_v0 }
  0x7f   : > { %433 = vst [vmem:[#allocation2 + $0xe0] sm:$0xff] %v2285_v0 }
  0x80   : > { %434 = vst [vmem:[#allocation2 + $0x90] sm:$0xff] %v2285_v0 }
  0x81   : > { %435 = vst [vmem:[#allocation2 + $0x70] sm:$0xff] %v2285_v0 }
  0x82   : > { %436 = vst [vmem:[#allocation2 + $0xc0] sm:$0xff] %v2285_v0 }
  0x83   : > { %437 = vst [vmem:[#allocation2 + $0xa8] sm:$0xff] %v2285_v0 }
  0x84   : > { %438 = vst [vmem:[#allocation2 + $0xd0] sm:$0xff] %v2285_v0 }
  0x85   : > { %439 = vst [vmem:[#allocation2 + $0x10] sm:$0xff] %v2285_v0 }
  0x86   : > { %440 = vst [vmem:[#allocation2 + $0x28] sm:$0xff] %v2285_v0 }
  0x87   : > { %441 = vst [vmem:[#allocation2 + $0xa0] sm:$0xff] %v2285_v0 }
  0x88   : > { %442 = vst [vmem:[#allocation2 + $0xf8] sm:$0xff] %v2285_v0 }
  0x89   : > { %443 = vst [vmem:[#allocation2 + $0x20] sm:$0xff] %v2285_v0 }
  0x8a   : > { %444 = vst [vmem:[#allocation2 + $0x98] sm:$0xff] %v2285_v0 }
  0x8b PF: > { %v2032_v1 = vld [vmem:[%s2506_s26 + $0x38] sm:$0xff]  ;;  %v2031_v4 = vld [vmem:[%s2506_s26 + $0x30] sm:$0xff]  ;;  %v2030_v7 = vld [vmem:[%s2506_s26 + $0x28] sm:$0xff]  ;;  %p1974_p13 = scmp.ne.s32.totalorder %s2267_s14, 2 }
  0x8c   : > { %v2518_v2 = vld [vmem:[%s2506_s26 + $0x78] sm:$0xff]  ;;  %989 = vmatpush.bf16.msra.mxu0 %v2032_v1  ;;  %2144 = vmatpush.bf16.msra.mxu3 %v2032_v1  ;;  %v2527_v5 = vld [vmem:[%s2506_s26 + $0x70] sm:$0xff]  ;;  %v2038_v8 = vld [vmem:[%s2506_s26 + $0x68] sm:$0xff] }
  0x8d   : > { %v2521_v3 = vld [vmem:[%s2506_s26 + $0xb8] sm:$0xff]  ;;  %1078 = vmatpush.bf16.msra.mxu1 %v2518_v2  ;;  %v2530_v6 = vld [vmem:[%s2506_s26 + $0xb0] sm:$0xff]  ;;  %v2537_v9 = vld [vmem:[%s2506_s26 + $0xa8] sm:$0xff] }
  0x8e   : > { %1167 = vmatpush.bf16.msra.mxu2 %v2521_v3  ;;  %v2029_v10 = vld [vmem:[%s2506_s26 + $0x20] sm:$0xff]  ;;  %v2028_v13 = vld [vmem:[%s2506_s26 + $0x18] sm:$0xff]  ;;  %v2027_v16 = vld [vmem:[%s2506_s26 + $0x10] sm:$0xff] }
  0x8f   : > { %v2037_v11 = vld [vmem:[%s2506_s26 + $0x60] sm:$0xff]  ;;  %v2036_v14 = vld [vmem:[%s2506_s26 + $0x58] sm:$0xff]  ;;  %v2035_v17 = vld [vmem:[%s2506_s26 + $0x50] sm:$0xff] }
  0x90   : > { %990 = vmatpush.bf16.msra.mxu0 %v2031_v4  ;;  %2145 = vmatpush.bf16.msra.mxu3 %v2031_v4  ;;  %v2543_v12 = vld [vmem:[%s2506_s26 + $0xa0] sm:$0xff]  ;;  %v2549_v15 = vld [vmem:[%s2506_s26 + $0x98] sm:$0xff]  ;;  %v2555_v18 = vld [vmem:[%s2506_s26 + $0x90] sm:$0xff] }
  0x91   : > { %1079 = vmatpush.bf16.msra.mxu1 %v2527_v5  ;;  %v2026_v19 = vld [vmem:[%s2506_s26 + $0x8] sm:$0xff]  ;;  %v2025_v22 = vld [vmem:[%s2506_s26] sm:$0xff]  ;;  %v1690_v30 = vld [vmem:[%s2513_s12 + $0xc] sm:$0xf0] }
  0x92   : > { %1168 = vmatpush.bf16.msra.mxu2 %v2530_v6  ;;  %v2034_v20 = vld [vmem:[%s2506_s26 + $0x48] sm:$0xff]  ;;  %v2033_v23 = vld [vmem:[%s2506_s26 + $0x40] sm:$0xff]  ;;  %v1979_v32 = vld [vmem:[%s2513_s12 + $0x10] sm:$0xf0] }
  0x93   : > { %v2561_v21 = vld [vmem:[%s2506_s26 + $0x88] sm:$0xff]  ;;  %v2566_v24 = vld [vmem:[%s2506_s26 + $0x80] sm:$0xff]  ;;  %v1700_v37 = vld [vmem:[%s2513_s12 + $0x18] sm:$0xf] }
  0x94   : > { %991 = vmatpush.bf16.msra.mxu0 %v2030_v7  ;;  %2146 = vmatpush.bf16.msra.mxu3 %v2030_v7  ;;  %v1688_v25 = vld [vmem:[%s2513_s12] sm:$0xf]  ;;  %v1978_v26 = vld [vmem:[%s2513_s12 + $0x8] sm:$0xf0]  ;;  %v1977_v29 = vld [vmem:[%s2513_s12 + $0x4] sm:$0xf] }
  0x95   : > { %1080 = vmatpush.bf16.msra.mxu1 %v2038_v8  ;;  %v1832_v27 = vld [vmem:[%s2513_s12 + $0x120] sm:$0xf]  ;;  %v2014_v28 = vld [vmem:[%s2513_s12 + $0x128] sm:$0xf0]  ;;  %v1696_v31 = vld [vmem:[%s2513_s12 + $0x8] sm:$0xf]  ;;  %v1689_v33 = vor.u32 %v1978_v26, %v1688_v25  ;;  %v1693_v35 = vor.u32 %v1977_v29, %v1690_v30 }
  0x96   : > { %1169 = vmatpush.bf16.msra.mxu2 %v2537_v9  ;;  %v1833_v34 = vor.u32 %v2014_v28, %v1832_v27  ;;  %v1697_v36 = vor.u32 %v1979_v32, %v1696_v31  ;;  %v1981_v38 = vld [vmem:[%s2513_s12 + $0x20] sm:$0xf0]  ;;  %v1844_v39 = vld [vmem:[%s2513_s12 + $0x138] sm:$0xf]  ;;  %v1980_v41 = vld [vmem:[%s2513_s12 + $0x1c] sm:$0xf] }
  0x97   : > { %v2017_v40 = vld [vmem:[%s2513_s12 + $0x140] sm:$0xf0]  ;;  %v1702_v42 = vld [vmem:[%s2513_s12 + $0x24] sm:$0xf0]  ;;  %v1708_v43 = vld [vmem:[%s2513_s12 + $0x20] sm:$0xf]  ;;  %v1701_v45 = vor.u32 %v1981_v38, %v1700_v37 }
  0x98   : > { %992 = vmatpush.bf16.msra.mxu0 %v2029_v10  ;;  %2147 = vmatpush.bf16.msra.mxu3 %v2029_v10  ;;  %v1982_v44 = vld [vmem:[%s2513_s12 + $0x28] sm:$0xf0]  ;;  %v1845_v46 = vor.u32 %v2017_v40, %v1844_v39  ;;  %v1705_v47 = vor.u32 %v1980_v41, %v1702_v42  ;;  %v1712_v49 = vld [vmem:[%s2513_s12 + $0x30] sm:$0xf]  ;;  %v1984_v50 = vld [vmem:[%s2513_s12 + $0x38] sm:$0xf0] }
  0x99   : > { %1081 = vmatpush.bf16.msra.mxu1 %v2037_v11  ;;  %v1709_v48 = vor.u32 %v1982_v44, %v1708_v43  ;;  %v1856_v51 = vld [vmem:[%s2513_s12 + $0x150] sm:$0xf]  ;;  %v2020_v52 = vld [vmem:[%s2513_s12 + $0x158] sm:$0xf0]  ;;  %v1983_v53 = vld [vmem:[%s2513_s12 + $0x34] sm:$0xf]  ;;  %v1713_v57 = vor.u32 %v1984_v50, %v1712_v49 }
  0x9a   : > { %1170 = vmatpush.bf16.msra.mxu2 %v2543_v12  ;;  %v1714_v54 = vld [vmem:[%s2513_s12 + $0x3c] sm:$0xf0]  ;;  %v1720_v55 = vld [vmem:[%s2513_s12 + $0x38] sm:$0xf]  ;;  %v1985_v56 = vld [vmem:[%s2513_s12 + $0x40] sm:$0xf0]  ;;  %v1857_v58 = vor.u32 %v2020_v52, %v1856_v51 }
  0x9b   : > { %v1717_v59 = vor.u32 %v1983_v53, %v1714_v54  ;;  %v1721_v60 = vor.u32 %v1985_v56, %v1720_v55  ;;  %v1724_v61 = vld [vmem:[%s2513_s12 + $0x48] sm:$0xf]  ;;  %v1987_v62 = vld [vmem:[%s2513_s12 + $0x50] sm:$0xf0]  ;;  %v1986_v1 = vld [vmem:[%s2513_s12 + $0x4c] sm:$0xf] }
  0x9c   : > { %993 = vmatpush.bf16.msra.mxu0 %v2028_v13  ;;  %2148 = vmatpush.bf16.msra.mxu3 %v2028_v13  ;;  %v1868_v63 = vld [vmem:[%s2513_s12 + $0x168] sm:$0xf]  ;;  %v2023_v0 = vld [vmem:[%s2513_s12 + $0x170] sm:$0xf0]  ;;  %v1988_v4 = vld [vmem:[%s2513_s12 + $0x58] sm:$0xf0] }
  0x9d   : > { %1082 = vmatpush.bf16.msra.mxu1 %v2036_v14  ;;  %v1990_v10 = vld [vmem:[%s2513_s12 + $0x68] sm:$0xf0]  ;;  %v1834_v13 = vld [vmem:[%s2513_s12 + $0x12c] sm:$0xf0]  ;;  %v2016_v25 = vld [vmem:[%s2513_s12 + $0x13c] sm:$0xf] }
  0x9e   : > { %1171 = vmatpush.bf16.msra.mxu2 %v2549_v15  ;;  %v1846_v26 = vld [vmem:[%s2513_s12 + $0x144] sm:$0xf0]  ;;  %v1756_v27 = vld [vmem:[%s2513_s12 + $0x80] sm:$0xf]  ;;  %v1994_v28 = vld [vmem:[%s2513_s12 + $0x88] sm:$0xf0] }
  0x9f   : > { %v1849_v30 = vor.u32 %v2016_v25, %v1846_v26  ;;  %v1757_v32 = vor.u32 %v1994_v28, %v1756_v27  ;;  %v1858_v37 = vld [vmem:[%s2513_s12 + $0x15c] sm:$0xf0]  ;;  %v1768_v39 = vld [vmem:[%s2513_s12 + $0x98] sm:$0xf]  ;;  %v1997_v40 = vld [vmem:[%s2513_s12 + $0xa0] sm:$0xf0] }
  0xa0   : > { %994 = vmatpush.bf16.msra.mxu0 %v2027_v16  ;;  %2149 = vmatpush.bf16.msra.mxu3 %v2027_v16  ;;  %v1991_v16 = vld [vmem:[%s2513_s12 + $0x70] sm:$0xf0]  ;;  %v1762_v38 = vld [vmem:[%s2513_s12 + $0x9c] sm:$0xf0]  ;;  %v1769_v44 = vor.u32 %v1997_v40, %v1768_v39  ;;  %v1870_v49 = vld [vmem:[%s2513_s12 + $0x174] sm:$0xf0] }
  0xa1   : > { %1083 = vmatpush.bf16.msra.mxu1 %v2035_v17  ;;  %v1774_v50 = vld [vmem:[%s2513_s12 + $0xb4] sm:$0xf0]  ;;  %v1780_v51 = vld [vmem:[%s2513_s12 + $0xb0] sm:$0xf]  ;;  %v2000_v52 = vld [vmem:[%s2513_s12 + $0xb8] sm:$0xf0] }
  0xa2   : > { %1172 = vmatpush.bf16.msra.mxu2 %v2555_v18  ;;  %v1781_v56 = vor.u32 %v2000_v52, %v1780_v51  ;;  %v446_v26 = vld [vmem:[#allocation2] sm:$0xff] }
  0xa4   : > { %995 = vmatpush.bf16.msra.mxu0 %v2026_v19  ;;  %2150 = vmatpush.bf16.msra.mxu3 %v2026_v19 }
  0xa5   : > { %1084 = vmatpush.bf16.msra.mxu1 %v2034_v20 }
  0xa6   : > { %1173 = vmatpush.bf16.msra.mxu2 %v2561_v21 }
  0xa8   : > { %996 = vmatpush.bf16.msra.mxu0 %v2025_v22  ;;  %2151 = vmatpush.bf16.msra.mxu3 %v2025_v22  ;;  %v1993_v22 = vld [vmem:[%s2513_s12 + $0x80] sm:$0xf0] }
  0xa9   : > { %1085 = vmatpush.bf16.msra.mxu1 %v2033_v23 }
  0xaa   : > { %1174 = vmatpush.bf16.msra.mxu2 %v2566_v24 }
  0xab   : > { %997 = vmatmul.bf16.vlgmr.msra.gmra.mxu0 %v1689_v33  ;;  %1057 = vmatmul.bf16.vlgmr.msra.gmra.mxu3 %v1833_v34  ;;  %v1760_v33 = vld [vmem:[%s2513_s12 + $0x90] sm:$0xf]  ;;  %v1996_v34 = vld [vmem:[%s2513_s12 + $0x98] sm:$0xf0] }
  0xac   : > { %2152 = vmatpush.bf16.msrb.mxu3 %v2518_v2  ;;  %1086 = vmatmul.bf16.vlgmr.msra.gmra.mxu1 %v1693_v35  ;;  %v1726_v2 = vld [vmem:[%s2513_s12 + $0x54] sm:$0xf0]  ;;  %v1995_v35 = vld [vmem:[%s2513_s12 + $0x94] sm:$0xf]  ;;  %v1761_v41 = vor.u32 %v1996_v34, %v1760_v33 }
  0xad   : > { %1175 = vmatmul.bf16.vlgmr.msra.gmra.mxu2 %v1697_v36  ;;  %v1729_v7 = vor.u32 %v1986_v1, %v1726_v2  ;;  %v2019_v36 = vld [vmem:[%s2513_s12 + $0x154] sm:$0xf]  ;;  %v1765_v43 = vor.u32 %v1995_v35, %v1762_v38 }
  0xae   : > { %v1861_v42 = vor.u32 %v2019_v36, %v1858_v37  ;;  %v447_v37 = vld [vmem:[#allocation2 + $0xd8] sm:$0xff] }
  0xb0   : > { %2153 = vmatpush.bf16.msrb.mxu3 %v2527_v5  ;;  %v1725_v5 = vor.u32 %v1987_v62, %v1724_v61  ;;  %v2015_v61 = vld [vmem:[%s2513_s12 + $0x130] sm:$0xf0]  ;;  %v1786_v62 = vld [vmem:[%s2513_s12 + $0xcc] sm:$0xf0] }
  0xb4   : > { %2154 = vmatpush.bf16.msrb.mxu3 %v2038_v8 }
  0xb8   : > { %2155 = vmatpush.bf16.msrb.mxu3 %v2037_v11  ;;  %v1989_v11 = vld [vmem:[%s2513_s12 + $0x64] sm:$0xf] }
  0xbb   : > { %1002 = vmatmul.bf16.gmra.mxu0 %v1701_v45  ;;  %1062 = vmatmul.bf16.gmra.mxu3 %v1845_v46  ;;  %v1772_v45 = vld [vmem:[%s2513_s12 + $0xa8] sm:$0xf]  ;;  %v1999_v46 = vld [vmem:[%s2513_s12 + $0xb0] sm:$0xf0] }
  0xbc   : > { %2156 = vmatpush.bf16.msrb.mxu3 %v2036_v14  ;;  %1091 = vmatmul.bf16.gmra.mxu1 %v1705_v47  ;;  %v1738_v14 = vld [vmem:[%s2513_s12 + $0x6c] sm:$0xf0]  ;;  %v1998_v47 = vld [vmem:[%s2513_s12 + $0xac] sm:$0xf]  ;;  %v1773_v53 = vor.u32 %v1999_v46, %v1772_v45  ;;  %v2007_v45 = vld [vmem:[%s2513_s12 + $0xf4] sm:$0xf] }
  0xbd   : > { %1180 = vmatmul.bf16.gmra.mxu2 %v1709_v48  ;;  %v1741_v19 = vor.u32 %v1989_v11, %v1738_v14  ;;  %v2022_v48 = vld [vmem:[%s2513_s12 + $0x16c] sm:$0xf]  ;;  %v1777_v55 = vor.u32 %v1998_v47, %v1774_v50  ;;  %v1864_v46 = vld [vmem:[%s2513_s12 + $0x158] sm:$0xf]  ;;  %v2021_v47 = vld [vmem:[%s2513_s12 + $0x160] sm:$0xf0] }
  0xbe   : > { %v1873_v54 = vor.u32 %v2022_v48, %v1870_v49  ;;  %v1810_v48 = vld [vmem:[%s2513_s12 + $0xfc] sm:$0xf0]  ;;  %v1816_v49 = vld [vmem:[%s2513_s12 + $0xf8] sm:$0xf]  ;;  %v2009_v50 = vld [vmem:[%s2513_s12 + $0x100] sm:$0xf0] }
  0xc0   : > { %2157 = vmatpush.bf16.msrb.mxu3 %v2035_v17 }
  0xc4   : > { %2158 = vmatpush.bf16.msrb.mxu3 %v2034_v20 }
  0xc8   : > { %2159 = vmatpush.bf16.msrb.mxu3 %v2033_v23  ;;  %v1992_v23 = vld [vmem:[%s2513_s12 + $0x7c] sm:$0xf] }
  0xcb   : > { %1007 = vmatmul.bf16.gmra.mxu0 %v1713_v57  ;;  %1067 = vmatmul.bf16.gmra.mxu3 %v1857_v58  ;;  %v1784_v57 = vld [vmem:[%s2513_s12 + $0xc0] sm:$0xf]  ;;  %v2002_v58 = vld [vmem:[%s2513_s12 + $0xc8] sm:$0xf0] }
  0xcc   : > { %2160 = vmatpush.bf16.msra.mxu3 %v2521_v3  ;;  %1096 = vmatmul.bf16.gmra.mxu1 %v1717_v59  ;;  %v1732_v3 = vld [vmem:[%s2513_s12 + $0x50] sm:$0xf]  ;;  %v2001_v59 = vld [vmem:[%s2513_s12 + $0xc4] sm:$0xf]  ;;  %v1785_v1 = vor.u32 %v2002_v58, %v1784_v57 }
  0xcd   : > { %1185 = vmatmul.bf16.gmra.mxu2 %v1721_v60  ;;  %v1733_v8 = vor.u32 %v1988_v4, %v1732_v3  ;;  %v1840_v60 = vld [vmem:[%s2513_s12 + $0x128] sm:$0xf]  ;;  %v1789_v4 = vor.u32 %v2001_v59, %v1786_v62  ;;  %v1813_v59 = vor.u32 %v2007_v45, %v1810_v48  ;;  %v453_v48 = vld [vmem:[#allocation2 + $0x80] sm:$0xff] }
  0xce   : > { %v1841_v2 = vor.u32 %v2015_v61, %v1840_v60  ;;  %v1817_v60 = vor.u32 %v2009_v50, %v1816_v49 }
  0xd0   : > { %2161 = vmatpush.bf16.msra.mxu3 %v2530_v6  ;;  %v1869_v6 = vor.u32 %v2023_v0, %v1868_v63  ;;  %v1792_v63 = vld [vmem:[%s2513_s12 + $0xc8] sm:$0xf]  ;;  %v2003_v0 = vld [vmem:[%s2513_s12 + $0xd0] sm:$0xf0] }
  0xd4   : > { %2162 = vmatpush.bf16.msra.mxu3 %v2537_v9  ;;  %v1736_v9 = vld [vmem:[%s2513_s12 + $0x60] sm:$0xf] }
  0xd5   : > { %v1737_v17 = vor.u32 %v1990_v10, %v1736_v9  ;;  %v445_v9 = vld [vmem:[#allocation2 + $0xb0] sm:$0xff] }
  0xd8   : > { %2163 = vmatpush.bf16.msra.mxu3 %v2543_v12  ;;  %v2013_v12 = vld [vmem:[%s2513_s12 + $0x124] sm:$0xf] }
  0xdb   : > { %1012 = vmatmul.bf16.gmra.mxu0 %v1725_v5  ;;  %1072 = vmatmul.bf16.gmra.mxu3 %v1869_v6  ;;  %v1793_v5 = vor.u32 %v2003_v0, %v1792_v63 }
  0xdc   : > { %2164 = vmatpush.bf16.msra.mxu3 %v2549_v15  ;;  %1101 = vmatmul.bf16.gmra.mxu1 %v1729_v7  ;;  %v1744_v15 = vld [vmem:[%s2513_s12 + $0x68] sm:$0xf] }
  0xdd   : > { %1190 = vmatmul.bf16.gmra.mxu2 %v1733_v8  ;;  %v1745_v20 = vor.u32 %v1991_v16, %v1744_v15  ;;  %v1796_v15 = vld [vmem:[%s2513_s12 + $0xd8] sm:$0xf]  ;;  %v2005_v16 = vld [vmem:[%s2513_s12 + $0xe0] sm:$0xf0] }
  0xde   : > { %v1797_v27 = vor.u32 %v2005_v16, %v1796_v15  ;;  %v2012_v15 = vld [vmem:[%s2513_s12 + $0x118] sm:$0xf0] }
  0xe0   : > { %2165 = vmatpush.bf16.msra.mxu3 %v2555_v18  ;;  %v1837_v18 = vor.u32 %v2013_v12, %v1834_v13 }
  0xe4   : > { %2166 = vmatpush.bf16.msra.mxu3 %v2561_v21  ;;  %v1748_v21 = vld [vmem:[%s2513_s12 + $0x78] sm:$0xf] }
  0xe5   : > { %v1749_v29 = vor.u32 %v1993_v22, %v1748_v21  ;;  %v1804_v21 = vld [vmem:[%s2513_s12 + $0xe0] sm:$0xf]  ;;  %v2006_v22 = vld [vmem:[%s2513_s12 + $0xe8] sm:$0xf0] }
  0xe8   : > { %2167 = vmatpush.bf16.msra.mxu3 %v2566_v24  ;;  %v1750_v24 = vld [vmem:[%s2513_s12 + $0x84] sm:$0xf0] }
  0xe9   : > { %v1753_v31 = vor.u32 %v1992_v23, %v1750_v24 }
  0xeb   : > { %1017 = vmatmul.bf16.gmra.mxu0 %v1737_v17  ;;  %1146 = vmatmul.bf16.vlgmr.msrb.gmra.mxu3 %v1837_v18  ;;  %v2004_v17 = vld [vmem:[%s2513_s12 + $0xdc] sm:$0xf]  ;;  %v1852_v18 = vld [vmem:[%s2513_s12 + $0x140] sm:$0xf] }
  0xec   : > { %1106 = vmatmul.bf16.gmra.mxu1 %v1741_v19  ;;  %v2018_v19 = vld [vmem:[%s2513_s12 + $0x148] sm:$0xf0] }
  0xed   : > { %1195 = vmatmul.bf16.gmra.mxu2 %v1745_v20  ;;  %v1798_v20 = vld [vmem:[%s2513_s12 + $0xe4] sm:$0xf0]  ;;  %v1853_v28 = vor.u32 %v2018_v19, %v1852_v18 }
  0xee   : > { %v450_v18 = vld [vmem:[#allocation2 + $0x68] sm:$0xff] }
  0xfb   : > { %1022 = vmatmul.bf16.gmra.mxu0 %v1749_v29  ;;  %1151 = vmatmul.bf16.gmra.mxu3 %v1849_v30 }
  0xfc   : > { %1111 = vmatmul.bf16.gmra.mxu1 %v1753_v31  ;;  %v1801_v31 = vor.u32 %v2004_v17, %v1798_v20 }
  0xfd   : > { %1200 = vmatmul.bf16.gmra.mxu2 %v1757_v32  ;;  %v1805_v32 = vor.u32 %v2006_v22, %v1804_v21 }
 0x10b   : > { %1027 = vmatmul.bf16.gmra.mxu0 %v1761_v41  ;;  %1156 = vmatmul.bf16.gmra.mxu3 %v1861_v42 }
 0x10c   : > { %1116 = vmatmul.bf16.gmra.mxu1 %v1765_v43  ;;  %v1808_v43 = vld [vmem:[%s2513_s12 + $0xf0] sm:$0xf] }
 0x10d   : > { %1205 = vmatmul.bf16.gmra.mxu2 %v1769_v44  ;;  %v2008_v44 = vld [vmem:[%s2513_s12 + $0xf8] sm:$0xf0] }
 0x11b   : > { %1032 = vmatmul.bf16.gmra.mxu0 %v1773_v53  ;;  %1161 = vmatmul.bf16.gmra.mxu3 %v1873_v54  ;;  %v448_v53 = vld [vmem:[#allocation2 + $0x18] sm:$0xff] }
 0x11c   : > { %1121 = vmatmul.bf16.gmra.mxu1 %v1777_v55  ;;  %v1809_v55 = vor.u32 %v2008_v44, %v1808_v43 }
 0x11d   : > { %1210 = vmatmul.bf16.gmra.mxu2 %v1781_v56  ;;  %v1865_v56 = vor.u32 %v2021_v47, %v1864_v46 }
 0x128   : > { %v998_v3 = vpop.f32.mrf.mxu0 }
 0x129   : > { %v1087_v6 = vpop.f32.mrf.mxu1 }
 0x12a   : > { %v1088_v7 = vadd.f32 %v1087_v6, %v998_v3 }
 0x12b   : > { %1037 = vmatmul.bf16.gmra.mxu0 %v1785_v1  ;;  %1235 = vmatmul.bf16.vlgmr.msra.gmra.mxu3 %v1841_v2  ;;  %v449_v1 = vld [vmem:[#allocation2 + $0x50] sm:$0xff] }
 0x12c   : > { %1126 = vmatmul.bf16.gmra.mxu1 %v1789_v4 }
 0x12d   : > { %1215 = vmatmul.bf16.gmra.mxu2 %v1793_v5 }
 0x12e   : > { %v2652_v8 = vpop.f32.mrf.mxu3 }
 0x130   : > { %v1176_v10 = vpop.f32.mrf.mxu2  ;;  %v1000_v12 = vpop.f32.mrf.mxu0 }
 0x131   : > { %v1177_v11 = vadd.f32 %v1176_v10, %v1088_v7  ;;  %v1089_v13 = vpop.f32.mrf.mxu1  ;;  %v1820_v7 = vld [vmem:[%s2513_s12 + $0x108] sm:$0xf]  ;;  %v2010_v10 = vld [vmem:[%s2513_s12 + $0x10c] sm:$0xf] }
 0x132   : > { %v1090_v23 = vadd.f32 %v1089_v13, %v1000_v12  ;;  %v2024_v12 = vld [vmem:[%s2513_s12 + $0x178] sm:$0xf0]  ;;  %v1822_v13 = vld [vmem:[%s2513_s12 + $0x114] sm:$0xf0] }
 0x133   : > { %v1256_v14 = vadd.f32 %v1177_v11, %v445_v9  ;;  %v2011_v9 = vld [vmem:[%s2513_s12 + $0x110] sm:$0xf0]  ;;  %v1876_v11 = vld [vmem:[%s2513_s12 + $0x170] sm:$0xf] }
 0x134   : > { %v1821_v20 = vor.u32 %v2011_v9, %v1820_v7  ;;  %v1877_v21 = vor.u32 %v2024_v12, %v1876_v11  ;;  %v456_v11 = vld [vmem:[#allocation2 + $0xb8] sm:$0xff] }
 0x135   : > { %1288 = vst [vmem:[#allocation2 + $0xb0] sm:$0xff] %v1256_v14  ;;  %v1828_v14 = vld [vmem:[%s2513_s12 + $0x110] sm:$0xf] }
 0x136   : > { %v2662_v25 = vpop.f32.mrf.mxu3 }
 0x138   : > { %v1178_v24 = vpop.f32.mrf.mxu2  ;;  %v1003_v30 = vpop.f32.mrf.mxu0 }
 0x139   : > { %v1179_v29 = vadd.f32 %v1178_v24, %v1090_v23  ;;  %v1092_v33 = vpop.f32.mrf.mxu1  ;;  %v1829_v24 = vor.u32 %v2012_v15, %v1828_v14 }
 0x13a   : > { %v1093_v35 = vadd.f32 %v1092_v33, %v1003_v30 }
 0x13b   : > { %v1257_v34 = vadd.f32 %v1179_v29, %v446_v26  ;;  %1042 = vmatmul.bf16.gmra.mxu0 %v1797_v27  ;;  %1240 = vmatmul.bf16.gmra.mxu3 %v1853_v28  ;;  %v1825_v26 = vor.u32 %v2010_v10, %v1822_v13 }
 0x13c   : > { %1131 = vmatmul.bf16.gmra.mxu1 %v1801_v31  ;;  %v451_v31 = vld [vmem:[#allocation2 + $0x30] sm:$0xff] }
 0x13d   : > { %1289 = vst [vmem:[#allocation2] sm:$0xff] %v1257_v34  ;;  %1220 = vmatmul.bf16.gmra.mxu2 %v1805_v32 }
 0x13e   : > { %v2664_v36 = vpop.f32.mrf.mxu3 }
 0x140   : > { %v1181_v38 = vpop.f32.mrf.mxu2  ;;  %v1005_v40 = vpop.f32.mrf.mxu0 }
 0x141   : > { %v1182_v39 = vadd.f32 %v1181_v38, %v1093_v35  ;;  %v1094_v41 = vpop.f32.mrf.mxu1 }
 0x142   : > { %v1095_v51 = vadd.f32 %v1094_v41, %v1005_v40  ;;  %v452_v40 = vld [vmem:[#allocation2 + $0x48] sm:$0xff] }
 0x143   : > { %v1258_v42 = vadd.f32 %v1182_v39, %v447_v37 }
 0x145   : > { %1290 = vst [vmem:[#allocation2 + $0xd8] sm:$0xff] %v1258_v42 }
 0x146   : > { %v2674_v52 = vpop.f32.mrf.mxu3 }
 0x148   : > { %v1183_v54 = vpop.f32.mrf.mxu2  ;;  %v1008_v58 = vpop.f32.mrf.mxu0 }
 0x149   : > { %v1184_v57 = vadd.f32 %v1183_v54, %v1095_v51  ;;  %v1097_v61 = vpop.f32.mrf.mxu1 }
 0x14a   : > { %v1098_v63 = vadd.f32 %v1097_v61, %v1008_v58 }
 0x14b   : > { %v1259_v62 = vadd.f32 %v1184_v57, %v448_v53  ;;  %1047 = vmatmul.bf16.gmra.mxu0 %v1809_v55  ;;  %1245 = vmatmul.bf16.gmra.mxu3 %v1865_v56  ;;  %v454_v57 = vld [vmem:[#allocation2 + $0x88] sm:$0xff] }
 0x14c   : > { %1136 = vmatmul.bf16.gmra.mxu1 %v1813_v59 }
 0x14d   : > { %1291 = vst [vmem:[#allocation2 + $0x18] sm:$0xff] %v1259_v62  ;;  %1225 = vmatmul.bf16.gmra.mxu2 %v1817_v60 }
 0x14e   : > { %v2676_v0 = vpop.f32.mrf.mxu3 }
 0x150   : > { %v1186_v2 = vpop.f32.mrf.mxu2  ;;  %v1010_v4 = vpop.f32.mrf.mxu0 }
 0x151   : > { %v1187_v3 = vadd.f32 %v1186_v2, %v1098_v63  ;;  %v1099_v5 = vpop.f32.mrf.mxu1  ;;  %v455_v2 = vld [vmem:[#allocation2 + $0xe8] sm:$0xff] }
 0x152   : > { %v1100_v16 = vadd.f32 %v1099_v5, %v1010_v4 }
 0x153   : > { %v1260_v6 = vadd.f32 %v1187_v3, %v449_v1 }
 0x155   : > { %1292 = vst [vmem:[#allocation2 + $0x50] sm:$0xff] %v1260_v6 }
 0x156   : > { %v2686_v17 = vpop.f32.mrf.mxu3 }
 0x158   : > { %v1188_v19 = vpop.f32.mrf.mxu2  ;;  %v1013_v23 = vpop.f32.mrf.mxu0 }
 0x159   : > { %v1189_v22 = vadd.f32 %v1188_v19, %v1100_v16  ;;  %v1102_v27 = vpop.f32.mrf.mxu1 }
 0x15a   : > { %v1103_v29 = vadd.f32 %v1102_v27, %v1013_v23 }
 0x15b   : > { %v1261_v28 = vadd.f32 %v1189_v22, %v450_v18  ;;  %1052 = vmatmul.bf16.gmra.mxu0 %v1821_v20  ;;  %1250 = vmatmul.bf16.gmra.mxu3 %v1877_v21  ;;  %v457_v20 = vld [vmem:[#allocation2 + $0x60] sm:$0xff] }
 0x15c   : > { %1141 = vmatmul.bf16.gmra.mxu1 %v1825_v26 }
 0x15d   : > { %1293 = vst [vmem:[#allocation2 + $0x68] sm:$0xff] %v1261_v28  ;;  %1230 = vmatmul.bf16.gmra.mxu2 %v1829_v24 }
 0x15e   : > { %v2688_v30 = vpop.f32.mrf.mxu3 }
 0x160   : > { %v1191_v32 = vpop.f32.mrf.mxu2  ;;  %v1015_v34 = vpop.f32.mrf.mxu0 }
 0x161   : > { %v1192_v33 = vadd.f32 %v1191_v32, %v1103_v29  ;;  %v1104_v35 = vpop.f32.mrf.mxu1  ;;  %v458_v29 = vld [vmem:[#allocation2 + $0xf0] sm:$0xff] }
 0x162   : > { %v1105_v38 = vadd.f32 %v1104_v35, %v1015_v34 }
 0x163   : > { %v1262_v37 = vadd.f32 %v1192_v33, %v451_v31 }
 0x165   : > { %1294 = vst [vmem:[#allocation2 + $0x30] sm:$0xff] %v1262_v37 }
 0x166   : > { %v2690_v39 = vpop.f32.mrf.mxu3 }
 0x168   : > { %v1193_v41 = vpop.f32.mrf.mxu2  ;;  %v1018_v43 = vpop.f32.mrf.mxu0 }
 0x169   : > { %v1194_v42 = vadd.f32 %v1193_v41, %v1105_v38  ;;  %v1107_v44 = vpop.f32.mrf.mxu1 }
 0x16a   : > { %v1108_v46 = vadd.f32 %v1107_v44, %v1018_v43 }
 0x16b   : > { %v1263_v45 = vadd.f32 %v1194_v42, %v452_v40  ;;  %v459_v40 = vld [vmem:[#allocation2 + $0x8] sm:$0xff] }
 0x16d   : > { %1295 = vst [vmem:[#allocation2 + $0x48] sm:$0xff] %v1263_v45 }
 0x16e   : > { %v2692_v47 = vpop.f32.mrf.mxu3 }
 0x170   : > { %v1196_v49 = vpop.f32.mrf.mxu2  ;;  %v1020_v51 = vpop.f32.mrf.mxu0 }
 0x171   : > { %v1197_v50 = vadd.f32 %v1196_v49, %v1108_v46  ;;  %v1109_v53 = vpop.f32.mrf.mxu1  ;;  %v460_v49 = vld [vmem:[#allocation2 + $0x78] sm:$0xff] }
 0x172   : > { %v1110_v55 = vadd.f32 %v1109_v53, %v1020_v51 }
 0x173   : > { %v1264_v54 = vadd.f32 %v1197_v50, %v453_v48 }
 0x175   : > { %1296 = vst [vmem:[#allocation2 + $0x80] sm:$0xff] %v1264_v54 }
 0x176   : > { %v2694_v56 = vpop.f32.mrf.mxu3 }
 0x178   : > { %v1198_v58 = vpop.f32.mrf.mxu2  ;;  %v1023_v60 = vpop.f32.mrf.mxu0 }
 0x179   : > { %v1199_v59 = vadd.f32 %v1198_v58, %v1110_v55  ;;  %v1112_v61 = vpop.f32.mrf.mxu1  ;;  %v1148_v58 = vadd.f32 %v2692_v47, %v2652_v8 }
 0x17a   : > { %v1113_v63 = vadd.f32 %v1112_v61, %v1023_v60  ;;  %v461_v61 = vld [vmem:[#allocation2 + $0x38] sm:$0xff] }
 0x17b   : > { %v1265_v62 = vadd.f32 %v1199_v59, %v454_v57  ;;  %v469_v59 = vld [vmem:[#allocation2 + $0xa8] sm:$0xff] }
 0x17d   : > { %1297 = vst [vmem:[#allocation2 + $0x88] sm:$0xff] %v1265_v62 }
 0x17e   : > { %v2696_v1 = vpop.f32.mrf.mxu3 }
 0x180   : > { %v1201_v3 = vpop.f32.mrf.mxu2  ;;  %v1025_v5 = vpop.f32.mrf.mxu0 }
 0x181   : > { %v1202_v4 = vadd.f32 %v1201_v3, %v1113_v63  ;;  %v1114_v6 = vpop.f32.mrf.mxu1 }
 0x182   : > { %v1115_v9 = vadd.f32 %v1114_v6, %v1025_v5 }
 0x183   : > { %v1266_v7 = vadd.f32 %v1202_v4, %v455_v2 }
 0x185   : > { %1298 = vst [vmem:[#allocation2 + $0xe8] sm:$0xff] %v1266_v7  ;;  %v1150_v7 = vadd.f32 %v2694_v56, %v2662_v25  ;;  %v463_v25 = vld [vmem:[#allocation2 + $0x40] sm:$0xff] }
 0x186   : > { %v2698_v10 = vpop.f32.mrf.mxu3 }
 0x188   : > { %v1203_v12 = vpop.f32.mrf.mxu2  ;;  %v1028_v14 = vpop.f32.mrf.mxu0 }
 0x189   : > { %v1204_v13 = vadd.f32 %v1203_v12, %v1115_v9  ;;  %v1117_v15 = vpop.f32.mrf.mxu1 }
 0x18a   : > { %v1118_v18 = vadd.f32 %v1117_v15, %v1028_v14 }
 0x18b   : > { %v1267_v16 = vadd.f32 %v1204_v13, %v456_v11  ;;  %v470_v11 = vld [vmem:[#allocation2 + $0xd0] sm:$0xff]  ;;  %v462_v13 = vld [vmem:[#allocation2 + $0x58] sm:$0xff] }
 0x18d   : > { %1299 = vst [vmem:[#allocation2 + $0xb8] sm:$0xff] %v1267_v16 }
 0x18e   : > { %v2700_v19 = vpop.f32.mrf.mxu3 }
 0x190   : > { %v1206_v21 = vpop.f32.mrf.mxu2  ;;  %v1030_v23 = vpop.f32.mrf.mxu0 }
 0x191   : > { %v1207_v22 = vadd.f32 %v1206_v21, %v1118_v18  ;;  %v1119_v26 = vpop.f32.mrf.mxu1 }
 0x192   : > { %v1120_v27 = vadd.f32 %v1119_v26, %v1030_v23  ;;  %v471_v23 = vld [vmem:[#allocation2 + $0x10] sm:$0xff] }
 0x193   : > { %v1268_v24 = vadd.f32 %v1207_v22, %v457_v20  ;;  %v1153_v22 = vadd.f32 %v2696_v1, %v2664_v36 }
 0x195   : > { %1300 = vst [vmem:[#allocation2 + $0x60] sm:$0xff] %v1268_v24 }
 0x196   : > { %v2702_v28 = vpop.f32.mrf.mxu3 }
 0x198   : > { %v1208_v31 = vpop.f32.mrf.mxu2  ;;  %v1033_v33 = vpop.f32.mrf.mxu0 }
 0x199   : > { %v1209_v32 = vadd.f32 %v1208_v31, %v1120_v27  ;;  %v1122_v34 = vpop.f32.mrf.mxu1 }
 0x19a   : > { %v1123_v37 = vadd.f32 %v1122_v34, %v1033_v33  ;;  %v1155_v34 = vadd.f32 %v2698_v10, %v2674_v52  ;;  %v465_v52 = vld [vmem:[#allocation2 + $0xe0] sm:$0xff] }
 0x19b   : > { %v1269_v35 = vadd.f32 %v1209_v32, %v458_v29 }
 0x19d   : > { %1301 = vst [vmem:[#allocation2 + $0xf0] sm:$0xff] %v1269_v35 }
 0x19e   : > { %v2704_v38 = vpop.f32.mrf.mxu3 }
 0x1a0   : > { %v1211_v41 = vpop.f32.mrf.mxu2  ;;  %v1035_v43 = vpop.f32.mrf.mxu0 }
 0x1a1   : > { %v1212_v42 = vadd.f32 %v1211_v41, %v1123_v37  ;;  %v1124_v44 = vpop.f32.mrf.mxu1  ;;  %v472_v37 = vld [vmem:[#allocation2 + $0x28] sm:$0xff] }
 0x1a2   : > { %v1125_v46 = vadd.f32 %v1124_v44, %v1035_v43  ;;  %v464_v41 = vld [vmem:[#allocation2 + $0xc8] sm:$0xff] }
 0x1a3   : > { %v1270_v45 = vadd.f32 %v1212_v42, %v459_v40 }
 0x1a5   : > { %1302 = vst [vmem:[#allocation2 + $0x8] sm:$0xff] %v1270_v45 }
 0x1a6   : > { %v2706_v48 = vpop.f32.mrf.mxu3 }
 0x1a8   : > { %v1213_v50 = vpop.f32.mrf.mxu2  ;;  %v1038_v53 = vpop.f32.mrf.mxu0 }
 0x1a9   : > { %v1214_v51 = vadd.f32 %v1213_v50, %v1125_v46  ;;  %v1127_v54 = vpop.f32.mrf.mxu1  ;;  %v1158_v50 = vadd.f32 %v2700_v19, %v2676_v0 }
 0x1aa   : > { %v1128_v57 = vadd.f32 %v1127_v54, %v1038_v53 }
 0x1ab   : > { %v1271_v55 = vadd.f32 %v1214_v51, %v460_v49  ;;  %v473_v51 = vld [vmem:[#allocation2 + $0xa0] sm:$0xff] }
 0x1ad   : > { %1303 = vst [vmem:[#allocation2 + $0x78] sm:$0xff] %v1271_v55 }
 0x1ae   : > { %v1236_v60 = vpop.f32.mrf.mxu3 }
 0x1af   : > { %v1237_v63 = vadd.f32 %v1236_v60, %v1148_v58 }
 0x1b0   : > { %v1216_v62 = vpop.f32.mrf.mxu2  ;;  %v1040_v3 = vpop.f32.mrf.mxu0 }
 0x1b1   : > { %v1217_v2 = vadd.f32 %v1216_v62, %v1128_v57  ;;  %v1280_v4 = vadd.f32 %v1237_v63, %v469_v59  ;;  %v1129_v5 = vpop.f32.mrf.mxu1  ;;  %v474_v63 = vld [vmem:[#allocation2 + $0xf8] sm:$0xff] }
 0x1b2   : > { %v1130_v9 = vadd.f32 %v1129_v5, %v1040_v3  ;;  %v466_v3 = vld [vmem:[#allocation2 + $0x90] sm:$0xff] }
 0x1b3   : > { %v1272_v6 = vadd.f32 %v1217_v2, %v461_v61  ;;  %1312 = vst [vmem:[#allocation2 + $0xa8] sm:$0xff] %v1280_v4  ;;  %v1160_v61 = vadd.f32 %v2702_v28, %v2686_v17  ;;  %v467_v17 = vld [vmem:[#allocation2 + $0x70] sm:$0xff] }
 0x1b5   : > { %1304 = vst [vmem:[#allocation2 + $0x38] sm:$0xff] %v1272_v6 }
 0x1b6   : > { %v1238_v12 = vpop.f32.mrf.mxu3 }
 0x1b7   : > { %v1239_v47 = vadd.f32 %v1238_v12, %v1150_v7  ;;  %v1163_v12 = vadd.f32 %v2704_v38, %v2688_v30 }
 0x1b8   : > { %v1218_v8 = vpop.f32.mrf.mxu2  ;;  %v1043_v15 = vpop.f32.mrf.mxu0 }
 0x1b9   : > { %v1219_v14 = vadd.f32 %v1218_v8, %v1130_v9  ;;  %v1281_v16 = vadd.f32 %v1239_v47, %v470_v11  ;;  %v1132_v18 = vpop.f32.mrf.mxu1 }
 0x1ba   : > { %v1133_v21 = vadd.f32 %v1132_v18, %v1043_v15 }
 0x1bb   : > { %v1273_v20 = vadd.f32 %v1219_v14, %v462_v13  ;;  %1313 = vst [vmem:[#allocation2 + $0xd0] sm:$0xff] %v1281_v16  ;;  %v475_v13 = vld [vmem:[#allocation2 + $0x20] sm:$0xff] }
 0x1bd   : > { %1305 = vst [vmem:[#allocation2 + $0x58] sm:$0xff] %v1273_v20 }
 0x1be   : > { %v1241_v26 = vpop.f32.mrf.mxu3 }
 0x1bf   : > { %v1242_v24 = vadd.f32 %v1241_v26, %v1153_v22 }
 0x1c0   : > { %v1221_v56 = vpop.f32.mrf.mxu2  ;;  %v1045_v29 = vpop.f32.mrf.mxu0 }
 0x1c1   : > { %v1222_v27 = vadd.f32 %v1221_v56, %v1133_v21  ;;  %v1282_v31 = vadd.f32 %v1242_v24, %v471_v23  ;;  %v1134_v32 = vpop.f32.mrf.mxu1  ;;  %v1165_v21 = vadd.f32 %v2706_v48, %v2690_v39  ;;  %v476_v23 = vld [vmem:[#allocation2 + $0x98] sm:$0xff] }
 0x1c2   : > { %v1135_v35 = vadd.f32 %v1134_v32, %v1045_v29 }
 0x1c3   : > { %v1274_v33 = vadd.f32 %v1222_v27, %v463_v25  ;;  %1314 = vst [vmem:[#allocation2 + $0x10] sm:$0xff] %v1282_v31  ;;  %v468_v25 = vld [vmem:[#allocation2 + $0xc0] sm:$0xff] }
 0x1c5   : > { %1306 = vst [vmem:[#allocation2 + $0x40] sm:$0xff] %v1274_v33 }
 0x1c6   : > { %v1243_v40 = vpop.f32.mrf.mxu3 }
 0x1c7   : > { %v1244_v1 = vadd.f32 %v1243_v40, %v1155_v34 }
 0x1c8   : > { %v1223_v36 = vpop.f32.mrf.mxu2  ;;  %v1048_v43 = vpop.f32.mrf.mxu0 }
 0x1c9   : > { %v1224_v42 = vadd.f32 %v1223_v36, %v1135_v35  ;;  %v1283_v44 = vadd.f32 %v1244_v1, %v472_v37  ;;  %v1137_v45 = vpop.f32.mrf.mxu1 }
 0x1ca   : > { %v1138_v49 = vadd.f32 %v1137_v45, %v1048_v43 }
 0x1cb   : > { %v1275_v46 = vadd.f32 %v1224_v42, %v464_v41  ;;  %1315 = vst [vmem:[#allocation2 + $0x28] sm:$0xff] %v1283_v44 }
 0x1cd   : > { %1307 = vst [vmem:[#allocation2 + $0xc8] sm:$0xff] %v1275_v46 }
 0x1ce   : > { %v1246_v53 = vpop.f32.mrf.mxu3 }
 0x1cf   : > { %v1247_v54 = vadd.f32 %v1246_v53, %v1158_v50 }
 0x1d0   : > { %v1226_v10 = vpop.f32.mrf.mxu2  ;;  %v1050_v57 = vpop.f32.mrf.mxu0 }
 0x1d1   : > { %v1227_v55 = vadd.f32 %v1226_v10, %v1138_v49  ;;  %v1284_v58 = vadd.f32 %v1247_v54, %v473_v51  ;;  %v1139_v59 = vpop.f32.mrf.mxu1 }
 0x1d2   : > { %v1140_v62 = vadd.f32 %v1139_v59, %v1050_v57 }
 0x1d3   : > { %v1276_v60 = vadd.f32 %v1227_v55, %v465_v52  ;;  %1316 = vst [vmem:[#allocation2 + $0xa0] sm:$0xff] %v1284_v58 }
 0x1d5   : > { %1308 = vst [vmem:[#allocation2 + $0xe0] sm:$0xff] %v1276_v60 }
 0x1d6   : > { %v1248_v2 = vpop.f32.mrf.mxu3 }
 0x1d7   : > { %v1249_v19 = vadd.f32 %v1248_v2, %v1160_v61 }
 0x1d8   : > { %v1228_v0 = vpop.f32.mrf.mxu2  ;;  %v1053_v6 = vpop.f32.mrf.mxu0 }
 0x1d9   : > { %v1229_v4 = vadd.f32 %v1228_v0, %v1140_v62  ;;  %v1285_v5 = vadd.f32 %v1249_v19, %v474_v63  ;;  %v1142_v7 = vpop.f32.mrf.mxu1 }
 0x1da   : > { %v1143_v11 = vadd.f32 %v1142_v7, %v1053_v6 }
 0x1db   : > { %v1277_v9 = vadd.f32 %v1229_v4, %v466_v3  ;;  %1317 = vst [vmem:[#allocation2 + $0xf8] sm:$0xff] %v1285_v5 }
 0x1dd   : > { %1309 = vst [vmem:[#allocation2 + $0x90] sm:$0xff] %v1277_v9 }
 0x1de   : > { %v1251_v8 = vpop.f32.mrf.mxu3 }
 0x1df   : > { %v1252_v47 = vadd.f32 %v1251_v8, %v1163_v12 }
 0x1e0   : > { %v1231_v28 = vpop.f32.mrf.mxu2  ;;  %v1055_v18 = vpop.f32.mrf.mxu0 }
 0x1e1   : > { %v1232_v14 = vadd.f32 %v1231_v28, %v1143_v11  ;;  %v1286_v15 = vadd.f32 %v1252_v47, %v475_v13  ;;  %v1144_v20 = vpop.f32.mrf.mxu1 }
 0x1e2   : > { %v1145_v22 = vadd.f32 %v1144_v20, %v1055_v18 }
 0x1e3   : > { %v1278_v16 = vadd.f32 %v1232_v14, %v467_v17  ;;  %1318 = vst [vmem:[#allocation2 + $0x20] sm:$0xff] %v1286_v15 }
 0x1e5   : > { %1310 = vst [vmem:[#allocation2 + $0x70] sm:$0xff] %v1278_v16 }
 0x1e6   : > { %v1253_v26 = vpop.f32.mrf.mxu3 }
 0x1e7   : > { %v1254_v38 = vadd.f32 %v1253_v26, %v1165_v21 }
 0x1e8   : > { %v1233_v30 = vpop.f32.mrf.mxu2 }
 0x1e9   : > { %v1234_v56 = vadd.f32 %v1233_v30, %v1145_v22  ;;  %v1287_v24 = vadd.f32 %v1254_v38, %v476_v23  ;;  %1323 = sbr.rel (%p1974_p13) target bundleno = 520 (0x208), region = 66 }
 0x1eb   : > { %v1279_v27 = vadd.f32 %v1234_v56, %v468_v25  ;;  %1319 = vst [vmem:[#allocation2 + $0x98] sm:$0xff] %v1287_v24 }
 0x1ed   : > { %1311 = vst [vmem:[#allocation2 + $0xc0] sm:$0xff] %v1279_v27 }
 0x1ee   : > { %v1324_v29 = vld [vmem:[#allocation2 + $0xb0] sm:$0xff]  ;;  %v1325_v31 = vld [vmem:[#allocation2] sm:$0xff]  ;;  %v1326_v48 = vld [vmem:[#allocation2 + $0xd8] sm:$0xff] }
 0x1ef   : > { %v2728_v39 = vld [vmem:[%s2801_s2] ss:$0 sm:$0xff]  ;;  %v1327_v32 = vld [vmem:[#allocation2 + $0x18] sm:$0xff]  ;;  %v1328_v33 = vld [vmem:[#allocation2 + $0x50] sm:$0xff] }
 0x1f0   : > { %v1329_v34 = vld [vmem:[#allocation2 + $0x68] sm:$0xff]  ;;  %v1330_v35 = vld [vmem:[#allocation2 + $0x30] sm:$0xff]  ;;  %v1360_v37 = vadd.f32 %v2728_v39, %v1324_v29  ;;  %v1361_v40 = vadd.f32 %v2728_v39, %v1325_v31  ;;  %v1362_v41 = vadd.f32 %v2728_v39, %v1326_v48  ;;  %v1363_v36 = vadd.f32 %v2728_v39, %v1327_v32  ;;  %v1332_v46 = vld [vmem:[#allocation2 + $0x80] sm:$0xff] }
 0x1f1   : > { %v1331_v1 = vld [vmem:[#allocation2 + $0x48] sm:$0xff]  ;;  %v1364_v42 = vadd.f32 %v2728_v39, %v1328_v33  ;;  %v1365_v43 = vadd.f32 %v2728_v39, %v1329_v34  ;;  %v1366_v44 = vadd.f32 %v2728_v39, %v1330_v35  ;;  %v1335_v54 = vld [vmem:[#allocation2 + $0xb8] sm:$0xff]  ;;  %v1336_v60 = vld [vmem:[#allocation2 + $0x60] sm:$0xff]  ;;  %v1368_v2 = vadd.f32 %v2728_v39, %v1332_v46 }
 0x1f2   : > { %v1367_v45 = vadd.f32 %v2728_v39, %v1331_v1  ;;  %v1333_v49 = vld [vmem:[#allocation2 + $0x88] sm:$0xff]  ;;  %v1392_v50 = vmax.f32 %v1360_v37, 0.0  ;;  %v1393_v51 = vmax.f32 %v1361_v40, 0.0  ;;  %v1394_v53 = vmax.f32 %v1362_v41, 0.0  ;;  %v1337_v61 = vld [vmem:[#allocation2 + $0xf0] sm:$0xff]  ;;  %v1339_v19 = vld [vmem:[#allocation2 + $0x78] sm:$0xff] }
 0x1f3   : > { %v1395_v52 = vmax.f32 %v1363_v36, 0.0  ;;  %v1334_v10 = vld [vmem:[#allocation2 + $0xe8] sm:$0xff]  ;;  %v1396_v55 = vmax.f32 %v1364_v42, 0.0  ;;  %v1397_v57 = vmax.f32 %v1365_v43, 0.0  ;;  %v1398_v58 = vmax.f32 %v1366_v44, 0.0  ;;  %v1340_v9 = vld [vmem:[#allocation2 + $0x38] sm:$0xff] }
 0x1f4   : > { %v1399_v59 = vmax.f32 %v1367_v45, 0.0  ;;  %v2052_v62 = vpack.c.bf16 %v1393_v51, %v1392_v50  ;;  %v1369_v3 = vadd.f32 %v2728_v39, %v1333_v49  ;;  %v1338_v0 = vld [vmem:[#allocation2 + $0x8] sm:$0xff]  ;;  %v1370_v6 = vadd.f32 %v2728_v39, %v1334_v10  ;;  %v1341_v17 = vld [vmem:[#allocation2 + $0x58] sm:$0xff]  ;;  %v1342_v16 = vld [vmem:[#allocation2 + $0x40] sm:$0xff] }
 0x1f5   : > { %v2057_v63 = vpack.c.bf16 %v1395_v52, %v1394_v53  ;;  %v2062_v4 = vpack.c.bf16 %v1397_v57, %v1396_v55  ;;  %v1371_v7 = vadd.f32 %v2728_v39, %v1335_v54  ;;  %v1400_v11 = vmax.f32 %v1368_v2, 0.0  ;;  %v1343_v18 = vld [vmem:[#allocation2 + $0xc8] sm:$0xff]  ;;  %v1344_v26 = vld [vmem:[#allocation2 + $0xe0] sm:$0xff]  ;;  %v1345_v25 = vld [vmem:[#allocation2 + $0x90] sm:$0xff] }
 0x1f6   : > { %v2067_v5 = vpack.c.bf16 %v1399_v59, %v1398_v58  ;;  %2053 = vst [vmem:[%s2511_s30] sm:$0xff] %v2052_v62   ;;  %v1401_v12 = vmax.f32 %v1369_v3, 0.0  ;;  %v1372_v13 = vadd.f32 %v2728_v39, %v1336_v60  ;;  %v1373_v8 = vadd.f32 %v2728_v39, %v1337_v61  ;;  %v1346_v27 = vld [vmem:[#allocation2 + $0x70] sm:$0xff]  ;;  %v1347_v29 = vld [vmem:[#allocation2 + $0xc0] sm:$0xff]  ;;  %v1348_v34 = vld [vmem:[#allocation2 + $0xa8] sm:$0xff] }
 0x1f7   : > { %2129 = vst [vmem:[%s2511_s30 + $0x8] sm:$0xff] %v2057_v63   ;;  %v1402_v28 = vmax.f32 %v1370_v6, 0.0  ;;  %v1403_v47 = vmax.f32 %v1371_v7, 0.0  ;;  %v1374_v14 = vadd.f32 %v2728_v39, %v1338_v0  ;;  %v1375_v15 = vadd.f32 %v2728_v39, %v1339_v19  ;;  %v1349_v36 = vld [vmem:[#allocation2 + $0xd0] sm:$0xff]  ;;  %v1351_v46 = vld [vmem:[#allocation2 + $0x28] sm:$0xff]  ;;  %v1352_v52 = vld [vmem:[#allocation2 + $0xa0] sm:$0xff] }
 0x1f8   : > { %2130 = vst [vmem:[%s2511_s30 + $0x10] sm:$0xff] %v2062_v4   ;;  %v2072_v20 = vpack.c.bf16 %v1401_v12, %v1400_v11  ;;  %v1404_v21 = vmax.f32 %v1372_v13, 0.0  ;;  %v1405_v22 = vmax.f32 %v1373_v8, 0.0  ;;  %v1376_v23 = vadd.f32 %v2728_v39, %v1340_v9  ;;  %v1350_v45 = vld [vmem:[#allocation2 + $0x10] sm:$0xff]  ;;  %v1353_v10 = vld [vmem:[#allocation2 + $0xf8] sm:$0xff]  ;;  %v1354_v59 = vld [vmem:[#allocation2 + $0x20] sm:$0xff] }
 0x1f9   : > { %2131 = vst [vmem:[%s2511_s30 + $0x18] sm:$0xff] %v2067_v5   ;;  %v2077_v30 = vpack.c.bf16 %v1403_v47, %v1402_v28  ;;  %v1406_v38 = vmax.f32 %v1374_v14, 0.0  ;;  %v1407_v56 = vmax.f32 %v1375_v15, 0.0  ;;  %v1377_v24 = vadd.f32 %v2728_v39, %v1341_v17  ;;  %v1355_v60 = vld [vmem:[#allocation2 + $0x98] sm:$0xff] }
 0x1fa   : > { %2132 = vst [vmem:[%s2511_s30 + $0x20] sm:$0xff] %v2072_v20   ;;  %v2082_v31 = vpack.c.bf16 %v1405_v22, %v1404_v21  ;;  %v1408_v48 = vmax.f32 %v1376_v23, 0.0  ;;  %v1378_v32 = vadd.f32 %v2728_v39, %v1342_v16  ;;  %v1379_v33 = vadd.f32 %v2728_v39, %v1343_v18 }
 0x1fb   : > { %2133 = vst [vmem:[%s2511_s30 + $0x28] sm:$0xff] %v2077_v30   ;;  %v2087_v35 = vpack.c.bf16 %v1407_v56, %v1406_v38  ;;  %v1409_v37 = vmax.f32 %v1377_v24, 0.0  ;;  %v1380_v40 = vadd.f32 %v2728_v39, %v1344_v26  ;;  %v1381_v41 = vadd.f32 %v2728_v39, %v1345_v25 }
 0x1fc   : > { %2134 = vst [vmem:[%s2511_s30 + $0x30] sm:$0xff] %v2082_v31   ;;  %v1410_v1 = vmax.f32 %v1378_v32, 0.0  ;;  %v1411_v42 = vmax.f32 %v1379_v33, 0.0  ;;  %v1382_v43 = vadd.f32 %v2728_v39, %v1346_v27  ;;  %v1383_v44 = vadd.f32 %v2728_v39, %v1347_v29 }
 0x1fd   : > { %2135 = vst [vmem:[%s2511_s30 + $0x38] sm:$0xff] %v2087_v35   ;;  %v2092_v49 = vpack.c.bf16 %v1409_v37, %v1408_v48  ;;  %v1412_v50 = vmax.f32 %v1380_v40, 0.0  ;;  %v1413_v51 = vmax.f32 %v1381_v41, 0.0  ;;  %v1384_v53 = vadd.f32 %v2728_v39, %v1348_v34 }
 0x1fe   : > { %v2097_v54 = vpack.c.bf16 %v1411_v42, %v1410_v1  ;;  %v1414_v55 = vmax.f32 %v1382_v43, 0.0  ;;  %v1415_v57 = vmax.f32 %v1383_v44, 0.0  ;;  %v1385_v58 = vadd.f32 %v2728_v39, %v1349_v36 }
 0x1ff   : > { %2136 = vst [vmem:[%s2511_s30 + $0x40] sm:$0xff] %v2092_v49   ;;  %v2102_v61 = vpack.c.bf16 %v1413_v51, %v1412_v50  ;;  %v1416_v62 = vmax.f32 %v1384_v53, 0.0  ;;  %v1386_v63 = vadd.f32 %v2728_v39, %v1350_v45  ;;  %v1387_v2 = vadd.f32 %v2728_v39, %v1351_v46 }
 0x200   : > { %2137 = vst [vmem:[%s2511_s30 + $0x48] sm:$0xff] %v2097_v54   ;;  %v2107_v3 = vpack.c.bf16 %v1415_v57, %v1414_v55  ;;  %v1417_v0 = vmax.f32 %v1385_v58, 0.0  ;;  %v1388_v19 = vadd.f32 %v2728_v39, %v1352_v52  ;;  %v1389_v4 = vadd.f32 %v2728_v39, %v1353_v10 }
 0x201   : > { %2138 = vst [vmem:[%s2511_s30 + $0x50] sm:$0xff] %v2102_v61   ;;  %v1418_v5 = vmax.f32 %v1386_v63, 0.0  ;;  %v1419_v6 = vmax.f32 %v1387_v2, 0.0  ;;  %v1390_v7 = vadd.f32 %v2728_v39, %v1354_v59  ;;  %v1391_v9 = vadd.f32 %v2728_v39, %v1355_v60 }
 0x202   : > { %2139 = vst [vmem:[%s2511_s30 + $0x58] sm:$0xff] %v2107_v3   ;;  %v2112_v11 = vpack.c.bf16 %v1417_v0, %v1416_v62  ;;  %v1420_v12 = vmax.f32 %v1388_v19, 0.0  ;;  %v1421_v13 = vmax.f32 %v1389_v4, 0.0 }
 0x203   : > { %v2117_v8 = vpack.c.bf16 %v1419_v6, %v1418_v5  ;;  %v1422_v17 = vmax.f32 %v1390_v7, 0.0  ;;  %v1423_v28 = vmax.f32 %v1391_v9, 0.0 }
 0x204   : > { %2140 = vst [vmem:[%s2511_s30 + $0x60] sm:$0xff] %v2112_v11   ;;  %v2122_v47 = vpack.c.bf16 %v1421_v13, %v1420_v12 }
 0x205   : > { %2141 = vst [vmem:[%s2511_s30 + $0x68] sm:$0xff] %v2117_v8   ;;  %v2127_v14 = vpack.c.bf16 %v1423_v28, %v1422_v17 }
 0x206   : > { %2142 = vst [vmem:[%s2511_s30 + $0x70] sm:$0xff] %v2122_v47  }
 0x207   : > { %2143 = vst [vmem:[%s2511_s30 + $0x78] sm:$0xff] %v2127_v14  }
 0x208 PF: > { %s13_s18 = sadd.s32 1, %s2283_s18   ;;  %s2803_s12 = smov %s2263_s13 }
 0x209   : > { %p10_p0 = scmp.ge.s32.totalorder %s13_s18, 8   ;;  %s2804_s13 = smov %s2357_s25 }
 0x20a   : > { %s2805_s14 = smov %s2275_s16  ;;  %s2806_s15 = smov %s2279_s17 }
 0x20b   : > { %s2807_s16 = smov %s2810_s19  ;;  %s2808_s17 = smov %s2814_s20 }
 0x20c   :  { %12 = sbr.rel (!%p10_p0) target bundleno = 4 (0x4), region = 113 }

// kernel: _lambda_.115
= control target key start
LH: loop header
LB: loop body
LE: loop exit
PB: predicated region body
PF: predicated region fallthrough
CT: control target
= control target key end

     0   :  { %s759_s12 = smov 0   ;;  %s761_s13 = smov 0   ;;  %s829_s0 = inlined_call_operand.vmem [shape: bf16[128,128], index: 0, kind: input, shape index: {}]   ;;  %s830_s1 = inlined_call_operand.vmem [shape: bf16[128,128], index: 1, kind: input, shape index: {}]   ;;  %s831_s2 = inlined_call_operand.vmem [shape: f32[1,128], index: 2, kind: input, shape index: {}]   ;;  %s832_s3 = inlined_call_operand.vmem [shape: bf16[128,128], index: 3, kind: output, shape index: {}]  }
   0x1   :  { %s763_s14 = smov 0  }
   0x2 LB: > { %s32_s15 = sadd.s32 1, %s733_s13  ;;  %p576_p0 = scmp.ge.s32.totalorder %s737_s14, 1  ;;  %s737_s14 = sphi %s763_s14, %s13_s14   ;;  %s733_s13 = sphi %s761_s13, %s834_s13   ;;  %s729_s12 = sphi %s759_s12, %s833_s12  }
   0x3   : > { %p34_p1 = scmp.ge.s32.totalorder %s32_s15, 2  ;;  %p188_p2 = scmp.lt.s32.totalorder %s737_s14, 3 }
   0x5   : > { %s836_s15 = smov (%p34_p1, %s32_s15), 0  ;;  %p189_p3 = pnand %p576_p0, %p188_p2 }
   0x6   : > { %s577_s24 = sshll.u32 (!%p189_p3), %s729_s12, 3 }
   0x7   : > { %192 = sbr.rel (%p189_p3) target bundleno = 191 (0xbf), region = 32  ;;  %p230_p4 = scmp.lt.s32.totalorder (!%p189_p3), %s577_s24, 15 }
   0xc   : > { %v642_v0 = vld [vmem:[%s830_s1 + $0x38] sm:$0xff]  ;;  %v641_v1 = vld [vmem:[%s830_s1 + $0x30] sm:$0xff]  ;;  %v640_v2 = vld [vmem:[%s830_s1 + $0x28] sm:$0xff]  ;;  %s838_s24 = smov (!%p230_p4, %s577_s24), 15 }
   0xd   : > { %375 = vmatpush.bf16.msra.mxu0 %v642_v0  ;;  %666 = vmatpush.bf16.msra.mxu1 %v642_v0  ;;  %v639_v3 = vld [vmem:[%s830_s1 + $0x20] sm:$0xff]  ;;  %v638_v4 = vld [vmem:[%s830_s1 + $0x18] sm:$0xff]  ;;  %v637_v5 = vld [vmem:[%s830_s1 + $0x10] sm:$0xff]  ;;  %s578_s4 = sshll.u32 %s838_s24, 2 }
   0xe   : > { %667 = vmatpush.bf16.msra.mxu2 %v642_v0  ;;  %668 = vmatpush.bf16.msra.mxu3 %v642_v0  ;;  %v636_v6 = vld [vmem:[%s830_s1 + $0x8] sm:$0xff]  ;;  %v635_v7 = vld [vmem:[%s830_s1] sm:$0xff]  ;;  %s236_s9 = scalar_lea.vmem %s829_s0, %s578_s4  ;;  %s257_s17 = scalar_lea.vmem %s832_s3, %s578_s4 }
   0xf   : > { %v631_v8 = vld [vmem:[%s236_s9] sm:$0xff]  ;;  %v632_v9 = vld [vmem:[%s236_s9 + $0x8] sm:$0xff]  ;;  %v633_v10 = vld [vmem:[%s236_s9 + $0x10] sm:$0xff] }
  0x10   : > { %v634_v11 = vld [vmem:[%s236_s9 + $0x18] sm:$0xff]  ;;  %v714_v14 = vld [vmem:[%s831_s2] ss:$0 sm:$0xff] }
  0x11   : > { %376 = vmatpush.bf16.msra.mxu0 %v641_v1  ;;  %669 = vmatpush.bf16.msra.mxu1 %v641_v1 }
  0x12   : > { %670 = vmatpush.bf16.msra.mxu2 %v641_v1  ;;  %671 = vmatpush.bf16.msra.mxu3 %v641_v1 }
  0x15   : > { %377 = vmatpush.bf16.msra.mxu0 %v640_v2  ;;  %672 = vmatpush.bf16.msra.mxu1 %v640_v2 }
  0x16   : > { %673 = vmatpush.bf16.msra.mxu2 %v640_v2  ;;  %674 = vmatpush.bf16.msra.mxu3 %v640_v2 }
  0x19   : > { %378 = vmatpush.bf16.msra.mxu0 %v639_v3  ;;  %675 = vmatpush.bf16.msra.mxu1 %v639_v3 }
  0x1a   : > { %676 = vmatpush.bf16.msra.mxu2 %v639_v3  ;;  %677 = vmatpush.bf16.msra.mxu3 %v639_v3 }
  0x1d   : > { %379 = vmatpush.bf16.msra.mxu0 %v638_v4  ;;  %678 = vmatpush.bf16.msra.mxu1 %v638_v4 }
  0x1e   : > { %679 = vmatpush.bf16.msra.mxu2 %v638_v4  ;;  %680 = vmatpush.bf16.msra.mxu3 %v638_v4 }
  0x21   : > { %380 = vmatpush.bf16.msra.mxu0 %v637_v5  ;;  %681 = vmatpush.bf16.msra.mxu1 %v637_v5 }
  0x22   : > { %682 = vmatpush.bf16.msra.mxu2 %v637_v5  ;;  %683 = vmatpush.bf16.msra.mxu3 %v637_v5 }
  0x25   : > { %381 = vmatpush.bf16.msra.mxu0 %v636_v6  ;;  %684 = vmatpush.bf16.msra.mxu1 %v636_v6 }
  0x26   : > { %685 = vmatpush.bf16.msra.mxu2 %v636_v6  ;;  %686 = vmatpush.bf16.msra.mxu3 %v636_v6 }
  0x29   : > { %382 = vmatpush.bf16.msra.mxu0 %v635_v7  ;;  %687 = vmatpush.bf16.msra.mxu1 %v635_v7 }
  0x2a   : > { %688 = vmatpush.bf16.msra.mxu2 %v635_v7  ;;  %689 = vmatpush.bf16.msra.mxu3 %v635_v7 }
  0x2c   : > { %383 = vmatmul.bf16.vlgmr.msra.gmra.mxu0 %v631_v8  ;;  %388 = vmatmul.bf16.vlgmr.msra.gmra.mxu1 %v632_v9 }
  0x2d   : > { %393 = vmatmul.bf16.vlgmr.msra.gmra.mxu2 %v633_v10  ;;  %398 = vmatmul.bf16.vlgmr.msra.gmra.mxu3 %v634_v11 }
  0xa9   : > { %v384_v12 = vpop.f32.mrf.mxu0  ;;  %v389_v13 = vpop.f32.mrf.mxu1 }
  0xaa   : > { %v435_v19 = vadd.f32 %v714_v14, %v384_v12  ;;  %v437_v20 = vadd.f32 %v714_v14, %v389_v13 }
  0xb0   : > { %v394_v15 = vpop.f32.mrf.mxu2  ;;  %v399_v16 = vpop.f32.mrf.mxu3 }
  0xb1   : > { %v386_v17 = vpop.f32.mrf.mxu0  ;;  %v391_v18 = vpop.f32.mrf.mxu1  ;;  %v439_v27 = vadd.f32 %v714_v14, %v394_v15  ;;  %v441_v28 = vadd.f32 %v714_v14, %v399_v16 }
  0xb2   : > { %v436_v21 = vadd.f32 %v714_v14, %v386_v17  ;;  %v438_v22 = vadd.f32 %v714_v14, %v391_v18 }
  0xb4   : > { %v646_v23 = vpack.c.bf16 %v436_v21, %v435_v19  ;;  %v651_v24 = vpack.c.bf16 %v438_v22, %v437_v20 }
  0xb6   : > { %647 = vst [vmem:[%s257_s17] sm:$0xff] %v646_v23  }
  0xb7   : > { %663 = vst [vmem:[%s257_s17 + $0x8] sm:$0xff] %v651_v24  }
  0xb8   : > { %v396_v25 = vpop.f32.mrf.mxu2  ;;  %v401_v26 = vpop.f32.mrf.mxu3 }
  0xb9   : > { %v440_v29 = vadd.f32 %v714_v14, %v396_v25  ;;  %v442_v30 = vadd.f32 %v714_v14, %v401_v26 }
  0xbb   : > { %v656_v31 = vpack.c.bf16 %v440_v29, %v439_v27  ;;  %v661_v32 = vpack.c.bf16 %v442_v30, %v441_v28 }
  0xbd   : > { %664 = vst [vmem:[%s257_s17 + $0x10] sm:$0xff] %v656_v31  }
  0xbe   : > { %665 = vst [vmem:[%s257_s17 + $0x18] sm:$0xff] %v661_v32  }
  0xbf PF: > { %s13_s14 = sadd.s32 1, %s737_s14   ;;  %s833_s12 = smov %s733_s13 }
  0xc0   : > { %p10_p5 = scmp.ge.s32.totalorder %s13_s14, 4   ;;  %s834_s13 = smov %s836_s15 }
  0xc2   :  { %12 = sbr.rel (!%p10_p5) target bundleno = 2 (0x2), region = 76 }

// kernel: _lambda_.117
= control target key start
LH: loop header
LB: loop body
LE: loop exit
PB: predicated region body
PF: predicated region fallthrough
CT: control target
= control target key end

     0   :  { %s1258_s12 = smov 0   ;;  %s1260_s13 = smov 0   ;;  %s1431_s0 = inlined_call_operand.vmem [shape: bf16[128,1152], index: 0, kind: input, shape index: {}]   ;;  %s1432_s1 = inlined_call_operand.vmem [shape: bf16[1152,128], index: 1, kind: input, shape index: {}]   ;;  %s1433_s2 = inlined_call_operand.vmem [shape: f32[1,128], index: 2, kind: input, shape index: {}]   ;;  %s1434_s3 = inlined_call_operand.vmem [shape: bf16[128,128], index: 3, kind: output, shape index: {}]  }
   0x1   :  { %s1262_s14 = smov 0   ;;  %s1264_s15 = smov 0  }
   0x2   :  { %s1266_s16 = smov 0   ;;  %s1268_s17 = smov 0  }
   0x3   :  { %s1270_s18 = smov 0  }
   0x4 LB: > { %s25_s19 = sadd.s32 1, %s1227_s16  ;;  %s32_s20 = sadd.s32 1, %s1231_s17  ;;  %s1235_s18 = sphi %s1270_s18, %s13_s18   ;;  %s1231_s17 = sphi %s1268_s17, %s1440_s17   ;;  %s1227_s16 = sphi %s1266_s16, %s1439_s16   ;;  %s1223_s15 = sphi %s1264_s15, %s1438_s15   ;;  %s1219_s14 = sphi %s1262_s14, %s1437_s14   ;;  %s1215_s13 = sphi %s1260_s13, %s1436_s13   ;;  %s1211_s12 = sphi %s1258_s12, %s1435_s12  }
   0x5   : > { %p26_p0 = scmp.ge.s32.totalorder %s25_s19, 3  ;;  %p48_p1 = scmp.ne.s32.totalorder %s1215_s13, %s1211_s12 }
   0x6   : > { %p49_p2 = scmp.eq.s32.totalorder %s1235_s18, 0  ;;  %s41_s24 = sadd.s32 1, %s1215_s13 }
   0x7   : > { %s1442_s19 = smov (%p26_p0, %s25_s19), 0  ;;  %s1444_s20 = smov (!%p26_p0, %s32_s20), %s1231_s17 }
   0x8   : > { %p50_p3 = por %p49_p2, %p48_p1  ;;  %p34_p4 = scmp.ge.s32.totalorder %s1444_s20, 2 }
   0x9   : > { %s37_s21 = ssub.s32 %s1227_s16, %s1442_s19  ;;  %p881_p6 = scmp.ge.s32.totalorder %s1235_s18, 6 }
   0xa   : > { %s1446_s20 = smov (%p34_p4, %s1444_s20), 0 }
   0xb   : > { %s36_s22 = ssub.s32 %s1231_s17, %s1446_s20  ;;  %162 = sbr.rel (%p881_p6) target bundleno = 41 (0x29), region = 20 }
   0xc   : > { %s38_s23 = sor.u32 %s37_s21, %s36_s22 }
   0xd   : > { %p39_p5 = scmp.eq.s32.totalorder %s38_s23, 0 }
   0xf   : > { %s1309_s25 = scalar_select %p39_p5, %s1215_s13, %s41_s24  }
  0x10   : > { %165 = sbr.rel (!%p50_p3) target bundleno = 41 (0x29), region = 24  ;;  %s167_s26 = sand.u32 (%p50_p3), 1, %s1215_s13  }
  0x11   : > { %s171_s27 = smul.u32 (%p50_p3), 3, %s1227_s16 }
  0x12   : > { %s1120_s28 = smul.u32 (%p50_p3), 96, %s167_s26 }
  0x13   : > { %s1121_s29 = smul.u32 (%p50_p3), 72, %s1231_s17 }
  0x14   : > { %s169_s8 = scalar_lea.vmem (%p50_p3), [#allocation3], %s1120_s28 }
  0x15   : > { %s173_s30 = sadd.s32 %s1121_s29, %s171_s27 }
  0x16   : > { %s884_s4 = sshll.u32 %s173_s30, 2 }
  0x17   : > { %s1318_s7 = scalar_lea.vmem %s1431_s0, %s884_s4 }
  0x18   : > { %v190_v0 = vld [vmem:[%s1318_s7] sm:$0xff]  ;;  %v194_v2 = vld [vmem:[%s1318_s7 + $0x48] sm:$0xff]  ;;  %v198_v4 = vld [vmem:[%s1318_s7 + $0x90] sm:$0xff] }
  0x19   : > { %v192_v1 = vld [vmem:[%s1318_s7 + $0x24] sm:$0xff]  ;;  %191 = vst [vmem:[%s169_s8] sm:$0xff] %v190_v0  ;;  %v196_v3 = vld [vmem:[%s1318_s7 + $0x6c] sm:$0xff]  ;;  %v200_v5 = vld [vmem:[%s1318_s7 + $0xb4] sm:$0xff] }
  0x1a   : > { %193 = vst [vmem:[%s169_s8 + $0xc] sm:$0xff] %v192_v1  ;;  %v202_v6 = vld [vmem:[%s1318_s7 + $0xd8] sm:$0xff]  ;;  %v885_v8 = vld [vmem:[%s1318_s7 + $0x8] sm:$0xf]  ;;  %v887_v9 = vld [vmem:[%s1318_s7 + $0x2c] sm:$0xf] }
  0x1b   : > { %195 = vst [vmem:[%s169_s8 + $0x18] sm:$0xff] %v194_v2  ;;  %v204_v7 = vld [vmem:[%s1318_s7 + $0xfc] sm:$0xff]  ;;  %v889_v10 = vld [vmem:[%s1318_s7 + $0x50] sm:$0xf]  ;;  %v891_v11 = vld [vmem:[%s1318_s7 + $0x74] sm:$0xf] }
  0x1c   : > { %197 = vst [vmem:[%s169_s8 + $0x24] sm:$0xff] %v196_v3  ;;  %v893_v12 = vld [vmem:[%s1318_s7 + $0x98] sm:$0xf]  ;;  %v895_v13 = vld [vmem:[%s1318_s7 + $0xbc] sm:$0xf] }
  0x1d   : > { %199 = vst [vmem:[%s169_s8 + $0x30] sm:$0xff] %v198_v4  ;;  %v897_v14 = vld [vmem:[%s1318_s7 + $0xe0] sm:$0xf]  ;;  %v899_v15 = vld [vmem:[%s1318_s7 + $0x104] sm:$0xf] }
  0x1e   : > { %201 = vst [vmem:[%s169_s8 + $0x3c] sm:$0xff] %v200_v5 }
  0x1f   : > { %203 = vst [vmem:[%s169_s8 + $0x48] sm:$0xff] %v202_v6 }
  0x20   : > { %205 = vst [vmem:[%s169_s8 + $0x54] sm:$0xff] %v204_v7 }
  0x21   : > { %886 = vst [vmem:[%s169_s8 + $0x8] sm:$0xf] %v885_v8 }
  0x22   : > { %888 = vst [vmem:[%s169_s8 + $0x14] sm:$0xf] %v887_v9 }
  0x23   : > { %890 = vst [vmem:[%s169_s8 + $0x20] sm:$0xf] %v889_v10 }
  0x24   : > { %892 = vst [vmem:[%s169_s8 + $0x2c] sm:$0xf] %v891_v11 }
  0x25   : > { %894 = vst [vmem:[%s169_s8 + $0x38] sm:$0xf] %v893_v12 }
  0x26   : > { %896 = vst [vmem:[%s169_s8 + $0x44] sm:$0xf] %v895_v13 }
  0x27   : > { %898 = vst [vmem:[%s169_s8 + $0x50] sm:$0xf] %v897_v14 }
  0x28   : > { %900 = vst [vmem:[%s169_s8 + $0x5c] sm:$0xf] %v899_v15 }
  0x29 PF: > { %p901_p7 = scmp.ge.s32.totalorder %s1235_s18, 1  ;;  %p246_p8 = scmp.lt.s32.totalorder %s1235_s18, 7 }
  0x2b   : > { %p247_p9 = pnand %p901_p7, %p246_p8 }
  0x2c   : > { %s253_s9 = sand.u32 (!%p247_p9), 1, %s1211_s12   ;;  %s292_s10 = smul.u32 (!%p247_p9), 48, %s1219_s14 }
  0x2d   : > { %250 = sbr.rel (%p247_p9) target bundleno = 308 (0x134), region = 54  ;;  %s903_s21 = sshll.u32 (!%p247_p9), %s1223_s15, 3 }
  0x2e   : > { %s1122_s11 = smul.u32 (!%p247_p9), 96, %s253_s9  ;;  %p293_p10 = scmp.lt.s32.totalorder (!%p247_p9), %s292_s10, 143 }
  0x2f   : > { %p305_p11 = scmp.lt.s32.totalorder (!%p247_p9), %s903_s21, 15  ;;  %p905_p12 = scmp.ne.s32.totalorder (!%p247_p9), %s1219_s14, 0 }
  0x30   : > { %s1351_s12 = scalar_lea.vmem (!%p247_p9), [#allocation3], %s1122_s11 }
  0x32   : > { %s1448_s10 = smov (!%p293_p10, %s292_s10), 143  ;;  %s1450_s21 = smov (!%p305_p11, %s903_s21), 15 }
  0x33   : > { %s902_s22 = sshll.u32 %s1448_s10, 2  ;;  %s904_s27 = sshll.u32 %s1450_s21, 2 }
  0x34   : > { %s1344_s26 = scalar_lea.vmem %s1432_s1, %s902_s22  ;;  %s1349_s30 = scalar_lea.vmem %s1434_s3, %s904_s27 }
  0x35   : > { %316 = sbr.rel (%p905_p12) target bundleno = 67 (0x43), region = 62 }
  0x3a   : > { %v1237_v16 = vmov 0.0  }
  0x3b   : > { %317 = vst [vmem:[#allocation2 + $0x30] sm:$0xff] %v1237_v16 }
  0x3c   : > { %318 = vst [vmem:[#allocation2] sm:$0xff] %v1237_v16 }
  0x3d   : > { %319 = vst [vmem:[#allocation2 + $0x18] sm:$0xff] %v1237_v16 }
  0x3e   : > { %320 = vst [vmem:[#allocation2 + $0x10] sm:$0xff] %v1237_v16 }
  0x3f   : > { %321 = vst [vmem:[#allocation2 + $0x8] sm:$0xff] %v1237_v16 }
  0x40   : > { %322 = vst [vmem:[#allocation2 + $0x20] sm:$0xff] %v1237_v16 }
  0x41   : > { %323 = vst [vmem:[#allocation2 + $0x28] sm:$0xff] %v1237_v16 }
  0x42   : > { %324 = vst [vmem:[#allocation2 + $0x38] sm:$0xff] %v1237_v16 }
  0x43 PF: > { %v1072_v17 = vld [vmem:[%s1344_s26 + $0x38] sm:$0xff]  ;;  %v1071_v20 = vld [vmem:[%s1344_s26 + $0x30] sm:$0xff]  ;;  %v1070_v23 = vld [vmem:[%s1344_s26 + $0x28] sm:$0xff]  ;;  %p1050_p13 = scmp.ne.s32.totalorder %s1219_s14, 2 }
  0x44   : > { %v1080_v18 = vld [vmem:[%s1344_s26 + $0x78] sm:$0xff]  ;;  %605 = vmatpush.bf16.msra.mxu0 %v1072_v17  ;;  %v1079_v21 = vld [vmem:[%s1344_s26 + $0x70] sm:$0xff]  ;;  %1112 = vmatpush.bf16.msra.mxu3 %v1072_v17  ;;  %v1078_v24 = vld [vmem:[%s1344_s26 + $0x68] sm:$0xff] }
  0x45   : > { %v1088_v19 = vld [vmem:[%s1344_s26 + $0xb8] sm:$0xff]  ;;  %634 = vmatpush.bf16.msra.mxu1 %v1080_v18  ;;  %v1087_v22 = vld [vmem:[%s1344_s26 + $0xb0] sm:$0xff]  ;;  %v1086_v25 = vld [vmem:[%s1344_s26 + $0xa8] sm:$0xff] }
  0x46   : > { %663 = vmatpush.bf16.msra.mxu2 %v1088_v19  ;;  %v1069_v26 = vld [vmem:[%s1344_s26 + $0x20] sm:$0xff]  ;;  %v1068_v29 = vld [vmem:[%s1344_s26 + $0x18] sm:$0xff]  ;;  %v1067_v32 = vld [vmem:[%s1344_s26 + $0x10] sm:$0xff] }
  0x47   : > { %v1077_v27 = vld [vmem:[%s1344_s26 + $0x60] sm:$0xff]  ;;  %v1076_v30 = vld [vmem:[%s1344_s26 + $0x58] sm:$0xff]  ;;  %v1075_v33 = vld [vmem:[%s1344_s26 + $0x50] sm:$0xff] }
  0x48   : > { %606 = vmatpush.bf16.msra.mxu0 %v1071_v20  ;;  %1113 = vmatpush.bf16.msra.mxu3 %v1071_v20  ;;  %v1085_v28 = vld [vmem:[%s1344_s26 + $0xa0] sm:$0xff]  ;;  %v1084_v31 = vld [vmem:[%s1344_s26 + $0x98] sm:$0xff]  ;;  %v1083_v34 = vld [vmem:[%s1344_s26 + $0x90] sm:$0xff] }
  0x49   : > { %635 = vmatpush.bf16.msra.mxu1 %v1079_v21  ;;  %v1066_v35 = vld [vmem:[%s1344_s26 + $0x8] sm:$0xff]  ;;  %v1065_v38 = vld [vmem:[%s1344_s26] sm:$0xff]  ;;  %v910_v44 = vld [vmem:[%s1351_s12 + $0xc] sm:$0xf0] }
  0x4a   : > { %664 = vmatpush.bf16.msra.mxu2 %v1087_v22  ;;  %v1074_v36 = vld [vmem:[%s1344_s26 + $0x48] sm:$0xff]  ;;  %v1073_v39 = vld [vmem:[%s1344_s26 + $0x40] sm:$0xff]  ;;  %v1055_v46 = vld [vmem:[%s1351_s12 + $0x10] sm:$0xf0] }
  0x4b   : > { %v1082_v37 = vld [vmem:[%s1344_s26 + $0x88] sm:$0xff]  ;;  %v1081_v40 = vld [vmem:[%s1344_s26 + $0x80] sm:$0xff]  ;;  %v920_v47 = vld [vmem:[%s1351_s12 + $0x18] sm:$0xf] }
  0x4c   : > { %607 = vmatpush.bf16.msra.mxu0 %v1070_v23  ;;  %1114 = vmatpush.bf16.msra.mxu3 %v1070_v23  ;;  %v908_v41 = vld [vmem:[%s1351_s12] sm:$0xf]  ;;  %v1054_v42 = vld [vmem:[%s1351_s12 + $0x8] sm:$0xf0]  ;;  %v1053_v43 = vld [vmem:[%s1351_s12 + $0x4] sm:$0xf] }
  0x4d   : > { %636 = vmatpush.bf16.msra.mxu1 %v1078_v24  ;;  %v916_v45 = vld [vmem:[%s1351_s12 + $0x8] sm:$0xf]  ;;  %v1057_v48 = vld [vmem:[%s1351_s12 + $0x20] sm:$0xf0]  ;;  %v909_v49 = vor.u32 %v1054_v42, %v908_v41  ;;  %v913_v50 = vor.u32 %v1053_v43, %v910_v44  ;;  %v1056_v53 = vld [vmem:[%s1351_s12 + $0x1c] sm:$0xf] }
  0x4e   : > { %665 = vmatpush.bf16.msra.mxu2 %v1086_v25  ;;  %v917_v51 = vor.u32 %v1055_v46, %v916_v45  ;;  %v921_v52 = vor.u32 %v1057_v48, %v920_v47  ;;  %v922_v54 = vld [vmem:[%s1351_s12 + $0x24] sm:$0xf0]  ;;  %v928_v55 = vld [vmem:[%s1351_s12 + $0x20] sm:$0xf]  ;;  %v1058_v56 = vld [vmem:[%s1351_s12 + $0x28] sm:$0xf0] }
  0x4f   : > { %v932_v57 = vld [vmem:[%s1351_s12 + $0x30] sm:$0xf]  ;;  %v1060_v58 = vld [vmem:[%s1351_s12 + $0x38] sm:$0xf0]  ;;  %v925_v59 = vor.u32 %v1056_v53, %v922_v54  ;;  %v929_v60 = vor.u32 %v1058_v56, %v928_v55  ;;  %v1059_v62 = vld [vmem:[%s1351_s12 + $0x34] sm:$0xf] }
  0x50   : > { %608 = vmatpush.bf16.msra.mxu0 %v1069_v26  ;;  %1115 = vmatpush.bf16.msra.mxu3 %v1069_v26  ;;  %v933_v61 = vor.u32 %v1060_v58, %v932_v57  ;;  %v934_v63 = vld [vmem:[%s1351_s12 + $0x3c] sm:$0xf0]  ;;  %v940_v0 = vld [vmem:[%s1351_s12 + $0x38] sm:$0xf]  ;;  %v1061_v1 = vld [vmem:[%s1351_s12 + $0x40] sm:$0xf0] }
  0x51   : > { %637 = vmatpush.bf16.msra.mxu1 %v1077_v27  ;;  %v944_v2 = vld [vmem:[%s1351_s12 + $0x48] sm:$0xf]  ;;  %v1063_v3 = vld [vmem:[%s1351_s12 + $0x50] sm:$0xf0]  ;;  %v937_v4 = vor.u32 %v1059_v62, %v934_v63  ;;  %v941_v5 = vor.u32 %v1061_v1, %v940_v0  ;;  %v1062_v7 = vld [vmem:[%s1351_s12 + $0x4c] sm:$0xf] }
  0x52   : > { %666 = vmatpush.bf16.msra.mxu2 %v1085_v28  ;;  %v945_v6 = vor.u32 %v1063_v3, %v944_v2  ;;  %v946_v8 = vld [vmem:[%s1351_s12 + $0x54] sm:$0xf0]  ;;  %v952_v9 = vld [vmem:[%s1351_s12 + $0x50] sm:$0xf]  ;;  %v1064_v10 = vld [vmem:[%s1351_s12 + $0x58] sm:$0xf0] }
  0x53   : > { %v949_v11 = vor.u32 %v1062_v7, %v946_v8  ;;  %v953_v12 = vor.u32 %v1064_v10, %v952_v9  ;;  %v325_v16 = vld [vmem:[#allocation2 + $0x30] sm:$0xff]  ;;  %v326_v24 = vld [vmem:[#allocation2] sm:$0xff]  ;;  %v329_v44 = vld [vmem:[#allocation2 + $0x8] sm:$0xff] }
  0x54   : > { %609 = vmatpush.bf16.msra.mxu0 %v1068_v29  ;;  %1116 = vmatpush.bf16.msra.mxu3 %v1068_v29  ;;  %v331_v58 = vld [vmem:[#allocation2 + $0x28] sm:$0xff]  ;;  %v332_v1 = vld [vmem:[#allocation2 + $0x38] sm:$0xff] }
  0x55   : > { %638 = vmatpush.bf16.msra.mxu1 %v1076_v30 }
  0x56   : > { %667 = vmatpush.bf16.msra.mxu2 %v1084_v31  ;;  %v327_v31 = vld [vmem:[#allocation2 + $0x18] sm:$0xff] }
  0x58   : > { %610 = vmatpush.bf16.msra.mxu0 %v1067_v32  ;;  %1117 = vmatpush.bf16.msra.mxu3 %v1067_v32 }
  0x59   : > { %639 = vmatpush.bf16.msra.mxu1 %v1075_v33 }
  0x5a   : > { %668 = vmatpush.bf16.msra.mxu2 %v1083_v34 }
  0x5c   : > { %611 = vmatpush.bf16.msra.mxu0 %v1066_v35  ;;  %1118 = vmatpush.bf16.msra.mxu3 %v1066_v35 }
  0x5d   : > { %640 = vmatpush.bf16.msra.mxu1 %v1074_v36 }
  0x5e   : > { %669 = vmatpush.bf16.msra.mxu2 %v1082_v37 }
  0x60   : > { %612 = vmatpush.bf16.msra.mxu0 %v1065_v38  ;;  %1119 = vmatpush.bf16.msra.mxu3 %v1065_v38  ;;  %v328_v38 = vld [vmem:[#allocation2 + $0x10] sm:$0xff] }
  0x61   : > { %641 = vmatpush.bf16.msra.mxu1 %v1073_v39 }
  0x62   : > { %670 = vmatpush.bf16.msra.mxu2 %v1081_v40 }
  0x63   : > { %613 = vmatmul.bf16.vlgmr.msra.gmra.mxu0 %v909_v49  ;;  %618 = vmatmul.bf16.vlgmr.msra.gmra.mxu3 %v921_v52 }
  0x64   : > { %642 = vmatmul.bf16.vlgmr.msra.gmra.mxu1 %v913_v50 }
  0x65   : > { %671 = vmatmul.bf16.vlgmr.msra.gmra.mxu2 %v917_v51  ;;  %v330_v51 = vld [vmem:[#allocation2 + $0x20] sm:$0xff] }
  0x73   : > { %623 = vmatmul.bf16.gmra.mxu3 %v933_v61 }
  0x74   : > { %647 = vmatmul.bf16.gmra.mxu1 %v925_v59 }
  0x75   : > { %676 = vmatmul.bf16.gmra.mxu2 %v929_v60 }
  0x83   : > { %628 = vmatmul.bf16.gmra.mxu3 %v945_v6 }
  0x84   : > { %652 = vmatmul.bf16.gmra.mxu1 %v937_v4 }
  0x85   : > { %681 = vmatmul.bf16.gmra.mxu2 %v941_v5 }
  0x94   : > { %657 = vmatmul.bf16.gmra.mxu1 %v949_v11 }
  0x95   : > { %686 = vmatmul.bf16.gmra.mxu2 %v953_v12 }
  0xe0   : > { %v614_v14 = vpop.f32.mrf.mxu0 }
  0xe1   : > { %v643_v13 = vpop.f32.mrf.mxu1 }
  0xe2   : > { %v644_v15 = vadd.f32 %v643_v13, %v614_v14 }
  0xe6   : > { %v619_v22 = vpop.f32.mrf.mxu3 }
  0xe8   : > { %v672_v17 = vpop.f32.mrf.mxu2  ;;  %v616_v21 = vpop.f32.mrf.mxu0 }
  0xe9   : > { %v673_v18 = vadd.f32 %v672_v17, %v644_v15  ;;  %v645_v19 = vpop.f32.mrf.mxu1 }
  0xea   : > { %v646_v23 = vadd.f32 %v645_v19, %v616_v21 }
  0xeb   : > { %v692_v20 = vadd.f32 %v673_v18, %v325_v16 }
  0xed   : > { %700 = vst [vmem:[#allocation2 + $0x30] sm:$0xff] %v692_v20 }
  0xee   : > { %v621_v30 = vpop.f32.mrf.mxu3 }
  0xf0   : > { %v674_v25 = vpop.f32.mrf.mxu2 }
  0xf1   : > { %v675_v26 = vadd.f32 %v674_v25, %v646_v23  ;;  %v648_v27 = vpop.f32.mrf.mxu1 }
  0xf2   : > { %v649_v29 = vadd.f32 %v648_v27, %v619_v22 }
  0xf3   : > { %v693_v28 = vadd.f32 %v675_v26, %v326_v24 }
  0xf5   : > { %701 = vst [vmem:[#allocation2] sm:$0xff] %v693_v28 }
  0xf6   : > { %v624_v37 = vpop.f32.mrf.mxu3 }
  0xf8   : > { %v677_v32 = vpop.f32.mrf.mxu2 }
  0xf9   : > { %v678_v33 = vadd.f32 %v677_v32, %v649_v29  ;;  %v650_v34 = vpop.f32.mrf.mxu1 }
  0xfa   : > { %v651_v36 = vadd.f32 %v650_v34, %v621_v30 }
  0xfb   : > { %v694_v35 = vadd.f32 %v678_v33, %v327_v31 }
  0xfd   : > { %702 = vst [vmem:[#allocation2 + $0x18] sm:$0xff] %v694_v35 }
  0xfe   : > { %v626_v48 = vpop.f32.mrf.mxu3 }
 0x100   : > { %v679_v39 = vpop.f32.mrf.mxu2 }
 0x101   : > { %v680_v40 = vadd.f32 %v679_v39, %v651_v36  ;;  %v653_v41 = vpop.f32.mrf.mxu1 }
 0x102   : > { %v654_v43 = vadd.f32 %v653_v41, %v624_v37 }
 0x103   : > { %v695_v42 = vadd.f32 %v680_v40, %v328_v38 }
 0x105   : > { %703 = vst [vmem:[#allocation2 + $0x10] sm:$0xff] %v695_v42 }
 0x106   : > { %v629_v56 = vpop.f32.mrf.mxu3 }
 0x108   : > { %v682_v45 = vpop.f32.mrf.mxu2 }
 0x109   : > { %v683_v46 = vadd.f32 %v682_v45, %v654_v43  ;;  %v655_v47 = vpop.f32.mrf.mxu1 }
 0x10a   : > { %v656_v50 = vadd.f32 %v655_v47, %v626_v48 }
 0x10b   : > { %v696_v49 = vadd.f32 %v683_v46, %v329_v44 }
 0x10d   : > { %704 = vst [vmem:[#allocation2 + $0x8] sm:$0xff] %v696_v49 }
 0x10e   : > { %v631_v63 = vpop.f32.mrf.mxu3 }
 0x110   : > { %v684_v52 = vpop.f32.mrf.mxu2 }
 0x111   : > { %v685_v53 = vadd.f32 %v684_v52, %v656_v50  ;;  %v658_v54 = vpop.f32.mrf.mxu1 }
 0x112   : > { %v659_v57 = vadd.f32 %v658_v54, %v629_v56 }
 0x113   : > { %v697_v55 = vadd.f32 %v685_v53, %v330_v51 }
 0x115   : > { %705 = vst [vmem:[#allocation2 + $0x20] sm:$0xff] %v697_v55 }
 0x118   : > { %v687_v59 = vpop.f32.mrf.mxu2 }
 0x119   : > { %v688_v60 = vadd.f32 %v687_v59, %v659_v57  ;;  %v660_v62 = vpop.f32.mrf.mxu1 }
 0x11a   : > { %v661_v0 = vadd.f32 %v660_v62, %v631_v63 }
 0x11b   : > { %v698_v61 = vadd.f32 %v688_v60, %v331_v58 }
 0x11d   : > { %706 = vst [vmem:[#allocation2 + $0x28] sm:$0xff] %v698_v61 }
 0x120   : > { %v689_v2 = vpop.f32.mrf.mxu2 }
 0x121   : > { %v690_v3 = vadd.f32 %v689_v2, %v661_v0  ;;  %711 = sbr.rel (%p1050_p13) target bundleno = 308 (0x134), region = 66 }
 0x123   : > { %v699_v4 = vadd.f32 %v690_v3, %v332_v1 }
 0x125   : > { %707 = vst [vmem:[#allocation2 + $0x38] sm:$0xff] %v699_v4 }
 0x126   : > { %v712_v5 = vld [vmem:[#allocation2 + $0x30] sm:$0xff]  ;;  %v713_v6 = vld [vmem:[#allocation2] sm:$0xff]  ;;  %v714_v8 = vld [vmem:[#allocation2 + $0x18] sm:$0xff] }
 0x127   : > { %v1180_v7 = vld [vmem:[%s1433_s2] ss:$0 sm:$0xff]  ;;  %v715_v9 = vld [vmem:[#allocation2 + $0x10] sm:$0xff]  ;;  %v716_v10 = vld [vmem:[#allocation2 + $0x8] sm:$0xff] }
 0x128   : > { %v717_v11 = vld [vmem:[#allocation2 + $0x20] sm:$0xff]  ;;  %v718_v12 = vld [vmem:[#allocation2 + $0x28] sm:$0xff]  ;;  %v724_v13 = vadd.f32 %v1180_v7, %v712_v5  ;;  %v725_v14 = vadd.f32 %v1180_v7, %v713_v6  ;;  %v726_v15 = vadd.f32 %v1180_v7, %v714_v8  ;;  %v727_v16 = vadd.f32 %v1180_v7, %v715_v9 }
 0x129   : > { %v728_v18 = vadd.f32 %v1180_v7, %v716_v10  ;;  %v729_v19 = vadd.f32 %v1180_v7, %v717_v11  ;;  %v730_v20 = vadd.f32 %v1180_v7, %v718_v12 }
 0x12a   : > { %v732_v22 = vmax.f32 %v724_v13, 0.0  ;;  %v733_v23 = vmax.f32 %v725_v14, 0.0  ;;  %v734_v24 = vmax.f32 %v726_v15, 0.0  ;;  %v735_v25 = vmax.f32 %v727_v16, 0.0 }
 0x12b   : > { %v736_v26 = vmax.f32 %v728_v18, 0.0  ;;  %v737_v27 = vmax.f32 %v729_v19, 0.0  ;;  %v738_v28 = vmax.f32 %v730_v20, 0.0 }
 0x12c   : > { %v719_v17 = vld [vmem:[#allocation2 + $0x38] sm:$0xff]  ;;  %v1092_v30 = vpack.c.bf16 %v733_v23, %v732_v22  ;;  %v1097_v31 = vpack.c.bf16 %v735_v25, %v734_v24 }
 0x12d   : > { %v731_v21 = vadd.f32 %v1180_v7, %v719_v17  ;;  %v1102_v32 = vpack.c.bf16 %v737_v27, %v736_v26 }
 0x12e   : > { %1093 = vst [vmem:[%s1349_s30] sm:$0xff] %v1092_v30  }
 0x12f   : > { %v739_v29 = vmax.f32 %v731_v21, 0.0  ;;  %1109 = vst [vmem:[%s1349_s30 + $0x8] sm:$0xff] %v1097_v31  }
 0x130   : > { %1110 = vst [vmem:[%s1349_s30 + $0x10] sm:$0xff] %v1102_v32  }
 0x131   : > { %v1107_v33 = vpack.c.bf16 %v739_v29, %v738_v28 }
 0x133   : > { %1111 = vst [vmem:[%s1349_s30 + $0x18] sm:$0xff] %v1107_v33  }
 0x134 PF: > { %s13_s18 = sadd.s32 1, %s1235_s18   ;;  %s1435_s12 = smov %s1215_s13 }
 0x135   : > { %p10_p0 = scmp.ge.s32.totalorder %s13_s18, 8   ;;  %s1436_s13 = smov %s1309_s25 }
 0x136   : > { %s1437_s14 = smov %s1227_s16  ;;  %s1438_s15 = smov %s1231_s17 }
 0x137   : > { %s1439_s16 = smov %s1442_s19  ;;  %s1440_s17 = smov %s1446_s20 }
 0x138   :  { %12 = sbr.rel (!%p10_p0) target bundleno = 4 (0x4), region = 113 }

// kernel: _lambda_.118
= control target key start
LH: loop header
LB: loop body
LE: loop exit
PB: predicated region body
PF: predicated region fallthrough
CT: control target
= control target key end

     0   :  { %s892_s15 = smov 0   ;;  %s894_s16 = smov 0   ;;  %s963_s0 = inlined_call_operand.vmem [shape: bf16[128,128], index: 0, kind: input, shape index: {}]   ;;  %s964_s1 = inlined_call_operand.vmem [shape: bf16[128,128], index: 1, kind: input, shape index: {}]   ;;  %s965_s2 = inlined_call_operand.vmem [shape: f32[1,128], index: 2, kind: input, shape index: {}]   ;;  %s966_s3 = inlined_call_operand.vmem [shape: bf16[128,128], index: 3, kind: input, shape index: {}]   ;;  %s967_s4 = inlined_call_operand.vmem [shape: bf16[128,128], index: 4, kind: output, shape index: {}]  }
   0x1   :  { %s896_s17 = smov 0  }
   0x2 LB: > { %s33_s18 = sadd.s32 1, %s861_s16  ;;  %p683_p0 = scmp.ge.s32.totalorder %s865_s17, 1  ;;  %s865_s17 = sphi %s896_s17, %s14_s17   ;;  %s861_s16 = sphi %s894_s16, %s969_s16   ;;  %s857_s15 = sphi %s892_s15, %s968_s15  }
   0x3   : > { %p35_p1 = scmp.ge.s32.totalorder %s33_s18, 2  ;;  %p229_p2 = scmp.lt.s32.totalorder %s865_s17, 3 }
   0x5   : > { %s971_s18 = smov (%p35_p1, %s33_s18), 0  ;;  %p230_p3 = pnand %p683_p0, %p229_p2 }
   0x6   : > { %s684_s27 = sshll.u32 (!%p230_p3), %s857_s15, 3 }
   0x7   : > { %233 = sbr.rel (%p230_p3) target bundleno = 195 (0xc3), region = 36  ;;  %p281_p4 = scmp.lt.s32.totalorder (!%p230_p3), %s684_s27, 15 }
   0xc   : > { %v751_v0 = vld [vmem:[%s964_s1 + $0x38] sm:$0xff]  ;;  %v750_v1 = vld [vmem:[%s964_s1 + $0x30] sm:$0xff]  ;;  %v749_v2 = vld [vmem:[%s964_s1 + $0x28] sm:$0xff]  ;;  %s973_s27 = smov (!%p281_p4, %s684_s27), 15 }
   0xd   : > { %435 = vmatpush.bf16.msra.mxu0 %v751_v0  ;;  %794 = vmatpush.bf16.msra.mxu1 %v751_v0  ;;  %v748_v3 = vld [vmem:[%s964_s1 + $0x20] sm:$0xff]  ;;  %v747_v4 = vld [vmem:[%s964_s1 + $0x18] sm:$0xff]  ;;  %v746_v5 = vld [vmem:[%s964_s1 + $0x10] sm:$0xff]  ;;  %s934_s8 = sshll.u32 %s973_s27, 2 }
   0xe   : > { %795 = vmatpush.bf16.msra.mxu2 %v751_v0  ;;  %796 = vmatpush.bf16.msra.mxu3 %v751_v0  ;;  %v745_v6 = vld [vmem:[%s964_s1 + $0x8] sm:$0xff]  ;;  %v744_v7 = vld [vmem:[%s964_s1] sm:$0xff]  ;;  %s287_s13 = scalar_lea.vmem %s963_s0, %s934_s8  ;;  %s308_s19 = scalar_lea.vmem %s966_s3, %s934_s8 }
   0xf   : > { %v740_v8 = vld [vmem:[%s287_s13] sm:$0xff]  ;;  %v741_v9 = vld [vmem:[%s287_s13 + $0x8] sm:$0xff]  ;;  %v742_v10 = vld [vmem:[%s287_s13 + $0x10] sm:$0xff]  ;;  %s317_s24 = scalar_lea.vmem %s967_s4, %s934_s8 }
  0x10   : > { %v743_v11 = vld [vmem:[%s287_s13 + $0x18] sm:$0xff]  ;;  %v842_v14 = vld [vmem:[%s965_s2] ss:$0 sm:$0xff]  ;;  %v788_v16 = vld [vmem:[%s308_s19 + $0x8] sm:$0xff]  }
  0x11   : > { %436 = vmatpush.bf16.msra.mxu0 %v750_v1  ;;  %797 = vmatpush.bf16.msra.mxu1 %v750_v1  ;;  %v753_v15 = vld [vmem:[%s308_s19] sm:$0xff]   ;;  %v758_v20 = vunpack.c.l.bf16 %v788_v16  ;;  %v759_v24 = vunpack.c.h.bf16 %v788_v16  ;;  %v789_v29 = vld [vmem:[%s308_s19 + $0x10] sm:$0xff]   ;;  %v790_v30 = vld [vmem:[%s308_s19 + $0x18] sm:$0xff]  }
  0x12   : > { %798 = vmatpush.bf16.msra.mxu2 %v750_v1  ;;  %799 = vmatpush.bf16.msra.mxu3 %v750_v1  ;;  %v754_v18 = vunpack.c.l.bf16 %v753_v15  ;;  %v755_v23 = vunpack.c.h.bf16 %v753_v15  ;;  %v762_v36 = vunpack.c.l.bf16 %v789_v29  ;;  %v766_v38 = vunpack.c.l.bf16 %v790_v30 }
  0x13   : > { %v763_v43 = vunpack.c.h.bf16 %v789_v29  ;;  %v767_v44 = vunpack.c.h.bf16 %v790_v30 }
  0x15   : > { %437 = vmatpush.bf16.msra.mxu0 %v749_v2  ;;  %800 = vmatpush.bf16.msra.mxu1 %v749_v2 }
  0x16   : > { %801 = vmatpush.bf16.msra.mxu2 %v749_v2  ;;  %802 = vmatpush.bf16.msra.mxu3 %v749_v2 }
  0x19   : > { %438 = vmatpush.bf16.msra.mxu0 %v748_v3  ;;  %803 = vmatpush.bf16.msra.mxu1 %v748_v3 }
  0x1a   : > { %804 = vmatpush.bf16.msra.mxu2 %v748_v3  ;;  %805 = vmatpush.bf16.msra.mxu3 %v748_v3 }
  0x1d   : > { %439 = vmatpush.bf16.msra.mxu0 %v747_v4  ;;  %806 = vmatpush.bf16.msra.mxu1 %v747_v4 }
  0x1e   : > { %807 = vmatpush.bf16.msra.mxu2 %v747_v4  ;;  %808 = vmatpush.bf16.msra.mxu3 %v747_v4 }
  0x21   : > { %440 = vmatpush.bf16.msra.mxu0 %v746_v5  ;;  %809 = vmatpush.bf16.msra.mxu1 %v746_v5 }
  0x22   : > { %810 = vmatpush.bf16.msra.mxu2 %v746_v5  ;;  %811 = vmatpush.bf16.msra.mxu3 %v746_v5 }
  0x25   : > { %441 = vmatpush.bf16.msra.mxu0 %v745_v6  ;;  %812 = vmatpush.bf16.msra.mxu1 %v745_v6 }
  0x26   : > { %813 = vmatpush.bf16.msra.mxu2 %v745_v6  ;;  %814 = vmatpush.bf16.msra.mxu3 %v745_v6 }
  0x29   : > { %442 = vmatpush.bf16.msra.mxu0 %v744_v7  ;;  %815 = vmatpush.bf16.msra.mxu1 %v744_v7 }
  0x2a   : > { %816 = vmatpush.bf16.msra.mxu2 %v744_v7  ;;  %817 = vmatpush.bf16.msra.mxu3 %v744_v7 }
  0x2c   : > { %443 = vmatmul.bf16.vlgmr.msra.gmra.mxu0 %v740_v8  ;;  %448 = vmatmul.bf16.vlgmr.msra.gmra.mxu1 %v741_v9 }
  0x2d   : > { %453 = vmatmul.bf16.vlgmr.msra.gmra.mxu2 %v742_v10  ;;  %458 = vmatmul.bf16.vlgmr.msra.gmra.mxu3 %v743_v11 }
  0xa9   : > { %v444_v12 = vpop.f32.mrf.mxu0  ;;  %v449_v13 = vpop.f32.mrf.mxu1 }
  0xaa   : > { %v495_v17 = vadd.f32 %v842_v14, %v444_v12  ;;  %v497_v19 = vadd.f32 %v842_v14, %v449_v13 }
  0xac   : > { %v519_v27 = vadd.f32 %v754_v18, %v495_v17  ;;  %v521_v28 = vadd.f32 %v758_v20, %v497_v19 }
  0xae   : > { %v527_v39 = vmax.f32 %v519_v27, 0.0  ;;  %v529_v40 = vmax.f32 %v521_v28, 0.0 }
  0xb0   : > { %v454_v21 = vpop.f32.mrf.mxu2  ;;  %v459_v22 = vpop.f32.mrf.mxu3 }
  0xb1   : > { %v446_v25 = vpop.f32.mrf.mxu0  ;;  %v451_v26 = vpop.f32.mrf.mxu1  ;;  %v499_v35 = vadd.f32 %v842_v14, %v454_v21  ;;  %v501_v37 = vadd.f32 %v842_v14, %v459_v22 }
  0xb2   : > { %v496_v31 = vadd.f32 %v842_v14, %v446_v25  ;;  %v498_v32 = vadd.f32 %v842_v14, %v451_v26 }
  0xb3   : > { %v523_v49 = vadd.f32 %v762_v36, %v499_v35  ;;  %v525_v50 = vadd.f32 %v766_v38, %v501_v37 }
  0xb4   : > { %v520_v33 = vadd.f32 %v755_v23, %v496_v31  ;;  %v522_v34 = vadd.f32 %v759_v24, %v498_v32 }
  0xb5   : > { %v531_v55 = vmax.f32 %v523_v49, 0.0  ;;  %v533_v56 = vmax.f32 %v525_v50, 0.0 }
  0xb6   : > { %v528_v41 = vmax.f32 %v520_v33, 0.0  ;;  %v530_v42 = vmax.f32 %v522_v34, 0.0 }
  0xb8   : > { %v771_v45 = vpack.c.bf16 %v528_v41, %v527_v39  ;;  %v776_v46 = vpack.c.bf16 %v530_v42, %v529_v40  ;;  %v456_v47 = vpop.f32.mrf.mxu2  ;;  %v461_v48 = vpop.f32.mrf.mxu3 }
  0xb9   : > { %v500_v51 = vadd.f32 %v842_v14, %v456_v47  ;;  %v502_v52 = vadd.f32 %v842_v14, %v461_v48 }
  0xba   : > { %772 = vst [vmem:[%s317_s24] sm:$0xff] %v771_v45  }
  0xbb   : > { %791 = vst [vmem:[%s317_s24 + $0x8] sm:$0xff] %v776_v46   ;;  %v524_v53 = vadd.f32 %v763_v43, %v500_v51  ;;  %v526_v54 = vadd.f32 %v767_v44, %v502_v52 }
  0xbd   : > { %v532_v57 = vmax.f32 %v524_v53, 0.0  ;;  %v534_v58 = vmax.f32 %v526_v54, 0.0 }
  0xbf   : > { %v781_v59 = vpack.c.bf16 %v532_v57, %v531_v55  ;;  %v786_v60 = vpack.c.bf16 %v534_v58, %v533_v56 }
  0xc1   : > { %792 = vst [vmem:[%s317_s24 + $0x10] sm:$0xff] %v781_v59  }
  0xc2   : > { %793 = vst [vmem:[%s317_s24 + $0x18] sm:$0xff] %v786_v60  }
  0xc3 PF: > { %s14_s17 = sadd.s32 1, %s865_s17   ;;  %s968_s15 = smov %s861_s16 }
  0xc4   : > { %p11_p5 = scmp.ge.s32.totalorder %s14_s17, 4   ;;  %s969_s16 = smov %s971_s18 }
  0xc6   :  { %13 = sbr.rel (!%p11_p5) target bundleno = 2 (0x2), region = 83 }

// kernel: _lambda_.119
= control target key start
LH: loop header
LB: loop body
LE: loop exit
PB: predicated region body
PF: predicated region fallthrough
CT: control target
= control target key end

     0   :  { %s767_s12 = smov 0   ;;  %s769_s13 = smov 0   ;;  %s837_s0 = inlined_call_operand.vmem [shape: bf16[128,128], index: 0, kind: input, shape index: {}]   ;;  %s838_s1 = inlined_call_operand.vmem [shape: bf16[128,128], index: 1, kind: input, shape index: {}]   ;;  %s839_s2 = inlined_call_operand.vmem [shape: f32[1,128], index: 2, kind: input, shape index: {}]   ;;  %s840_s3 = inlined_call_operand.vmem [shape: bf16[128,128], index: 3, kind: output, shape index: {}]  }
   0x1   :  { %s771_s14 = smov 0  }
   0x2 LB: > { %s32_s15 = sadd.s32 1, %s741_s13  ;;  %p584_p0 = scmp.ge.s32.totalorder %s745_s14, 1  ;;  %s745_s14 = sphi %s771_s14, %s13_s14   ;;  %s741_s13 = sphi %s769_s13, %s842_s13   ;;  %s737_s12 = sphi %s767_s12, %s841_s12  }
   0x3   : > { %p34_p1 = scmp.ge.s32.totalorder %s32_s15, 2  ;;  %p188_p2 = scmp.lt.s32.totalorder %s745_s14, 3 }
   0x5   : > { %s844_s15 = smov (%p34_p1, %s32_s15), 0  ;;  %p189_p3 = pnand %p584_p0, %p188_p2 }
   0x6   : > { %s585_s24 = sshll.u32 (!%p189_p3), %s737_s12, 3 }
   0x7   : > { %192 = sbr.rel (%p189_p3) target bundleno = 193 (0xc1), region = 32  ;;  %p230_p4 = scmp.lt.s32.totalorder (!%p189_p3), %s585_s24, 15 }
   0xc   : > { %v650_v0 = vld [vmem:[%s838_s1 + $0x38] sm:$0xff]  ;;  %v649_v1 = vld [vmem:[%s838_s1 + $0x30] sm:$0xff]  ;;  %v648_v2 = vld [vmem:[%s838_s1 + $0x28] sm:$0xff]  ;;  %s846_s24 = smov (!%p230_p4, %s585_s24), 15 }
   0xd   : > { %375 = vmatpush.bf16.msra.mxu0 %v650_v0  ;;  %674 = vmatpush.bf16.msra.mxu1 %v650_v0  ;;  %v647_v3 = vld [vmem:[%s838_s1 + $0x20] sm:$0xff]  ;;  %v646_v4 = vld [vmem:[%s838_s1 + $0x18] sm:$0xff]  ;;  %v645_v5 = vld [vmem:[%s838_s1 + $0x10] sm:$0xff]  ;;  %s586_s4 = sshll.u32 %s846_s24, 2 }
   0xe   : > { %675 = vmatpush.bf16.msra.mxu2 %v650_v0  ;;  %676 = vmatpush.bf16.msra.mxu3 %v650_v0  ;;  %v644_v6 = vld [vmem:[%s838_s1 + $0x8] sm:$0xff]  ;;  %v643_v7 = vld [vmem:[%s838_s1] sm:$0xff]  ;;  %s236_s9 = scalar_lea.vmem %s837_s0, %s586_s4  ;;  %s257_s17 = scalar_lea.vmem %s840_s3, %s586_s4 }
   0xf   : > { %v639_v8 = vld [vmem:[%s236_s9] sm:$0xff]  ;;  %v640_v9 = vld [vmem:[%s236_s9 + $0x8] sm:$0xff]  ;;  %v641_v10 = vld [vmem:[%s236_s9 + $0x10] sm:$0xff] }
  0x10   : > { %v642_v11 = vld [vmem:[%s236_s9 + $0x18] sm:$0xff]  ;;  %v722_v14 = vld [vmem:[%s839_s2] ss:$0 sm:$0xff] }
  0x11   : > { %376 = vmatpush.bf16.msra.mxu0 %v649_v1  ;;  %677 = vmatpush.bf16.msra.mxu1 %v649_v1 }
  0x12   : > { %678 = vmatpush.bf16.msra.mxu2 %v649_v1  ;;  %679 = vmatpush.bf16.msra.mxu3 %v649_v1 }
  0x15   : > { %377 = vmatpush.bf16.msra.mxu0 %v648_v2  ;;  %680 = vmatpush.bf16.msra.mxu1 %v648_v2 }
  0x16   : > { %681 = vmatpush.bf16.msra.mxu2 %v648_v2  ;;  %682 = vmatpush.bf16.msra.mxu3 %v648_v2 }
  0x19   : > { %378 = vmatpush.bf16.msra.mxu0 %v647_v3  ;;  %683 = vmatpush.bf16.msra.mxu1 %v647_v3 }
  0x1a   : > { %684 = vmatpush.bf16.msra.mxu2 %v647_v3  ;;  %685 = vmatpush.bf16.msra.mxu3 %v647_v3 }
  0x1d   : > { %379 = vmatpush.bf16.msra.mxu0 %v646_v4  ;;  %686 = vmatpush.bf16.msra.mxu1 %v646_v4 }
  0x1e   : > { %687 = vmatpush.bf16.msra.mxu2 %v646_v4  ;;  %688 = vmatpush.bf16.msra.mxu3 %v646_v4 }
  0x21   : > { %380 = vmatpush.bf16.msra.mxu0 %v645_v5  ;;  %689 = vmatpush.bf16.msra.mxu1 %v645_v5 }
  0x22   : > { %690 = vmatpush.bf16.msra.mxu2 %v645_v5  ;;  %691 = vmatpush.bf16.msra.mxu3 %v645_v5 }
  0x25   : > { %381 = vmatpush.bf16.msra.mxu0 %v644_v6  ;;  %692 = vmatpush.bf16.msra.mxu1 %v644_v6 }
  0x26   : > { %693 = vmatpush.bf16.msra.mxu2 %v644_v6  ;;  %694 = vmatpush.bf16.msra.mxu3 %v644_v6 }
  0x29   : > { %382 = vmatpush.bf16.msra.mxu0 %v643_v7  ;;  %695 = vmatpush.bf16.msra.mxu1 %v643_v7 }
  0x2a   : > { %696 = vmatpush.bf16.msra.mxu2 %v643_v7  ;;  %697 = vmatpush.bf16.msra.mxu3 %v643_v7 }
  0x2c   : > { %383 = vmatmul.bf16.vlgmr.msra.gmra.mxu0 %v639_v8  ;;  %388 = vmatmul.bf16.vlgmr.msra.gmra.mxu1 %v640_v9 }
  0x2d   : > { %393 = vmatmul.bf16.vlgmr.msra.gmra.mxu2 %v641_v10  ;;  %398 = vmatmul.bf16.vlgmr.msra.gmra.mxu3 %v642_v11 }
  0xa9   : > { %v384_v12 = vpop.f32.mrf.mxu0  ;;  %v389_v13 = vpop.f32.mrf.mxu1 }
  0xaa   : > { %v435_v15 = vadd.f32 %v722_v14, %v384_v12  ;;  %v437_v16 = vadd.f32 %v722_v14, %v389_v13 }
  0xac   : > { %v443_v23 = vmax.f32 %v435_v15, 0.0  ;;  %v445_v24 = vmax.f32 %v437_v16, 0.0 }
  0xb0   : > { %v394_v17 = vpop.f32.mrf.mxu2  ;;  %v399_v18 = vpop.f32.mrf.mxu3 }
  0xb1   : > { %v386_v19 = vpop.f32.mrf.mxu0  ;;  %v391_v20 = vpop.f32.mrf.mxu1  ;;  %v439_v29 = vadd.f32 %v722_v14, %v394_v17  ;;  %v441_v30 = vadd.f32 %v722_v14, %v399_v18 }
  0xb2   : > { %v436_v21 = vadd.f32 %v722_v14, %v386_v19  ;;  %v438_v22 = vadd.f32 %v722_v14, %v391_v20 }
  0xb3   : > { %v447_v35 = vmax.f32 %v439_v29, 0.0  ;;  %v449_v36 = vmax.f32 %v441_v30, 0.0 }
  0xb4   : > { %v444_v25 = vmax.f32 %v436_v21, 0.0  ;;  %v446_v26 = vmax.f32 %v438_v22, 0.0 }
  0xb6   : > { %v654_v27 = vpack.c.bf16 %v444_v25, %v443_v23  ;;  %v659_v28 = vpack.c.bf16 %v446_v26, %v445_v24 }
  0xb8   : > { %655 = vst [vmem:[%s257_s17] sm:$0xff] %v654_v27   ;;  %v396_v31 = vpop.f32.mrf.mxu2  ;;  %v401_v32 = vpop.f32.mrf.mxu3 }
  0xb9   : > { %671 = vst [vmem:[%s257_s17 + $0x8] sm:$0xff] %v659_v28   ;;  %v440_v33 = vadd.f32 %v722_v14, %v396_v31  ;;  %v442_v34 = vadd.f32 %v722_v14, %v401_v32 }
  0xbb   : > { %v448_v37 = vmax.f32 %v440_v33, 0.0  ;;  %v450_v38 = vmax.f32 %v442_v34, 0.0 }
  0xbd   : > { %v664_v39 = vpack.c.bf16 %v448_v37, %v447_v35  ;;  %v669_v40 = vpack.c.bf16 %v450_v38, %v449_v36 }
  0xbf   : > { %672 = vst [vmem:[%s257_s17 + $0x10] sm:$0xff] %v664_v39  }
  0xc0   : > { %673 = vst [vmem:[%s257_s17 + $0x18] sm:$0xff] %v669_v40  }
  0xc1 PF: > { %s13_s14 = sadd.s32 1, %s745_s14   ;;  %s841_s12 = smov %s741_s13 }
  0xc2   : > { %p10_p5 = scmp.ge.s32.totalorder %s13_s14, 4   ;;  %s842_s13 = smov %s844_s15 }
  0xc4   :  { %12 = sbr.rel (!%p10_p5) target bundleno = 2 (0x2), region = 76 }

// kernel: _lambda_.128
= control target key start
LH: loop header
LB: loop body
LE: loop exit
PB: predicated region body
PF: predicated region fallthrough
CT: control target
= control target key end

     0   :  { %s741_s12 = smov 0   ;;  %s743_s13 = smov 0   ;;  %s880_s0 = inlined_call_operand.vmem [shape: bf16[32,128], index: 0, kind: input, shape index: {}]   ;;  %s881_s1 = inlined_call_operand.vmem [shape: bf16[128,256], index: 1, kind: input, shape index: {}]   ;;  %s882_s2 = inlined_call_operand.vmem [shape: f32[1,256], index: 2, kind: input, shape index: {}]   ;;  %s883_s3 = inlined_call_operand.vmem [shape: bf16[32,256], index: 3, kind: output, shape index: {}]  }
   0x1   :  { %s745_s14 = smov 0  }
   0x2 LB: > { %s32_s15 = sadd.s32 1, %s715_s13  ;;  %p579_p0 = scmp.ge.s32.totalorder %s719_s14, 1  ;;  %s719_s14 = sphi %s745_s14, %s13_s14   ;;  %s715_s13 = sphi %s743_s13, %s885_s13   ;;  %s711_s12 = sphi %s741_s12, %s884_s12  }
   0x3   : > { %p34_p1 = scmp.ge.s32.totalorder %s32_s15, 2  ;;  %p193_p2 = scmp.lt.s32.totalorder %s719_s14, 3 }
   0x5   : > { %s887_s15 = smov (%p34_p1, %s32_s15), 0  ;;  %p194_p3 = pnand %p579_p0, %p193_p2 }
   0x6   : > { %s580_s6 = sshll.u32 (!%p194_p3), %s711_s12, 1 }
   0x7   : > { %197 = sbr.rel (%p194_p3) target bundleno = 186 (0xba), region = 32  ;;  %p240_p4 = scmp.lt.s32.totalorder (!%p194_p3), %s580_s6, 3 }
   0xc   : > { %v647_v0 = vld [vmem:[%s881_s1 + $0x70] sm:$0xf]  ;;  %v672_v1 = vld [vmem:[%s881_s1 + $0x74] sm:$0xf0]  ;;  %v671_v2 = vld [vmem:[%s881_s1 + $0x74] sm:$0xf] }
   0xd   : > { %v648_v3 = vor.u32 %v672_v1, %v647_v0  ;;  %v649_v4 = vld [vmem:[%s881_s1 + $0x78] sm:$0xf0]  ;;  %v639_v5 = vld [vmem:[%s881_s1 + $0x60] sm:$0xf]  ;;  %v670_v6 = vld [vmem:[%s881_s1 + $0x64] sm:$0xf0] }
   0xe   : > { %v652_v7 = vor.u32 %v671_v2, %v649_v4  ;;  %v669_v8 = vld [vmem:[%s881_s1 + $0x64] sm:$0xf]  ;;  %v641_v9 = vld [vmem:[%s881_s1 + $0x68] sm:$0xf0]  ;;  %v640_v10 = vor.u32 %v670_v6, %v639_v5  ;;  %v631_v12 = vld [vmem:[%s881_s1 + $0x50] sm:$0xf] }
   0xf   : > { %393 = vmatpush.bf16.msra.mxu0 %v648_v3  ;;  %v644_v11 = vor.u32 %v669_v8, %v641_v9  ;;  %v668_v13 = vld [vmem:[%s881_s1 + $0x54] sm:$0xf0]  ;;  %v667_v14 = vld [vmem:[%s881_s1 + $0x54] sm:$0xf]  ;;  %v633_v15 = vld [vmem:[%s881_s1 + $0x58] sm:$0xf0] }
  0x10   : > { %407 = vmatpush.bf16.msra.mxu1 %v652_v7  ;;  %v632_v16 = vor.u32 %v668_v13, %v631_v12  ;;  %v636_v17 = vor.u32 %v667_v14, %v633_v15  ;;  %v623_v18 = vld [vmem:[%s881_s1 + $0x40] sm:$0xf]  ;;  %v666_v19 = vld [vmem:[%s881_s1 + $0x44] sm:$0xf0]  ;;  %v665_v20 = vld [vmem:[%s881_s1 + $0x44] sm:$0xf] }
  0x11   : > { %v625_v21 = vld [vmem:[%s881_s1 + $0x48] sm:$0xf0]  ;;  %v624_v22 = vor.u32 %v666_v19, %v623_v18  ;;  %v615_v24 = vld [vmem:[%s881_s1 + $0x30] sm:$0xf]  ;;  %v664_v25 = vld [vmem:[%s881_s1 + $0x34] sm:$0xf0] }
  0x12   : > { %v628_v23 = vor.u32 %v665_v20, %v625_v21  ;;  %v663_v26 = vld [vmem:[%s881_s1 + $0x34] sm:$0xf]  ;;  %v617_v27 = vld [vmem:[%s881_s1 + $0x38] sm:$0xf0]  ;;  %v616_v28 = vor.u32 %v664_v25, %v615_v24  ;;  %v607_v30 = vld [vmem:[%s881_s1 + $0x20] sm:$0xf] }
  0x13   : > { %394 = vmatpush.bf16.msra.mxu0 %v640_v10  ;;  %v620_v29 = vor.u32 %v663_v26, %v617_v27  ;;  %v662_v31 = vld [vmem:[%s881_s1 + $0x24] sm:$0xf0]  ;;  %v661_v32 = vld [vmem:[%s881_s1 + $0x24] sm:$0xf]  ;;  %v609_v33 = vld [vmem:[%s881_s1 + $0x28] sm:$0xf0] }
  0x14   : > { %408 = vmatpush.bf16.msra.mxu1 %v644_v11  ;;  %v608_v34 = vor.u32 %v662_v31, %v607_v30  ;;  %v612_v35 = vor.u32 %v661_v32, %v609_v33  ;;  %v599_v36 = vld [vmem:[%s881_s1 + $0x10] sm:$0xf]  ;;  %v660_v37 = vld [vmem:[%s881_s1 + $0x14] sm:$0xf0]  ;;  %s889_s6 = smov (!%p240_p4, %s580_s6), 3 }
  0x15   : > { %v659_v38 = vld [vmem:[%s881_s1 + $0x14] sm:$0xf]  ;;  %v601_v39 = vld [vmem:[%s881_s1 + $0x18] sm:$0xf0]  ;;  %v600_v40 = vor.u32 %v660_v37, %v599_v36  ;;  %v591_v42 = vld [vmem:[%s881_s1] sm:$0xf] }
  0x16   : > { %v604_v41 = vor.u32 %v659_v38, %v601_v39  ;;  %v658_v43 = vld [vmem:[%s881_s1 + $0x4] sm:$0xf0]  ;;  %s581_s30 = sshll.u32 %s889_s6, 2  ;;  %v657_v44 = vld [vmem:[%s881_s1 + $0x4] sm:$0xf]  ;;  %s655_s18 = sshll.u32 %s889_s6, 3 }
  0x17   : > { %395 = vmatpush.bf16.msra.mxu0 %v632_v16  ;;  %v593_v45 = vld [vmem:[%s881_s1 + $0x8] sm:$0xf0]  ;;  %v592_v46 = vor.u32 %v658_v43, %v591_v42  ;;  %s246_s11 = scalar_lea.vmem %s880_s0, %s581_s30  ;;  %v436_v49 = vld [vmem:[%s882_s2] sm:$0x3]  ;;  %s274_s20 = scalar_lea.vmem %s883_s3, %s655_s18 }
  0x18   : > { %409 = vmatpush.bf16.msra.mxu1 %v636_v17  ;;  %v596_v47 = vor.u32 %v657_v44, %v593_v45  ;;  %v656_v48 = vld [vmem:[%s246_s11] sm:$0xff]  ;;  %v438_v50 = vperm.slane %v436_v49, 0  ;;  %v439_v51 = vperm.slane %v436_v49, 1 }
  0x1b   : > { %396 = vmatpush.bf16.msra.mxu0 %v624_v22 }
  0x1c   : > { %410 = vmatpush.bf16.msra.mxu1 %v628_v23 }
  0x1f   : > { %397 = vmatpush.bf16.msra.mxu0 %v616_v28 }
  0x20   : > { %411 = vmatpush.bf16.msra.mxu1 %v620_v29 }
  0x23   : > { %398 = vmatpush.bf16.msra.mxu0 %v608_v34 }
  0x24   : > { %412 = vmatpush.bf16.msra.mxu1 %v612_v35 }
  0x27   : > { %399 = vmatpush.bf16.msra.mxu0 %v600_v40 }
  0x28   : > { %413 = vmatpush.bf16.msra.mxu1 %v604_v41 }
  0x2b   : > { %400 = vmatpush.bf16.msra.mxu0 %v592_v46 }
  0x2c   : > { %414 = vmatpush.bf16.msra.mxu1 %v596_v47 }
  0x2e   : > { %401 = vmatmul.bf16.vlgmr.msra.gmra.mxu0 %v656_v48 }
  0x2f   : > { %415 = vmatmul.bf16.vlgmr.msra.gmra.mxu1 %v656_v48 }
  0xab   : > { %v402_v52 = vpop.f32.mrf.mxu0 }
  0xac   : > { %v442_v53 = vadd.f32 %v438_v50, %v402_v52  ;;  %v416_v54 = vpop.f32.mrf.mxu1 }
  0xad   : > { %v443_v55 = vadd.f32 %v439_v51, %v416_v54 }
  0xaf   : > { %v446_v56 = vpack.c.bf16 %v443_v55, %v442_v53 }
  0xb1   : > { %448 = vst [vmem:[%s274_s20] sm:$0xff] %v446_v56 }
  0xb3   : > { %v404_v57 = vpop.f32.mrf.mxu0 }
  0xb4   : > { %v444_v58 = vadd.f32 %v438_v50, %v404_v57  ;;  %v418_v59 = vpop.f32.mrf.mxu1 }
  0xb5   : > { %v445_v60 = vadd.f32 %v439_v51, %v418_v59 }
  0xb7   : > { %v447_v61 = vpack.c.bf16 %v445_v60, %v444_v58 }
  0xb9   : > { %449 = vst [vmem:[%s274_s20 + $0x8] sm:$0xff] %v447_v61 }
  0xba PF: > { %s13_s14 = sadd.s32 1, %s719_s14   ;;  %s884_s12 = smov %s715_s13 }
  0xbb   : > { %p10_p5 = scmp.ge.s32.totalorder %s13_s14, 4   ;;  %s885_s13 = smov %s887_s15 }
  0xbd   :  { %12 = sbr.rel (!%p10_p5) target bundleno = 2 (0x2), region = 76 }

// kernel: _lambda_.130
= control target key start
LH: loop header
LB: loop body
LE: loop exit
PB: predicated region body
PF: predicated region fallthrough
CT: control target
= control target key end

     0   :  { %s992_s12 = smov 0   ;;  %s994_s13 = smov 0   ;;  %s1126_s0 = inlined_call_operand.vmem [shape: bf16[32,1152], index: 0, kind: input, shape index: {}]   ;;  %s1127_s1 = inlined_call_operand.vmem [shape: bf16[1152,128], index: 1, kind: input, shape index: {}]   ;;  %s1128_s2 = inlined_call_operand.vmem [shape: f32[1,128], index: 2, kind: input, shape index: {}]   ;;  %s1129_s3 = inlined_call_operand.vmem [shape: bf16[32,128], index: 3, kind: output, shape index: {}]  }
   0x1   :  { %s996_s14 = smov 0   ;;  %s998_s15 = smov 0  }
   0x2   :  { %s1000_s16 = smov 0   ;;  %s1002_s17 = smov 0  }
   0x3   :  { %s1004_s18 = smov 0  }
   0x4 LB: > { %s25_s19 = sadd.s32 1, %s961_s16  ;;  %s32_s20 = sadd.s32 1, %s965_s17  ;;  %s969_s18 = sphi %s1004_s18, %s13_s18   ;;  %s965_s17 = sphi %s1002_s17, %s1135_s17   ;;  %s961_s16 = sphi %s1000_s16, %s1134_s16   ;;  %s957_s15 = sphi %s998_s15, %s1133_s15   ;;  %s953_s14 = sphi %s996_s14, %s1132_s14   ;;  %s949_s13 = sphi %s994_s13, %s1131_s13   ;;  %s945_s12 = sphi %s992_s12, %s1130_s12  }
   0x5   : > { %p26_p0 = scmp.ge.s32.totalorder %s25_s19, 3  ;;  %p48_p1 = scmp.ne.s32.totalorder %s949_s13, %s945_s12 }
   0x6   : > { %p49_p2 = scmp.eq.s32.totalorder %s969_s18, 0  ;;  %s41_s24 = sadd.s32 1, %s949_s13 }
   0x7   : > { %s1137_s19 = smov (%p26_p0, %s25_s19), 0  ;;  %s1139_s20 = smov (!%p26_p0, %s32_s20), %s965_s17 }
   0x8   : > { %p50_p3 = por %p49_p2, %p48_p1  ;;  %p34_p4 = scmp.ge.s32.totalorder %s1139_s20, 2 }
   0x9   : > { %s37_s21 = ssub.s32 %s961_s16, %s1137_s19  ;;  %p698_p6 = scmp.ge.s32.totalorder %s969_s18, 6 }
   0xa   : > { %s1141_s20 = smov (%p34_p4, %s1139_s20), 0 }
   0xb   : > { %s36_s22 = ssub.s32 %s965_s17, %s1141_s20  ;;  %162 = sbr.rel (%p698_p6) target bundleno = 29 (0x1d), region = 20 }
   0xc   : > { %s38_s23 = sor.u32 %s37_s21, %s36_s22 }
   0xd   : > { %p39_p5 = scmp.eq.s32.totalorder %s38_s23, 0 }
   0xf   : > { %s1043_s25 = scalar_select %p39_p5, %s949_s13, %s41_s24  }
  0x10   : > { %165 = sbr.rel (!%p50_p3) target bundleno = 29 (0x1d), region = 24  ;;  %s167_s26 = sand.u32 (%p50_p3), 1, %s949_s13  }
  0x11   : > { %s171_s27 = smul.u32 (%p50_p3), 3, %s961_s16 }
  0x12   : > { %s854_s28 = smul.u32 (%p50_p3), 24, %s167_s26 }
  0x13   : > { %s855_s29 = smul.u32 (%p50_p3), 18, %s965_s17 }
  0x14   : > { %s169_s8 = scalar_lea.vmem (%p50_p3), [#allocation3], %s854_s28 }
  0x15   : > { %s173_s30 = sadd.s32 %s855_s29, %s171_s27 }
  0x16   : > { %s701_s4 = sshll.u32 %s173_s30, 2 }
  0x17   : > { %s175_s7 = scalar_lea.vmem %s1126_s0, %s701_s4 }
  0x18   : > { %v190_v0 = vld [vmem:[%s175_s7] sm:$0xff]  ;;  %v702_v2 = vld [vmem:[%s175_s7 + $0x8] sm:$0xf]  ;;  %v704_v3 = vld [vmem:[%s175_s7 + $0x2c] sm:$0xf] }
  0x19   : > { %v192_v1 = vld [vmem:[%s175_s7 + $0x24] sm:$0xff]  ;;  %191 = vst [vmem:[%s169_s8] sm:$0xff] %v190_v0 }
  0x1a   : > { %193 = vst [vmem:[%s169_s8 + $0xc] sm:$0xff] %v192_v1 }
  0x1b   : > { %703 = vst [vmem:[%s169_s8 + $0x8] sm:$0xf] %v702_v2 }
  0x1c   : > { %705 = vst [vmem:[%s169_s8 + $0x14] sm:$0xf] %v704_v3 }
  0x1d PF: > { %p706_p7 = scmp.ge.s32.totalorder %s969_s18, 1  ;;  %p222_p8 = scmp.lt.s32.totalorder %s969_s18, 7 }
  0x1f   : > { %p223_p9 = pnand %p706_p7, %p222_p8 }
  0x20   : > { %s229_s9 = sand.u32 (!%p223_p9), 1, %s945_s12   ;;  %s268_s10 = smul.u32 (!%p223_p9), 48, %s953_s14 }
  0x21   : > { %226 = sbr.rel (%p223_p9) target bundleno = 242 (0xf2), region = 54  ;;  %s708_s21 = sshll.u32 (!%p223_p9), %s957_s15, 1 }
  0x22   : > { %s856_s11 = smul.u32 (!%p223_p9), 24, %s229_s9  ;;  %p269_p10 = scmp.lt.s32.totalorder (!%p223_p9), %s268_s10, 143 }
  0x23   : > { %p281_p11 = scmp.lt.s32.totalorder (!%p223_p9), %s708_s21, 3  ;;  %p710_p12 = scmp.ne.s32.totalorder (!%p223_p9), %s953_s14, 0 }
  0x24   : > { %s1067_s12 = scalar_lea.vmem (!%p223_p9), [#allocation3], %s856_s11 }
  0x26   : > { %s1143_s10 = smov (!%p269_p10, %s268_s10), 143  ;;  %s1145_s21 = smov (!%p281_p11, %s708_s21), 3 }
  0x27   : > { %s707_s22 = sshll.u32 %s1143_s10, 2  ;;  %s709_s27 = sshll.u32 %s1145_s21, 2 }
  0x28   : > { %s1060_s26 = scalar_lea.vmem %s1127_s1, %s707_s22  ;;  %s1065_s30 = scalar_lea.vmem %s1129_s3, %s709_s27 }
  0x29   : > { %292 = sbr.rel (%p710_p12) target bundleno = 49 (0x31), region = 62 }
  0x2e   : > { %v971_v4 = vmov 0.0  }
  0x2f   : > { %293 = vst [vmem:[#allocation2] sm:$0xff] %v971_v4 }
  0x30   : > { %294 = vst [vmem:[#allocation2 + $0x8] sm:$0xff] %v971_v4 }
  0x31 PF: > { %v832_v5 = vld [vmem:[%s1060_s26 + $0x38] sm:$0xff]  ;;  %v831_v8 = vld [vmem:[%s1060_s26 + $0x30] sm:$0xff]  ;;  %v830_v11 = vld [vmem:[%s1060_s26 + $0x28] sm:$0xff]  ;;  %p819_p13 = scmp.ne.s32.totalorder %s953_s14, 2 }
  0x32   : > { %v840_v6 = vld [vmem:[%s1060_s26 + $0x78] sm:$0xff]  ;;  %509 = vmatpush.bf16.msra.mxu0 %v832_v5  ;;  %v839_v9 = vld [vmem:[%s1060_s26 + $0x70] sm:$0xff]  ;;  %v838_v12 = vld [vmem:[%s1060_s26 + $0x68] sm:$0xff] }
  0x33   : > { %v848_v7 = vld [vmem:[%s1060_s26 + $0xb8] sm:$0xff]  ;;  %523 = vmatpush.bf16.msra.mxu1 %v840_v6  ;;  %v847_v10 = vld [vmem:[%s1060_s26 + $0xb0] sm:$0xff]  ;;  %v846_v13 = vld [vmem:[%s1060_s26 + $0xa8] sm:$0xff] }
  0x34   : > { %537 = vmatpush.bf16.msra.mxu2 %v848_v7  ;;  %v829_v14 = vld [vmem:[%s1060_s26 + $0x20] sm:$0xff]  ;;  %v828_v17 = vld [vmem:[%s1060_s26 + $0x18] sm:$0xff]  ;;  %v827_v20 = vld [vmem:[%s1060_s26 + $0x10] sm:$0xff] }
  0x35   : > { %v837_v15 = vld [vmem:[%s1060_s26 + $0x60] sm:$0xff]  ;;  %v836_v18 = vld [vmem:[%s1060_s26 + $0x58] sm:$0xff]  ;;  %v835_v21 = vld [vmem:[%s1060_s26 + $0x50] sm:$0xff] }
  0x36   : > { %510 = vmatpush.bf16.msra.mxu0 %v831_v8  ;;  %v845_v16 = vld [vmem:[%s1060_s26 + $0xa0] sm:$0xff]  ;;  %v844_v19 = vld [vmem:[%s1060_s26 + $0x98] sm:$0xff]  ;;  %v843_v22 = vld [vmem:[%s1060_s26 + $0x90] sm:$0xff] }
  0x37   : > { %524 = vmatpush.bf16.msra.mxu1 %v839_v9  ;;  %v826_v23 = vld [vmem:[%s1060_s26 + $0x8] sm:$0xff]  ;;  %v825_v26 = vld [vmem:[%s1060_s26] sm:$0xff]  ;;  %v823_v29 = vld [vmem:[%s1067_s12 + $0x8] sm:$0xf0] }
  0x38   : > { %538 = vmatpush.bf16.msra.mxu2 %v847_v10  ;;  %v834_v24 = vld [vmem:[%s1060_s26 + $0x48] sm:$0xff]  ;;  %v833_v27 = vld [vmem:[%s1060_s26 + $0x40] sm:$0xff]  ;;  %v721_v33 = vld [vmem:[%s1067_s12 + $0x8] sm:$0xf] }
  0x39   : > { %v842_v25 = vld [vmem:[%s1060_s26 + $0x88] sm:$0xff]  ;;  %v715_v31 = vld [vmem:[%s1067_s12 + $0xc] sm:$0xf0]  ;;  %v824_v34 = vld [vmem:[%s1067_s12 + $0x10] sm:$0xf0] }
  0x3a   : > { %511 = vmatpush.bf16.msra.mxu0 %v830_v11  ;;  %v713_v28 = vld [vmem:[%s1067_s12] sm:$0xf]  ;;  %v822_v30 = vld [vmem:[%s1067_s12 + $0x4] sm:$0xf]  ;;  %v841_v32 = vld [vmem:[%s1060_s26 + $0x80] sm:$0xff]  ;;  %v722_v37 = vor.u32 %v824_v34, %v721_v33 }
  0x3b   : > { %525 = vmatpush.bf16.msra.mxu1 %v838_v12  ;;  %v714_v35 = vor.u32 %v823_v29, %v713_v28  ;;  %v718_v36 = vor.u32 %v822_v30, %v715_v31  ;;  %v295_v41 = vld [vmem:[#allocation2] sm:$0xff]  ;;  %v296_v48 = vld [vmem:[#allocation2 + $0x8] sm:$0xff] }
  0x3c   : > { %539 = vmatpush.bf16.msra.mxu2 %v846_v13 }
  0x3e   : > { %512 = vmatpush.bf16.msra.mxu0 %v829_v14 }
  0x3f   : > { %526 = vmatpush.bf16.msra.mxu1 %v837_v15 }
  0x40   : > { %540 = vmatpush.bf16.msra.mxu2 %v845_v16 }
  0x42   : > { %513 = vmatpush.bf16.msra.mxu0 %v828_v17 }
  0x43   : > { %527 = vmatpush.bf16.msra.mxu1 %v836_v18 }
  0x44   : > { %541 = vmatpush.bf16.msra.mxu2 %v844_v19 }
  0x46   : > { %514 = vmatpush.bf16.msra.mxu0 %v827_v20 }
  0x47   : > { %528 = vmatpush.bf16.msra.mxu1 %v835_v21 }
  0x48   : > { %542 = vmatpush.bf16.msra.mxu2 %v843_v22 }
  0x4a   : > { %515 = vmatpush.bf16.msra.mxu0 %v826_v23 }
  0x4b   : > { %529 = vmatpush.bf16.msra.mxu1 %v834_v24 }
  0x4c   : > { %543 = vmatpush.bf16.msra.mxu2 %v842_v25 }
  0x4e   : > { %516 = vmatpush.bf16.msra.mxu0 %v825_v26 }
  0x4f   : > { %530 = vmatpush.bf16.msra.mxu1 %v833_v27 }
  0x50   : > { %544 = vmatpush.bf16.msra.mxu2 %v841_v32 }
  0x51   : > { %517 = vmatmul.bf16.vlgmr.msra.gmra.mxu0 %v714_v35 }
  0x52   : > { %531 = vmatmul.bf16.vlgmr.msra.gmra.mxu1 %v718_v36 }
  0x53   : > { %545 = vmatmul.bf16.vlgmr.msra.gmra.mxu2 %v722_v37 }
  0xce   : > { %v518_v38 = vpop.f32.mrf.mxu0 }
  0xcf   : > { %v532_v39 = vpop.f32.mrf.mxu1 }
  0xd0   : > { %v533_v40 = vadd.f32 %v532_v39, %v518_v38 }
  0xd6   : > { %v546_v42 = vpop.f32.mrf.mxu2  ;;  %v520_v45 = vpop.f32.mrf.mxu0 }
  0xd7   : > { %v547_v43 = vadd.f32 %v546_v42, %v533_v40  ;;  %v534_v46 = vpop.f32.mrf.mxu1 }
  0xd8   : > { %v535_v47 = vadd.f32 %v534_v46, %v520_v45 }
  0xd9   : > { %v551_v44 = vadd.f32 %v547_v43, %v295_v41 }
  0xdb   : > { %553 = vst [vmem:[#allocation2] sm:$0xff] %v551_v44 }
  0xde   : > { %v548_v49 = vpop.f32.mrf.mxu2 }
  0xdf   : > { %v549_v50 = vadd.f32 %v548_v49, %v535_v47  ;;  %558 = sbr.rel (%p819_p13) target bundleno = 242 (0xf2), region = 66 }
  0xe1   : > { %v552_v51 = vadd.f32 %v549_v50, %v296_v48 }
  0xe3   : > { %554 = vst [vmem:[#allocation2 + $0x8] sm:$0xff] %v552_v51 }
  0xe4   : > { %v559_v52 = vld [vmem:[#allocation2] sm:$0xff] }
  0xe5   : > { %v914_v54 = vld [vmem:[%s1128_s2] ss:$0 sm:$0xff] }
  0xe6   : > { %v565_v55 = vadd.f32 %v914_v54, %v559_v52 }
  0xe8   : > { %v567_v57 = vmax.f32 %v565_v55, 0.0 }
  0xea   : > { %v560_v53 = vld [vmem:[#allocation2 + $0x8] sm:$0xff] }
  0xeb   : > { %v566_v56 = vadd.f32 %v914_v54, %v560_v53 }
  0xed   : > { %v568_v58 = vmax.f32 %v566_v56, 0.0 }
  0xef   : > { %v852_v59 = vpack.c.bf16 %v568_v58, %v567_v57 }
  0xf1   : > { %853 = vst [vmem:[%s1065_s30] sm:$0xff] %v852_v59  }
  0xf2 PF: > { %s13_s18 = sadd.s32 1, %s969_s18   ;;  %s1130_s12 = smov %s949_s13 }
  0xf3   : > { %p10_p0 = scmp.ge.s32.totalorder %s13_s18, 8   ;;  %s1131_s13 = smov %s1043_s25 }
  0xf4   : > { %s1132_s14 = smov %s961_s16  ;;  %s1133_s15 = smov %s965_s17 }
  0xf5   : > { %s1134_s16 = smov %s1137_s19  ;;  %s1135_s17 = smov %s1141_s20 }
  0xf6   :  { %12 = sbr.rel (!%p10_p0) target bundleno = 4 (0x4), region = 113 }

// kernel: _lambda_.131
= control target key start
LH: loop header
LB: loop body
LE: loop exit
PB: predicated region body
PF: predicated region fallthrough
CT: control target
= control target key end

     0   :  { %s850_s15 = smov 0   ;;  %s852_s16 = smov 0   ;;  %s992_s0 = inlined_call_operand.vmem [shape: bf16[32,128], index: 0, kind: input, shape index: {}]   ;;  %s993_s1 = inlined_call_operand.vmem [shape: bf16[128,256], index: 1, kind: input, shape index: {}]   ;;  %s994_s2 = inlined_call_operand.vmem [shape: f32[1,256], index: 2, kind: input, shape index: {}]   ;;  %s995_s3 = inlined_call_operand.vmem [shape: bf16[32,256], index: 3, kind: input, shape index: {}]   ;;  %s996_s4 = inlined_call_operand.vmem [shape: bf16[32,256], index: 4, kind: output, shape index: {}]  }
   0x1   :  { %s854_s17 = smov 0  }
   0x2 LB: > { %s33_s18 = sadd.s32 1, %s819_s16  ;;  %p679_p0 = scmp.ge.s32.totalorder %s823_s17, 1  ;;  %s823_s17 = sphi %s854_s17, %s14_s17   ;;  %s819_s16 = sphi %s852_s16, %s998_s16   ;;  %s815_s15 = sphi %s850_s15, %s997_s15  }
   0x3   : > { %p35_p1 = scmp.ge.s32.totalorder %s33_s18, 2  ;;  %p237_p2 = scmp.lt.s32.totalorder %s823_s17, 3 }
   0x5   : > { %s1000_s18 = smov (%p35_p1, %s33_s18), 0  ;;  %p238_p3 = pnand %p679_p0, %p237_p2 }
   0x6   : > { %s680_s11 = sshll.u32 (!%p238_p3), %s815_s15, 1 }
   0x7   : > { %241 = sbr.rel (%p238_p3) target bundleno = 190 (0xbe), region = 36  ;;  %p296_p4 = scmp.lt.s32.totalorder (!%p238_p3), %s680_s11, 3 }
   0xc   : > { %v750_v0 = vld [vmem:[%s993_s1 + $0x70] sm:$0xf]  ;;  %v776_v1 = vld [vmem:[%s993_s1 + $0x74] sm:$0xf0]  ;;  %v775_v2 = vld [vmem:[%s993_s1 + $0x74] sm:$0xf] }
   0xd   : > { %v751_v3 = vor.u32 %v776_v1, %v750_v0  ;;  %v752_v4 = vld [vmem:[%s993_s1 + $0x78] sm:$0xf0]  ;;  %v742_v5 = vld [vmem:[%s993_s1 + $0x60] sm:$0xf]  ;;  %v774_v6 = vld [vmem:[%s993_s1 + $0x64] sm:$0xf0] }
   0xe   : > { %v755_v7 = vor.u32 %v775_v2, %v752_v4  ;;  %v773_v8 = vld [vmem:[%s993_s1 + $0x64] sm:$0xf]  ;;  %v744_v9 = vld [vmem:[%s993_s1 + $0x68] sm:$0xf0]  ;;  %v743_v10 = vor.u32 %v774_v6, %v742_v5  ;;  %v734_v12 = vld [vmem:[%s993_s1 + $0x50] sm:$0xf] }
   0xf   : > { %461 = vmatpush.bf16.msra.mxu0 %v751_v3  ;;  %v747_v11 = vor.u32 %v773_v8, %v744_v9  ;;  %v772_v13 = vld [vmem:[%s993_s1 + $0x54] sm:$0xf0]  ;;  %v771_v14 = vld [vmem:[%s993_s1 + $0x54] sm:$0xf]  ;;  %v736_v15 = vld [vmem:[%s993_s1 + $0x58] sm:$0xf0] }
  0x10   : > { %475 = vmatpush.bf16.msra.mxu1 %v755_v7  ;;  %v735_v16 = vor.u32 %v772_v13, %v734_v12  ;;  %v739_v17 = vor.u32 %v771_v14, %v736_v15  ;;  %v726_v18 = vld [vmem:[%s993_s1 + $0x40] sm:$0xf]  ;;  %v770_v19 = vld [vmem:[%s993_s1 + $0x44] sm:$0xf0]  ;;  %v769_v20 = vld [vmem:[%s993_s1 + $0x44] sm:$0xf] }
  0x11   : > { %v728_v21 = vld [vmem:[%s993_s1 + $0x48] sm:$0xf0]  ;;  %v727_v22 = vor.u32 %v770_v19, %v726_v18  ;;  %v718_v24 = vld [vmem:[%s993_s1 + $0x30] sm:$0xf]  ;;  %v768_v25 = vld [vmem:[%s993_s1 + $0x34] sm:$0xf0] }
  0x12   : > { %v731_v23 = vor.u32 %v769_v20, %v728_v21  ;;  %v767_v26 = vld [vmem:[%s993_s1 + $0x34] sm:$0xf]  ;;  %v720_v27 = vld [vmem:[%s993_s1 + $0x38] sm:$0xf0]  ;;  %v719_v28 = vor.u32 %v768_v25, %v718_v24  ;;  %v710_v30 = vld [vmem:[%s993_s1 + $0x20] sm:$0xf] }
  0x13   : > { %462 = vmatpush.bf16.msra.mxu0 %v743_v10  ;;  %v723_v29 = vor.u32 %v767_v26, %v720_v27  ;;  %v766_v31 = vld [vmem:[%s993_s1 + $0x24] sm:$0xf0]  ;;  %v765_v32 = vld [vmem:[%s993_s1 + $0x24] sm:$0xf]  ;;  %v712_v33 = vld [vmem:[%s993_s1 + $0x28] sm:$0xf0] }
  0x14   : > { %476 = vmatpush.bf16.msra.mxu1 %v747_v11  ;;  %v711_v34 = vor.u32 %v766_v31, %v710_v30  ;;  %v715_v35 = vor.u32 %v765_v32, %v712_v33  ;;  %v702_v36 = vld [vmem:[%s993_s1 + $0x10] sm:$0xf]  ;;  %v764_v37 = vld [vmem:[%s993_s1 + $0x14] sm:$0xf0]  ;;  %s1002_s11 = smov (!%p296_p4, %s680_s11), 3 }
  0x15   : > { %v763_v38 = vld [vmem:[%s993_s1 + $0x14] sm:$0xf]  ;;  %v704_v39 = vld [vmem:[%s993_s1 + $0x18] sm:$0xf0]  ;;  %v703_v40 = vor.u32 %v764_v37, %v702_v36  ;;  %v694_v42 = vld [vmem:[%s993_s1] sm:$0xf] }
  0x16   : > { %v707_v41 = vor.u32 %v763_v38, %v704_v39  ;;  %v762_v43 = vld [vmem:[%s993_s1 + $0x4] sm:$0xf0]  ;;  %s681_s9 = sshll.u32 %s1002_s11, 2  ;;  %v761_v44 = vld [vmem:[%s993_s1 + $0x4] sm:$0xf]  ;;  %s758_s22 = sshll.u32 %s1002_s11, 3 }
  0x17   : > { %463 = vmatpush.bf16.msra.mxu0 %v735_v16  ;;  %v696_v45 = vld [vmem:[%s993_s1 + $0x8] sm:$0xf0]  ;;  %v695_v46 = vor.u32 %v762_v43, %v694_v42  ;;  %s302_s21 = scalar_lea.vmem %s992_s0, %s681_s9  ;;  %s330_s24 = scalar_lea.vmem %s995_s3, %s758_s22  ;;  %v504_v49 = vld [vmem:[%s994_s2] sm:$0x3] }
  0x18   : > { %477 = vmatpush.bf16.msra.mxu1 %v739_v17  ;;  %v699_v47 = vor.u32 %v761_v44, %v696_v45  ;;  %v760_v48 = vld [vmem:[%s302_s21] sm:$0xff]  ;;  %v506_v51 = vperm.slane %v504_v49, 0  ;;  %v507_v52 = vperm.slane %v504_v49, 1  ;;  %v515_v61 = vld [vmem:[%s330_s24 + $0x8] sm:$0xff]  ;;  %s342_s28 = scalar_lea.vmem %s996_s4, %s758_s22 }
  0x19   : > { %v514_v50 = vld [vmem:[%s330_s24] sm:$0xff]  ;;  %v518_v0 = vunpack.c.l.bf16 %v515_v61  ;;  %v519_v3 = vunpack.c.h.bf16 %v515_v61 }
  0x1a   : > { %v516_v53 = vunpack.c.l.bf16 %v514_v50  ;;  %v517_v55 = vunpack.c.h.bf16 %v514_v50 }
  0x1b   : > { %464 = vmatpush.bf16.msra.mxu0 %v727_v22 }
  0x1c   : > { %478 = vmatpush.bf16.msra.mxu1 %v731_v23 }
  0x1f   : > { %465 = vmatpush.bf16.msra.mxu0 %v719_v28 }
  0x20   : > { %479 = vmatpush.bf16.msra.mxu1 %v723_v29 }
  0x23   : > { %466 = vmatpush.bf16.msra.mxu0 %v711_v34 }
  0x24   : > { %480 = vmatpush.bf16.msra.mxu1 %v715_v35 }
  0x27   : > { %467 = vmatpush.bf16.msra.mxu0 %v703_v40 }
  0x28   : > { %481 = vmatpush.bf16.msra.mxu1 %v707_v41 }
  0x2b   : > { %468 = vmatpush.bf16.msra.mxu0 %v695_v46 }
  0x2c   : > { %482 = vmatpush.bf16.msra.mxu1 %v699_v47 }
  0x2e   : > { %469 = vmatmul.bf16.vlgmr.msra.gmra.mxu0 %v760_v48 }
  0x2f   : > { %483 = vmatmul.bf16.vlgmr.msra.gmra.mxu1 %v760_v48 }
  0xab   : > { %v470_v54 = vpop.f32.mrf.mxu0 }
  0xac   : > { %v510_v56 = vadd.f32 %v506_v51, %v470_v54  ;;  %v484_v57 = vpop.f32.mrf.mxu1 }
  0xad   : > { %v511_v58 = vadd.f32 %v507_v52, %v484_v57 }
  0xae   : > { %v520_v59 = vadd.f32 %v516_v53, %v510_v56 }
  0xaf   : > { %v521_v60 = vadd.f32 %v517_v55, %v511_v58 }
  0xb0   : > { %v524_v62 = vmax.f32 %v520_v59, 0.0 }
  0xb1   : > { %v525_v63 = vmax.f32 %v521_v60, 0.0 }
  0xb3   : > { %v528_v1 = vpack.c.bf16 %v525_v63, %v524_v62  ;;  %v472_v2 = vpop.f32.mrf.mxu0 }
  0xb4   : > { %v512_v4 = vadd.f32 %v506_v51, %v472_v2  ;;  %v486_v5 = vpop.f32.mrf.mxu1 }
  0xb5   : > { %530 = vst [vmem:[%s342_s28] sm:$0xff] %v528_v1  ;;  %v513_v6 = vadd.f32 %v507_v52, %v486_v5 }
  0xb6   : > { %v522_v7 = vadd.f32 %v518_v0, %v512_v4 }
  0xb7   : > { %v523_v8 = vadd.f32 %v519_v3, %v513_v6 }
  0xb8   : > { %v526_v9 = vmax.f32 %v522_v7, 0.0 }
  0xb9   : > { %v527_v10 = vmax.f32 %v523_v8, 0.0 }
  0xbb   : > { %v529_v11 = vpack.c.bf16 %v527_v10, %v526_v9 }
  0xbd   : > { %531 = vst [vmem:[%s342_s28 + $0x8] sm:$0xff] %v529_v11 }
  0xbe PF: > { %s14_s17 = sadd.s32 1, %s823_s17   ;;  %s997_s15 = smov %s819_s16 }
  0xbf   : > { %p11_p5 = scmp.ge.s32.totalorder %s14_s17, 4   ;;  %s998_s16 = smov %s1000_s18 }
  0xc1   :  { %13 = sbr.rel (!%p11_p5) target bundleno = 2 (0x2), region = 83 }

// kernel: _lambda_.132
= control target key start
LH: loop header
LB: loop body
LE: loop exit
PB: predicated region body
PF: predicated region fallthrough
CT: control target
= control target key end

     0   :  { %8 = vsyncpa [#allocation4], 0  ;;  %s812_s12 = smov 0   ;;  %s814_s13 = smov 0   ;;  %s904_s0 = inlined_call_operand.vmem [shape: bf16[32,256], index: 0, kind: input, shape index: {}]   ;;  %s905_s1 = inlined_call_operand.vmem [shape: bf16[256,128], index: 1, kind: input, shape index: {}]   ;;  %s906_s2 = inlined_call_operand.hbm [shape: f32[1,128], index: 2, kind: input, shape index: {}]   ;;  %s907_s3 = inlined_call_operand.vmem [shape: bf16[32,128], index: 3, kind: output, shape index: {}]  }
   0x1   :  { %s816_s14 = smov 0  }
   0x2 LB: > { %s586_s15 = sadd.s32 4294967295, %s789_s14   ;;  %s33_s16 = sadd.s32 1, %s785_s13  ;;  %s789_s14 = sphi %s816_s14, %s14_s14   ;;  %s785_s13 = sphi %s814_s13, %s909_s13   ;;  %s781_s12 = sphi %s812_s12, %s908_s12  }
   0x3   : > { %p35_p0 = scmp.ge.s32.totalorder %s33_s16, 2  ;;  %p588_p1 = scmp.ge.s32.totalorder %s789_s14, 1 }
   0x4   : > { %p148_p2 = scmp.lt.s32.totalorder %s789_s14, 3  ;;  %p705_p4 = scmp.eq.s32.totalorder %s586_s15, 0 }
   0x5   : > { %s911_s16 = smov (%p35_p0, %s33_s16), 0  ;;  %s173_s19 = sshll.u32 %s906_s2, 4  ;;  %s174_s19 = int_to_ptr.hbm [resolvable:$true] %s173_s19 }
   0x6   : > { %p149_p3 = pnand %p588_p1, %p148_p2  ;;  %s791_s20 = smov [#allocation3]  }
   0x7   : > { %s175_s21 = sshll.u32 %s791_s20, 4  ;;  %s176_s21 = int_to_ptr.vmem [resolvable:$true] %s175_s21 }
   0x8   : > { %p701_p5 = pneg %p149_p3  ;;  %203 = sbr.rel (%p149_p3) target bundleno = 190 (0xbe), region = 32 }
   0xa   : > { %p702_p6 = pnand %p705_p4, %p701_p5 }
   0xc   : > { %704 = dma.hbm_to_vmem [thread:$0]  (!%p702_p6), %s174_s19, 16, %s176_s21, [#allocation4]  }
   0xd   : > { %776 = dma.done.wait (%p705_p4), [#allocation4], 16  }
   0xe   : > { %778 = vsyncadd (%p705_p4), [#allocation4], 4294967280  ;;  %v683_v0 = vld [vmem:[%s905_s1 + $0x38] sm:$0xff]  ;;  %v682_v2 = vld [vmem:[%s905_s1 + $0x30] sm:$0xff]  ;;  %s594_s7 = sshll.u32 %s781_s12, 1 }
   0xf   : > { %v691_v1 = vld [vmem:[%s905_s1 + $0x78] sm:$0xff]  ;;  %422 = vmatpush.bf16.msra.mxu0 %v683_v0  ;;  %v690_v3 = vld [vmem:[%s905_s1 + $0x70] sm:$0xff]  ;;  %v681_v4 = vld [vmem:[%s905_s1 + $0x28] sm:$0xff]  ;;  %p246_p7 = scmp.lt.s32.totalorder %s594_s7, 3 }
  0x10   : > { %436 = vmatpush.bf16.msra.mxu1 %v691_v1  ;;  %v689_v5 = vld [vmem:[%s905_s1 + $0x68] sm:$0xff]  ;;  %v680_v6 = vld [vmem:[%s905_s1 + $0x20] sm:$0xff]  ;;  %v679_v8 = vld [vmem:[%s905_s1 + $0x18] sm:$0xff] }
  0x11   : > { %v688_v7 = vld [vmem:[%s905_s1 + $0x60] sm:$0xff]  ;;  %v687_v9 = vld [vmem:[%s905_s1 + $0x58] sm:$0xff]  ;;  %s913_s7 = smov (!%p246_p7, %s594_s7), 3  ;;  %v678_v10 = vld [vmem:[%s905_s1 + $0x10] sm:$0xff] }
  0x12   : > { %v686_v11 = vld [vmem:[%s905_s1 + $0x50] sm:$0xff]  ;;  %s673_s23 = sshll.u32 %s913_s7, 3  ;;  %v677_v12 = vld [vmem:[%s905_s1 + $0x8] sm:$0xff]  ;;  %v676_v14 = vld [vmem:[%s905_s1] sm:$0xff]  ;;  %s598_s9 = sshll.u32 %s913_s7, 2 }
  0x13   : > { %423 = vmatpush.bf16.msra.mxu0 %v682_v2  ;;  %v685_v13 = vld [vmem:[%s905_s1 + $0x48] sm:$0xff]  ;;  %s253_s30 = scalar_lea.vmem %s904_s0, %s673_s23  ;;  %v684_v15 = vld [vmem:[%s905_s1 + $0x40] sm:$0xff]  ;;  %s272_s15 = scalar_lea.vmem %s907_s3, %s598_s9 }
  0x14   : > { %437 = vmatpush.bf16.msra.mxu1 %v690_v3  ;;  %v601_v16 = vld [vmem:[%s253_s30] sm:$0xf]  ;;  %v675_v17 = vld [vmem:[%s253_s30 + $0x4] sm:$0xf0]  ;;  %v674_v18 = vld [vmem:[%s253_s30 + $0x4] sm:$0xf] }
  0x15   : > { %v603_v19 = vld [vmem:[%s253_s30 + $0x8] sm:$0xf0]  ;;  %v602_v20 = vor.u32 %v675_v17, %v601_v16  ;;  %v732_v25 = vld [vmem:[#allocation3] ss:$0 sm:$0xff] }
  0x16   : > { %v606_v21 = vor.u32 %v674_v18, %v603_v19 }
  0x17   : > { %424 = vmatpush.bf16.msra.mxu0 %v681_v4 }
  0x18   : > { %438 = vmatpush.bf16.msra.mxu1 %v689_v5 }
  0x1b   : > { %425 = vmatpush.bf16.msra.mxu0 %v680_v6 }
  0x1c   : > { %439 = vmatpush.bf16.msra.mxu1 %v688_v7 }
  0x1f   : > { %426 = vmatpush.bf16.msra.mxu0 %v679_v8 }
  0x20   : > { %440 = vmatpush.bf16.msra.mxu1 %v687_v9 }
  0x23   : > { %427 = vmatpush.bf16.msra.mxu0 %v678_v10 }
  0x24   : > { %441 = vmatpush.bf16.msra.mxu1 %v686_v11 }
  0x27   : > { %428 = vmatpush.bf16.msra.mxu0 %v677_v12 }
  0x28   : > { %442 = vmatpush.bf16.msra.mxu1 %v685_v13 }
  0x2b   : > { %429 = vmatpush.bf16.msra.mxu0 %v676_v14 }
  0x2c   : > { %443 = vmatpush.bf16.msra.mxu1 %v684_v15 }
  0x2e   : > { %430 = vmatmul.bf16.vlgmr.msra.gmra.mxu0 %v602_v20 }
  0x2f   : > { %444 = vmatmul.bf16.vlgmr.msra.gmra.mxu1 %v606_v21 }
  0xab   : > { %v431_v22 = vpop.f32.mrf.mxu0 }
  0xac   : > { %v445_v23 = vpop.f32.mrf.mxu1 }
  0xad   : > { %v446_v24 = vadd.f32 %v445_v23, %v431_v22 }
  0xaf   : > { %v463_v28 = vadd.f32 %v732_v25, %v446_v24 }
  0xb1   : > { %v465_v31 = vmax.f32 %v463_v28, 0.0 }
  0xb3   : > { %v433_v26 = vpop.f32.mrf.mxu0 }
  0xb4   : > { %v447_v27 = vpop.f32.mrf.mxu1 }
  0xb5   : > { %v448_v29 = vadd.f32 %v447_v27, %v433_v26 }
  0xb7   : > { %v464_v30 = vadd.f32 %v732_v25, %v448_v29 }
  0xb9   : > { %v466_v32 = vmax.f32 %v464_v30, 0.0 }
  0xbb   : > { %v695_v33 = vpack.c.bf16 %v466_v32, %v465_v31 }
  0xbd   : > { %696 = vst [vmem:[%s272_s15] sm:$0xff] %v695_v33  }
  0xbe PF: > { %s14_s14 = sadd.s32 1, %s789_s14   ;;  %s908_s12 = smov %s785_s13 }
  0xbf   : > { %p11_p8 = scmp.ge.s32.totalorder %s14_s14, 4   ;;  %s909_s13 = smov %s911_s16 }
  0xc1   :  { %13 = sbr.rel (!%p11_p8) target bundleno = 2 (0x2), region = 79 }
  0xc6   :  { %499 = vsyncpa [#allocation4], 1 }
  0xc7   :  { %501 = vsyncpa [#allocation4 + $0x1], 1 }

// kernel: _lambda_.173
= control target key start
LH: loop header
LB: loop body
LE: loop exit
PB: predicated region body
PF: predicated region fallthrough
CT: control target
= control target key end

     0   :  { %9 = vsyncpa [#allocation4], 0  ;;  %s1010_s0 = inlined_call_operand.vmem [shape: bf16[32,128], index: 0, kind: input, shape index: {}]   ;;  %s1011_s1 = inlined_call_operand.hbm [shape: bf16[128,256], index: 1, kind: input, shape index: {}]   ;;  %s1012_s2 = inlined_call_operand.hbm [shape: f32[1,256], index: 2, kind: input, shape index: {}]   ;;  %s1013_s3 = inlined_call_operand.vmem [shape: bf16[32,256], index: 3, kind: input, shape index: {}]   ;;  %s1014_s4 = inlined_call_operand.vmem [shape: bf16[32,256], index: 4, kind: output, shape index: {}]  }
   0x1   :  { %10 = vsyncpa [#allocation6], 0  ;;  %s938_s15 = smov 0   ;;  %s940_s16 = smov 0  }
   0x2   :  { %s942_s17 = smov 0  }
   0x3 LB: > { %s664_s18 = sadd.s32 4294967295, %s907_s17   ;;  %s35_s19 = sadd.s32 1, %s903_s16  ;;  %s907_s17 = sphi %s942_s17, %s16_s17   ;;  %s903_s16 = sphi %s940_s16, %s1018_s16   ;;  %s899_s15 = sphi %s938_s15, %s1017_s15  }
   0x4   : > { %p37_p0 = scmp.ge.s32.totalorder %s35_s19, 2  ;;  %p666_p1 = scmp.ge.s32.totalorder %s907_s17, 1 }
   0x5   : > { %p178_p2 = scmp.lt.s32.totalorder %s907_s17, 3  ;;  %p963_p4 = scmp.eq.s32.totalorder %s664_s18, 0 }
   0x6   : > { %s1020_s19 = smov (%p37_p0, %s35_s19), 0  ;;  %s195_s24 = sshll.u32 %s1011_s1, 4  ;;  %s196_s24 = int_to_ptr.hbm [resolvable:$true] %s195_s24 }
   0x7   : > { %p959_p3 = pnand %p666_p1, %p178_p2  ;;  %s909_s25 = smov [#allocation3]  }
   0x8   : > { %s197_s26 = sshll.u32 %s909_s25, 4  ;;  %s212_s29 = sshll.u32 %s1012_s2, 4  ;;  %s198_s26 = int_to_ptr.vmem [resolvable:$true] %s197_s26  ;;  %s213_s29 = int_to_ptr.hbm [resolvable:$true] %s212_s29 }
   0x9   : > { %p778_p5 = pneg %p959_p3  ;;  %s910_s30 = smov 128  }
   0xa   : > { %s911_s5 = smov 8   ;;  %s912_s6 = smov [#allocation5]  }
   0xb   : > { %p779_p6 = pnand %p963_p4, %p778_p5  ;;  %s214_s7 = sshll.u32 %s912_s6, 4  ;;  %s215_s7 = int_to_ptr.vmem [resolvable:$true] %s214_s7 }
   0xc   : > { %254 = sbr.rel (%p959_p3) target bundleno = 198 (0xc6), region = 36 }
   0xd   : > { %781 = dma.hbm_to_vmem [thread:$0]  (!%p779_p6), %s196_s24, 2048, %s198_s26, [#allocation4], %s910_s30, %s910_s30, %s911_s5  }
   0xe   : > { %784 = dma.hbm_to_vmem [thread:$0]  (!%p779_p6), %s213_s29, 32, %s215_s7, [#allocation6]  }
  0x11   : > { %890 = dma.done.wait (%p963_p4), [#allocation4], 2048  }
  0x12   : > { %892 = vsyncadd (%p963_p4), [#allocation4], 4294965248 }
  0x13   : > { %894 = dma.done.wait (%p963_p4), [#allocation6], 32  }
  0x14   : > { %896 = vsyncadd (%p963_p4), [#allocation6], 4294967264  ;;  %v743_v0 = vld [vmem:[#allocation3 + $0x70] sm:$0xf]  ;;  %v769_v1 = vld [vmem:[#allocation3 + $0x74] sm:$0xf0] }
  0x15   : > { %v768_v2 = vld [vmem:[#allocation3 + $0x74] sm:$0xf]  ;;  %v744_v3 = vor.u32 %v769_v1, %v743_v0  ;;  %v745_v4 = vld [vmem:[#allocation3 + $0x78] sm:$0xf0]  ;;  %v735_v5 = vld [vmem:[#allocation3 + $0x60] sm:$0xf] }
  0x16   : > { %v767_v6 = vld [vmem:[#allocation3 + $0x64] sm:$0xf0]  ;;  %v748_v7 = vor.u32 %v768_v2, %v745_v4  ;;  %v766_v8 = vld [vmem:[#allocation3 + $0x64] sm:$0xf]  ;;  %v737_v9 = vld [vmem:[#allocation3 + $0x68] sm:$0xf0] }
  0x17   : > { %456 = vmatpush.bf16.msra.mxu0 %v744_v3  ;;  %v736_v10 = vor.u32 %v767_v6, %v735_v5  ;;  %v740_v11 = vor.u32 %v766_v8, %v737_v9  ;;  %v727_v12 = vld [vmem:[#allocation3 + $0x50] sm:$0xf]  ;;  %v765_v13 = vld [vmem:[#allocation3 + $0x54] sm:$0xf0]  ;;  %v764_v14 = vld [vmem:[#allocation3 + $0x54] sm:$0xf] }
  0x18   : > { %470 = vmatpush.bf16.msra.mxu1 %v748_v7  ;;  %v729_v15 = vld [vmem:[#allocation3 + $0x58] sm:$0xf0]  ;;  %v728_v16 = vor.u32 %v765_v13, %v727_v12  ;;  %v719_v18 = vld [vmem:[#allocation3 + $0x40] sm:$0xf]  ;;  %v763_v19 = vld [vmem:[#allocation3 + $0x44] sm:$0xf0] }
  0x19   : > { %v732_v17 = vor.u32 %v764_v14, %v729_v15  ;;  %v762_v20 = vld [vmem:[#allocation3 + $0x44] sm:$0xf]  ;;  %v721_v21 = vld [vmem:[#allocation3 + $0x48] sm:$0xf0]  ;;  %v720_v22 = vor.u32 %v763_v19, %v719_v18  ;;  %v711_v24 = vld [vmem:[#allocation3 + $0x30] sm:$0xf] }
  0x1a   : > { %v724_v23 = vor.u32 %v762_v20, %v721_v21  ;;  %v761_v25 = vld [vmem:[#allocation3 + $0x34] sm:$0xf0]  ;;  %v760_v26 = vld [vmem:[#allocation3 + $0x34] sm:$0xf]  ;;  %v713_v27 = vld [vmem:[#allocation3 + $0x38] sm:$0xf0] }
  0x1b   : > { %457 = vmatpush.bf16.msra.mxu0 %v736_v10  ;;  %s673_s8 = sshll.u32 %s899_s15, 1  ;;  %v712_v28 = vor.u32 %v761_v25, %v711_v24  ;;  %v716_v29 = vor.u32 %v760_v26, %v713_v27  ;;  %v703_v30 = vld [vmem:[#allocation3 + $0x20] sm:$0xf]  ;;  %v759_v31 = vld [vmem:[#allocation3 + $0x24] sm:$0xf0] }
  0x1c   : > { %471 = vmatpush.bf16.msra.mxu1 %v740_v11  ;;  %p305_p7 = scmp.lt.s32.totalorder %s673_s8, 3  ;;  %v758_v32 = vld [vmem:[#allocation3 + $0x24] sm:$0xf]  ;;  %v705_v33 = vld [vmem:[#allocation3 + $0x28] sm:$0xf0]  ;;  %v704_v34 = vor.u32 %v759_v31, %v703_v30 }
  0x1d   : > { %v708_v35 = vor.u32 %v758_v32, %v705_v33  ;;  %v695_v36 = vld [vmem:[#allocation3 + $0x10] sm:$0xf]  ;;  %v757_v37 = vld [vmem:[#allocation3 + $0x14] sm:$0xf0]  ;;  %v756_v38 = vld [vmem:[#allocation3 + $0x14] sm:$0xf] }
  0x1e   : > { %s1022_s8 = smov (!%p305_p7, %s673_s8), 3  ;;  %v697_v39 = vld [vmem:[#allocation3 + $0x18] sm:$0xf0]  ;;  %v696_v40 = vor.u32 %v757_v37, %v695_v36  ;;  %v687_v42 = vld [vmem:[#allocation3] sm:$0xf] }
  0x1f   : > { %458 = vmatpush.bf16.msra.mxu0 %v728_v16  ;;  %v700_v41 = vor.u32 %v756_v38, %v697_v39  ;;  %v755_v43 = vld [vmem:[#allocation3 + $0x4] sm:$0xf0]  ;;  %s674_s9 = sshll.u32 %s1022_s8, 2  ;;  %v754_v44 = vld [vmem:[#allocation3 + $0x4] sm:$0xf]  ;;  %s751_s13 = sshll.u32 %s1022_s8, 3 }
  0x20   : > { %472 = vmatpush.bf16.msra.mxu1 %v732_v17  ;;  %v689_v45 = vld [vmem:[#allocation3 + $0x8] sm:$0xf0]  ;;  %v688_v46 = vor.u32 %v755_v43, %v687_v42  ;;  %s311_s12 = scalar_lea.vmem %s1010_s0, %s674_s9  ;;  %s325_s18 = scalar_lea.vmem %s1013_s3, %s751_s13  ;;  %v499_v49 = vld [vmem:[#allocation5] sm:$0x3] }
  0x21   : > { %v692_v47 = vor.u32 %v754_v44, %v689_v45  ;;  %v753_v48 = vld [vmem:[%s311_s12] sm:$0xff]  ;;  %v501_v51 = vperm.slane %v499_v49, 0  ;;  %v502_v52 = vperm.slane %v499_v49, 1  ;;  %v510_v61 = vld [vmem:[%s325_s18 + $0x8] sm:$0xff]  ;;  %s337_s22 = scalar_lea.vmem %s1014_s4, %s751_s13 }
  0x22   : > { %v509_v50 = vld [vmem:[%s325_s18] sm:$0xff]  ;;  %v513_v0 = vunpack.c.l.bf16 %v510_v61  ;;  %v514_v3 = vunpack.c.h.bf16 %v510_v61 }
  0x23   : > { %459 = vmatpush.bf16.msra.mxu0 %v720_v22  ;;  %v511_v53 = vunpack.c.l.bf16 %v509_v50  ;;  %v512_v55 = vunpack.c.h.bf16 %v509_v50 }
  0x24   : > { %473 = vmatpush.bf16.msra.mxu1 %v724_v23 }
  0x27   : > { %460 = vmatpush.bf16.msra.mxu0 %v712_v28 }
  0x28   : > { %474 = vmatpush.bf16.msra.mxu1 %v716_v29 }
  0x2b   : > { %461 = vmatpush.bf16.msra.mxu0 %v704_v34 }
  0x2c   : > { %475 = vmatpush.bf16.msra.mxu1 %v708_v35 }
  0x2f   : > { %462 = vmatpush.bf16.msra.mxu0 %v696_v40 }
  0x30   : > { %476 = vmatpush.bf16.msra.mxu1 %v700_v41 }
  0x33   : > { %463 = vmatpush.bf16.msra.mxu0 %v688_v46 }
  0x34   : > { %477 = vmatpush.bf16.msra.mxu1 %v692_v47 }
  0x36   : > { %464 = vmatmul.bf16.vlgmr.msra.gmra.mxu0 %v753_v48 }
  0x37   : > { %478 = vmatmul.bf16.vlgmr.msra.gmra.mxu1 %v753_v48 }
  0xb3   : > { %v465_v54 = vpop.f32.mrf.mxu0 }
  0xb4   : > { %v505_v56 = vadd.f32 %v501_v51, %v465_v54  ;;  %v479_v57 = vpop.f32.mrf.mxu1 }
  0xb5   : > { %v506_v58 = vadd.f32 %v502_v52, %v479_v57 }
  0xb6   : > { %v515_v59 = vadd.f32 %v511_v53, %v505_v56 }
  0xb7   : > { %v516_v60 = vadd.f32 %v512_v55, %v506_v58 }
  0xb8   : > { %v519_v62 = vmax.f32 %v515_v59, 0.0 }
  0xb9   : > { %v520_v63 = vmax.f32 %v516_v60, 0.0 }
  0xbb   : > { %v523_v1 = vpack.c.bf16 %v520_v63, %v519_v62  ;;  %v467_v2 = vpop.f32.mrf.mxu0 }
  0xbc   : > { %v507_v4 = vadd.f32 %v501_v51, %v467_v2  ;;  %v481_v5 = vpop.f32.mrf.mxu1 }
  0xbd   : > { %525 = vst [vmem:[%s337_s22] sm:$0xff] %v523_v1  ;;  %v508_v6 = vadd.f32 %v502_v52, %v481_v5 }
  0xbe   : > { %v517_v7 = vadd.f32 %v513_v0, %v507_v4 }
  0xbf   : > { %v518_v8 = vadd.f32 %v514_v3, %v508_v6 }
  0xc0   : > { %v521_v9 = vmax.f32 %v517_v7, 0.0 }
  0xc1   : > { %v522_v10 = vmax.f32 %v518_v8, 0.0 }
  0xc3   : > { %v524_v11 = vpack.c.bf16 %v522_v10, %v521_v9 }
  0xc5   : > { %526 = vst [vmem:[%s337_s22 + $0x8] sm:$0xff] %v524_v11 }
  0xc6 PF: > { %s16_s17 = sadd.s32 1, %s907_s17   ;;  %s1017_s15 = smov %s903_s16 }
  0xc7   : > { %p13_p8 = scmp.ge.s32.totalorder %s16_s17, 4   ;;  %s1018_s16 = smov %s1020_s19 }
  0xc9   :  { %15 = sbr.rel (!%p13_p8) target bundleno = 3 (0x3), region = 88 }
  0xce   :  { %560 = vsyncpa [#allocation4], 1 }
  0xcf   :  { %562 = vsyncpa [#allocation4 + $0x1], 1 }
  0xd0   :  { %563 = vsyncpa [#allocation6], 1 }

// kernel: _lambda_.137
= control target key start
LH: loop header
LB: loop body
LE: loop exit
PB: predicated region body
PF: predicated region fallthrough
CT: control target
= control target key end

     0   :  { %9 = vsyncpa [#allocation4], 0  ;;  %s903_s15 = smov 0   ;;  %s905_s16 = smov 0   ;;  %s1046_s0 = inlined_call_operand.vmem [shape: bf16[32,128], index: 0, kind: input, shape index: {}]   ;;  %s1047_s1 = inlined_call_operand.vmem [shape: bf16[128,256], index: 1, kind: input, shape index: {}]   ;;  %s1048_s2 = inlined_call_operand.hbm [shape: f32[1,256], index: 2, kind: input, shape index: {}]   ;;  %s1049_s3 = inlined_call_operand.vmem [shape: bf16[32,256], index: 3, kind: input, shape index: {}]   ;;  %s1050_s4 = inlined_call_operand.vmem [shape: bf16[32,256], index: 4, kind: output, shape index: {}]  }
   0x1   :  { %s907_s17 = smov 0  }
   0x2 LB: > { %s679_s18 = sadd.s32 4294967295, %s875_s17   ;;  %s34_s19 = sadd.s32 1, %s871_s16  ;;  %s875_s17 = sphi %s907_s17, %s15_s17   ;;  %s871_s16 = sphi %s905_s16, %s1052_s16   ;;  %s867_s15 = sphi %s903_s15, %s1051_s15  }
   0x3   : > { %p36_p0 = scmp.ge.s32.totalorder %s34_s19, 2  ;;  %p681_p1 = scmp.ge.s32.totalorder %s875_s17, 1 }
   0x4   : > { %p177_p2 = scmp.lt.s32.totalorder %s875_s17, 3  ;;  %p792_p4 = scmp.eq.s32.totalorder %s679_s18, 0 }
   0x5   : > { %s1054_s19 = smov (%p36_p0, %s34_s19), 0  ;;  %s206_s22 = sshll.u32 %s1048_s2, 4  ;;  %s207_s22 = int_to_ptr.hbm [resolvable:$true] %s206_s22 }
   0x6   : > { %p178_p3 = pnand %p681_p1, %p177_p2  ;;  %s877_s23 = smov [#allocation3]  }
   0x7   : > { %s208_s24 = sshll.u32 %s877_s23, 4  ;;  %s209_s24 = int_to_ptr.vmem [resolvable:$true] %s208_s24 }
   0x8   : > { %p788_p5 = pneg %p178_p3  ;;  %248 = sbr.rel (%p178_p3) target bundleno = 192 (0xc0), region = 36 }
   0xa   : > { %p789_p6 = pnand %p792_p4, %p788_p5 }
   0xc   : > { %791 = dma.hbm_to_vmem [thread:$0]  (!%p789_p6), %s207_s22, 32, %s209_s24, [#allocation4]  }
   0xd   : > { %862 = dma.done.wait (%p792_p4), [#allocation4], 32  }
   0xe   : > { %864 = vsyncadd (%p792_p4), [#allocation4], 4294967264  ;;  %v757_v0 = vld [vmem:[%s1047_s1 + $0x70] sm:$0xf]  ;;  %v783_v1 = vld [vmem:[%s1047_s1 + $0x74] sm:$0xf0] }
   0xf   : > { %v782_v2 = vld [vmem:[%s1047_s1 + $0x74] sm:$0xf]  ;;  %v758_v3 = vor.u32 %v783_v1, %v757_v0  ;;  %v759_v4 = vld [vmem:[%s1047_s1 + $0x78] sm:$0xf0]  ;;  %v749_v5 = vld [vmem:[%s1047_s1 + $0x60] sm:$0xf] }
  0x10   : > { %v781_v6 = vld [vmem:[%s1047_s1 + $0x64] sm:$0xf0]  ;;  %v762_v7 = vor.u32 %v782_v2, %v759_v4  ;;  %v780_v8 = vld [vmem:[%s1047_s1 + $0x64] sm:$0xf]  ;;  %v751_v9 = vld [vmem:[%s1047_s1 + $0x68] sm:$0xf0] }
  0x11   : > { %465 = vmatpush.bf16.msra.mxu0 %v758_v3  ;;  %v750_v10 = vor.u32 %v781_v6, %v749_v5  ;;  %v754_v11 = vor.u32 %v780_v8, %v751_v9  ;;  %v741_v12 = vld [vmem:[%s1047_s1 + $0x50] sm:$0xf]  ;;  %v779_v13 = vld [vmem:[%s1047_s1 + $0x54] sm:$0xf0]  ;;  %v778_v14 = vld [vmem:[%s1047_s1 + $0x54] sm:$0xf] }
  0x12   : > { %479 = vmatpush.bf16.msra.mxu1 %v762_v7  ;;  %v743_v15 = vld [vmem:[%s1047_s1 + $0x58] sm:$0xf0]  ;;  %v742_v16 = vor.u32 %v779_v13, %v741_v12  ;;  %v733_v18 = vld [vmem:[%s1047_s1 + $0x40] sm:$0xf]  ;;  %v777_v19 = vld [vmem:[%s1047_s1 + $0x44] sm:$0xf0] }
  0x13   : > { %v746_v17 = vor.u32 %v778_v14, %v743_v15  ;;  %v776_v20 = vld [vmem:[%s1047_s1 + $0x44] sm:$0xf]  ;;  %v735_v21 = vld [vmem:[%s1047_s1 + $0x48] sm:$0xf0]  ;;  %v734_v22 = vor.u32 %v777_v19, %v733_v18  ;;  %v725_v24 = vld [vmem:[%s1047_s1 + $0x30] sm:$0xf] }
  0x14   : > { %v738_v23 = vor.u32 %v776_v20, %v735_v21  ;;  %v775_v25 = vld [vmem:[%s1047_s1 + $0x34] sm:$0xf0]  ;;  %v774_v26 = vld [vmem:[%s1047_s1 + $0x34] sm:$0xf]  ;;  %v727_v27 = vld [vmem:[%s1047_s1 + $0x38] sm:$0xf0] }
  0x15   : > { %466 = vmatpush.bf16.msra.mxu0 %v750_v10  ;;  %s687_s21 = sshll.u32 %s867_s15, 1  ;;  %v726_v28 = vor.u32 %v775_v25, %v725_v24  ;;  %v730_v29 = vor.u32 %v774_v26, %v727_v27  ;;  %v717_v30 = vld [vmem:[%s1047_s1 + $0x20] sm:$0xf]  ;;  %v773_v31 = vld [vmem:[%s1047_s1 + $0x24] sm:$0xf0] }
  0x16   : > { %480 = vmatpush.bf16.msra.mxu1 %v754_v11  ;;  %p304_p7 = scmp.lt.s32.totalorder %s687_s21, 3  ;;  %v772_v32 = vld [vmem:[%s1047_s1 + $0x24] sm:$0xf]  ;;  %v719_v33 = vld [vmem:[%s1047_s1 + $0x28] sm:$0xf0]  ;;  %v718_v34 = vor.u32 %v773_v31, %v717_v30 }
  0x17   : > { %v722_v35 = vor.u32 %v772_v32, %v719_v33  ;;  %v709_v36 = vld [vmem:[%s1047_s1 + $0x10] sm:$0xf]  ;;  %v771_v37 = vld [vmem:[%s1047_s1 + $0x14] sm:$0xf0]  ;;  %v770_v38 = vld [vmem:[%s1047_s1 + $0x14] sm:$0xf] }
  0x18   : > { %s1056_s21 = smov (!%p304_p7, %s687_s21), 3  ;;  %v711_v39 = vld [vmem:[%s1047_s1 + $0x18] sm:$0xf0]  ;;  %v710_v40 = vor.u32 %v771_v37, %v709_v36  ;;  %v701_v42 = vld [vmem:[%s1047_s1] sm:$0xf] }
  0x19   : > { %467 = vmatpush.bf16.msra.mxu0 %v742_v16  ;;  %v714_v41 = vor.u32 %v770_v38, %v711_v39  ;;  %v769_v43 = vld [vmem:[%s1047_s1 + $0x4] sm:$0xf0]  ;;  %s688_s18 = sshll.u32 %s1056_s21, 2  ;;  %v768_v44 = vld [vmem:[%s1047_s1 + $0x4] sm:$0xf]  ;;  %s765_s28 = sshll.u32 %s1056_s21, 3 }
  0x1a   : > { %481 = vmatpush.bf16.msra.mxu1 %v746_v17  ;;  %v703_v45 = vld [vmem:[%s1047_s1 + $0x8] sm:$0xf0]  ;;  %v702_v46 = vor.u32 %v769_v43, %v701_v42  ;;  %s310_s27 = scalar_lea.vmem %s1046_s0, %s688_s18  ;;  %s334_s30 = scalar_lea.vmem %s1049_s3, %s765_s28  ;;  %v508_v49 = vld [vmem:[#allocation3] sm:$0x3] }
  0x1b   : > { %v706_v47 = vor.u32 %v768_v44, %v703_v45  ;;  %v767_v48 = vld [vmem:[%s310_s27] sm:$0xff]  ;;  %v510_v51 = vperm.slane %v508_v49, 0  ;;  %v511_v52 = vperm.slane %v508_v49, 1  ;;  %v519_v61 = vld [vmem:[%s334_s30 + $0x8] sm:$0xff]  ;;  %s346_s6 = scalar_lea.vmem %s1050_s4, %s765_s28 }
  0x1c   : > { %v518_v50 = vld [vmem:[%s334_s30] sm:$0xff]  ;;  %v522_v0 = vunpack.c.l.bf16 %v519_v61  ;;  %v523_v3 = vunpack.c.h.bf16 %v519_v61 }
  0x1d   : > { %468 = vmatpush.bf16.msra.mxu0 %v734_v22  ;;  %v520_v53 = vunpack.c.l.bf16 %v518_v50  ;;  %v521_v55 = vunpack.c.h.bf16 %v518_v50 }
  0x1e   : > { %482 = vmatpush.bf16.msra.mxu1 %v738_v23 }
  0x21   : > { %469 = vmatpush.bf16.msra.mxu0 %v726_v28 }
  0x22   : > { %483 = vmatpush.bf16.msra.mxu1 %v730_v29 }
  0x25   : > { %470 = vmatpush.bf16.msra.mxu0 %v718_v34 }
  0x26   : > { %484 = vmatpush.bf16.msra.mxu1 %v722_v35 }
  0x29   : > { %471 = vmatpush.bf16.msra.mxu0 %v710_v40 }
  0x2a   : > { %485 = vmatpush.bf16.msra.mxu1 %v714_v41 }
  0x2d   : > { %472 = vmatpush.bf16.msra.mxu0 %v702_v46 }
  0x2e   : > { %486 = vmatpush.bf16.msra.mxu1 %v706_v47 }
  0x30   : > { %473 = vmatmul.bf16.vlgmr.msra.gmra.mxu0 %v767_v48 }
  0x31   : > { %487 = vmatmul.bf16.vlgmr.msra.gmra.mxu1 %v767_v48 }
  0xad   : > { %v474_v54 = vpop.f32.mrf.mxu0 }
  0xae   : > { %v514_v56 = vadd.f32 %v510_v51, %v474_v54  ;;  %v488_v57 = vpop.f32.mrf.mxu1 }
  0xaf   : > { %v515_v58 = vadd.f32 %v511_v52, %v488_v57 }
  0xb0   : > { %v524_v59 = vadd.f32 %v520_v53, %v514_v56 }
  0xb1   : > { %v525_v60 = vadd.f32 %v521_v55, %v515_v58 }
  0xb2   : > { %v528_v62 = vmax.f32 %v524_v59, 0.0 }
  0xb3   : > { %v529_v63 = vmax.f32 %v525_v60, 0.0 }
  0xb5   : > { %v532_v1 = vpack.c.bf16 %v529_v63, %v528_v62  ;;  %v476_v2 = vpop.f32.mrf.mxu0 }
  0xb6   : > { %v516_v4 = vadd.f32 %v510_v51, %v476_v2  ;;  %v490_v5 = vpop.f32.mrf.mxu1 }
  0xb7   : > { %534 = vst [vmem:[%s346_s6] sm:$0xff] %v532_v1  ;;  %v517_v6 = vadd.f32 %v511_v52, %v490_v5 }
  0xb8   : > { %v526_v7 = vadd.f32 %v522_v0, %v516_v4 }
  0xb9   : > { %v527_v8 = vadd.f32 %v523_v3, %v517_v6 }
  0xba   : > { %v530_v9 = vmax.f32 %v526_v7, 0.0 }
  0xbb   : > { %v531_v10 = vmax.f32 %v527_v8, 0.0 }
  0xbd   : > { %v533_v11 = vpack.c.bf16 %v531_v10, %v530_v9 }
  0xbf   : > { %535 = vst [vmem:[%s346_s6 + $0x8] sm:$0xff] %v533_v11 }
  0xc0 PF: > { %s15_s17 = sadd.s32 1, %s875_s17   ;;  %s1051_s15 = smov %s871_s16 }
  0xc1   : > { %p12_p8 = scmp.ge.s32.totalorder %s15_s17, 4   ;;  %s1052_s16 = smov %s1054_s19 }
  0xc3   :  { %14 = sbr.rel (!%p12_p8) target bundleno = 2 (0x2), region = 86 }
  0xc8   :  { %569 = vsyncpa [#allocation4], 1 }
  0xc9   :  { %571 = vsyncpa [#allocation4 + $0x1], 1 }

// kernel: _lambda_.174
= control target key start
LH: loop header
LB: loop body
LE: loop exit
PB: predicated region body
PF: predicated region fallthrough
CT: control target
= control target key end

     0   :  { %8 = vsyncpa [#allocation4], 0  ;;  %s923_s0 = inlined_call_operand.vmem [shape: bf16[32,256], index: 0, kind: input, shape index: {}]   ;;  %s924_s1 = inlined_call_operand.hbm [shape: bf16[256,128], index: 1, kind: input, shape index: {}]   ;;  %s925_s2 = inlined_call_operand.hbm [shape: f32[1,128], index: 2, kind: input, shape index: {}]   ;;  %s926_s3 = inlined_call_operand.vmem [shape: bf16[32,128], index: 3, kind: output, shape index: {}]  }
   0x1   :  { %9 = vsyncpa [#allocation6], 0  ;;  %s854_s12 = smov 0   ;;  %s856_s13 = smov 0  }
   0x2   :  { %s858_s14 = smov 0  }
   0x3 LB: > { %s578_s15 = sadd.s32 4294967295, %s828_s14   ;;  %s34_s16 = sadd.s32 1, %s824_s13  ;;  %s828_s14 = sphi %s858_s14, %s15_s14   ;;  %s824_s13 = sphi %s856_s13, %s930_s13   ;;  %s820_s12 = sphi %s854_s12, %s929_s12  }
   0x4   : > { %p36_p0 = scmp.ge.s32.totalorder %s34_s16, 2  ;;  %p580_p1 = scmp.ge.s32.totalorder %s828_s14, 1 }
   0x5   : > { %p149_p2 = scmp.lt.s32.totalorder %s828_s14, 3  ;;  %p879_p4 = scmp.eq.s32.totalorder %s578_s15, 0 }
   0x6   : > { %s932_s16 = smov (%p36_p0, %s34_s16), 0  ;;  %s164_s21 = sshll.u32 %s924_s1, 4  ;;  %s165_s21 = int_to_ptr.hbm [resolvable:$true] %s164_s21 }
   0x7   : > { %p875_p3 = pnand %p580_p1, %p149_p2  ;;  %s830_s22 = smov [#allocation3]  }
   0x8   : > { %s166_s23 = sshll.u32 %s830_s22, 4  ;;  %s180_s26 = sshll.u32 %s925_s2, 4  ;;  %s167_s23 = int_to_ptr.vmem [resolvable:$true] %s166_s23  ;;  %s181_s26 = int_to_ptr.hbm [resolvable:$true] %s180_s26 }
   0x9   : > { %p698_p5 = pneg %p875_p3  ;;  %s831_s27 = smov 64  }
   0xa   : > { %s832_s28 = smov 4   ;;  %s833_s29 = smov [#allocation5]  }
   0xb   : > { %p699_p6 = pnand %p879_p4, %p698_p5  ;;  %s182_s30 = sshll.u32 %s833_s29, 4  ;;  %s183_s30 = int_to_ptr.vmem [resolvable:$true] %s182_s30 }
   0xc   : > { %210 = sbr.rel (%p875_p3) target bundleno = 196 (0xc4), region = 32 }
   0xd   : > { %701 = dma.hbm_to_vmem [thread:$0]  (!%p699_p6), %s165_s21, 2048, %s167_s23, [#allocation4], %s831_s27, %s831_s27, %s832_s28  }
   0xe   : > { %704 = dma.hbm_to_vmem [thread:$0]  (!%p699_p6), %s181_s26, 16, %s183_s30, [#allocation6]  }
  0x11   : > { %811 = dma.done.wait (%p879_p4), [#allocation4], 2048  }
  0x12   : > { %813 = vsyncadd (%p879_p4), [#allocation4], 4294965248 }
  0x13   : > { %815 = dma.done.wait (%p879_p4), [#allocation6], 16  }
  0x14   : > { %817 = vsyncadd (%p879_p4), [#allocation6], 4294967280  ;;  %v676_v0 = vld [vmem:[#allocation3 + $0x38] sm:$0xff]  ;;  %v675_v2 = vld [vmem:[#allocation3 + $0x30] sm:$0xff]  ;;  %s587_s4 = sshll.u32 %s820_s12, 1 }
  0x15   : > { %v684_v1 = vld [vmem:[#allocation3 + $0x78] sm:$0xff]  ;;  %418 = vmatpush.bf16.msra.mxu0 %v676_v0  ;;  %v683_v3 = vld [vmem:[#allocation3 + $0x70] sm:$0xff]  ;;  %v674_v4 = vld [vmem:[#allocation3 + $0x28] sm:$0xff]  ;;  %p250_p7 = scmp.lt.s32.totalorder %s587_s4, 3 }
  0x16   : > { %432 = vmatpush.bf16.msra.mxu1 %v684_v1  ;;  %v682_v5 = vld [vmem:[#allocation3 + $0x68] sm:$0xff]  ;;  %v673_v6 = vld [vmem:[#allocation3 + $0x20] sm:$0xff]  ;;  %v672_v8 = vld [vmem:[#allocation3 + $0x18] sm:$0xff] }
  0x17   : > { %v681_v7 = vld [vmem:[#allocation3 + $0x60] sm:$0xff]  ;;  %v680_v9 = vld [vmem:[#allocation3 + $0x58] sm:$0xff]  ;;  %s934_s4 = smov (!%p250_p7, %s587_s4), 3  ;;  %v671_v10 = vld [vmem:[#allocation3 + $0x10] sm:$0xff] }
  0x18   : > { %v679_v11 = vld [vmem:[#allocation3 + $0x50] sm:$0xff]  ;;  %s666_s5 = sshll.u32 %s934_s4, 3  ;;  %v670_v12 = vld [vmem:[#allocation3 + $0x8] sm:$0xff]  ;;  %v669_v14 = vld [vmem:[#allocation3] sm:$0xff]  ;;  %s591_s9 = sshll.u32 %s934_s4, 2 }
  0x19   : > { %419 = vmatpush.bf16.msra.mxu0 %v675_v2  ;;  %v678_v13 = vld [vmem:[#allocation3 + $0x48] sm:$0xff]  ;;  %s257_s8 = scalar_lea.vmem %s923_s0, %s666_s5  ;;  %v677_v15 = vld [vmem:[#allocation3 + $0x40] sm:$0xff]  ;;  %s268_s12 = scalar_lea.vmem %s926_s3, %s591_s9 }
  0x1a   : > { %433 = vmatpush.bf16.msra.mxu1 %v683_v3  ;;  %v594_v16 = vld [vmem:[%s257_s8] sm:$0xf]  ;;  %v668_v17 = vld [vmem:[%s257_s8 + $0x4] sm:$0xf0]  ;;  %v667_v18 = vld [vmem:[%s257_s8 + $0x4] sm:$0xf] }
  0x1b   : > { %v596_v19 = vld [vmem:[%s257_s8 + $0x8] sm:$0xf0]  ;;  %v595_v20 = vor.u32 %v668_v17, %v594_v16  ;;  %v737_v25 = vld [vmem:[#allocation5] ss:$0 sm:$0xff] }
  0x1c   : > { %v599_v21 = vor.u32 %v667_v18, %v596_v19 }
  0x1d   : > { %420 = vmatpush.bf16.msra.mxu0 %v674_v4 }
  0x1e   : > { %434 = vmatpush.bf16.msra.mxu1 %v682_v5 }
  0x21   : > { %421 = vmatpush.bf16.msra.mxu0 %v673_v6 }
  0x22   : > { %435 = vmatpush.bf16.msra.mxu1 %v681_v7 }
  0x25   : > { %422 = vmatpush.bf16.msra.mxu0 %v672_v8 }
  0x26   : > { %436 = vmatpush.bf16.msra.mxu1 %v680_v9 }
  0x29   : > { %423 = vmatpush.bf16.msra.mxu0 %v671_v10 }
  0x2a   : > { %437 = vmatpush.bf16.msra.mxu1 %v679_v11 }
  0x2d   : > { %424 = vmatpush.bf16.msra.mxu0 %v670_v12 }
  0x2e   : > { %438 = vmatpush.bf16.msra.mxu1 %v678_v13 }
  0x31   : > { %425 = vmatpush.bf16.msra.mxu0 %v669_v14 }
  0x32   : > { %439 = vmatpush.bf16.msra.mxu1 %v677_v15 }
  0x34   : > { %426 = vmatmul.bf16.vlgmr.msra.gmra.mxu0 %v595_v20 }
  0x35   : > { %440 = vmatmul.bf16.vlgmr.msra.gmra.mxu1 %v599_v21 }
  0xb1   : > { %v427_v22 = vpop.f32.mrf.mxu0 }
  0xb2   : > { %v441_v23 = vpop.f32.mrf.mxu1 }
  0xb3   : > { %v442_v24 = vadd.f32 %v441_v23, %v427_v22 }
  0xb5   : > { %v459_v28 = vadd.f32 %v737_v25, %v442_v24 }
  0xb7   : > { %v461_v31 = vmax.f32 %v459_v28, 0.0 }
  0xb9   : > { %v429_v26 = vpop.f32.mrf.mxu0 }
  0xba   : > { %v443_v27 = vpop.f32.mrf.mxu1 }
  0xbb   : > { %v444_v29 = vadd.f32 %v443_v27, %v429_v26 }
  0xbd   : > { %v460_v30 = vadd.f32 %v737_v25, %v444_v29 }
  0xbf   : > { %v462_v32 = vmax.f32 %v460_v30, 0.0 }
  0xc1   : > { %v688_v33 = vpack.c.bf16 %v462_v32, %v461_v31 }
  0xc3   : > { %689 = vst [vmem:[%s268_s12] sm:$0xff] %v688_v33  }
  0xc4 PF: > { %s15_s14 = sadd.s32 1, %s828_s14   ;;  %s929_s12 = smov %s824_s13 }
  0xc5   : > { %p12_p8 = scmp.ge.s32.totalorder %s15_s14, 4   ;;  %s930_s13 = smov %s932_s16 }
  0xc7   :  { %14 = sbr.rel (!%p12_p8) target bundleno = 3 (0x3), region = 81 }
  0xcc   :  { %495 = vsyncpa [#allocation4], 1 }
  0xcd   :  { %497 = vsyncpa [#allocation4 + $0x1], 1 }
  0xce   :  { %498 = vsyncpa [#allocation6], 1 }

// kernel: _lambda_.133
= control target key start
LH: loop header
LB: loop body
LE: loop exit
PB: predicated region body
PF: predicated region fallthrough
CT: control target
= control target key end

     0   :  { %s1275_s0 = inlined_call_operand.hbm [shape: bf16[32,1152], index: 0, kind: input, shape index: {}]   ;;  %s1276_s1 = inlined_call_operand.vmem [shape: bf16[1152,128], index: 1, kind: input, shape index: {}]   ;;  %s1277_s2 = inlined_call_operand.hbm [shape: f32[1,128], index: 2, kind: input, shape index: {}]   ;;  %s1278_s3 = inlined_call_operand.vmem [shape: bf16[32,128], index: 3, kind: output, shape index: {}]  }
   0x1   :  { %1282 = sst [smem:[#allocation12_spill]] %s1276_s1 }
   0x2   :  { %1283 = sst [smem:[#allocation13_spill]] %s1277_s2 }
   0x3   :  { %8 = vsyncpa [#allocation4], 0 }
   0x4   :  { %10 = vsyncpa [#allocation4 + $0x1], 0 }
   0x5   :  { %11 = vsyncpa [#allocation6], 0  ;;  %s1091_s12 = smov 0   ;;  %s1093_s13 = smov 0  }
   0x6   :  { %s1095_s14 = smov 0   ;;  %s1097_s15 = smov 0  }
   0x7   :  { %s1099_s16 = smov 0   ;;  %s1101_s17 = smov 0  }
   0x8   :  { %s1103_s18 = smov 0   ;;  %s1105_s19 = smov 0  }
   0x9 LB: > { %1284 = sst [smem:[#allocation9_spill]] %s1056_s17  ;;  %s687_s20 = sadd.s32 4294967295, %s1064_s19   ;;  %s1064_s19 = sphi %s1105_s19, %s17_s19   ;;  %s1060_s18 = sphi %s1103_s18, %s1303_s18   ;;  %s1056_s17 = sphi %s1101_s17, %s1302_s17   ;;  %s1052_s16 = sphi %s1099_s16, %s1301_s16   ;;  %s1048_s15 = sphi %s1097_s15, %s1296_s15   ;;  %s1044_s14 = sphi %s1095_s14, %s1300_s14   ;;  %s1040_s13 = sphi %s1093_s13, %s1299_s13   ;;  %s1036_s12 = sphi %s1091_s12, %s1298_s12  }
   0xa   : > { %1285 = sst [smem:[#allocation10_spill]] %s1064_s19  ;;  %p52_p0 = scmp.ne.s32.totalorder %s1044_s14, %s1040_s13 }
   0xb   : > { %p53_p1 = scmp.eq.s32.totalorder %s1064_s19, 0  ;;  %p58_p2 = scmp.ne.s32.totalorder %s1040_s13, %s1036_s12 }
   0xc   : > { %p1135_p3 = scmp.eq.s32.totalorder %s687_s20, 0  ;;  %p689_p5 = scmp.ge.s32.totalorder %s1064_s19, 1 }
   0xd   : > { %p1139_p4 = por %p53_p1, %p52_p0  ;;  %p151_p7 = scmp.lt.s32.totalorder %s1064_s19, 7 }
   0xe   : > { %p1146_p6 = por %p1135_p3, %p58_p2  ;;  %s1289_s2 = sld [smem:[#allocation13_spill]] }
   0xf   : > { %p1154_p8 = pnand %p689_p5, %p151_p7  ;;  %s1066_s29 = smov [#allocation5]  }
  0x10   : > { %s166_s30 = sshll.u32 %s1066_s29, 4  ;;  %p862_p10 = scmp.lt.s32.totalorder %s1064_s19, 6  ;;  %s167_s30 = int_to_ptr.vmem [resolvable:$true] %s166_s30 }
  0x11   : > { %p853_p9 = pneg %p1154_p8  ;;  %s29_s5 = sadd.s32 1, %s1056_s17 }
  0x12   : > { %p1165_p12 = pnand %p862_p10, %p1139_p4  ;;  %s36_s6 = sadd.s32 1, %s1060_s18 }
  0x13   : > { %p854_p11 = pnand %p853_p9, %p1135_p3  ;;  %p30_p13 = scmp.ge.s32.totalorder %s29_s5, 3 }
  0x14   : > { %s164_s27 = sshll.u32 %s1289_s2, 4  ;;  %s177_s7 = sand.u32 1, %s1044_s14   ;;  %s165_s27 = int_to_ptr.hbm [resolvable:$true] %s164_s27 }
  0x15   : > { %856 = dma.hbm_to_vmem [thread:$0]  (!%p854_p11), %s165_s27, 16, %s167_s30, [#allocation6]  }
  0x16   : > { %s844_s8 = smul.u32 24, %s177_s7  ;;  %s1305_s5 = smov (%p30_p13, %s29_s5), 0 }
  0x17   : > { %1292 = sst [smem:[#allocation11_spill]] %s1305_s5  ;;  %s1307_s6 = smov (!%p30_p13, %s36_s6), %s1060_s18 }
  0x18   : > { %s41_s9 = ssub.s32 %s1056_s17, %s1305_s5  ;;  %p38_p0 = scmp.ge.s32.totalorder %s1307_s6, 2 }
  0x19   : > { %s183_s10 = smul.u32 3, %s1056_s17  ;;  %s181_s12 = scalar_lea.vmem [#allocation3], %s844_s8 }
  0x1a   : > { %s845_s11 = smul.u32 18, %s1060_s18  ;;  %s192_s20 = sshll.u32 %s181_s12, 4  ;;  %s193_s20 = int_to_ptr.vmem [resolvable:$true] %s192_s20 }
  0x1b   : > { %s1309_s6 = smov (%p38_p0, %s1307_s6), 0  ;;  %s1293_s5 = sadd.s32 1, %s1044_s14 }
  0x1c   : > { %s187_s23 = sadd.s32 %s845_s11, %s183_s10  ;;  %s40_s25 = ssub.s32 %s1060_s18, %s1309_s6 }
  0x1d   : > { %s694_s26 = sshll.u32 %s187_s23, 2  ;;  %s42_s27 = sor.u32 %s41_s9, %s40_s25 }
  0x1e   : > { %s189_s21 = scalar_lea.hbm %s1275_s0, %s694_s26  ;;  %p43_p1 = scmp.eq.s32.totalorder %s42_s27, 0 }
  0x1f   : > { %s190_s2 = sshll.u32 %s189_s21, 4  ;;  %s178_s8 = scalar_lea.sflag [#allocation4], %s177_s7  ;;  %s191_s2 = int_to_ptr.hbm [resolvable:$true] %s190_s2 }
  0x20   : > { %s1189_s17 = scalar_select %p43_p1, %s1044_s14, %s1293_s5  }
  0x21   : > { %s1067_s12 = smov 576   ;;  %s1068_s19 = smov 192  }
  0x22   : > { %s1069_s1 = smov 12   ;;  %216 = sbr.rel (%p1154_p8) target bundleno = 250 (0xfa), region = 32 }
  0x23   : > { %860 = dma.hbm_to_vmem [thread:$0]  (!%p1165_p12), %s191_s2, 384, %s193_s20, %s178_s8, %s1067_s12, %s1068_s19, %s1069_s1  }
  0x24   : > { %s218_s9 = sand.u32 (!%p1154_p8), 1, %s1040_s13  }
  0x25   : > { %s846_s10 = smul.u32 (!%p1154_p8), 24, %s218_s9  ;;  %s219_s11 = scalar_lea.sflag (!%p1154_p8), [#allocation4], %s218_s9 }
  0x27   : > { %s1196_s23 = scalar_lea.vmem [#allocation3], %s846_s10 }
  0x28   : > { %1027 = dma.done.wait (%p1146_p6), %s219_s11, 384  }
  0x29   : > { %1029 = vsyncadd (%p1146_p6), %s219_s11, 4294966912 }
  0x2a   : > { %1031 = dma.done.wait (%p1135_p3), [#allocation6], 16  }
  0x2b   : > { %1033 = vsyncadd (%p1135_p3), [#allocation6], 4294967280  ;;  %s264_s1 = smul.u32 48, %s1048_s15  ;;  %s698_s2 = sshll.u32 %s1052_s16, 1 }
  0x2c   : > { %p274_p2 = scmp.lt.s32.totalorder %s698_s2, 3  ;;  %s1294_s20 = sld [smem:[#allocation12_spill]] }
  0x2d   : > { %p265_p4 = scmp.lt.s32.totalorder %s264_s1, 143  ;;  %p700_p3 = scmp.ne.s32.totalorder %s1048_s15, 0 }
  0x2e   : > { %s1311_s2 = smov (!%p274_p2, %s698_s2), 3 }
  0x2f   : > { %s1313_s1 = smov (!%p265_p4, %s264_s1), 143  ;;  %s699_s19 = sshll.u32 %s1311_s2, 2 }
  0x30   : > { %s697_s21 = sshll.u32 %s1313_s1, 2  ;;  %s1211_s24 = scalar_lea.vmem %s1278_s3, %s699_s19 }
  0x31   : > { %285 = sbr.rel (%p700_p3) target bundleno = 57 (0x39), region = 44 }
  0x32   : > { %s1216_s22 = scalar_lea.vmem %s1294_s20, %s697_s21 }
  0x36   : > { %v1070_v0 = vmov 0.0  }
  0x37   : > { %286 = vst [vmem:[#allocation2] sm:$0xff] %v1070_v0 }
  0x38   : > { %287 = vst [vmem:[#allocation2 + $0x8] sm:$0xff] %v1070_v0 }
  0x39 PF: > { %v822_v1 = vld [vmem:[%s1216_s22 + $0x38] sm:$0xff]  ;;  %v821_v4 = vld [vmem:[%s1216_s22 + $0x30] sm:$0xff]  ;;  %v820_v7 = vld [vmem:[%s1216_s22 + $0x28] sm:$0xff]  ;;  %p809_p5 = scmp.ne.s32.totalorder %s1048_s15, 2 }
  0x3a   : > { %v830_v2 = vld [vmem:[%s1216_s22 + $0x78] sm:$0xff]  ;;  %502 = vmatpush.bf16.msra.mxu0 %v822_v1  ;;  %v829_v5 = vld [vmem:[%s1216_s22 + $0x70] sm:$0xff]  ;;  %v828_v8 = vld [vmem:[%s1216_s22 + $0x68] sm:$0xff] }
  0x3b   : > { %v838_v3 = vld [vmem:[%s1216_s22 + $0xb8] sm:$0xff]  ;;  %516 = vmatpush.bf16.msra.mxu1 %v830_v2  ;;  %v837_v6 = vld [vmem:[%s1216_s22 + $0xb0] sm:$0xff]  ;;  %v836_v9 = vld [vmem:[%s1216_s22 + $0xa8] sm:$0xff] }
  0x3c   : > { %530 = vmatpush.bf16.msra.mxu2 %v838_v3  ;;  %v819_v10 = vld [vmem:[%s1216_s22 + $0x20] sm:$0xff]  ;;  %v818_v13 = vld [vmem:[%s1216_s22 + $0x18] sm:$0xff]  ;;  %v817_v16 = vld [vmem:[%s1216_s22 + $0x10] sm:$0xff] }
  0x3d   : > { %v827_v11 = vld [vmem:[%s1216_s22 + $0x60] sm:$0xff]  ;;  %v826_v14 = vld [vmem:[%s1216_s22 + $0x58] sm:$0xff]  ;;  %v825_v17 = vld [vmem:[%s1216_s22 + $0x50] sm:$0xff] }
  0x3e   : > { %503 = vmatpush.bf16.msra.mxu0 %v821_v4  ;;  %v835_v12 = vld [vmem:[%s1216_s22 + $0xa0] sm:$0xff]  ;;  %v834_v15 = vld [vmem:[%s1216_s22 + $0x98] sm:$0xff]  ;;  %v833_v18 = vld [vmem:[%s1216_s22 + $0x90] sm:$0xff] }
  0x3f   : > { %517 = vmatpush.bf16.msra.mxu1 %v829_v5  ;;  %v816_v19 = vld [vmem:[%s1216_s22 + $0x8] sm:$0xff]  ;;  %v815_v22 = vld [vmem:[%s1216_s22] sm:$0xff]  ;;  %v813_v25 = vld [vmem:[%s1196_s23 + $0x8] sm:$0xf0] }
  0x40   : > { %531 = vmatpush.bf16.msra.mxu2 %v837_v6  ;;  %v824_v20 = vld [vmem:[%s1216_s22 + $0x48] sm:$0xff]  ;;  %v823_v23 = vld [vmem:[%s1216_s22 + $0x40] sm:$0xff]  ;;  %v711_v29 = vld [vmem:[%s1196_s23 + $0x8] sm:$0xf] }
  0x41   : > { %v832_v21 = vld [vmem:[%s1216_s22 + $0x88] sm:$0xff]  ;;  %v705_v27 = vld [vmem:[%s1196_s23 + $0xc] sm:$0xf0]  ;;  %v814_v30 = vld [vmem:[%s1196_s23 + $0x10] sm:$0xf0] }
  0x42   : > { %504 = vmatpush.bf16.msra.mxu0 %v820_v7  ;;  %v703_v24 = vld [vmem:[%s1196_s23] sm:$0xf]  ;;  %v812_v26 = vld [vmem:[%s1196_s23 + $0x4] sm:$0xf]  ;;  %v831_v28 = vld [vmem:[%s1216_s22 + $0x80] sm:$0xff]  ;;  %v712_v33 = vor.u32 %v814_v30, %v711_v29 }
  0x43   : > { %518 = vmatpush.bf16.msra.mxu1 %v828_v8  ;;  %v704_v31 = vor.u32 %v813_v25, %v703_v24  ;;  %v708_v32 = vor.u32 %v812_v26, %v705_v27  ;;  %v288_v37 = vld [vmem:[#allocation2] sm:$0xff]  ;;  %v289_v44 = vld [vmem:[#allocation2 + $0x8] sm:$0xff] }
  0x44   : > { %532 = vmatpush.bf16.msra.mxu2 %v836_v9 }
  0x46   : > { %505 = vmatpush.bf16.msra.mxu0 %v819_v10 }
  0x47   : > { %519 = vmatpush.bf16.msra.mxu1 %v827_v11 }
  0x48   : > { %533 = vmatpush.bf16.msra.mxu2 %v835_v12 }
  0x4a   : > { %506 = vmatpush.bf16.msra.mxu0 %v818_v13 }
  0x4b   : > { %520 = vmatpush.bf16.msra.mxu1 %v826_v14 }
  0x4c   : > { %534 = vmatpush.bf16.msra.mxu2 %v834_v15 }
  0x4e   : > { %507 = vmatpush.bf16.msra.mxu0 %v817_v16 }
  0x4f   : > { %521 = vmatpush.bf16.msra.mxu1 %v825_v17 }
  0x50   : > { %535 = vmatpush.bf16.msra.mxu2 %v833_v18 }
  0x52   : > { %508 = vmatpush.bf16.msra.mxu0 %v816_v19 }
  0x53   : > { %522 = vmatpush.bf16.msra.mxu1 %v824_v20 }
  0x54   : > { %536 = vmatpush.bf16.msra.mxu2 %v832_v21 }
  0x56   : > { %509 = vmatpush.bf16.msra.mxu0 %v815_v22 }
  0x57   : > { %523 = vmatpush.bf16.msra.mxu1 %v823_v23 }
  0x58   : > { %537 = vmatpush.bf16.msra.mxu2 %v831_v28 }
  0x59   : > { %510 = vmatmul.bf16.vlgmr.msra.gmra.mxu0 %v704_v31 }
  0x5a   : > { %524 = vmatmul.bf16.vlgmr.msra.gmra.mxu1 %v708_v32 }
  0x5b   : > { %538 = vmatmul.bf16.vlgmr.msra.gmra.mxu2 %v712_v33 }
  0xd6   : > { %v511_v34 = vpop.f32.mrf.mxu0 }
  0xd7   : > { %v525_v35 = vpop.f32.mrf.mxu1 }
  0xd8   : > { %v526_v36 = vadd.f32 %v525_v35, %v511_v34 }
  0xde   : > { %v539_v38 = vpop.f32.mrf.mxu2  ;;  %v513_v41 = vpop.f32.mrf.mxu0 }
  0xdf   : > { %v540_v39 = vadd.f32 %v539_v38, %v526_v36  ;;  %v527_v42 = vpop.f32.mrf.mxu1 }
  0xe0   : > { %v528_v43 = vadd.f32 %v527_v42, %v513_v41 }
  0xe1   : > { %v544_v40 = vadd.f32 %v540_v39, %v288_v37 }
  0xe3   : > { %546 = vst [vmem:[#allocation2] sm:$0xff] %v544_v40 }
  0xe6   : > { %v541_v45 = vpop.f32.mrf.mxu2 }
  0xe7   : > { %v542_v46 = vadd.f32 %v541_v45, %v528_v43  ;;  %551 = sbr.rel (%p809_p5) target bundleno = 250 (0xfa), region = 48 }
  0xe9   : > { %v545_v47 = vadd.f32 %v542_v46, %v289_v44 }
  0xeb   : > { %547 = vst [vmem:[#allocation2 + $0x8] sm:$0xff] %v545_v47 }
  0xec   : > { %v552_v48 = vld [vmem:[#allocation2] sm:$0xff] }
  0xed   : > { %v933_v50 = vld [vmem:[#allocation5] ss:$0 sm:$0xff] }
  0xee   : > { %v558_v51 = vadd.f32 %v933_v50, %v552_v48 }
  0xf0   : > { %v560_v53 = vmax.f32 %v558_v51, 0.0 }
  0xf2   : > { %v553_v49 = vld [vmem:[#allocation2 + $0x8] sm:$0xff] }
  0xf3   : > { %v559_v52 = vadd.f32 %v933_v50, %v553_v49 }
  0xf5   : > { %v561_v54 = vmax.f32 %v559_v52, 0.0 }
  0xf7   : > { %v842_v55 = vpack.c.bf16 %v561_v54, %v560_v53 }
  0xf9   : > { %843 = vst [vmem:[%s1211_s24] sm:$0xff] %v842_v55  }
  0xfa PF: > { %s1295_s16 = sld [smem:[#allocation10_spill]]  ;;  %s1298_s12 = smov %s1040_s13 }
  0xfb   : > { %s1296_s15 = sld [smem:[#allocation9_spill]]  ;;  %s1299_s13 = smov %s1044_s14 }
  0xfc   : > { %s1297_s25 = sld [smem:[#allocation11_spill]]  ;;  %s1300_s14 = smov %s1189_s17 }
 0x100   : > { %s17_s19 = sadd.s32 1, %s1295_s16   ;;  %s1301_s16 = smov %s1060_s18 }
 0x101   : > { %p14_p6 = scmp.ge.s32.totalorder %s17_s19, 8   ;;  %s1303_s18 = smov %s1309_s6 }
 0x102   : > { %s1302_s17 = smov %s1297_s25 }
 0x103   :  { %16 = sbr.rel (!%p14_p6) target bundleno = 9 (0x9), region = 88 }
 0x108   :  { %594 = vsyncpa [#allocation4], 1 }
 0x109   :  { %596 = vsyncpa [#allocation4 + $0x1], 1 }
 0x10a   :  { %597 = vsyncpa [#allocation6], 1 }

// kernel: _lambda_.199
= control target key start
LH: loop header
LB: loop body
LE: loop exit
PB: predicated region body
PF: predicated region fallthrough
CT: control target
= control target key end

     0   :  { %s757_s12 = smov 0   ;;  %s759_s13 = smov 0   ;;  %s848_s0 = inlined_call_operand.vmem [shape: bf16[32,256], index: 0, kind: input, shape index: {}]   ;;  %s849_s1 = inlined_call_operand.vmem [shape: bf16[256,128], index: 1, kind: input, shape index: {}]   ;;  %s850_s2 = inlined_call_operand.vmem [shape: f32[1,128], index: 2, kind: input, shape index: {}]   ;;  %s851_s3 = inlined_call_operand.vmem [shape: bf16[32,128], index: 3, kind: output, shape index: {}]  }
   0x1   :  { %s761_s14 = smov 0  }
   0x2 LB: > { %s32_s15 = sadd.s32 1, %s731_s13  ;;  %p584_p0 = scmp.ge.s32.totalorder %s735_s14, 1  ;;  %s735_s14 = sphi %s761_s14, %s13_s14   ;;  %s731_s13 = sphi %s759_s13, %s853_s13   ;;  %s727_s12 = sphi %s757_s12, %s852_s12  }
   0x3   : > { %p34_p1 = scmp.ge.s32.totalorder %s32_s15, 2  ;;  %p191_p2 = scmp.lt.s32.totalorder %s735_s14, 3 }
   0x5   : > { %s855_s15 = smov (%p34_p1, %s32_s15), 0  ;;  %p192_p3 = pnand %p584_p0, %p191_p2 }
   0x6   : > { %s585_s28 = sshll.u32 (!%p192_p3), %s727_s12, 1 }
   0x7   : > { %195 = sbr.rel (%p192_p3) target bundleno = 188 (0xbc), region = 32  ;;  %p236_p4 = scmp.lt.s32.totalorder (!%p192_p3), %s585_s28, 3 }
   0xc   : > { %v674_v0 = vld [vmem:[%s849_s1 + $0x38] sm:$0xff]  ;;  %v673_v2 = vld [vmem:[%s849_s1 + $0x30] sm:$0xff]  ;;  %v672_v4 = vld [vmem:[%s849_s1 + $0x28] sm:$0xff]  ;;  %s857_s28 = smov (!%p236_p4, %s585_s28), 3 }
   0xd   : > { %v682_v1 = vld [vmem:[%s849_s1 + $0x78] sm:$0xff]  ;;  %415 = vmatpush.bf16.msra.mxu0 %v674_v0  ;;  %v681_v3 = vld [vmem:[%s849_s1 + $0x70] sm:$0xff]  ;;  %v680_v5 = vld [vmem:[%s849_s1 + $0x68] sm:$0xff]  ;;  %s664_s17 = sshll.u32 %s857_s28, 3  ;;  %s589_s5 = sshll.u32 %s857_s28, 2 }
   0xe   : > { %429 = vmatpush.bf16.msra.mxu1 %v682_v1  ;;  %v671_v6 = vld [vmem:[%s849_s1 + $0x20] sm:$0xff]  ;;  %v670_v8 = vld [vmem:[%s849_s1 + $0x18] sm:$0xff]  ;;  %v669_v10 = vld [vmem:[%s849_s1 + $0x10] sm:$0xff]  ;;  %s243_s24 = scalar_lea.vmem %s848_s0, %s664_s17  ;;  %s265_s8 = scalar_lea.vmem %s851_s3, %s589_s5 }
   0xf   : > { %v679_v7 = vld [vmem:[%s849_s1 + $0x60] sm:$0xff]  ;;  %v678_v9 = vld [vmem:[%s849_s1 + $0x58] sm:$0xff]  ;;  %v677_v11 = vld [vmem:[%s849_s1 + $0x50] sm:$0xff] }
  0x10   : > { %v668_v12 = vld [vmem:[%s849_s1 + $0x8] sm:$0xff]  ;;  %v667_v14 = vld [vmem:[%s849_s1] sm:$0xff] }
  0x11   : > { %416 = vmatpush.bf16.msra.mxu0 %v673_v2  ;;  %v676_v13 = vld [vmem:[%s849_s1 + $0x48] sm:$0xff]  ;;  %v675_v15 = vld [vmem:[%s849_s1 + $0x40] sm:$0xff] }
  0x12   : > { %430 = vmatpush.bf16.msra.mxu1 %v681_v3  ;;  %v592_v16 = vld [vmem:[%s243_s24] sm:$0xf]  ;;  %v666_v17 = vld [vmem:[%s243_s24 + $0x4] sm:$0xf0]  ;;  %v665_v18 = vld [vmem:[%s243_s24 + $0x4] sm:$0xf] }
  0x13   : > { %v594_v19 = vld [vmem:[%s243_s24 + $0x8] sm:$0xf0]  ;;  %v593_v20 = vor.u32 %v666_v17, %v592_v16  ;;  %v712_v25 = vld [vmem:[%s850_s2] ss:$0 sm:$0xff] }
  0x14   : > { %v597_v21 = vor.u32 %v665_v18, %v594_v19 }
  0x15   : > { %417 = vmatpush.bf16.msra.mxu0 %v672_v4 }
  0x16   : > { %431 = vmatpush.bf16.msra.mxu1 %v680_v5 }
  0x19   : > { %418 = vmatpush.bf16.msra.mxu0 %v671_v6 }
  0x1a   : > { %432 = vmatpush.bf16.msra.mxu1 %v679_v7 }
  0x1d   : > { %419 = vmatpush.bf16.msra.mxu0 %v670_v8 }
  0x1e   : > { %433 = vmatpush.bf16.msra.mxu1 %v678_v9 }
  0x21   : > { %420 = vmatpush.bf16.msra.mxu0 %v669_v10 }
  0x22   : > { %434 = vmatpush.bf16.msra.mxu1 %v677_v11 }
  0x25   : > { %421 = vmatpush.bf16.msra.mxu0 %v668_v12 }
  0x26   : > { %435 = vmatpush.bf16.msra.mxu1 %v676_v13 }
  0x29   : > { %422 = vmatpush.bf16.msra.mxu0 %v667_v14 }
  0x2a   : > { %436 = vmatpush.bf16.msra.mxu1 %v675_v15 }
  0x2c   : > { %423 = vmatmul.bf16.vlgmr.msra.gmra.mxu0 %v593_v20 }
  0x2d   : > { %437 = vmatmul.bf16.vlgmr.msra.gmra.mxu1 %v597_v21 }
  0xa9   : > { %v424_v22 = vpop.f32.mrf.mxu0 }
  0xaa   : > { %v438_v23 = vpop.f32.mrf.mxu1 }
  0xab   : > { %v439_v24 = vadd.f32 %v438_v23, %v424_v22 }
  0xad   : > { %v456_v28 = vadd.f32 %v712_v25, %v439_v24 }
  0xaf   : > { %v458_v31 = vmax.f32 %v456_v28, 0.0 }
  0xb1   : > { %v426_v26 = vpop.f32.mrf.mxu0 }
  0xb2   : > { %v440_v27 = vpop.f32.mrf.mxu1 }
  0xb3   : > { %v441_v29 = vadd.f32 %v440_v27, %v426_v26 }
  0xb5   : > { %v457_v30 = vadd.f32 %v712_v25, %v441_v29 }
  0xb7   : > { %v459_v32 = vmax.f32 %v457_v30, 0.0 }
  0xb9   : > { %v686_v33 = vpack.c.bf16 %v459_v32, %v458_v31 }
  0xbb   : > { %687 = vst [vmem:[%s265_s8] sm:$0xff] %v686_v33  }
  0xbc PF: > { %s13_s14 = sadd.s32 1, %s735_s14   ;;  %s852_s12 = smov %s731_s13 }
  0xbd   : > { %p10_p5 = scmp.ge.s32.totalorder %s13_s14, 4   ;;  %s853_s13 = smov %s855_s15 }
  0xbf   :  { %12 = sbr.rel (!%p10_p5) target bundleno = 2 (0x2), region = 76 }

// kernel: _lambda_.198
= control target key start
LH: loop header
LB: loop body
LE: loop exit
PB: predicated region body
PF: predicated region fallthrough
CT: control target
= control target key end

     0   :  { %s1101_s12 = smov 0   ;;  %s1103_s13 = smov 0   ;;  %s1306_s0 = inlined_call_operand.vmem [shape: bf16[8,256], index: 0, kind: input, shape index: {}]   ;;  %s1307_s1 = inlined_call_operand.vmem [shape: bf16[256,512], index: 1, kind: input, shape index: {}]   ;;  %s1308_s2 = inlined_call_operand.vmem [shape: f32[1,512], index: 2, kind: input, shape index: {}]   ;;  %s1309_s3 = inlined_call_operand.vmem [shape: bf16[8,512], index: 3, kind: output, shape index: {}]  }
   0x1   :  { %s1105_s14 = smov 0   ;;  %s1107_s15 = smov 0  }
   0x2   :  { %s1109_s16 = smov 0  }
   0x3 LB: > { %s28_s17 = sadd.s32 1, %s1075_s15  ;;  %p76_p1 = scmp.ne.s32.totalorder %s1067_s13, %s1063_s12  ;;  %s1079_s16 = sphi %s1109_s16, %s13_s16   ;;  %s1075_s15 = sphi %s1107_s15, %s1313_s15   ;;  %s1071_s14 = sphi %s1105_s14, %s1312_s14   ;;  %s1067_s13 = sphi %s1103_s13, %s1311_s13   ;;  %s1063_s12 = sphi %s1101_s12, %s1310_s12  }
   0x4   : > { %p30_p0 = scmp.ge.s32.totalorder %s28_s17, 2  ;;  %p77_p2 = scmp.eq.s32.totalorder %s1079_s16, 0 }
   0x5   : > { %s69_s19 = sadd.s32 1, %s1067_s13  ;;  %p829_p5 = scmp.ge.s32.totalorder %s1079_s16, 2 }
   0x6   : > { %s1315_s17 = smov (%p30_p0, %s28_s17), 0  ;;  %p78_p3 = por %p77_p2, %p76_p1 }
   0x7   : > { %s65_s18 = ssub.s32 %s1075_s15, %s1315_s17  ;;  %169 = sbr.rel (%p829_p5) target bundleno = 48 (0x30), region = 20 }
   0x8   : > { %p67_p4 = scmp.eq.s32.totalorder %s65_s18, 0 }
   0xa   : > { %s1136_s20 = scalar_select %p67_p4, %s1067_s13, %s69_s19  }
   0xc   : > { %172 = sbr.rel (!%p78_p3) target bundleno = 48 (0x30), region = 24  ;;  %s174_s21 = sand.u32 (%p78_p3), 1, %s1067_s13  }
   0xd   : > { %s968_s22 = sshll.u32 (%p78_p3), %s1075_s15, 3  ;;  %s830_s23 = sshll.u32 (%p78_p3), %s174_s21, 8 }
   0xe   : > { %s1144_s26 = scalar_lea.vmem (%p78_p3), %s1307_s1, %s968_s22  ;;  %s1149_s27 = scalar_lea.vmem (%p78_p3), [#allocation3], %s830_s23 }
   0xf   : > { %v273_v0 = vld [vmem:[%s1144_s26] sm:$0xff] (%p78_p3)  ;;  %v275_v1 = vld [vmem:[%s1144_s26 + $0x10] sm:$0xff] (%p78_p3) }
  0x10   : > { %v277_v2 = vld [vmem:[%s1144_s26 + $0x20] sm:$0xff] (%p78_p3)  ;;  %274 = vst [vmem:[%s1149_s27] sm:$0xff] (%p78_p3), %v273_v0  ;;  %v279_v3 = vld [vmem:[%s1144_s26 + $0x30] sm:$0xff] (%p78_p3) }
  0x11   : > { %276 = vst [vmem:[%s1149_s27 + $0x8] sm:$0xff] %v275_v1  ;;  %v281_v4 = vld [vmem:[%s1144_s26 + $0x40] sm:$0xff]  ;;  %v283_v5 = vld [vmem:[%s1144_s26 + $0x50] sm:$0xff] }
  0x12   : > { %278 = vst [vmem:[%s1149_s27 + $0x10] sm:$0xff] %v277_v2  ;;  %v285_v6 = vld [vmem:[%s1144_s26 + $0x60] sm:$0xff]  ;;  %v287_v7 = vld [vmem:[%s1144_s26 + $0x70] sm:$0xff] }
  0x13   : > { %280 = vst [vmem:[%s1149_s27 + $0x18] sm:$0xff] %v279_v3  ;;  %v289_v8 = vld [vmem:[%s1144_s26 + $0x80] sm:$0xff]  ;;  %v291_v9 = vld [vmem:[%s1144_s26 + $0x90] sm:$0xff] }
  0x14   : > { %282 = vst [vmem:[%s1149_s27 + $0x20] sm:$0xff] %v281_v4  ;;  %v293_v10 = vld [vmem:[%s1144_s26 + $0xa0] sm:$0xff]  ;;  %v295_v11 = vld [vmem:[%s1144_s26 + $0xb0] sm:$0xff] }
  0x15   : > { %284 = vst [vmem:[%s1149_s27 + $0x28] sm:$0xff] %v283_v5  ;;  %v297_v12 = vld [vmem:[%s1144_s26 + $0xc0] sm:$0xff]  ;;  %v299_v13 = vld [vmem:[%s1144_s26 + $0xd0] sm:$0xff] }
  0x16   : > { %286 = vst [vmem:[%s1149_s27 + $0x30] sm:$0xff] %v285_v6  ;;  %v301_v14 = vld [vmem:[%s1144_s26 + $0xe0] sm:$0xff]  ;;  %v303_v15 = vld [vmem:[%s1144_s26 + $0xf0] sm:$0xff] }
  0x17   : > { %288 = vst [vmem:[%s1149_s27 + $0x38] sm:$0xff] %v287_v7  ;;  %v305_v16 = vld [vmem:[%s1144_s26 + $0x100] sm:$0xff]  ;;  %v307_v17 = vld [vmem:[%s1144_s26 + $0x110] sm:$0xff] }
  0x18   : > { %290 = vst [vmem:[%s1149_s27 + $0x40] sm:$0xff] %v289_v8  ;;  %v309_v18 = vld [vmem:[%s1144_s26 + $0x120] sm:$0xff]  ;;  %v311_v19 = vld [vmem:[%s1144_s26 + $0x130] sm:$0xff] }
  0x19   : > { %292 = vst [vmem:[%s1149_s27 + $0x48] sm:$0xff] %v291_v9  ;;  %v313_v20 = vld [vmem:[%s1144_s26 + $0x140] sm:$0xff]  ;;  %v315_v21 = vld [vmem:[%s1144_s26 + $0x150] sm:$0xff] }
  0x1a   : > { %294 = vst [vmem:[%s1149_s27 + $0x50] sm:$0xff] %v293_v10  ;;  %v317_v22 = vld [vmem:[%s1144_s26 + $0x160] sm:$0xff]  ;;  %v319_v23 = vld [vmem:[%s1144_s26 + $0x170] sm:$0xff] }
  0x1b   : > { %296 = vst [vmem:[%s1149_s27 + $0x58] sm:$0xff] %v295_v11  ;;  %v321_v24 = vld [vmem:[%s1144_s26 + $0x180] sm:$0xff]  ;;  %v323_v25 = vld [vmem:[%s1144_s26 + $0x190] sm:$0xff] }
  0x1c   : > { %298 = vst [vmem:[%s1149_s27 + $0x60] sm:$0xff] %v297_v12  ;;  %v325_v26 = vld [vmem:[%s1144_s26 + $0x1a0] sm:$0xff]  ;;  %v327_v27 = vld [vmem:[%s1144_s26 + $0x1b0] sm:$0xff] }
  0x1d   : > { %300 = vst [vmem:[%s1149_s27 + $0x68] sm:$0xff] %v299_v13  ;;  %v329_v28 = vld [vmem:[%s1144_s26 + $0x1c0] sm:$0xff]  ;;  %v331_v29 = vld [vmem:[%s1144_s26 + $0x1d0] sm:$0xff] }
  0x1e   : > { %302 = vst [vmem:[%s1149_s27 + $0x70] sm:$0xff] %v301_v14  ;;  %v333_v30 = vld [vmem:[%s1144_s26 + $0x1e0] sm:$0xff]  ;;  %v335_v31 = vld [vmem:[%s1144_s26 + $0x1f0] sm:$0xff] }
  0x1f   : > { %304 = vst [vmem:[%s1149_s27 + $0x78] sm:$0xff] %v303_v15 }
  0x20   : > { %306 = vst [vmem:[%s1149_s27 + $0x80] sm:$0xff] %v305_v16 }
  0x21   : > { %308 = vst [vmem:[%s1149_s27 + $0x88] sm:$0xff] %v307_v17 }
  0x22   : > { %310 = vst [vmem:[%s1149_s27 + $0x90] sm:$0xff] %v309_v18 }
  0x23   : > { %312 = vst [vmem:[%s1149_s27 + $0x98] sm:$0xff] %v311_v19 }
  0x24   : > { %314 = vst [vmem:[%s1149_s27 + $0xa0] sm:$0xff] %v313_v20 }
  0x25   : > { %316 = vst [vmem:[%s1149_s27 + $0xa8] sm:$0xff] %v315_v21 }
  0x26   : > { %318 = vst [vmem:[%s1149_s27 + $0xb0] sm:$0xff] %v317_v22 }
  0x27   : > { %320 = vst [vmem:[%s1149_s27 + $0xb8] sm:$0xff] %v319_v23 }
  0x28   : > { %322 = vst [vmem:[%s1149_s27 + $0xc0] sm:$0xff] %v321_v24 }
  0x29   : > { %324 = vst [vmem:[%s1149_s27 + $0xc8] sm:$0xff] %v323_v25 }
  0x2a   : > { %326 = vst [vmem:[%s1149_s27 + $0xd0] sm:$0xff] %v325_v26 }
  0x2b   : > { %328 = vst [vmem:[%s1149_s27 + $0xd8] sm:$0xff] %v327_v27 }
  0x2c   : > { %330 = vst [vmem:[%s1149_s27 + $0xe0] sm:$0xff] %v329_v28 }
  0x2d   : > { %332 = vst [vmem:[%s1149_s27 + $0xe8] sm:$0xff] %v331_v29 }
  0x2e   : > { %334 = vst [vmem:[%s1149_s27 + $0xf0] sm:$0xff] %v333_v30 }
  0x2f   : > { %336 = vst [vmem:[%s1149_s27 + $0xf8] sm:$0xff] %v335_v31 }
  0x30 PF: > { %p833_p6 = scmp.ge.s32.totalorder %s1079_s16, 1  ;;  %p349_p7 = scmp.lt.s32.totalorder %s1079_s16, 3 }
  0x32   : > { %p350_p8 = pnand %p833_p6, %p349_p7 }
  0x33   : > { %s356_s28 = sand.u32 (!%p350_p8), 1, %s1063_s12   ;;  %s835_s6 = sshll.u32 (!%p350_p8), %s1071_s14, 1 }
  0x34   : > { %353 = sbr.rel (%p350_p8) target bundleno = 233 (0xe9), region = 66  ;;  %s834_s29 = sshll.u32 (!%p350_p8), %s356_s28, 8 }
  0x35   : > { %s1215_s30 = scalar_lea.vmem (!%p350_p8), [#allocation3], %s834_s29  ;;  %p409_p9 = scmp.lt.s32.totalorder (!%p350_p8), %s835_s6, 3 }
  0x39   : > { %v896_v32 = vld [vmem:[%s1215_s30 + $0x70] sm:$0xf]  ;;  %v984_v33 = vld [vmem:[%s1215_s30 + $0x74] sm:$0xf0]  ;;  %v983_v37 = vld [vmem:[%s1215_s30 + $0x74] sm:$0xf] }
  0x3a   : > { %v960_v34 = vld [vmem:[%s1215_s30 + $0xf0] sm:$0xf]  ;;  %v897_v35 = vor.u32 %v984_v33, %v896_v32  ;;  %v1000_v36 = vld [vmem:[%s1215_s30 + $0xf4] sm:$0xf0]  ;;  %v898_v38 = vld [vmem:[%s1215_s30 + $0x78] sm:$0xf0] }
  0x3b   : > { %v961_v39 = vor.u32 %v1000_v36, %v960_v34  ;;  %v901_v40 = vor.u32 %v983_v37, %v898_v38  ;;  %v999_v41 = vld [vmem:[%s1215_s30 + $0xf4] sm:$0xf]  ;;  %v962_v42 = vld [vmem:[%s1215_s30 + $0xf8] sm:$0xf0]  ;;  %v888_v43 = vld [vmem:[%s1215_s30 + $0x60] sm:$0xf] }
  0x3c   : > { %631 = vmatpush.bf16.msra.mxu0 %v897_v35  ;;  %v965_v44 = vor.u32 %v999_v41, %v962_v42  ;;  %v982_v45 = vld [vmem:[%s1215_s30 + $0x64] sm:$0xf0]  ;;  %v952_v46 = vld [vmem:[%s1215_s30 + $0xe0] sm:$0xf]  ;;  %v981_v50 = vld [vmem:[%s1215_s30 + $0x64] sm:$0xf] }
  0x3d   : > { %v998_v47 = vld [vmem:[%s1215_s30 + $0xe4] sm:$0xf0]  ;;  %644 = vmatpush.bf16.msra.mxu1 %v961_v39  ;;  %657 = vmatpush.bf16.msra.mxu2 %v901_v40  ;;  %v889_v48 = vor.u32 %v982_v45, %v888_v43  ;;  %v890_v51 = vld [vmem:[%s1215_s30 + $0x68] sm:$0xf0]  ;;  %v997_v52 = vld [vmem:[%s1215_s30 + $0xe4] sm:$0xf] }
  0x3e   : > { %v953_v49 = vor.u32 %v998_v47, %v952_v46  ;;  %670 = vmatpush.bf16.msra.mxu3 %v965_v44  ;;  %v893_v53 = vor.u32 %v981_v50, %v890_v51  ;;  %v954_v54 = vld [vmem:[%s1215_s30 + $0xe8] sm:$0xf0]  ;;  %v880_v55 = vld [vmem:[%s1215_s30 + $0x50] sm:$0xf]  ;;  %v980_v56 = vld [vmem:[%s1215_s30 + $0x54] sm:$0xf0] }
  0x3f   : > { %v957_v57 = vor.u32 %v997_v52, %v954_v54  ;;  %v944_v58 = vld [vmem:[%s1215_s30 + $0xd0] sm:$0xf]  ;;  %v996_v59 = vld [vmem:[%s1215_s30 + $0xd4] sm:$0xf0]  ;;  %v979_v60 = vld [vmem:[%s1215_s30 + $0x54] sm:$0xf]  ;;  %v881_v61 = vor.u32 %v980_v56, %v880_v55 }
  0x40   : > { %632 = vmatpush.bf16.msra.mxu0 %v889_v48  ;;  %v882_v62 = vld [vmem:[%s1215_s30 + $0x58] sm:$0xf0]  ;;  %v995_v63 = vld [vmem:[%s1215_s30 + $0xd4] sm:$0xf]  ;;  %v945_v1 = vor.u32 %v996_v59, %v944_v58  ;;  %v872_v3 = vld [vmem:[%s1215_s30 + $0x40] sm:$0xf] }
  0x41   : > { %v946_v0 = vld [vmem:[%s1215_s30 + $0xd8] sm:$0xf0]  ;;  %645 = vmatpush.bf16.msra.mxu1 %v953_v49  ;;  %658 = vmatpush.bf16.msra.mxu2 %v893_v53  ;;  %v885_v2 = vor.u32 %v979_v60, %v882_v62  ;;  %v978_v4 = vld [vmem:[%s1215_s30 + $0x44] sm:$0xf0]  ;;  %v936_v5 = vld [vmem:[%s1215_s30 + $0xc0] sm:$0xf] }
  0x42   : > { %671 = vmatpush.bf16.msra.mxu3 %v957_v57  ;;  %v949_v6 = vor.u32 %v995_v63, %v946_v0  ;;  %v994_v7 = vld [vmem:[%s1215_s30 + $0xc4] sm:$0xf0]  ;;  %v977_v8 = vld [vmem:[%s1215_s30 + $0x44] sm:$0xf]  ;;  %v874_v9 = vld [vmem:[%s1215_s30 + $0x48] sm:$0xf0]  ;;  %v873_v12 = vor.u32 %v978_v4, %v872_v3 }
  0x43   : > { %v993_v10 = vld [vmem:[%s1215_s30 + $0xc4] sm:$0xf]  ;;  %v938_v11 = vld [vmem:[%s1215_s30 + $0xc8] sm:$0xf0]  ;;  %v937_v13 = vor.u32 %v994_v7, %v936_v5  ;;  %v877_v14 = vor.u32 %v977_v8, %v874_v9  ;;  %v864_v15 = vld [vmem:[%s1215_s30 + $0x30] sm:$0xf] }
  0x44   : > { %633 = vmatpush.bf16.msra.mxu0 %v881_v61  ;;  %v976_v16 = vld [vmem:[%s1215_s30 + $0x34] sm:$0xf0]  ;;  %v928_v17 = vld [vmem:[%s1215_s30 + $0xb0] sm:$0xf]  ;;  %v941_v18 = vor.u32 %v993_v10, %v938_v11  ;;  %v975_v20 = vld [vmem:[%s1215_s30 + $0x34] sm:$0xf] }
  0x45   : > { %646 = vmatpush.bf16.msra.mxu1 %v945_v1  ;;  %659 = vmatpush.bf16.msra.mxu2 %v885_v2  ;;  %v992_v19 = vld [vmem:[%s1215_s30 + $0xb4] sm:$0xf0]  ;;  %v866_v21 = vld [vmem:[%s1215_s30 + $0x38] sm:$0xf0]  ;;  %v991_v22 = vld [vmem:[%s1215_s30 + $0xb4] sm:$0xf]  ;;  %v865_v24 = vor.u32 %v976_v16, %v864_v15 }
  0x46   : > { %672 = vmatpush.bf16.msra.mxu3 %v949_v6  ;;  %v930_v23 = vld [vmem:[%s1215_s30 + $0xb8] sm:$0xf0]  ;;  %v929_v25 = vor.u32 %v992_v19, %v928_v17  ;;  %v869_v26 = vor.u32 %v975_v20, %v866_v21  ;;  %v856_v27 = vld [vmem:[%s1215_s30 + $0x20] sm:$0xf]  ;;  %v974_v28 = vld [vmem:[%s1215_s30 + $0x24] sm:$0xf0] }
  0x47   : > { %v920_v29 = vld [vmem:[%s1215_s30 + $0xa0] sm:$0xf]  ;;  %v933_v30 = vor.u32 %v991_v22, %v930_v23  ;;  %v990_v31 = vld [vmem:[%s1215_s30 + $0xa4] sm:$0xf0]  ;;  %v973_v32 = vld [vmem:[%s1215_s30 + $0x24] sm:$0xf]  ;;  %v857_v36 = vor.u32 %v974_v28, %v856_v27 }
  0x48   : > { %634 = vmatpush.bf16.msra.mxu0 %v873_v12  ;;  %v858_v33 = vld [vmem:[%s1215_s30 + $0x28] sm:$0xf0]  ;;  %v989_v34 = vld [vmem:[%s1215_s30 + $0xa4] sm:$0xf]  ;;  %v921_v37 = vor.u32 %v990_v31, %v920_v29  ;;  %v848_v39 = vld [vmem:[%s1215_s30 + $0x10] sm:$0xf] }
  0x49   : > { %647 = vmatpush.bf16.msra.mxu1 %v937_v13  ;;  %660 = vmatpush.bf16.msra.mxu2 %v877_v14  ;;  %v922_v35 = vld [vmem:[%s1215_s30 + $0xa8] sm:$0xf0]  ;;  %v861_v38 = vor.u32 %v973_v32, %v858_v33  ;;  %v972_v40 = vld [vmem:[%s1215_s30 + $0x14] sm:$0xf0]  ;;  %v912_v41 = vld [vmem:[%s1215_s30 + $0x90] sm:$0xf] }
  0x4a   : > { %673 = vmatpush.bf16.msra.mxu3 %v941_v18  ;;  %v925_v42 = vor.u32 %v989_v34, %v922_v35  ;;  %v988_v43 = vld [vmem:[%s1215_s30 + $0x94] sm:$0xf0]  ;;  %v971_v44 = vld [vmem:[%s1215_s30 + $0x14] sm:$0xf]  ;;  %v850_v45 = vld [vmem:[%s1215_s30 + $0x18] sm:$0xf0]  ;;  %v849_v48 = vor.u32 %v972_v40, %v848_v39 }
  0x4b   : > { %v987_v46 = vld [vmem:[%s1215_s30 + $0x94] sm:$0xf]  ;;  %v914_v47 = vld [vmem:[%s1215_s30 + $0x98] sm:$0xf0]  ;;  %v431_v49 = vld [vmem:[%s1306_s0] sm:$0xff]  ;;  %v913_v50 = vor.u32 %v988_v43, %v912_v41  ;;  %v853_v51 = vor.u32 %v971_v44, %v850_v45  ;;  %s1317_s6 = smov (!%p409_p9, %s835_s6), 3 }
  0x4c   : > { %635 = vmatpush.bf16.msra.mxu0 %v865_v24  ;;  %v840_v52 = vld [vmem:[%s1215_s30] sm:$0xf]  ;;  %v970_v53 = vld [vmem:[%s1215_s30 + $0x4] sm:$0xf0]  ;;  %v917_v55 = vor.u32 %v987_v46, %v914_v47  ;;  %v969_v57 = vld [vmem:[%s1215_s30 + $0x4] sm:$0xf]  ;;  %v465_v61 = vunpack.c.l.b16 %v431_v49  ;;  %v466_v63 = vunpack.c.h.b16 %v431_v49  ;;  %s411_s9 = scalar_lea.vmem %s1308_s2, %s1317_s6 }
  0x4d   : > { %648 = vmatpush.bf16.msra.mxu1 %v929_v25  ;;  %661 = vmatpush.bf16.msra.mxu2 %v869_v26  ;;  %v904_v54 = vld [vmem:[%s1215_s30 + $0x80] sm:$0xf]  ;;  %v986_v56 = vld [vmem:[%s1215_s30 + $0x84] sm:$0xf0]  ;;  %v842_v58 = vld [vmem:[%s1215_s30 + $0x8] sm:$0xf0]  ;;  %v841_v62 = vor.u32 %v970_v53, %v840_v52 }
  0x4e   : > { %674 = vmatpush.bf16.msra.mxu3 %v933_v30  ;;  %v985_v59 = vld [vmem:[%s1215_s30 + $0x84] sm:$0xf]  ;;  %v906_v60 = vld [vmem:[%s1215_s30 + $0x88] sm:$0xf0]  ;;  %v905_v0 = vor.u32 %v986_v56, %v904_v54  ;;  %v845_v1 = vor.u32 %v969_v57, %v842_v58  ;;  %v467_v3 = vpack.c.b16 %v465_v61, %v465_v61  ;;  %v468_v4 = vpack.c.b16 %v466_v63, %v466_v63  ;;  %v692_v7 = vld [vmem:[%s411_s9] sm:$0x3] }
  0x4f   : > { %v909_v2 = vor.u32 %v985_v59, %v906_v60  ;;  %v694_v9 = vperm.slane %v692_v7, 0  ;;  %v695_v11 = vperm.slane %v692_v7, 1  ;;  %s837_s10 = sshll.u32 %s1317_s6, 2 }
  0x50   : > { %636 = vmatpush.bf16.msra.mxu0 %v857_v36  ;;  %s421_s14 = scalar_lea.vmem %s1309_s3, %s837_s10 }
  0x51   : > { %649 = vmatpush.bf16.msra.mxu1 %v921_v37  ;;  %662 = vmatpush.bf16.msra.mxu2 %v861_v38 }
  0x52   : > { %675 = vmatpush.bf16.msra.mxu3 %v925_v42 }
  0x54   : > { %637 = vmatpush.bf16.msra.mxu0 %v849_v48 }
  0x55   : > { %650 = vmatpush.bf16.msra.mxu1 %v913_v50  ;;  %663 = vmatpush.bf16.msra.mxu2 %v853_v51 }
  0x56   : > { %676 = vmatpush.bf16.msra.mxu3 %v917_v55 }
  0x58   : > { %638 = vmatpush.bf16.msra.mxu0 %v841_v62 }
  0x59   : > { %651 = vmatpush.bf16.msra.mxu1 %v905_v0  ;;  %664 = vmatpush.bf16.msra.mxu2 %v845_v1 }
  0x5a   : > { %677 = vmatpush.bf16.msra.mxu3 %v909_v2 }
  0x5b   : > { %639 = vmatmul.bf16.vlgmr.msra.gmra.mxu0 %v467_v3 }
  0x5c   : > { %652 = vmatmul.bf16.vlgmr.msra.gmra.mxu1 %v468_v4  ;;  %665 = vmatmul.bf16.vlgmr.msra.gmra.mxu2 %v467_v3 }
  0x5d   : > { %678 = vmatmul.bf16.vlgmr.msra.gmra.mxu3 %v468_v4 }
  0xd8   : > { %v640_v5 = vpop.f32.mrf.mxu0 }
  0xd9   : > { %v653_v6 = vpop.f32.mrf.mxu1 }
  0xda   : > { %v654_v8 = vadd.f32 %v653_v6, %v640_v5 }
  0xdc   : > { %v698_v14 = vadd.f32 %v694_v9, %v654_v8 }
  0xdf   : > { %v666_v10 = vpop.f32.mrf.mxu2 }
  0xe0   : > { %v679_v12 = vpop.f32.mrf.mxu3  ;;  %v642_v13 = vpop.f32.mrf.mxu0 }
  0xe1   : > { %v680_v15 = vadd.f32 %v679_v12, %v666_v10  ;;  %v655_v16 = vpop.f32.mrf.mxu1 }
  0xe3   : > { %v699_v17 = vadd.f32 %v695_v11, %v680_v15 }
  0xe5   : > { %v700_v18 = vpack.c.bf16 %v699_v17, %v698_v14 }
  0xe7   : > { %701 = vst [vmem:[%s421_s14] sm:$0xff] %v700_v18  ;;  %v668_v19 = vpop.f32.mrf.mxu2 }
  0xe8   : > { %v681_v20 = vpop.f32.mrf.mxu3 }
  0xe9 PF: > { %s13_s16 = sadd.s32 1, %s1079_s16   ;;  %s1310_s12 = smov %s1067_s13 }
  0xea   : > { %p10_p10 = scmp.ge.s32.totalorder %s13_s16, 4   ;;  %s1311_s13 = smov %s1136_s20 }
  0xeb   : > { %s1312_s14 = smov %s1075_s15  ;;  %s1313_s15 = smov %s1315_s17 }
  0xec   :  { %12 = sbr.rel (!%p10_p10) target bundleno = 3 (0x3), region = 119 }

// kernel: _lambda_.202
= control target key start
LH: loop header
LB: loop body
LE: loop exit
PB: predicated region body
PF: predicated region fallthrough
CT: control target
= control target key end

     0   :  { %s651_s1 = inlined_call_operand.vmem [shape: bf16[512,128], index: 1, kind: input, shape index: {}]   ;;  %s652_s0 = inlined_call_operand.vmem [shape: bf16[8,512], index: 0, kind: input, shape index: {}]   ;;  %s653_s2 = inlined_call_operand.vmem [shape: f32[1,128], index: 2, kind: input, shape index: {}]   ;;  %s654_s3 = inlined_call_operand.vmem [shape: bf16[8,128], index: 3, kind: output, shape index: {}]  }
   0x1   :  { %v497_v0 = vld [vmem:[%s651_s1 + $0x38] sm:$0xff]  ;;  %v496_v4 = vld [vmem:[%s651_s1 + $0x30] sm:$0xff]  ;;  %v495_v8 = vld [vmem:[%s651_s1 + $0x28] sm:$0xff] }
   0x2   :  { %v505_v1 = vld [vmem:[%s651_s1 + $0x78] sm:$0xff]  ;;  %292 = vmatpush.bf16.msra.mxu0 %v497_v0  ;;  %v504_v5 = vld [vmem:[%s651_s1 + $0x70] sm:$0xff]  ;;  %v503_v9 = vld [vmem:[%s651_s1 + $0x68] sm:$0xff] }
   0x3   :  { %v513_v2 = vld [vmem:[%s651_s1 + $0xb8] sm:$0xff]  ;;  %305 = vmatpush.bf16.msra.mxu1 %v505_v1  ;;  %v512_v6 = vld [vmem:[%s651_s1 + $0xb0] sm:$0xff]  ;;  %v511_v10 = vld [vmem:[%s651_s1 + $0xa8] sm:$0xff] }
   0x4   :  { %v521_v3 = vld [vmem:[%s651_s1 + $0xf8] sm:$0xff]  ;;  %318 = vmatpush.bf16.msra.mxu2 %v513_v2  ;;  %v520_v7 = vld [vmem:[%s651_s1 + $0xf0] sm:$0xff]  ;;  %v519_v11 = vld [vmem:[%s651_s1 + $0xe8] sm:$0xff] }
   0x5   :  { %331 = vmatpush.bf16.msra.mxu3 %v521_v3  ;;  %v494_v12 = vld [vmem:[%s651_s1 + $0x20] sm:$0xff]  ;;  %v493_v16 = vld [vmem:[%s651_s1 + $0x18] sm:$0xff]  ;;  %v492_v20 = vld [vmem:[%s651_s1 + $0x10] sm:$0xff] }
   0x6   :  { %293 = vmatpush.bf16.msra.mxu0 %v496_v4  ;;  %v502_v13 = vld [vmem:[%s651_s1 + $0x60] sm:$0xff]  ;;  %v501_v17 = vld [vmem:[%s651_s1 + $0x58] sm:$0xff]  ;;  %v500_v21 = vld [vmem:[%s651_s1 + $0x50] sm:$0xff] }
   0x7   :  { %306 = vmatpush.bf16.msra.mxu1 %v504_v5  ;;  %v510_v14 = vld [vmem:[%s651_s1 + $0xa0] sm:$0xff]  ;;  %v509_v18 = vld [vmem:[%s651_s1 + $0x98] sm:$0xff]  ;;  %v508_v22 = vld [vmem:[%s651_s1 + $0x90] sm:$0xff] }
   0x8   :  { %319 = vmatpush.bf16.msra.mxu2 %v512_v6  ;;  %v518_v15 = vld [vmem:[%s651_s1 + $0xe0] sm:$0xff]  ;;  %v517_v19 = vld [vmem:[%s651_s1 + $0xd8] sm:$0xff]  ;;  %v516_v23 = vld [vmem:[%s651_s1 + $0xd0] sm:$0xff] }
   0x9   :  { %332 = vmatpush.bf16.msra.mxu3 %v520_v7  ;;  %v491_v24 = vld [vmem:[%s651_s1 + $0x8] sm:$0xff]  ;;  %v20_v26 = vld [vmem:[%s652_s0] sm:$0xff] }
   0xa   :  { %294 = vmatpush.bf16.msra.mxu0 %v495_v8  ;;  %v499_v25 = vld [vmem:[%s651_s1 + $0x48] sm:$0xff]  ;;  %v88_v30 = vunpack.c.l.b16 %v20_v26  ;;  %v89_v31 = vunpack.c.h.b16 %v20_v26  ;;  %v490_v32 = vld [vmem:[%s651_s1] sm:$0xff] }
   0xb   :  { %307 = vmatpush.bf16.msra.mxu1 %v503_v9  ;;  %v507_v27 = vld [vmem:[%s651_s1 + $0x88] sm:$0xff]  ;;  %v498_v33 = vld [vmem:[%s651_s1 + $0x40] sm:$0xff] }
   0xc   :  { %320 = vmatpush.bf16.msra.mxu2 %v511_v10  ;;  %v515_v28 = vld [vmem:[%s651_s1 + $0xc8] sm:$0xff]  ;;  %v506_v36 = vld [vmem:[%s651_s1 + $0x80] sm:$0xff]  ;;  %v92_v38 = vpack.c.b16 %v88_v30, %v88_v30  ;;  %v93_v39 = vpack.c.b16 %v89_v31, %v89_v31 }
   0xd   :  { %333 = vmatpush.bf16.msra.mxu3 %v519_v11  ;;  %v21_v29 = vld [vmem:[%s652_s0 + $0x8] sm:$0xff]  ;;  %v514_v37 = vld [vmem:[%s651_s1 + $0xc0] sm:$0xff] }
   0xe   :  { %295 = vmatpush.bf16.msra.mxu0 %v494_v12  ;;  %v90_v34 = vunpack.c.l.b16 %v21_v29  ;;  %v91_v35 = vunpack.c.h.b16 %v21_v29  ;;  %v522_v48 = vld [vmem:[%s653_s2] ss:$0 sm:$0xff] }
   0xf   :  { %308 = vmatpush.bf16.msra.mxu1 %v502_v13 }
  0x10   :  { %321 = vmatpush.bf16.msra.mxu2 %v510_v14  ;;  %v94_v40 = vpack.c.b16 %v90_v34, %v90_v34  ;;  %v95_v41 = vpack.c.b16 %v91_v35, %v91_v35 }
  0x11   :  { %334 = vmatpush.bf16.msra.mxu3 %v518_v15 }
  0x12   :  { %296 = vmatpush.bf16.msra.mxu0 %v493_v16 }
  0x13   :  { %309 = vmatpush.bf16.msra.mxu1 %v501_v17 }
  0x14   :  { %322 = vmatpush.bf16.msra.mxu2 %v509_v18 }
  0x15   :  { %335 = vmatpush.bf16.msra.mxu3 %v517_v19 }
  0x16   :  { %297 = vmatpush.bf16.msra.mxu0 %v492_v20 }
  0x17   :  { %310 = vmatpush.bf16.msra.mxu1 %v500_v21 }
  0x18   :  { %323 = vmatpush.bf16.msra.mxu2 %v508_v22 }
  0x19   :  { %336 = vmatpush.bf16.msra.mxu3 %v516_v23 }
  0x1a   :  { %298 = vmatpush.bf16.msra.mxu0 %v491_v24 }
  0x1b   :  { %311 = vmatpush.bf16.msra.mxu1 %v499_v25 }
  0x1c   :  { %324 = vmatpush.bf16.msra.mxu2 %v507_v27 }
  0x1d   :  { %337 = vmatpush.bf16.msra.mxu3 %v515_v28 }
  0x1e   :  { %299 = vmatpush.bf16.msra.mxu0 %v490_v32 }
  0x1f   :  { %312 = vmatpush.bf16.msra.mxu1 %v498_v33 }
  0x20   :  { %325 = vmatpush.bf16.msra.mxu2 %v506_v36 }
  0x21   :  { %338 = vmatpush.bf16.msra.mxu3 %v514_v37  ;;  %300 = vmatmul.bf16.vlgmr.msra.gmra.mxu0 %v92_v38 }
  0x22   :  { %313 = vmatmul.bf16.vlgmr.msra.gmra.mxu1 %v93_v39 }
  0x23   :  { %326 = vmatmul.bf16.vlgmr.msra.gmra.mxu2 %v94_v40 }
  0x24   :  { %339 = vmatmul.bf16.vlgmr.msra.gmra.mxu3 %v95_v41 }
  0x9e   :  { %v301_v42 = vpop.f32.mrf.mxu0 }
  0x9f   :  { %v314_v43 = vpop.f32.mrf.mxu1 }
  0xa0   :  { %v315_v44 = vadd.f32 %v314_v43, %v301_v42 }
  0xa6   :  { %v327_v45 = vpop.f32.mrf.mxu2  ;;  %v303_v49 = vpop.f32.mrf.mxu0 }
  0xa7   :  { %v340_v46 = vpop.f32.mrf.mxu3  ;;  %v328_v47 = vadd.f32 %v327_v45, %v315_v44  ;;  %v316_v50 = vpop.f32.mrf.mxu1 }
  0xa9   :  { %v341_v51 = vadd.f32 %v340_v46, %v328_v47 }
  0xab   :  { %v354_v52 = vadd.f32 %v522_v48, %v341_v51 }
  0xad   :  { %v355_v53 = vmax.f32 %v354_v52, 0.0 }
  0xae   :  { %v329_v54 = vpop.f32.mrf.mxu2 }
  0xaf   :  { %v342_v55 = vpop.f32.mrf.mxu3  ;;  %v356_v56 = vpack.c.bf16 %v355_v53, %v355_v53 }
  0xb1   :  { %357 = vst [vmem:[%s654_s3] sm:$0xf] %v356_v56 }

// kernel: _lambda_.200
= control target key start
LH: loop header
LB: loop body
LE: loop exit
PB: predicated region body
PF: predicated region fallthrough
CT: control target
= control target key end

     0   :  { %s832_s12 = smov 0   ;;  %s834_s13 = smov 0   ;;  %s907_s0 = inlined_call_operand.vmem [shape: bf16[8,1152], index: 0, kind: input, shape index: {}]   ;;  %s908_s1 = inlined_call_operand.vmem [shape: bf16[1152,128], index: 1, kind: input, shape index: {}]   ;;  %s909_s2 = inlined_call_operand.vmem [shape: f32[1,128], index: 2, kind: input, shape index: {}]   ;;  %s910_s3 = inlined_call_operand.vmem [shape: bf16[8,128], index: 3, kind: output, shape index: {}]  }
   0x1   :  { %s836_s14 = smov 0  }
   0x2 LB: > { %s25_s15 = sadd.s32 1, %s805_s13  ;;  %p633_p0 = scmp.ge.s32.totalorder %s809_s14, 1  ;;  %s809_s14 = sphi %s836_s14, %s13_s14   ;;  %s805_s13 = sphi %s834_s13, %s912_s13   ;;  %s801_s12 = sphi %s832_s12, %s911_s12  }
   0x3   : > { %p26_p1 = scmp.ge.s32.totalorder %s25_s15, 3  ;;  %p189_p2 = scmp.lt.s32.totalorder %s809_s14, 4 }
   0x5   : > { %s914_s15 = smov (%p26_p1, %s25_s15), 0  ;;  %p190_p3 = pnand %p633_p0, %p189_p2 }
   0x6   : > { %s230_s16 = smul.u32 (!%p190_p3), 3, %s801_s12  ;;  %p636_p6 = scmp.ne.s32.totalorder (!%p190_p3), %s801_s12, 0 }
   0x7   : > { %193 = sbr.rel (%p190_p3) target bundleno = 207 (0xcf), region = 32 }
   0x8   : > { %s240_s17 = smul.u32 (!%p190_p3), 48, %s801_s12  ;;  %p233_p4 = scmp.lt.s32.totalorder (!%p190_p3), %s230_s16, 8 }
   0xa   : > { %p241_p5 = scmp.lt.s32.totalorder (!%p190_p3), %s240_s17, 143 }
   0xc   : > { %s916_s16 = smov (!%p233_p4, %s230_s16), 8  ;;  %s918_s17 = smov (!%p241_p5, %s240_s17), 143 }
   0xd   : > { %s634_s18 = sshll.u32 %s916_s16, 2  ;;  %s635_s22 = sshll.u32 %s918_s17, 2 }
   0xe   : > { %s857_s21 = scalar_lea.vmem %s907_s0, %s634_s18  ;;  %s862_s25 = scalar_lea.vmem %s908_s1, %s635_s22 }
   0xf   : > { %262 = sbr.rel (%p636_p6) target bundleno = 22 (0x16), region = 36 }
  0x14   : > { %v811_v0 = vmov 0.0  }
  0x15   : > { %263 = vst [vmem:[#allocation2] sm:$0xff] %v811_v0 }
  0x16 PF: > { %v744_v1 = vld [vmem:[%s862_s25 + $0x38] sm:$0xff]  ;;  %v743_v4 = vld [vmem:[%s862_s25 + $0x30] sm:$0xff]  ;;  %v742_v7 = vld [vmem:[%s862_s25 + $0x28] sm:$0xff]  ;;  %p733_p7 = scmp.ne.s32.totalorder %s801_s12, 2 }
  0x17   : > { %v752_v2 = vld [vmem:[%s862_s25 + $0x78] sm:$0xff]  ;;  %470 = vmatpush.bf16.msra.mxu0 %v744_v1  ;;  %v751_v5 = vld [vmem:[%s862_s25 + $0x70] sm:$0xff]  ;;  %v750_v8 = vld [vmem:[%s862_s25 + $0x68] sm:$0xff] }
  0x18   : > { %v760_v3 = vld [vmem:[%s862_s25 + $0xb8] sm:$0xff]  ;;  %483 = vmatpush.bf16.msra.mxu1 %v752_v2  ;;  %v759_v6 = vld [vmem:[%s862_s25 + $0xb0] sm:$0xff]  ;;  %v758_v9 = vld [vmem:[%s862_s25 + $0xa8] sm:$0xff] }
  0x19   : > { %496 = vmatpush.bf16.msra.mxu2 %v760_v3  ;;  %v741_v10 = vld [vmem:[%s862_s25 + $0x20] sm:$0xff]  ;;  %v740_v13 = vld [vmem:[%s862_s25 + $0x18] sm:$0xff]  ;;  %v739_v16 = vld [vmem:[%s862_s25 + $0x10] sm:$0xff] }
  0x1a   : > { %v749_v11 = vld [vmem:[%s862_s25 + $0x60] sm:$0xff]  ;;  %v748_v14 = vld [vmem:[%s862_s25 + $0x58] sm:$0xff]  ;;  %v747_v17 = vld [vmem:[%s862_s25 + $0x50] sm:$0xff] }
  0x1b   : > { %471 = vmatpush.bf16.msra.mxu0 %v743_v4  ;;  %v757_v12 = vld [vmem:[%s862_s25 + $0xa0] sm:$0xff]  ;;  %v756_v15 = vld [vmem:[%s862_s25 + $0x98] sm:$0xff]  ;;  %v755_v18 = vld [vmem:[%s862_s25 + $0x90] sm:$0xff] }
  0x1c   : > { %484 = vmatpush.bf16.msra.mxu1 %v751_v5  ;;  %v738_v19 = vld [vmem:[%s862_s25 + $0x8] sm:$0xff]  ;;  %v265_v21 = vld [vmem:[%s857_s21] sm:$0xff] }
  0x1d   : > { %497 = vmatpush.bf16.msra.mxu2 %v759_v6  ;;  %v746_v20 = vld [vmem:[%s862_s25 + $0x48] sm:$0xff]  ;;  %v317_v24 = vunpack.c.l.b16 %v265_v21  ;;  %v318_v25 = vunpack.c.h.b16 %v265_v21  ;;  %v737_v26 = vld [vmem:[%s862_s25] sm:$0xff] }
  0x1e   : > { %v754_v22 = vld [vmem:[%s862_s25 + $0x88] sm:$0xff]  ;;  %v745_v27 = vld [vmem:[%s862_s25 + $0x40] sm:$0xff] }
  0x1f   : > { %472 = vmatpush.bf16.msra.mxu0 %v742_v7  ;;  %v266_v23 = vld [vmem:[%s857_s21 + $0x8] sm:$0xf]  ;;  %v753_v29 = vld [vmem:[%s862_s25 + $0x80] sm:$0xff]  ;;  %v320_v30 = vpack.c.b16 %v317_v24, %v317_v24  ;;  %v321_v31 = vpack.c.b16 %v318_v25, %v318_v25 }
  0x20   : > { %485 = vmatpush.bf16.msra.mxu1 %v750_v8  ;;  %v319_v28 = vunpack.c.l.b16 %v266_v23  ;;  %v264_v36 = vld [vmem:[#allocation2] sm:$0xff] }
  0x21   : > { %498 = vmatpush.bf16.msra.mxu2 %v758_v9 }
  0x22   : > { %v322_v32 = vpack.c.b16 %v319_v28, %v319_v28 }
  0x23   : > { %473 = vmatpush.bf16.msra.mxu0 %v741_v10 }
  0x24   : > { %486 = vmatpush.bf16.msra.mxu1 %v749_v11 }
  0x25   : > { %499 = vmatpush.bf16.msra.mxu2 %v757_v12 }
  0x27   : > { %474 = vmatpush.bf16.msra.mxu0 %v740_v13 }
  0x28   : > { %487 = vmatpush.bf16.msra.mxu1 %v748_v14 }
  0x29   : > { %500 = vmatpush.bf16.msra.mxu2 %v756_v15 }
  0x2b   : > { %475 = vmatpush.bf16.msra.mxu0 %v739_v16 }
  0x2c   : > { %488 = vmatpush.bf16.msra.mxu1 %v747_v17 }
  0x2d   : > { %501 = vmatpush.bf16.msra.mxu2 %v755_v18 }
  0x2f   : > { %476 = vmatpush.bf16.msra.mxu0 %v738_v19 }
  0x30   : > { %489 = vmatpush.bf16.msra.mxu1 %v746_v20 }
  0x31   : > { %502 = vmatpush.bf16.msra.mxu2 %v754_v22 }
  0x33   : > { %477 = vmatpush.bf16.msra.mxu0 %v737_v26 }
  0x34   : > { %490 = vmatpush.bf16.msra.mxu1 %v745_v27 }
  0x35   : > { %503 = vmatpush.bf16.msra.mxu2 %v753_v29 }
  0x36   : > { %478 = vmatmul.bf16.vlgmr.msra.gmra.mxu0 %v320_v30 }
  0x37   : > { %491 = vmatmul.bf16.vlgmr.msra.gmra.mxu1 %v321_v31 }
  0x38   : > { %504 = vmatmul.bf16.vlgmr.msra.gmra.mxu2 %v322_v32 }
  0xb3   : > { %v479_v33 = vpop.f32.mrf.mxu0 }
  0xb4   : > { %v492_v34 = vpop.f32.mrf.mxu1 }
  0xb5   : > { %v493_v35 = vadd.f32 %v492_v34, %v479_v33 }
  0xbb   : > { %v505_v37 = vpop.f32.mrf.mxu2  ;;  %v481_v39 = vpop.f32.mrf.mxu0 }
  0xbc   : > { %v506_v38 = vadd.f32 %v505_v37, %v493_v35  ;;  %v494_v40 = vpop.f32.mrf.mxu1 }
  0xbe   : > { %v509_v41 = vadd.f32 %v506_v38, %v264_v36 }
  0xbf   : > { %514 = sbr.rel (%p733_p7) target bundleno = 207 (0xcf), region = 40 }
  0xc0   : > { %510 = vst [vmem:[#allocation2] sm:$0xff] %v509_v41 }
  0xc3   : > { %v507_v42 = vpop.f32.mrf.mxu2 }
  0xc4   : > { %v786_v44 = vld [vmem:[%s909_s2] ss:$0 sm:$0xff] }
  0xc7   : > { %v515_v43 = vld [vmem:[#allocation2] sm:$0xff] }
  0xc8   : > { %v520_v45 = vadd.f32 %v786_v44, %v515_v43 }
  0xca   : > { %v521_v46 = vmax.f32 %v520_v45, 0.0 }
  0xcc   : > { %v522_v47 = vpack.c.bf16 %v521_v46, %v521_v46 }
  0xce   : > { %523 = vst [vmem:[%s910_s3] sm:$0xf] %v522_v47 }
  0xcf PF: > { %s13_s14 = sadd.s32 1, %s809_s14   ;;  %s911_s12 = smov %s805_s13 }
  0xd0   : > { %p10_p8 = scmp.ge.s32.totalorder %s13_s14, 5   ;;  %s912_s13 = smov %s914_s15 }
  0xd2   :  { %12 = sbr.rel (!%p10_p8) target bundleno = 2 (0x2), region = 76 }

// kernel: _lambda_.201
= control target key start
LH: loop header
LB: loop body
LE: loop exit
PB: predicated region body
PF: predicated region fallthrough
CT: control target
= control target key end

     0   :  { %s912_s15 = smov 0   ;;  %s914_s16 = smov 0   ;;  %s1038_s0 = inlined_call_operand.vmem [shape: bf16[8,128], index: 0, kind: input, shape index: {}]   ;;  %s1039_s1 = inlined_call_operand.vmem [shape: bf16[128,512], index: 1, kind: input, shape index: {}]   ;;  %s1040_s2 = inlined_call_operand.vmem [shape: f32[1,512], index: 2, kind: input, shape index: {}]   ;;  %s1041_s3 = inlined_call_operand.vmem [shape: bf16[8,512], index: 3, kind: input, shape index: {}]   ;;  %s1042_s4 = inlined_call_operand.vmem [shape: bf16[8,512], index: 4, kind: output, shape index: {}]  }
   0x1   :  { %s916_s17 = smov 0   ;;  %s918_s18 = smov 0  }
   0x2   :  { %s920_s19 = smov 0  }
   0x3 LB: > { %s29_s20 = sadd.s32 1, %s881_s18  ;;  %p77_p1 = scmp.ne.s32.totalorder %s873_s16, %s869_s15  ;;  %s885_s19 = sphi %s920_s19, %s14_s19   ;;  %s881_s18 = sphi %s918_s18, %s1046_s18   ;;  %s877_s17 = sphi %s916_s17, %s1045_s17   ;;  %s873_s16 = sphi %s914_s16, %s1044_s16   ;;  %s869_s15 = sphi %s912_s15, %s1043_s15  }
   0x4   : > { %p31_p0 = scmp.ge.s32.totalorder %s29_s20, 2  ;;  %p78_p2 = scmp.eq.s32.totalorder %s885_s19, 0 }
   0x5   : > { %s70_s22 = sadd.s32 1, %s873_s16  ;;  %p713_p5 = scmp.ge.s32.totalorder %s885_s19, 2 }
   0x6   : > { %s1048_s20 = smov (%p31_p0, %s29_s20), 0  ;;  %p79_p3 = por %p78_p2, %p77_p1 }
   0x7   : > { %s66_s21 = ssub.s32 %s881_s18, %s1048_s20  ;;  %195 = sbr.rel (%p713_p5) target bundleno = 32 (0x20), region = 20 }
   0x8   : > { %p68_p4 = scmp.eq.s32.totalorder %s66_s21, 0 }
   0xa   : > { %s947_s23 = scalar_select %p68_p4, %s873_s16, %s70_s22  }
   0xc   : > { %198 = sbr.rel (!%p79_p3) target bundleno = 32 (0x20), region = 24  ;;  %s200_s24 = sand.u32 (%p79_p3), 1, %s873_s16  }
   0xd   : > { %s790_s25 = sshll.u32 (%p79_p3), %s881_s18, 3  ;;  %s714_s26 = sshll.u32 (%p79_p3), %s200_s24, 7 }
   0xe   : > { %s955_s29 = scalar_lea.vmem (%p79_p3), %s1039_s1, %s790_s25  ;;  %s202_s30 = scalar_lea.vmem (%p79_p3), [#allocation3], %s714_s26 }
   0xf   : > { %v267_v0 = vld [vmem:[%s955_s29] sm:$0xff] (%p79_p3)  ;;  %v269_v1 = vld [vmem:[%s955_s29 + $0x10] sm:$0xff] (%p79_p3) }
  0x10   : > { %v271_v2 = vld [vmem:[%s955_s29 + $0x20] sm:$0xff] (%p79_p3)  ;;  %268 = vst [vmem:[%s202_s30] sm:$0xff] (%p79_p3), %v267_v0  ;;  %v273_v3 = vld [vmem:[%s955_s29 + $0x30] sm:$0xff] (%p79_p3) }
  0x11   : > { %270 = vst [vmem:[%s202_s30 + $0x8] sm:$0xff] %v269_v1  ;;  %v275_v4 = vld [vmem:[%s955_s29 + $0x40] sm:$0xff]  ;;  %v277_v5 = vld [vmem:[%s955_s29 + $0x50] sm:$0xff] }
  0x12   : > { %272 = vst [vmem:[%s202_s30 + $0x10] sm:$0xff] %v271_v2  ;;  %v279_v6 = vld [vmem:[%s955_s29 + $0x60] sm:$0xff]  ;;  %v281_v7 = vld [vmem:[%s955_s29 + $0x70] sm:$0xff] }
  0x13   : > { %274 = vst [vmem:[%s202_s30 + $0x18] sm:$0xff] %v273_v3  ;;  %v283_v8 = vld [vmem:[%s955_s29 + $0x80] sm:$0xff]  ;;  %v285_v9 = vld [vmem:[%s955_s29 + $0x90] sm:$0xff] }
  0x14   : > { %276 = vst [vmem:[%s202_s30 + $0x20] sm:$0xff] %v275_v4  ;;  %v287_v10 = vld [vmem:[%s955_s29 + $0xa0] sm:$0xff]  ;;  %v289_v11 = vld [vmem:[%s955_s29 + $0xb0] sm:$0xff] }
  0x15   : > { %278 = vst [vmem:[%s202_s30 + $0x28] sm:$0xff] %v277_v5  ;;  %v291_v12 = vld [vmem:[%s955_s29 + $0xc0] sm:$0xff]  ;;  %v293_v13 = vld [vmem:[%s955_s29 + $0xd0] sm:$0xff] }
  0x16   : > { %280 = vst [vmem:[%s202_s30 + $0x30] sm:$0xff] %v279_v6  ;;  %v295_v14 = vld [vmem:[%s955_s29 + $0xe0] sm:$0xff]  ;;  %v297_v15 = vld [vmem:[%s955_s29 + $0xf0] sm:$0xff] }
  0x17   : > { %282 = vst [vmem:[%s202_s30 + $0x38] sm:$0xff] %v281_v7 }
  0x18   : > { %284 = vst [vmem:[%s202_s30 + $0x40] sm:$0xff] %v283_v8 }
  0x19   : > { %286 = vst [vmem:[%s202_s30 + $0x48] sm:$0xff] %v285_v9 }
  0x1a   : > { %288 = vst [vmem:[%s202_s30 + $0x50] sm:$0xff] %v287_v10 }
  0x1b   : > { %290 = vst [vmem:[%s202_s30 + $0x58] sm:$0xff] %v289_v11 }
  0x1c   : > { %292 = vst [vmem:[%s202_s30 + $0x60] sm:$0xff] %v291_v12 }
  0x1d   : > { %294 = vst [vmem:[%s202_s30 + $0x68] sm:$0xff] %v293_v13 }
  0x1e   : > { %296 = vst [vmem:[%s202_s30 + $0x70] sm:$0xff] %v295_v14 }
  0x1f   : > { %298 = vst [vmem:[%s202_s30 + $0x78] sm:$0xff] %v297_v15 }
  0x20 PF: > { %p717_p6 = scmp.ge.s32.totalorder %s885_s19, 1  ;;  %p324_p7 = scmp.lt.s32.totalorder %s885_s19, 3 }
  0x22   : > { %p325_p8 = pnand %p717_p6, %p324_p7 }
  0x23   : > { %s331_s5 = sand.u32 (!%p325_p8), 1, %s869_s15   ;;  %s719_s10 = sshll.u32 (!%p325_p8), %s877_s17, 1 }
  0x24   : > { %328 = sbr.rel (%p325_p8) target bundleno = 211 (0xd3), region = 70  ;;  %s718_s6 = sshll.u32 (!%p325_p8), %s331_s5, 7 }
  0x25   : > { %s976_s7 = scalar_lea.vmem (!%p325_p8), [#allocation3], %s718_s6  ;;  %p390_p9 = scmp.lt.s32.totalorder (!%p325_p8), %s719_s10, 3 }
  0x29   : > { %v782_v16 = vld [vmem:[%s976_s7 + $0x70] sm:$0xf]  ;;  %v806_v17 = vld [vmem:[%s976_s7 + $0x74] sm:$0xf0]  ;;  %v805_v18 = vld [vmem:[%s976_s7 + $0x74] sm:$0xf] }
  0x2a   : > { %v783_v19 = vor.u32 %v806_v17, %v782_v16  ;;  %v784_v20 = vld [vmem:[%s976_s7 + $0x78] sm:$0xf0]  ;;  %v774_v21 = vld [vmem:[%s976_s7 + $0x60] sm:$0xf]  ;;  %v804_v22 = vld [vmem:[%s976_s7 + $0x64] sm:$0xf0] }
  0x2b   : > { %v787_v23 = vor.u32 %v805_v18, %v784_v20  ;;  %v803_v24 = vld [vmem:[%s976_s7 + $0x64] sm:$0xf]  ;;  %v776_v25 = vld [vmem:[%s976_s7 + $0x68] sm:$0xf0]  ;;  %v775_v26 = vor.u32 %v804_v22, %v774_v21  ;;  %v766_v28 = vld [vmem:[%s976_s7 + $0x50] sm:$0xf] }
  0x2c   : > { %519 = vmatpush.bf16.msra.mxu0 %v783_v19  ;;  %v779_v27 = vor.u32 %v803_v24, %v776_v25  ;;  %v802_v29 = vld [vmem:[%s976_s7 + $0x54] sm:$0xf0]  ;;  %v801_v30 = vld [vmem:[%s976_s7 + $0x54] sm:$0xf]  ;;  %v768_v31 = vld [vmem:[%s976_s7 + $0x58] sm:$0xf0] }
  0x2d   : > { %532 = vmatpush.bf16.msra.mxu1 %v787_v23  ;;  %v767_v32 = vor.u32 %v802_v29, %v766_v28  ;;  %v771_v33 = vor.u32 %v801_v30, %v768_v31  ;;  %v758_v34 = vld [vmem:[%s976_s7 + $0x40] sm:$0xf]  ;;  %v800_v35 = vld [vmem:[%s976_s7 + $0x44] sm:$0xf0]  ;;  %v799_v36 = vld [vmem:[%s976_s7 + $0x44] sm:$0xf] }
  0x2e   : > { %v760_v37 = vld [vmem:[%s976_s7 + $0x48] sm:$0xf0]  ;;  %v759_v38 = vor.u32 %v800_v35, %v758_v34  ;;  %v750_v40 = vld [vmem:[%s976_s7 + $0x30] sm:$0xf]  ;;  %v798_v41 = vld [vmem:[%s976_s7 + $0x34] sm:$0xf0] }
  0x2f   : > { %v763_v39 = vor.u32 %v799_v36, %v760_v37  ;;  %v797_v42 = vld [vmem:[%s976_s7 + $0x34] sm:$0xf]  ;;  %v752_v43 = vld [vmem:[%s976_s7 + $0x38] sm:$0xf0]  ;;  %v751_v44 = vor.u32 %v798_v41, %v750_v40  ;;  %v742_v46 = vld [vmem:[%s976_s7 + $0x20] sm:$0xf] }
  0x30   : > { %520 = vmatpush.bf16.msra.mxu0 %v775_v26  ;;  %v755_v45 = vor.u32 %v797_v42, %v752_v43  ;;  %v796_v47 = vld [vmem:[%s976_s7 + $0x24] sm:$0xf0]  ;;  %v795_v48 = vld [vmem:[%s976_s7 + $0x24] sm:$0xf]  ;;  %v744_v49 = vld [vmem:[%s976_s7 + $0x28] sm:$0xf0] }
  0x31   : > { %533 = vmatpush.bf16.msra.mxu1 %v779_v27  ;;  %v743_v50 = vor.u32 %v796_v47, %v742_v46  ;;  %v747_v51 = vor.u32 %v795_v48, %v744_v49  ;;  %v734_v52 = vld [vmem:[%s976_s7 + $0x10] sm:$0xf]  ;;  %v794_v53 = vld [vmem:[%s976_s7 + $0x14] sm:$0xf0]  ;;  %v793_v54 = vld [vmem:[%s976_s7 + $0x14] sm:$0xf] }
  0x32   : > { %v736_v55 = vld [vmem:[%s976_s7 + $0x18] sm:$0xf0]  ;;  %v735_v56 = vor.u32 %v794_v53, %v734_v52  ;;  %v726_v58 = vld [vmem:[%s976_s7] sm:$0xf]  ;;  %v792_v59 = vld [vmem:[%s976_s7 + $0x4] sm:$0xf0] }
  0x33   : > { %v739_v57 = vor.u32 %v793_v54, %v736_v55  ;;  %v791_v60 = vld [vmem:[%s976_s7 + $0x4] sm:$0xf]  ;;  %v728_v61 = vld [vmem:[%s976_s7 + $0x8] sm:$0xf0]  ;;  %v727_v62 = vor.u32 %v792_v59, %v726_v58  ;;  %v422_v0 = vld [vmem:[%s1038_s0] sm:$0xf] }
  0x34   : > { %521 = vmatpush.bf16.msra.mxu0 %v767_v32  ;;  %v731_v63 = vor.u32 %v791_v60, %v728_v61  ;;  %s1050_s10 = smov (!%p390_p9, %s719_s10), 3 }
  0x35   : > { %534 = vmatpush.bf16.msra.mxu1 %v771_v33  ;;  %s721_s11 = sshll.u32 %s1050_s10, 2  ;;  %s392_s14 = scalar_lea.vmem %s1040_s2, %s1050_s10 }
  0x36   : > { %s402_s22 = scalar_lea.vmem %s1041_s3, %s721_s11  ;;  %v554_v1 = vld [vmem:[%s392_s14] sm:$0x3]  ;;  %s412_s25 = scalar_lea.vmem %s1042_s4, %s721_s11 }
  0x37   : > { %v562_v2 = vld [vmem:[%s402_s22] sm:$0xff]  ;;  %v556_v3 = vperm.slane %v554_v1, 0  ;;  %v557_v4 = vperm.slane %v554_v1, 1 }
  0x38   : > { %522 = vmatpush.bf16.msra.mxu0 %v759_v38  ;;  %v563_v5 = vunpack.c.l.bf16 %v562_v2  ;;  %v564_v7 = vunpack.c.h.bf16 %v562_v2 }
  0x39   : > { %535 = vmatpush.bf16.msra.mxu1 %v763_v39 }
  0x3c   : > { %523 = vmatpush.bf16.msra.mxu0 %v751_v44 }
  0x3d   : > { %536 = vmatpush.bf16.msra.mxu1 %v755_v45 }
  0x40   : > { %524 = vmatpush.bf16.msra.mxu0 %v743_v50 }
  0x41   : > { %537 = vmatpush.bf16.msra.mxu1 %v747_v51 }
  0x44   : > { %525 = vmatpush.bf16.msra.mxu0 %v735_v56 }
  0x45   : > { %538 = vmatpush.bf16.msra.mxu1 %v739_v57 }
  0x48   : > { %526 = vmatpush.bf16.msra.mxu0 %v727_v62 }
  0x49   : > { %539 = vmatpush.bf16.msra.mxu1 %v731_v63 }
  0x4b   : > { %527 = vmatmul.bf16.vlgmr.msra.gmra.mxu0 %v422_v0 }
  0x4c   : > { %540 = vmatmul.bf16.vlgmr.msra.gmra.mxu1 %v422_v0 }
  0xc8   : > { %v528_v6 = vpop.f32.mrf.mxu0 }
  0xc9   : > { %v560_v8 = vadd.f32 %v556_v3, %v528_v6  ;;  %v541_v9 = vpop.f32.mrf.mxu1 }
  0xca   : > { %v561_v10 = vadd.f32 %v557_v4, %v541_v9 }
  0xcb   : > { %v565_v11 = vadd.f32 %v563_v5, %v560_v8 }
  0xcc   : > { %v566_v12 = vadd.f32 %v564_v7, %v561_v10 }
  0xcd   : > { %v567_v13 = vmax.f32 %v565_v11, 0.0 }
  0xce   : > { %v568_v14 = vmax.f32 %v566_v12, 0.0 }
  0xd0   : > { %v569_v15 = vpack.c.bf16 %v568_v14, %v567_v13  ;;  %v530_v16 = vpop.f32.mrf.mxu0 }
  0xd1   : > { %v543_v17 = vpop.f32.mrf.mxu1 }
  0xd2   : > { %570 = vst [vmem:[%s412_s25] sm:$0xff] %v569_v15 }
  0xd3 PF: > { %s14_s19 = sadd.s32 1, %s885_s19   ;;  %s1043_s15 = smov %s873_s16 }
  0xd4   : > { %p11_p10 = scmp.ge.s32.totalorder %s14_s19, 4   ;;  %s1044_s16 = smov %s947_s23 }
  0xd5   : > { %s1045_s17 = smov %s881_s18  ;;  %s1046_s18 = smov %s1048_s20 }
  0xd6   :  { %13 = sbr.rel (!%p11_p10) target bundleno = 3 (0x3), region = 126 }

</bundles_post_ra>
